<compile_context>
chip_gen: v7x
topology: tpu7x:2x2x1
jax: 0.10.0
libtpu: 0.0.40
codegen_flags: <defaults>
</compile_context>

<pallas_src>
import functools
import numpy as np

import jax
import jax.numpy as jnp
from jax import lax
from jax.experimental import pallas as pl
from jax.experimental.pallas import tpu as pltpu

# ----------------------- small synthetic config -----------------------------
CFG = dict(
    window_size=8,    # img_dim  (num_patches = 8, patch_dim = 1)
    patch_dim=1,
    num_classes=10,   # out_dim
    embedding_dim=32,
    num_heads=4,
    num_layers=2,
    hidden_dim=64,
    rgb_feat=16,      # stands in for FEATURE_SIZES[rgb_type]
    flow_feat=16,     # stands in for FEATURE_SIZES[flow_type]
)
LN_EPS = 1e-5


# ----------------------- shared math helpers (jnp, kernel-safe) -------------
def _layernorm(x, g, b):
    mu = jnp.mean(x, axis=-1, keepdims=True)
    var = jnp.mean((x - mu) ** 2, axis=-1, keepdims=True)
    return (x - mu) * lax.rsqrt(var + LN_EPS) * g + b


def _gelu(x):
    c = 0.7978845608028654  # sqrt(2/pi)
    return 0.5 * x * (1.0 + jnp.tanh(c * (x + 0.044715 * x * x * x)))


# ----------------------------- Pallas kernel ---------------------------------
def vit_kernel(TB, T, S_pad, D, H, L, C,
               x_ref,
               w_enc_ref, b_enc_ref, pos_ref,
               ln1g_ref, ln1b_ref, wqkv_ref, bqkv_ref, wo_ref, bo_ref,
               ln2g_ref, ln2b_ref, w1_ref, b1_ref, w2_ref, b2_ref,
               lnfg_ref, lnfb_ref, wh_ref, bh_ref, mask_ref,
               out_ref):
    dh = D // H
    scale = 1.0 / float(dh) ** 0.5
    M = TB * S_pad

    # ---- patch encoding: one (TB*T, C) @ (C, D) MXU matmul -------------------
    xin = x_ref[...].reshape(TB * T, C)
    emb = jnp.dot(xin, w_enc_ref[...], preferred_element_type=jnp.float32) \
        + b_enc_ref[...]
    emb3 = emb.reshape(TB, T, D)

    # ---- build padded sequences in registers (no VMEM scratch round-trip) ---
    # pos_ref already holds positional encoding with the cls token folded into
    # row T and zeros past row S, so only a zero pad is appended to the patches.
    seq = jnp.concatenate(
        [emb3, jnp.zeros((TB, S_pad - T, D), jnp.float32)], axis=1
    ) + pos_ref[...][None]
    x = seq.reshape(M, D)                                   # (M, D) stacked tile

    # block-diagonal key mask over the stacked batch tile (precomputed, VMEM)
    neg_mask = mask_ref[...]

    for l in range(L):
        # ---- multi-head self-attention (pre-LN) ----
        xn = _layernorm(x, ln1g_ref[l:l + 1, :], ln1b_ref[l:l + 1, :])
        qkv = jnp.dot(xn, wqkv_ref[l], preferred_element_type=jnp.float32) \
            + bqkv_ref[l:l + 1, :]                          # (M, 3D)
        heads = []
        for h in range(H):
            qh = qkv[:, h * dh:(h + 1) * dh]
            kh = qkv[:, D + h * dh:D + (h + 1) * dh]
            vh = qkv[:, 2 * D + h * dh:2 * D + (h + 1) * dh]
            s = lax.dot_general(qh, kh, (((1,), (1,)), ((), ())),
                                preferred_element_type=jnp.float32) * scale
            s = s + neg_mask
            s = s - jnp.max(s, axis=-1, keepdims=True)
            p = jnp.exp(s)
            p = p * pl.reciprocal(jnp.sum(p, axis=-1, keepdims=True), approx=True)
            heads.append(jnp.dot(p, vh, preferred_element_type=jnp.float32))
        attn = jnp.concatenate(heads, axis=-1)              # (M, D)
        # fused output projection: one (M, D) x (D, D) matmul per layer
        x = x + jnp.dot(attn, wo_ref[l], preferred_element_type=jnp.float32) \
            + bo_ref[l:l + 1, :]

        # ---- MLP (pre-LN, GELU) ----
        xn2 = _layernorm(x, ln2g_ref[l:l + 1, :], ln2b_ref[l:l + 1, :])
        hmid = _gelu(jnp.dot(xn2, w1_ref[l], preferred_element_type=jnp.float32)
                     + b1_ref[l:l + 1, :])
        x = x + jnp.dot(hmid, w2_ref[l], preferred_element_type=jnp.float32) \
            + b2_ref[l:l + 1, :]

    # ---- gather token 0 of each stacked sequence via a one-hot MXU matmul ---
    # (avoids strided sublane slices; cuts HBM writeback from (M,128) to (TB,128))
    r = lax.broadcasted_iota(jnp.int32, (TB, M), 0)
    c = lax.broadcasted_iota(jnp.int32, (TB, M), 1)
    sel = (c == r * S_pad).astype(jnp.float32)              # (TB, M)
    tok = jnp.dot(sel, x, preferred_element_type=jnp.float32)   # (TB, D)

    # ---- final LN + classification head (lane-dense (TB, 128) store) --------
    tokn = _layernorm(tok, lnfg_ref[...], lnfb_ref[...])
    out_ref[...] = jnp.dot(tokn, wh_ref[...], preferred_element_type=jnp.float32) \
        + bh_ref[...]


# ----------------------------- wrapper ---------------------------------------
WEIGHT_ORDER = ["w_enc", "b_enc", "pos_aug",
                "ln1g", "ln1b", "wqkv", "bqkv", "wo", "bo",
                "ln2g", "ln2b", "w1", "b1", "w2", "b2",
                "lnfg", "lnfb", "wh_pad", "bh_pad", "neg_mask"]


def vit_forward_pallas(rgb, flow, params, cfg, tile_b=8):
    B, T, C_rgb = rgb.shape
    _, _, C_flow = flow.shape
    C = C_rgb + C_flow
    D = cfg["embedding_dim"]
    H = cfg["num_heads"]
    K = cfg["num_classes"]
    L = cfg["num_layers"]
    S = T + 1                                    # seq_length = num_patches + 1
    S_pad = max(8, ((S + 7) // 8) * 8)
    TB = tile_b                                  # batch elements per grid step
    B_pad = ((B + TB - 1) // TB) * TB
    Kp = ((K + 127) // 128) * 128                # lane-dense head output
    M = TB * S_pad

    # pre-concatenate rgb & flow -> single K=C encoder matmul in the kernel
    x = jnp.concatenate([rgb, flow], axis=-1)    # (B, T, C)
    if B_pad != B:
        x = jnp.pad(x, ((0, B_pad - B), (0, 0), (0, 0)))

    # fold cls token + zero pad into one padded positional table
    pos_aug = jnp.zeros((S_pad, D), jnp.float32).at[:S].set(params["pos"])
    pos_aug = pos_aug.at[T].add(params["cls"][0])
    wh_pad = jnp.zeros((D, Kp), jnp.float32).at[:, :K].set(params["wh"])
    bh_pad = jnp.zeros((1, Kp), jnp.float32).at[:, :K].set(params["bh"])

    # block-diagonal key mask over the stacked batch tile (host-side constant,
    # constant-index BlockSpec -> DMA'd into VMEM once)
    idx = np.arange(M)
    same_batch = (idx[:, None] // S_pad) == (idx[None, :] // S_pad)
    valid_key = (idx[None, :] % S_pad) < S
    neg_mask = jnp.asarray(
        np.where(same_batch & valid_key, 0.0, -1e30).astype(np.float32))

    p = dict(params, pos_aug=pos_aug, wh_pad=wh_pad, bh_pad=bh_pad,
             neg_mask=neg_mask)
    weights = [p[name] for name in WEIGHT_ORDER]

    def weight_spec(w):
        nd = w.ndim
        return pl.BlockSpec(w.shape, lambda b, _nd=nd: (0,) * _nd)

    in_specs = [pl.BlockSpec((TB, T, C), lambda b: (b, 0, 0))] \
        + [weight_spec(w) for w in weights]
    out_spec = pl.BlockSpec((TB, Kp), lambda b: (b, 0))

    kernel = functools.partial(vit_kernel, TB, T, S_pad, D, H, L, C)

    out = pl.pallas_call(
        kernel,
        out_shape=jax.ShapeDtypeStruct((B_pad, Kp), jnp.float32),
        grid_spec=pltpu.PrefetchScalarGridSpec(
            num_scalar_prefetch=0,
            grid=(B_pad // TB,),
            in_specs=in_specs,
            out_specs=out_spec,
        ),
        compiler_params=pltpu.CompilerParams(
            dimension_semantics=("parallel",)),   # batch axis is independent
    )(x, *weights)

    logits = out[:B, :K]
    return logits[:, None, :]                    # (B, 1, K) like the module


# ----------------------------- pure-JAX reference ----------------------------
def vit_forward_ref(rgb, flow, params, cfg):
    D = cfg["embedding_dim"]
    H = cfg["num_heads"]
    L = cfg["num_layers"]
    dh = D // H
    scale = 1.0 / float(dh) ** 0.5

    x = jnp.concatenate([rgb, flow], axis=-1)                       # (B, T, C)
    x = jnp.einsum("btc,cd->btd", x, params["w_enc"]) + params["b_enc"]
    B = x.shape[0]
    cls = jnp.broadcast_to(params["cls"][None], (B, 1, D))
    x = jnp.concatenate([x, cls], axis=1)                           # (B, S, D)
    x = x + params["pos"][None]

    for l in range(L):
        xn = _layernorm(x, params["ln1g"][l], params["ln1b"][l])
        qkv = xn @ params["wqkv"][l] + params["bqkv"][l]
        q, k, v = jnp.split(qkv, 3, axis=-1)
        S = q.shape[1]
        q = q.reshape(B, S, H, dh)
        k = k.reshape(B, S, H, dh)
        v = v.reshape(B, S, H, dh)
        s = jnp.einsum("bqhd,bkhd->bhqk", q, k) * scale
        p = jax.nn.softmax(s, axis=-1)
        o = jnp.einsum("bhqk,bkhd->bqhd", p, v).reshape(B, S, D)
        x = x + o @ params["wo"][l] + params["bo"][l]
        xn2 = _layernorm(x, params["ln2g"][l], params["ln2b"][l])
        x = x + _gelu(xn2 @ params["w1"][l] + params["b1"][l]) @ params["w2"][l] \
            + params["b2"][l]

    x = _layernorm(x, params["lnfg"][0], params["lnfb"][0])
    tok0 = x[:, 0]
    logits = tok0 @ params["wh"] + params["bh"]
    return logits[:, None, :]                                       # (B, 1, K)


# ----------------------------- params ----------------------------------------
def init_params(key, cfg):
    C = cfg["rgb_feat"] + cfg["flow_feat"]
    D = cfg["embedding_dim"]
    Hm = cfg["hidden_dim"]
    L = cfg["num_layers"]
    K = cfg["num_classes"]
    T = cfg["window_size"]
    S = T + 1
    keys = jax.random.split(key, 12)

    def rnd(k, shape, scale=0.05):
        return jax.random.normal(k, shape, jnp.float32) * scale

    return dict(
        w_enc=rnd(keys[0], (C, D)),
        b_enc=rnd(keys[1], (1, D), 0.02),
        cls=jnp.zeros((1, D), jnp.float32),          # matches nn.Parameter(torch.zeros)
        pos=rnd(keys[2], (S, D), 0.02),
        ln1g=jnp.ones((L, D), jnp.float32), ln1b=jnp.zeros((L, D), jnp.float32),
        wqkv=rnd(keys[3], (L, D, 3 * D)), bqkv=rnd(keys[4], (L, 3 * D), 0.02),
        wo=rnd(keys[5], (L, D, D)), bo=rnd(keys[6], (L, D), 0.02),
        ln2g=jnp.ones((L, D), jnp.float32), ln2b=jnp.zeros((L, D), jnp.float32),
        w1=rnd(keys[7], (L, D, Hm)), b1=rnd(keys[8], (L, Hm), 0.02),
        w2=rnd(keys[9], (L, Hm, D)), b2=rnd(keys[10], (L, D), 0.02),
        lnfg=jnp.ones((1, D), jnp.float32), lnfb=jnp.zeros((1, D), jnp.float32),
        wh=rnd(keys[11], (D, K)), bh=jnp.zeros((1, K), jnp.float32),
    )


# ----------------------------- main -------------------------------------------
if __name__ == "__main__":
    key = jax.random.PRNGKey(0)
    k_rgb, k_flow, k_par = jax.random.split(key, 3)
    B = 16   # 2 grid steps of TB=8 stacked sequences (M = 128 rows per step)
    rgb = jax.random.normal(k_rgb, (B, CFG["window_size"], CFG["rgb_feat"]), jnp.float32)
    flow = jax.random.normal(k_flow, (B, CFG["window_size"], CFG["flow_feat"]), jnp.float32)
    params = init_params(k_par, CFG)

    out = vit_forward_pallas(rgb, flow, params, CFG)
    out = jax.block_until_ready(out)

    ref = vit_forward_ref(rgb, flow, params, CFG)
    assert out.shape == (B, 1, CFG["num_classes"]), out.shape
    np.testing.assert_allclose(np.asarray(out), np.asarray(ref), rtol=2e-3, atol=2e-3)
    print("KERNEL_OK")
</pallas_src>

<mosaic_0001>
module attributes {stable_mosaic.version = 11 : i64} {
  func.func @vit_kernel(%arg0: i32, %arg1: memref<8x8x32xf32, #tpu.memory_space<vmem>>, %arg2: memref<32x32xf32, #tpu.memory_space<vmem>>, %arg3: memref<1x32xf32, #tpu.memory_space<vmem>>, %arg4: memref<16x32xf32, #tpu.memory_space<vmem>>, %arg5: memref<2x32xf32, #tpu.memory_space<vmem>>, %arg6: memref<2x32xf32, #tpu.memory_space<vmem>>, %arg7: memref<2x32x96xf32, #tpu.memory_space<vmem>>, %arg8: memref<2x96xf32, #tpu.memory_space<vmem>>, %arg9: memref<2x32x32xf32, #tpu.memory_space<vmem>>, %arg10: memref<2x32xf32, #tpu.memory_space<vmem>>, %arg11: memref<2x32xf32, #tpu.memory_space<vmem>>, %arg12: memref<2x32xf32, #tpu.memory_space<vmem>>, %arg13: memref<2x32x64xf32, #tpu.memory_space<vmem>>, %arg14: memref<2x64xf32, #tpu.memory_space<vmem>>, %arg15: memref<2x64x32xf32, #tpu.memory_space<vmem>>, %arg16: memref<2x32xf32, #tpu.memory_space<vmem>>, %arg17: memref<1x32xf32, #tpu.memory_space<vmem>>, %arg18: memref<1x32xf32, #tpu.memory_space<vmem>>, %arg19: memref<32x128xf32, #tpu.memory_space<vmem>>, %arg20: memref<1x128xf32, #tpu.memory_space<vmem>>, %arg21: memref<128x128xf32, #tpu.memory_space<vmem>>, %arg22: memref<8x128xf32, #tpu.memory_space<vmem>>) attributes {dimension_semantics = [#tpu.dimension_semantics<parallel>], iteration_bounds = array<i64: 2>, scalar_prefetch = 0 : i64, scratch_operands = 0 : i64, tpu.core_type = #tpu.core_type<tc>, window_params = [{transform_indices = @transform_0, window_bounds = array<i64: 8, 8, 32>}, {pipeline_mode = #tpu.pipeline_mode<synchronous>, transform_indices = @transform_1, window_bounds = array<i64: 32, 32>}, {pipeline_mode = #tpu.pipeline_mode<synchronous>, transform_indices = @transform_2, window_bounds = array<i64: 1, 32>}, {pipeline_mode = #tpu.pipeline_mode<synchronous>, transform_indices = @transform_3, window_bounds = array<i64: 16, 32>}, {pipeline_mode = #tpu.pipeline_mode<synchronous>, transform_indices = @transform_4, window_bounds = array<i64: 2, 32>}, {pipeline_mode = #tpu.pipeline_mode<synchronous>, transform_indices = @transform_5, window_bounds = array<i64: 2, 32>}, {pipeline_mode = #tpu.pipeline_mode<synchronous>, transform_indices = @transform_6, window_bounds = array<i64: 2, 32, 96>}, {pipeline_mode = #tpu.pipeline_mode<synchronous>, transform_indices = @transform_7, window_bounds = array<i64: 2, 96>}, {pipeline_mode = #tpu.pipeline_mode<synchronous>, transform_indices = @transform_8, window_bounds = array<i64: 2, 32, 32>}, {pipeline_mode = #tpu.pipeline_mode<synchronous>, transform_indices = @transform_9, window_bounds = array<i64: 2, 32>}, {pipeline_mode = #tpu.pipeline_mode<synchronous>, transform_indices = @transform_10, window_bounds = array<i64: 2, 32>}, {pipeline_mode = #tpu.pipeline_mode<synchronous>, transform_indices = @transform_11, window_bounds = array<i64: 2, 32>}, {pipeline_mode = #tpu.pipeline_mode<synchronous>, transform_indices = @transform_12, window_bounds = array<i64: 2, 32, 64>}, {pipeline_mode = #tpu.pipeline_mode<synchronous>, transform_indices = @transform_13, window_bounds = array<i64: 2, 64>}, {pipeline_mode = #tpu.pipeline_mode<synchronous>, transform_indices = @transform_14, window_bounds = array<i64: 2, 64, 32>}, {pipeline_mode = #tpu.pipeline_mode<synchronous>, transform_indices = @transform_15, window_bounds = array<i64: 2, 32>}, {pipeline_mode = #tpu.pipeline_mode<synchronous>, transform_indices = @transform_16, window_bounds = array<i64: 1, 32>}, {pipeline_mode = #tpu.pipeline_mode<synchronous>, transform_indices = @transform_17, window_bounds = array<i64: 1, 32>}, {pipeline_mode = #tpu.pipeline_mode<synchronous>, transform_indices = @transform_18, window_bounds = array<i64: 32, 128>}, {pipeline_mode = #tpu.pipeline_mode<synchronous>, transform_indices = @transform_19, window_bounds = array<i64: 1, 128>}, {pipeline_mode = #tpu.pipeline_mode<synchronous>, transform_indices = @transform_20, window_bounds = array<i64: 128, 128>}, {transform_indices = @transform_21, window_bounds = array<i64: 8, 128>}]} {
    %c0 = arith.constant 0 : index
    %c0_0 = arith.constant 0 : index
    %c0_1 = arith.constant 0 : index
    %0 = vector.load %arg1[%c0, %c0_0, %c0_1] : memref<8x8x32xf32, #tpu.memory_space<vmem>>, vector<8x8x32xf32>
    %1 = vector.shape_cast %0 : vector<8x8x32xf32> to vector<64x32xf32>
    %c0_2 = arith.constant 0 : index
    %c0_3 = arith.constant 0 : index
    %2 = vector.load %arg2[%c0_2, %c0_3] : memref<32x32xf32, #tpu.memory_space<vmem>>, vector<32x32xf32>
    %cst = arith.constant dense<0.000000e+00> : vector<64x32xf32>
    %3 = tpu.matmul %1, %2, %cst {dimension_numbers = #tpu.dot_dimension_numbers<[1], [0], [0], [1], [0, 0, 1, 1], [], []>} : vector<64x32xf32>, vector<32x32xf32>, vector<64x32xf32> -> vector<64x32xf32>
    %c0_4 = arith.constant 0 : index
    %c0_5 = arith.constant 0 : index
    %4 = vector.load %arg3[%c0_4, %c0_5] : memref<1x32xf32, #tpu.memory_space<vmem>>, vector<1x32xf32>
    %5 = vector.broadcast %4 : vector<1x32xf32> to vector<64x32xf32>
    %6 = arith.addf %3, %5 : vector<64x32xf32>
    %7 = vector.shape_cast %6 : vector<64x32xf32> to vector<8x8x32xf32>
    %cst_6 = arith.constant 0.000000e+00 : f32
    %8 = vector.broadcast %cst_6 : f32 to vector<8x8x32xf32>
    %9 = tpu.concatenate %7, %8 in 1 : vector<8x8x32xf32>, vector<8x8x32xf32> -> vector<8x16x32xf32>
    %c0_7 = arith.constant 0 : index
    %c0_8 = arith.constant 0 : index
    %10 = vector.load %arg4[%c0_7, %c0_8] : memref<16x32xf32, #tpu.memory_space<vmem>>, vector<16x32xf32>
    %11 = vector.shape_cast %10 : vector<16x32xf32> to vector<1x16x32xf32>
    %12 = vector.broadcast %11 : vector<1x16x32xf32> to vector<8x16x32xf32>
    %13 = arith.addf %9, %12 : vector<8x16x32xf32>
    %14 = vector.shape_cast %13 : vector<8x16x32xf32> to vector<128x32xf32>
    %c0_9 = arith.constant 0 : index
    %c0_10 = arith.constant 0 : index
    %15 = vector.load %arg21[%c0_9, %c0_10] : memref<128x128xf32, #tpu.memory_space<vmem>>, vector<128x128xf32>
    %c0_11 = arith.constant 0 : index
    %c0_12 = arith.constant 0 : index
    %16 = vector.load %arg5[%c0_11, %c0_12] : memref<2x32xf32, #tpu.memory_space<vmem>>, vector<1x32xf32>
    %c0_13 = arith.constant 0 : index
    %c0_14 = arith.constant 0 : index
    %17 = vector.load %arg6[%c0_13, %c0_14] : memref<2x32xf32, #tpu.memory_space<vmem>>, vector<1x32xf32>
    %cst_15 = arith.constant dense<0.000000e+00> : vector<128xf32>
    %18 = vector.multi_reduction <add>, %14, %cst_15 [1] : vector<128x32xf32> to vector<128xf32>
    %19 = vector.shape_cast %18 : vector<128xf32> to vector<128x1xf32>
    %cst_16 = arith.constant 3.200000e+01 : f32
    %20 = vector.broadcast %cst_16 : f32 to vector<128x1xf32>
    %21 = arith.divf %19, %20 : vector<128x1xf32>
    %22 = vector.broadcast %21 : vector<128x1xf32> to vector<128x32xf32>
    %23 = arith.subf %14, %22 : vector<128x32xf32>
    %24 = arith.mulf %23, %23 : vector<128x32xf32>
    %cst_17 = arith.constant dense<0.000000e+00> : vector<128xf32>
    %25 = vector.multi_reduction <add>, %24, %cst_17 [1] : vector<128x32xf32> to vector<128xf32>
    %26 = vector.shape_cast %25 : vector<128xf32> to vector<128x1xf32>
    %cst_18 = arith.constant 3.200000e+01 : f32
    %27 = vector.broadcast %cst_18 : f32 to vector<128x1xf32>
    %28 = arith.divf %26, %27 : vector<128x1xf32>
    %29 = vector.broadcast %21 : vector<128x1xf32> to vector<128x32xf32>
    %30 = arith.subf %14, %29 : vector<128x32xf32>
    %cst_19 = arith.constant 9.99999974E-6 : f32
    %31 = vector.broadcast %cst_19 : f32 to vector<128x1xf32>
    %32 = arith.addf %28, %31 : vector<128x1xf32>
    %33 = math.rsqrt %32 : vector<128x1xf32>
    %34 = vector.broadcast %33 : vector<128x1xf32> to vector<128x32xf32>
    %35 = arith.mulf %30, %34 : vector<128x32xf32>
    %36 = vector.broadcast %16 : vector<1x32xf32> to vector<128x32xf32>
    %37 = arith.mulf %35, %36 : vector<128x32xf32>
    %38 = vector.broadcast %17 : vector<1x32xf32> to vector<128x32xf32>
    %39 = arith.addf %37, %38 : vector<128x32xf32>
    %c0_20 = arith.constant 0 : index
    %c0_21 = arith.constant 0 : index
    %c0_22 = arith.constant 0 : index
    %40 = vector.load %arg7[%c0_20, %c0_21, %c0_22] : memref<2x32x96xf32, #tpu.memory_space<vmem>>, vector<1x32x96xf32>
    %41 = vector.shape_cast %40 : vector<1x32x96xf32> to vector<32x96xf32>
    %cst_23 = arith.constant dense<0.000000e+00> : vector<128x96xf32>
    %42 = tpu.matmul %39, %41, %cst_23 {dimension_numbers = #tpu.dot_dimension_numbers<[1], [0], [0], [1], [0, 0, 1, 1], [], []>} : vector<128x32xf32>, vector<32x96xf32>, vector<128x96xf32> -> vector<128x96xf32>
    %c0_24 = arith.constant 0 : index
    %c0_25 = arith.constant 0 : index
    %43 = vector.load %arg8[%c0_24, %c0_25] : memref<2x96xf32, #tpu.memory_space<vmem>>, vector<1x96xf32>
    %44 = vector.broadcast %43 : vector<1x96xf32> to vector<128x96xf32>
    %45 = arith.addf %42, %44 : vector<128x96xf32>
    %46 = vector.extract_strided_slice %45 {offsets = [0, 0], sizes = [128, 8], strides = [1, 1]} : vector<128x96xf32> to vector<128x8xf32>
    %47 = vector.extract_strided_slice %45 {offsets = [0, 32], sizes = [128, 8], strides = [1, 1]} : vector<128x96xf32> to vector<128x8xf32>
    %48 = vector.extract_strided_slice %45 {offsets = [0, 64], sizes = [128, 8], strides = [1, 1]} : vector<128x96xf32> to vector<128x8xf32>
    %cst_26 = arith.constant dense<0.000000e+00> : vector<128x128xf32>
    %49 = tpu.matmul %46, %47, %cst_26 {dimension_numbers = #tpu.dot_dimension_numbers<[1], [1], [0], [0], [0, 0, 1, 0], [], []>} : vector<128x8xf32>, vector<128x8xf32>, vector<128x128xf32> -> vector<128x128xf32>
    %cst_27 = arith.constant 0.353553385 : f32
    %50 = vector.broadcast %cst_27 : f32 to vector<128x128xf32>
    %51 = arith.mulf %49, %50 : vector<128x128xf32>
    %52 = arith.addf %51, %15 : vector<128x128xf32>
    %cst_28 = arith.constant dense<0xFF800000> : vector<128xf32>
    %53 = vector.multi_reduction <maximumf>, %52, %cst_28 [1] : vector<128x128xf32> to vector<128xf32>
    %54 = vector.shape_cast %53 : vector<128xf32> to vector<128x1xf32>
    %55 = vector.broadcast %54 : vector<128x1xf32> to vector<128x128xf32>
    %56 = arith.subf %52, %55 : vector<128x128xf32>
    %57 = math.exp %56 : vector<128x128xf32>
    %cst_29 = arith.constant dense<0.000000e+00> : vector<128xf32>
    %58 = vector.multi_reduction <add>, %57, %cst_29 [1] : vector<128x128xf32> to vector<128xf32>
    %59 = vector.shape_cast %58 : vector<128xf32> to vector<128x1xf32>
    %60 = tpu.reciprocal %59 {approx = true} : vector<128x1xf32> -> vector<128x1xf32>
    %61 = vector.broadcast %60 : vector<128x1xf32> to vector<128x128xf32>
    %62 = arith.mulf %57, %61 : vector<128x128xf32>
    %cst_30 = arith.constant dense<0.000000e+00> : vector<128x8xf32>
    %63 = tpu.matmul %62, %48, %cst_30 {dimension_numbers = #tpu.dot_dimension_numbers<[1], [0], [0], [1], [0, 0, 1, 1], [], []>} : vector<128x128xf32>, vector<128x8xf32>, vector<128x8xf32> -> vector<128x8xf32>
    %64 = vector.extract_strided_slice %45 {offsets = [0, 8], sizes = [128, 8], strides = [1, 1]} : vector<128x96xf32> to vector<128x8xf32>
    %65 = vector.extract_strided_slice %45 {offsets = [0, 40], sizes = [128, 8], strides = [1, 1]} : vector<128x96xf32> to vector<128x8xf32>
    %66 = vector.extract_strided_slice %45 {offsets = [0, 72], sizes = [128, 8], strides = [1, 1]} : vector<128x96xf32> to vector<128x8xf32>
    %cst_31 = arith.constant dense<0.000000e+00> : vector<128x128xf32>
    %67 = tpu.matmul %64, %65, %cst_31 {dimension_numbers = #tpu.dot_dimension_numbers<[1], [1], [0], [0], [0, 0, 1, 0], [], []>} : vector<128x8xf32>, vector<128x8xf32>, vector<128x128xf32> -> vector<128x128xf32>
    %cst_32 = arith.constant 0.353553385 : f32
    %68 = vector.broadcast %cst_32 : f32 to vector<128x128xf32>
    %69 = arith.mulf %67, %68 : vector<128x128xf32>
    %70 = arith.addf %69, %15 : vector<128x128xf32>
    %cst_33 = arith.constant dense<0xFF800000> : vector<128xf32>
    %71 = vector.multi_reduction <maximumf>, %70, %cst_33 [1] : vector<128x128xf32> to vector<128xf32>
    %72 = vector.shape_cast %71 : vector<128xf32> to vector<128x1xf32>
    %73 = vector.broadcast %72 : vector<128x1xf32> to vector<128x128xf32>
    %74 = arith.subf %70, %73 : vector<128x128xf32>
    %75 = math.exp %74 : vector<128x128xf32>
    %cst_34 = arith.constant dense<0.000000e+00> : vector<128xf32>
    %76 = vector.multi_reduction <add>, %75, %cst_34 [1] : vector<128x128xf32> to vector<128xf32>
    %77 = vector.shape_cast %76 : vector<128xf32> to vector<128x1xf32>
    %78 = tpu.reciprocal %77 {approx = true} : vector<128x1xf32> -> vector<128x1xf32>
    %79 = vector.broadcast %78 : vector<128x1xf32> to vector<128x128xf32>
    %80 = arith.mulf %75, %79 : vector<128x128xf32>
    %cst_35 = arith.constant dense<0.000000e+00> : vector<128x8xf32>
    %81 = tpu.matmul %80, %66, %cst_35 {dimension_numbers = #tpu.dot_dimension_numbers<[1], [0], [0], [1], [0, 0, 1, 1], [], []>} : vector<128x128xf32>, vector<128x8xf32>, vector<128x8xf32> -> vector<128x8xf32>
    %82 = vector.extract_strided_slice %45 {offsets = [0, 16], sizes = [128, 8], strides = [1, 1]} : vector<128x96xf32> to vector<128x8xf32>
    %83 = vector.extract_strided_slice %45 {offsets = [0, 48], sizes = [128, 8], strides = [1, 1]} : vector<128x96xf32> to vector<128x8xf32>
    %84 = vector.extract_strided_slice %45 {offsets = [0, 80], sizes = [128, 8], strides = [1, 1]} : vector<128x96xf32> to vector<128x8xf32>
    %cst_36 = arith.constant dense<0.000000e+00> : vector<128x128xf32>
    %85 = tpu.matmul %82, %83, %cst_36 {dimension_numbers = #tpu.dot_dimension_numbers<[1], [1], [0], [0], [0, 0, 1, 0], [], []>} : vector<128x8xf32>, vector<128x8xf32>, vector<128x128xf32> -> vector<128x128xf32>
    %cst_37 = arith.constant 0.353553385 : f32
    %86 = vector.broadcast %cst_37 : f32 to vector<128x128xf32>
    %87 = arith.mulf %85, %86 : vector<128x128xf32>
    %88 = arith.addf %87, %15 : vector<128x128xf32>
    %cst_38 = arith.constant dense<0xFF800000> : vector<128xf32>
    %89 = vector.multi_reduction <maximumf>, %88, %cst_38 [1] : vector<128x128xf32> to vector<128xf32>
    %90 = vector.shape_cast %89 : vector<128xf32> to vector<128x1xf32>
    %91 = vector.broadcast %90 : vector<128x1xf32> to vector<128x128xf32>
    %92 = arith.subf %88, %91 : vector<128x128xf32>
    %93 = math.exp %92 : vector<128x128xf32>
    %cst_39 = arith.constant dense<0.000000e+00> : vector<128xf32>
    %94 = vector.multi_reduction <add>, %93, %cst_39 [1] : vector<128x128xf32> to vector<128xf32>
    %95 = vector.shape_cast %94 : vector<128xf32> to vector<128x1xf32>
    %96 = tpu.reciprocal %95 {approx = true} : vector<128x1xf32> -> vector<128x1xf32>
    %97 = vector.broadcast %96 : vector<128x1xf32> to vector<128x128xf32>
    %98 = arith.mulf %93, %97 : vector<128x128xf32>
    %cst_40 = arith.constant dense<0.000000e+00> : vector<128x8xf32>
    %99 = tpu.matmul %98, %84, %cst_40 {dimension_numbers = #tpu.dot_dimension_numbers<[1], [0], [0], [1], [0, 0, 1, 1], [], []>} : vector<128x128xf32>, vector<128x8xf32>, vector<128x8xf32> -> vector<128x8xf32>
    %100 = vector.extract_strided_slice %45 {offsets = [0, 24], sizes = [128, 8], strides = [1, 1]} : vector<128x96xf32> to vector<128x8xf32>
    %101 = vector.extract_strided_slice %45 {offsets = [0, 56], sizes = [128, 8], strides = [1, 1]} : vector<128x96xf32> to vector<128x8xf32>
    %102 = vector.extract_strided_slice %45 {offsets = [0, 88], sizes = [128, 8], strides = [1, 1]} : vector<128x96xf32> to vector<128x8xf32>
    %cst_41 = arith.constant dense<0.000000e+00> : vector<128x128xf32>
    %103 = tpu.matmul %100, %101, %cst_41 {dimension_numbers = #tpu.dot_dimension_numbers<[1], [1], [0], [0], [0, 0, 1, 0], [], []>} : vector<128x8xf32>, vector<128x8xf32>, vector<128x128xf32> -> vector<128x128xf32>
    %cst_42 = arith.constant 0.353553385 : f32
    %104 = vector.broadcast %cst_42 : f32 to vector<128x128xf32>
    %105 = arith.mulf %103, %104 : vector<128x128xf32>
    %106 = arith.addf %105, %15 : vector<128x128xf32>
    %cst_43 = arith.constant dense<0xFF800000> : vector<128xf32>
    %107 = vector.multi_reduction <maximumf>, %106, %cst_43 [1] : vector<128x128xf32> to vector<128xf32>
    %108 = vector.shape_cast %107 : vector<128xf32> to vector<128x1xf32>
    %109 = vector.broadcast %108 : vector<128x1xf32> to vector<128x128xf32>
    %110 = arith.subf %106, %109 : vector<128x128xf32>
    %111 = math.exp %110 : vector<128x128xf32>
    %cst_44 = arith.constant dense<0.000000e+00> : vector<128xf32>
    %112 = vector.multi_reduction <add>, %111, %cst_44 [1] : vector<128x128xf32> to vector<128xf32>
    %113 = vector.shape_cast %112 : vector<128xf32> to vector<128x1xf32>
    %114 = tpu.reciprocal %113 {approx = true} : vector<128x1xf32> -> vector<128x1xf32>
    %115 = vector.broadcast %114 : vector<128x1xf32> to vector<128x128xf32>
    %116 = arith.mulf %111, %115 : vector<128x128xf32>
    %cst_45 = arith.constant dense<0.000000e+00> : vector<128x8xf32>
    %117 = tpu.matmul %116, %102, %cst_45 {dimension_numbers = #tpu.dot_dimension_numbers<[1], [0], [0], [1], [0, 0, 1, 1], [], []>} : vector<128x128xf32>, vector<128x8xf32>, vector<128x8xf32> -> vector<128x8xf32>
    %118 = tpu.concatenate %63, %81, %99, %117 in 1 : vector<128x8xf32>, vector<128x8xf32>, vector<128x8xf32>, vector<128x8xf32> -> vector<128x32xf32>
    %c0_46 = arith.constant 0 : index
    %c0_47 = arith.constant 0 : index
    %c0_48 = arith.constant 0 : index
    %119 = vector.load %arg9[%c0_46, %c0_47, %c0_48] : memref<2x32x32xf32, #tpu.memory_space<vmem>>, vector<1x32x32xf32>
    %120 = vector.shape_cast %119 : vector<1x32x32xf32> to vector<32x32xf32>
    %cst_49 = arith.constant dense<0.000000e+00> : vector<128x32xf32>
    %121 = tpu.matmul %118, %120, %cst_49 {dimension_numbers = #tpu.dot_dimension_numbers<[1], [0], [0], [1], [0, 0, 1, 1], [], []>} : vector<128x32xf32>, vector<32x32xf32>, vector<128x32xf32> -> vector<128x32xf32>
    %122 = arith.addf %14, %121 : vector<128x32xf32>
    %c0_50 = arith.constant 0 : index
    %c0_51 = arith.constant 0 : index
    %123 = vector.load %arg10[%c0_50, %c0_51] : memref<2x32xf32, #tpu.memory_space<vmem>>, vector<1x32xf32>
    %124 = vector.broadcast %123 : vector<1x32xf32> to vector<128x32xf32>
    %125 = arith.addf %122, %124 : vector<128x32xf32>
    %c0_52 = arith.constant 0 : index
    %c0_53 = arith.constant 0 : index
    %126 = vector.load %arg11[%c0_52, %c0_53] : memref<2x32xf32, #tpu.memory_space<vmem>>, vector<1x32xf32>
    %c0_54 = arith.constant 0 : index
    %c0_55 = arith.constant 0 : index
    %127 = vector.load %arg12[%c0_54, %c0_55] : memref<2x32xf32, #tpu.memory_space<vmem>>, vector<1x32xf32>
    %cst_56 = arith.constant dense<0.000000e+00> : vector<128xf32>
    %128 = vector.multi_reduction <add>, %125, %cst_56 [1] : vector<128x32xf32> to vector<128xf32>
    %129 = vector.shape_cast %128 : vector<128xf32> to vector<128x1xf32>
    %cst_57 = arith.constant 3.200000e+01 : f32
    %130 = vector.broadcast %cst_57 : f32 to vector<128x1xf32>
    %131 = arith.divf %129, %130 : vector<128x1xf32>
    %132 = vector.broadcast %131 : vector<128x1xf32> to vector<128x32xf32>
    %133 = arith.subf %125, %132 : vector<128x32xf32>
    %134 = arith.mulf %133, %133 : vector<128x32xf32>
    %cst_58 = arith.constant dense<0.000000e+00> : vector<128xf32>
    %135 = vector.multi_reduction <add>, %134, %cst_58 [1] : vector<128x32xf32> to vector<128xf32>
    %136 = vector.shape_cast %135 : vector<128xf32> to vector<128x1xf32>
    %cst_59 = arith.constant 3.200000e+01 : f32
    %137 = vector.broadcast %cst_59 : f32 to vector<128x1xf32>
    %138 = arith.divf %136, %137 : vector<128x1xf32>
    %139 = vector.broadcast %131 : vector<128x1xf32> to vector<128x32xf32>
    %140 = arith.subf %125, %139 : vector<128x32xf32>
    %cst_60 = arith.constant 9.99999974E-6 : f32
    %141 = vector.broadcast %cst_60 : f32 to vector<128x1xf32>
    %142 = arith.addf %138, %141 : vector<128x1xf32>
    %143 = math.rsqrt %142 : vector<128x1xf32>
    %144 = vector.broadcast %143 : vector<128x1xf32> to vector<128x32xf32>
    %145 = arith.mulf %140, %144 : vector<128x32xf32>
    %146 = vector.broadcast %126 : vector<1x32xf32> to vector<128x32xf32>
    %147 = arith.mulf %145, %146 : vector<128x32xf32>
    %148 = vector.broadcast %127 : vector<1x32xf32> to vector<128x32xf32>
    %149 = arith.addf %147, %148 : vector<128x32xf32>
    %c0_61 = arith.constant 0 : index
    %c0_62 = arith.constant 0 : index
    %c0_63 = arith.constant 0 : index
    %150 = vector.load %arg13[%c0_61, %c0_62, %c0_63] : memref<2x32x64xf32, #tpu.memory_space<vmem>>, vector<1x32x64xf32>
    %151 = vector.shape_cast %150 : vector<1x32x64xf32> to vector<32x64xf32>
    %cst_64 = arith.constant dense<0.000000e+00> : vector<128x64xf32>
    %152 = tpu.matmul %149, %151, %cst_64 {dimension_numbers = #tpu.dot_dimension_numbers<[1], [0], [0], [1], [0, 0, 1, 1], [], []>} : vector<128x32xf32>, vector<32x64xf32>, vector<128x64xf32> -> vector<128x64xf32>
    %c0_65 = arith.constant 0 : index
    %c0_66 = arith.constant 0 : index
    %153 = vector.load %arg14[%c0_65, %c0_66] : memref<2x64xf32, #tpu.memory_space<vmem>>, vector<1x64xf32>
    %154 = vector.broadcast %153 : vector<1x64xf32> to vector<128x64xf32>
    %155 = arith.addf %152, %154 : vector<128x64xf32>
    %cst_67 = arith.constant 5.000000e-01 : f32
    %156 = vector.broadcast %cst_67 : f32 to vector<128x64xf32>
    %157 = arith.mulf %156, %155 : vector<128x64xf32>
    %cst_68 = arith.constant 4.471500e-02 : f32
    %158 = vector.broadcast %cst_68 : f32 to vector<128x64xf32>
    %159 = arith.mulf %158, %155 : vector<128x64xf32>
    %160 = arith.mulf %159, %155 : vector<128x64xf32>
    %161 = arith.mulf %160, %155 : vector<128x64xf32>
    %162 = arith.addf %155, %161 : vector<128x64xf32>
    %cst_69 = arith.constant 0.797884583 : f32
    %163 = vector.broadcast %cst_69 : f32 to vector<128x64xf32>
    %164 = arith.mulf %163, %162 : vector<128x64xf32>
    %165 = math.tanh %164 : vector<128x64xf32>
    %cst_70 = arith.constant 1.000000e+00 : f32
    %166 = vector.broadcast %cst_70 : f32 to vector<128x64xf32>
    %167 = arith.addf %166, %165 : vector<128x64xf32>
    %168 = arith.mulf %157, %167 : vector<128x64xf32>
    %c0_71 = arith.constant 0 : index
    %c0_72 = arith.constant 0 : index
    %c0_73 = arith.constant 0 : index
    %169 = vector.load %arg15[%c0_71, %c0_72, %c0_73] : memref<2x64x32xf32, #tpu.memory_space<vmem>>, vector<1x64x32xf32>
    %170 = vector.shape_cast %169 : vector<1x64x32xf32> to vector<64x32xf32>
    %cst_74 = arith.constant dense<0.000000e+00> : vector<128x32xf32>
    %171 = tpu.matmul %168, %170, %cst_74 {dimension_numbers = #tpu.dot_dimension_numbers<[1], [0], [0], [1], [0, 0, 1, 1], [], []>} : vector<128x64xf32>, vector<64x32xf32>, vector<128x32xf32> -> vector<128x32xf32>
    %172 = arith.addf %125, %171 : vector<128x32xf32>
    %c0_75 = arith.constant 0 : index
    %c0_76 = arith.constant 0 : index
    %173 = vector.load %arg16[%c0_75, %c0_76] : memref<2x32xf32, #tpu.memory_space<vmem>>, vector<1x32xf32>
    %174 = vector.broadcast %173 : vector<1x32xf32> to vector<128x32xf32>
    %175 = arith.addf %172, %174 : vector<128x32xf32>
    %c1 = arith.constant 1 : index
    %c0_77 = arith.constant 0 : index
    %176 = vector.load %arg5[%c1, %c0_77] : memref<2x32xf32, #tpu.memory_space<vmem>>, vector<1x32xf32>
    %c1_78 = arith.constant 1 : index
    %c0_79 = arith.constant 0 : index
    %177 = vector.load %arg6[%c1_78, %c0_79] : memref<2x32xf32, #tpu.memory_space<vmem>>, vector<1x32xf32>
    %cst_80 = arith.constant dense<0.000000e+00> : vector<128xf32>
    %178 = vector.multi_reduction <add>, %175, %cst_80 [1] : vector<128x32xf32> to vector<128xf32>
    %179 = vector.shape_cast %178 : vector<128xf32> to vector<128x1xf32>
    %cst_81 = arith.constant 3.200000e+01 : f32
    %180 = vector.broadcast %cst_81 : f32 to vector<128x1xf32>
    %181 = arith.divf %179, %180 : vector<128x1xf32>
    %182 = vector.broadcast %181 : vector<128x1xf32> to vector<128x32xf32>
    %183 = arith.subf %175, %182 : vector<128x32xf32>
    %184 = arith.mulf %183, %183 : vector<128x32xf32>
    %cst_82 = arith.constant dense<0.000000e+00> : vector<128xf32>
    %185 = vector.multi_reduction <add>, %184, %cst_82 [1] : vector<128x32xf32> to vector<128xf32>
    %186 = vector.shape_cast %185 : vector<128xf32> to vector<128x1xf32>
    %cst_83 = arith.constant 3.200000e+01 : f32
    %187 = vector.broadcast %cst_83 : f32 to vector<128x1xf32>
    %188 = arith.divf %186, %187 : vector<128x1xf32>
    %189 = vector.broadcast %181 : vector<128x1xf32> to vector<128x32xf32>
    %190 = arith.subf %175, %189 : vector<128x32xf32>
    %cst_84 = arith.constant 9.99999974E-6 : f32
    %191 = vector.broadcast %cst_84 : f32 to vector<128x1xf32>
    %192 = arith.addf %188, %191 : vector<128x1xf32>
    %193 = math.rsqrt %192 : vector<128x1xf32>
    %194 = vector.broadcast %193 : vector<128x1xf32> to vector<128x32xf32>
    %195 = arith.mulf %190, %194 : vector<128x32xf32>
    %196 = vector.broadcast %176 : vector<1x32xf32> to vector<128x32xf32>
    %197 = arith.mulf %195, %196 : vector<128x32xf32>
    %198 = vector.broadcast %177 : vector<1x32xf32> to vector<128x32xf32>
    %199 = arith.addf %197, %198 : vector<128x32xf32>
    %c1_85 = arith.constant 1 : index
    %c0_86 = arith.constant 0 : index
    %c0_87 = arith.constant 0 : index
    %200 = vector.load %arg7[%c1_85, %c0_86, %c0_87] : memref<2x32x96xf32, #tpu.memory_space<vmem>>, vector<1x32x96xf32>
    %201 = vector.shape_cast %200 : vector<1x32x96xf32> to vector<32x96xf32>
    %cst_88 = arith.constant dense<0.000000e+00> : vector<128x96xf32>
    %202 = tpu.matmul %199, %201, %cst_88 {dimension_numbers = #tpu.dot_dimension_numbers<[1], [0], [0], [1], [0, 0, 1, 1], [], []>} : vector<128x32xf32>, vector<32x96xf32>, vector<128x96xf32> -> vector<128x96xf32>
    %c1_89 = arith.constant 1 : index
    %c0_90 = arith.constant 0 : index
    %203 = vector.load %arg8[%c1_89, %c0_90] : memref<2x96xf32, #tpu.memory_space<vmem>>, vector<1x96xf32>
    %204 = vector.broadcast %203 : vector<1x96xf32> to vector<128x96xf32>
    %205 = arith.addf %202, %204 : vector<128x96xf32>
    %206 = vector.extract_strided_slice %205 {offsets = [0, 0], sizes = [128, 8], strides = [1, 1]} : vector<128x96xf32> to vector<128x8xf32>
    %207 = vector.extract_strided_slice %205 {offsets = [0, 32], sizes = [128, 8], strides = [1, 1]} : vector<128x96xf32> to vector<128x8xf32>
    %208 = vector.extract_strided_slice %205 {offsets = [0, 64], sizes = [128, 8], strides = [1, 1]} : vector<128x96xf32> to vector<128x8xf32>
    %cst_91 = arith.constant dense<0.000000e+00> : vector<128x128xf32>
    %209 = tpu.matmul %206, %207, %cst_91 {dimension_numbers = #tpu.dot_dimension_numbers<[1], [1], [0], [0], [0, 0, 1, 0], [], []>} : vector<128x8xf32>, vector<128x8xf32>, vector<128x128xf32> -> vector<128x128xf32>
    %cst_92 = arith.constant 0.353553385 : f32
    %210 = vector.broadcast %cst_92 : f32 to vector<128x128xf32>
    %211 = arith.mulf %209, %210 : vector<128x128xf32>
    %212 = arith.addf %211, %15 : vector<128x128xf32>
    %cst_93 = arith.constant dense<0xFF800000> : vector<128xf32>
    %213 = vector.multi_reduction <maximumf>, %212, %cst_93 [1] : vector<128x128xf32> to vector<128xf32>
    %214 = vector.shape_cast %213 : vector<128xf32> to vector<128x1xf32>
    %215 = vector.broadcast %214 : vector<128x1xf32> to vector<128x128xf32>
    %216 = arith.subf %212, %215 : vector<128x128xf32>
    %217 = math.exp %216 : vector<128x128xf32>
    %cst_94 = arith.constant dense<0.000000e+00> : vector<128xf32>
    %218 = vector.multi_reduction <add>, %217, %cst_94 [1] : vector<128x128xf32> to vector<128xf32>
    %219 = vector.shape_cast %218 : vector<128xf32> to vector<128x1xf32>
    %220 = tpu.reciprocal %219 {approx = true} : vector<128x1xf32> -> vector<128x1xf32>
    %221 = vector.broadcast %220 : vector<128x1xf32> to vector<128x128xf32>
    %222 = arith.mulf %217, %221 : vector<128x128xf32>
    %cst_95 = arith.constant dense<0.000000e+00> : vector<128x8xf32>
    %223 = tpu.matmul %222, %208, %cst_95 {dimension_numbers = #tpu.dot_dimension_numbers<[1], [0], [0], [1], [0, 0, 1, 1], [], []>} : vector<128x128xf32>, vector<128x8xf32>, vector<128x8xf32> -> vector<128x8xf32>
    %224 = vector.extract_strided_slice %205 {offsets = [0, 8], sizes = [128, 8], strides = [1, 1]} : vector<128x96xf32> to vector<128x8xf32>
    %225 = vector.extract_strided_slice %205 {offsets = [0, 40], sizes = [128, 8], strides = [1, 1]} : vector<128x96xf32> to vector<128x8xf32>
    %226 = vector.extract_strided_slice %205 {offsets = [0, 72], sizes = [128, 8], strides = [1, 1]} : vector<128x96xf32> to vector<128x8xf32>
    %cst_96 = arith.constant dense<0.000000e+00> : vector<128x128xf32>
    %227 = tpu.matmul %224, %225, %cst_96 {dimension_numbers = #tpu.dot_dimension_numbers<[1], [1], [0], [0], [0, 0, 1, 0], [], []>} : vector<128x8xf32>, vector<128x8xf32>, vector<128x128xf32> -> vector<128x128xf32>
    %cst_97 = arith.constant 0.353553385 : f32
    %228 = vector.broadcast %cst_97 : f32 to vector<128x128xf32>
    %229 = arith.mulf %227, %228 : vector<128x128xf32>
    %230 = arith.addf %229, %15 : vector<128x128xf32>
    %cst_98 = arith.constant dense<0xFF800000> : vector<128xf32>
    %231 = vector.multi_reduction <maximumf>, %230, %cst_98 [1] : vector<128x128xf32> to vector<128xf32>
    %232 = vector.shape_cast %231 : vector<128xf32> to vector<128x1xf32>
    %233 = vector.broadcast %232 : vector<128x1xf32> to vector<128x128xf32>
    %234 = arith.subf %230, %233 : vector<128x128xf32>
    %235 = math.exp %234 : vector<128x128xf32>
    %cst_99 = arith.constant dense<0.000000e+00> : vector<128xf32>
    %236 = vector.multi_reduction <add>, %235, %cst_99 [1] : vector<128x128xf32> to vector<128xf32>
    %237 = vector.shape_cast %236 : vector<128xf32> to vector<128x1xf32>
    %238 = tpu.reciprocal %237 {approx = true} : vector<128x1xf32> -> vector<128x1xf32>
    %239 = vector.broadcast %238 : vector<128x1xf32> to vector<128x128xf32>
    %240 = arith.mulf %235, %239 : vector<128x128xf32>
    %cst_100 = arith.constant dense<0.000000e+00> : vector<128x8xf32>
    %241 = tpu.matmul %240, %226, %cst_100 {dimension_numbers = #tpu.dot_dimension_numbers<[1], [0], [0], [1], [0, 0, 1, 1], [], []>} : vector<128x128xf32>, vector<128x8xf32>, vector<128x8xf32> -> vector<128x8xf32>
    %242 = vector.extract_strided_slice %205 {offsets = [0, 16], sizes = [128, 8], strides = [1, 1]} : vector<128x96xf32> to vector<128x8xf32>
    %243 = vector.extract_strided_slice %205 {offsets = [0, 48], sizes = [128, 8], strides = [1, 1]} : vector<128x96xf32> to vector<128x8xf32>
    %244 = vector.extract_strided_slice %205 {offsets = [0, 80], sizes = [128, 8], strides = [1, 1]} : vector<128x96xf32> to vector<128x8xf32>
    %cst_101 = arith.constant dense<0.000000e+00> : vector<128x128xf32>
    %245 = tpu.matmul %242, %243, %cst_101 {dimension_numbers = #tpu.dot_dimension_numbers<[1], [1], [0], [0], [0, 0, 1, 0], [], []>} : vector<128x8xf32>, vector<128x8xf32>, vector<128x128xf32> -> vector<128x128xf32>
    %cst_102 = arith.constant 0.353553385 : f32
    %246 = vector.broadcast %cst_102 : f32 to vector<128x128xf32>
    %247 = arith.mulf %245, %246 : vector<128x128xf32>
    %248 = arith.addf %247, %15 : vector<128x128xf32>
    %cst_103 = arith.constant dense<0xFF800000> : vector<128xf32>
    %249 = vector.multi_reduction <maximumf>, %248, %cst_103 [1] : vector<128x128xf32> to vector<128xf32>
    %250 = vector.shape_cast %249 : vector<128xf32> to vector<128x1xf32>
    %251 = vector.broadcast %250 : vector<128x1xf32> to vector<128x128xf32>
    %252 = arith.subf %248, %251 : vector<128x128xf32>
    %253 = math.exp %252 : vector<128x128xf32>
    %cst_104 = arith.constant dense<0.000000e+00> : vector<128xf32>
    %254 = vector.multi_reduction <add>, %253, %cst_104 [1] : vector<128x128xf32> to vector<128xf32>
    %255 = vector.shape_cast %254 : vector<128xf32> to vector<128x1xf32>
    %256 = tpu.reciprocal %255 {approx = true} : vector<128x1xf32> -> vector<128x1xf32>
    %257 = vector.broadcast %256 : vector<128x1xf32> to vector<128x128xf32>
    %258 = arith.mulf %253, %257 : vector<128x128xf32>
    %cst_105 = arith.constant dense<0.000000e+00> : vector<128x8xf32>
    %259 = tpu.matmul %258, %244, %cst_105 {dimension_numbers = #tpu.dot_dimension_numbers<[1], [0], [0], [1], [0, 0, 1, 1], [], []>} : vector<128x128xf32>, vector<128x8xf32>, vector<128x8xf32> -> vector<128x8xf32>
    %260 = vector.extract_strided_slice %205 {offsets = [0, 24], sizes = [128, 8], strides = [1, 1]} : vector<128x96xf32> to vector<128x8xf32>
    %261 = vector.extract_strided_slice %205 {offsets = [0, 56], sizes = [128, 8], strides = [1, 1]} : vector<128x96xf32> to vector<128x8xf32>
    %262 = vector.extract_strided_slice %205 {offsets = [0, 88], sizes = [128, 8], strides = [1, 1]} : vector<128x96xf32> to vector<128x8xf32>
    %cst_106 = arith.constant dense<0.000000e+00> : vector<128x128xf32>
    %263 = tpu.matmul %260, %261, %cst_106 {dimension_numbers = #tpu.dot_dimension_numbers<[1], [1], [0], [0], [0, 0, 1, 0], [], []>} : vector<128x8xf32>, vector<128x8xf32>, vector<128x128xf32> -> vector<128x128xf32>
    %cst_107 = arith.constant 0.353553385 : f32
    %264 = vector.broadcast %cst_107 : f32 to vector<128x128xf32>
    %265 = arith.mulf %263, %264 : vector<128x128xf32>
    %266 = arith.addf %265, %15 : vector<128x128xf32>
    %cst_108 = arith.constant dense<0xFF800000> : vector<128xf32>
    %267 = vector.multi_reduction <maximumf>, %266, %cst_108 [1] : vector<128x128xf32> to vector<128xf32>
    %268 = vector.shape_cast %267 : vector<128xf32> to vector<128x1xf32>
    %269 = vector.broadcast %268 : vector<128x1xf32> to vector<128x128xf32>
    %270 = arith.subf %266, %269 : vector<128x128xf32>
    %271 = math.exp %270 : vector<128x128xf32>
    %cst_109 = arith.constant dense<0.000000e+00> : vector<128xf32>
    %272 = vector.multi_reduction <add>, %271, %cst_109 [1] : vector<128x128xf32> to vector<128xf32>
    %273 = vector.shape_cast %272 : vector<128xf32> to vector<128x1xf32>
    %274 = tpu.reciprocal %273 {approx = true} : vector<128x1xf32> -> vector<128x1xf32>
    %275 = vector.broadcast %274 : vector<128x1xf32> to vector<128x128xf32>
    %276 = arith.mulf %271, %275 : vector<128x128xf32>
    %cst_110 = arith.constant dense<0.000000e+00> : vector<128x8xf32>
    %277 = tpu.matmul %276, %262, %cst_110 {dimension_numbers = #tpu.dot_dimension_numbers<[1], [0], [0], [1], [0, 0, 1, 1], [], []>} : vector<128x128xf32>, vector<128x8xf32>, vector<128x8xf32> -> vector<128x8xf32>
    %278 = tpu.concatenate %223, %241, %259, %277 in 1 : vector<128x8xf32>, vector<128x8xf32>, vector<128x8xf32>, vector<128x8xf32> -> vector<128x32xf32>
    %c1_111 = arith.constant 1 : index
    %c0_112 = arith.constant 0 : index
    %c0_113 = arith.constant 0 : index
    %279 = vector.load %arg9[%c1_111, %c0_112, %c0_113] : memref<2x32x32xf32, #tpu.memory_space<vmem>>, vector<1x32x32xf32>
    %280 = vector.shape_cast %279 : vector<1x32x32xf32> to vector<32x32xf32>
    %cst_114 = arith.constant dense<0.000000e+00> : vector<128x32xf32>
    %281 = tpu.matmul %278, %280, %cst_114 {dimension_numbers = #tpu.dot_dimension_numbers<[1], [0], [0], [1], [0, 0, 1, 1], [], []>} : vector<128x32xf32>, vector<32x32xf32>, vector<128x32xf32> -> vector<128x32xf32>
    %282 = arith.addf %175, %281 : vector<128x32xf32>
    %c1_115 = arith.constant 1 : index
    %c0_116 = arith.constant 0 : index
    %283 = vector.load %arg10[%c1_115, %c0_116] : memref<2x32xf32, #tpu.memory_space<vmem>>, vector<1x32xf32>
    %284 = vector.broadcast %283 : vector<1x32xf32> to vector<128x32xf32>
    %285 = arith.addf %282, %284 : vector<128x32xf32>
    %c1_117 = arith.constant 1 : index
    %c0_118 = arith.constant 0 : index
    %286 = vector.load %arg11[%c1_117, %c0_118] : memref<2x32xf32, #tpu.memory_space<vmem>>, vector<1x32xf32>
    %c1_119 = arith.constant 1 : index
    %c0_120 = arith.constant 0 : index
    %287 = vector.load %arg12[%c1_119, %c0_120] : memref<2x32xf32, #tpu.memory_space<vmem>>, vector<1x32xf32>
    %cst_121 = arith.constant dense<0.000000e+00> : vector<128xf32>
    %288 = vector.multi_reduction <add>, %285, %cst_121 [1] : vector<128x32xf32> to vector<128xf32>
    %289 = vector.shape_cast %288 : vector<128xf32> to vector<128x1xf32>
    %cst_122 = arith.constant 3.200000e+01 : f32
    %290 = vector.broadcast %cst_122 : f32 to vector<128x1xf32>
    %291 = arith.divf %289, %290 : vector<128x1xf32>
    %292 = vector.broadcast %291 : vector<128x1xf32> to vector<128x32xf32>
    %293 = arith.subf %285, %292 : vector<128x32xf32>
    %294 = arith.mulf %293, %293 : vector<128x32xf32>
    %cst_123 = arith.constant dense<0.000000e+00> : vector<128xf32>
    %295 = vector.multi_reduction <add>, %294, %cst_123 [1] : vector<128x32xf32> to vector<128xf32>
    %296 = vector.shape_cast %295 : vector<128xf32> to vector<128x1xf32>
    %cst_124 = arith.constant 3.200000e+01 : f32
    %297 = vector.broadcast %cst_124 : f32 to vector<128x1xf32>
    %298 = arith.divf %296, %297 : vector<128x1xf32>
    %299 = vector.broadcast %291 : vector<128x1xf32> to vector<128x32xf32>
    %300 = arith.subf %285, %299 : vector<128x32xf32>
    %cst_125 = arith.constant 9.99999974E-6 : f32
    %301 = vector.broadcast %cst_125 : f32 to vector<128x1xf32>
    %302 = arith.addf %298, %301 : vector<128x1xf32>
    %303 = math.rsqrt %302 : vector<128x1xf32>
    %304 = vector.broadcast %303 : vector<128x1xf32> to vector<128x32xf32>
    %305 = arith.mulf %300, %304 : vector<128x32xf32>
    %306 = vector.broadcast %286 : vector<1x32xf32> to vector<128x32xf32>
    %307 = arith.mulf %305, %306 : vector<128x32xf32>
    %308 = vector.broadcast %287 : vector<1x32xf32> to vector<128x32xf32>
    %309 = arith.addf %307, %308 : vector<128x32xf32>
    %c1_126 = arith.constant 1 : index
    %c0_127 = arith.constant 0 : index
    %c0_128 = arith.constant 0 : index
    %310 = vector.load %arg13[%c1_126, %c0_127, %c0_128] : memref<2x32x64xf32, #tpu.memory_space<vmem>>, vector<1x32x64xf32>
    %311 = vector.shape_cast %310 : vector<1x32x64xf32> to vector<32x64xf32>
    %cst_129 = arith.constant dense<0.000000e+00> : vector<128x64xf32>
    %312 = tpu.matmul %309, %311, %cst_129 {dimension_numbers = #tpu.dot_dimension_numbers<[1], [0], [0], [1], [0, 0, 1, 1], [], []>} : vector<128x32xf32>, vector<32x64xf32>, vector<128x64xf32> -> vector<128x64xf32>
    %c1_130 = arith.constant 1 : index
    %c0_131 = arith.constant 0 : index
    %313 = vector.load %arg14[%c1_130, %c0_131] : memref<2x64xf32, #tpu.memory_space<vmem>>, vector<1x64xf32>
    %314 = vector.broadcast %313 : vector<1x64xf32> to vector<128x64xf32>
    %315 = arith.addf %312, %314 : vector<128x64xf32>
    %cst_132 = arith.constant 5.000000e-01 : f32
    %316 = vector.broadcast %cst_132 : f32 to vector<128x64xf32>
    %317 = arith.mulf %316, %315 : vector<128x64xf32>
    %cst_133 = arith.constant 4.471500e-02 : f32
    %318 = vector.broadcast %cst_133 : f32 to vector<128x64xf32>
    %319 = arith.mulf %318, %315 : vector<128x64xf32>
    %320 = arith.mulf %319, %315 : vector<128x64xf32>
    %321 = arith.mulf %320, %315 : vector<128x64xf32>
    %322 = arith.addf %315, %321 : vector<128x64xf32>
    %cst_134 = arith.constant 0.797884583 : f32
    %323 = vector.broadcast %cst_134 : f32 to vector<128x64xf32>
    %324 = arith.mulf %323, %322 : vector<128x64xf32>
    %325 = math.tanh %324 : vector<128x64xf32>
    %cst_135 = arith.constant 1.000000e+00 : f32
    %326 = vector.broadcast %cst_135 : f32 to vector<128x64xf32>
    %327 = arith.addf %326, %325 : vector<128x64xf32>
    %328 = arith.mulf %317, %327 : vector<128x64xf32>
    %c1_136 = arith.constant 1 : index
    %c0_137 = arith.constant 0 : index
    %c0_138 = arith.constant 0 : index
    %329 = vector.load %arg15[%c1_136, %c0_137, %c0_138] : memref<2x64x32xf32, #tpu.memory_space<vmem>>, vector<1x64x32xf32>
    %330 = vector.shape_cast %329 : vector<1x64x32xf32> to vector<64x32xf32>
    %cst_139 = arith.constant dense<0.000000e+00> : vector<128x32xf32>
    %331 = tpu.matmul %328, %330, %cst_139 {dimension_numbers = #tpu.dot_dimension_numbers<[1], [0], [0], [1], [0, 0, 1, 1], [], []>} : vector<128x64xf32>, vector<64x32xf32>, vector<128x32xf32> -> vector<128x32xf32>
    %332 = arith.addf %285, %331 : vector<128x32xf32>
    %c1_140 = arith.constant 1 : index
    %c0_141 = arith.constant 0 : index
    %333 = vector.load %arg16[%c1_140, %c0_141] : memref<2x32xf32, #tpu.memory_space<vmem>>, vector<1x32xf32>
    %334 = vector.broadcast %333 : vector<1x32xf32> to vector<128x32xf32>
    %335 = arith.addf %332, %334 : vector<128x32xf32>
    %336 = tpu.iota {dimensions = array<i32: 0>} : vector<8x128xi32>
    %337 = tpu.iota {dimensions = array<i32: 1>} : vector<8x128xi32>
    %c16_i32 = arith.constant 16 : i32
    %338 = vector.broadcast %c16_i32 : i32 to vector<8x128xi32>
    %339 = arith.muli %336, %338 : vector<8x128xi32>
    %340 = arith.cmpi eq, %337, %339 : vector<8x128xi32>
    %341 = arith.extui %340 : vector<8x128xi1> to vector<8x128xi32>
    %342 = arith.sitofp %341 : vector<8x128xi32> to vector<8x128xf32>
    %cst_142 = arith.constant dense<0.000000e+00> : vector<8x32xf32>
    %343 = tpu.matmul %342, %335, %cst_142 {dimension_numbers = #tpu.dot_dimension_numbers<[1], [0], [0], [1], [0, 0, 1, 1], [], []>} : vector<8x128xf32>, vector<128x32xf32>, vector<8x32xf32> -> vector<8x32xf32>
    %c0_143 = arith.constant 0 : index
    %c0_144 = arith.constant 0 : index
    %344 = vector.load %arg17[%c0_143, %c0_144] : memref<1x32xf32, #tpu.memory_space<vmem>>, vector<1x32xf32>
    %c0_145 = arith.constant 0 : index
    %c0_146 = arith.constant 0 : index
    %345 = vector.load %arg18[%c0_145, %c0_146] : memref<1x32xf32, #tpu.memory_space<vmem>>, vector<1x32xf32>
    %cst_147 = arith.constant dense<0.000000e+00> : vector<8xf32>
    %346 = vector.multi_reduction <add>, %343, %cst_147 [1] : vector<8x32xf32> to vector<8xf32>
    %347 = vector.shape_cast %346 : vector<8xf32> to vector<8x1xf32>
    %cst_148 = arith.constant 3.200000e+01 : f32
    %348 = vector.broadcast %cst_148 : f32 to vector<8x1xf32>
    %349 = arith.divf %347, %348 : vector<8x1xf32>
    %350 = vector.broadcast %349 : vector<8x1xf32> to vector<8x32xf32>
    %351 = arith.subf %343, %350 : vector<8x32xf32>
    %352 = arith.mulf %351, %351 : vector<8x32xf32>
    %cst_149 = arith.constant dense<0.000000e+00> : vector<8xf32>
    %353 = vector.multi_reduction <add>, %352, %cst_149 [1] : vector<8x32xf32> to vector<8xf32>
    %354 = vector.shape_cast %353 : vector<8xf32> to vector<8x1xf32>
    %cst_150 = arith.constant 3.200000e+01 : f32
    %355 = vector.broadcast %cst_150 : f32 to vector<8x1xf32>
    %356 = arith.divf %354, %355 : vector<8x1xf32>
    %357 = vector.broadcast %349 : vector<8x1xf32> to vector<8x32xf32>
    %358 = arith.subf %343, %357 : vector<8x32xf32>
    %cst_151 = arith.constant 9.99999974E-6 : f32
    %359 = vector.broadcast %cst_151 : f32 to vector<8x1xf32>
    %360 = arith.addf %356, %359 : vector<8x1xf32>
    %361 = math.rsqrt %360 : vector<8x1xf32>
    %362 = vector.broadcast %361 : vector<8x1xf32> to vector<8x32xf32>
    %363 = arith.mulf %358, %362 : vector<8x32xf32>
    %364 = vector.broadcast %344 : vector<1x32xf32> to vector<8x32xf32>
    %365 = arith.mulf %363, %364 : vector<8x32xf32>
    %366 = vector.broadcast %345 : vector<1x32xf32> to vector<8x32xf32>
    %367 = arith.addf %365, %366 : vector<8x32xf32>
    %c0_152 = arith.constant 0 : index
    %c0_153 = arith.constant 0 : index
    %368 = vector.load %arg19[%c0_152, %c0_153] : memref<32x128xf32, #tpu.memory_space<vmem>>, vector<32x128xf32>
    %cst_154 = arith.constant dense<0.000000e+00> : vector<8x128xf32>
    %369 = tpu.matmul %367, %368, %cst_154 {dimension_numbers = #tpu.dot_dimension_numbers<[1], [0], [0], [1], [0, 0, 1, 1], [], []>} : vector<8x32xf32>, vector<32x128xf32>, vector<8x128xf32> -> vector<8x128xf32>
    %c0_155 = arith.constant 0 : index
    %c0_156 = arith.constant 0 : index
    %370 = vector.load %arg20[%c0_155, %c0_156] : memref<1x128xf32, #tpu.memory_space<vmem>>, vector<1x128xf32>
    %371 = vector.broadcast %370 : vector<1x128xf32> to vector<8x128xf32>
    %372 = arith.addf %369, %371 : vector<8x128xf32>
    %c0_157 = arith.constant 0 : index
    %c0_158 = arith.constant 0 : index
    %373 = vector.load %arg22[%c0_157, %c0_158] : memref<8x128xf32, #tpu.memory_space<vmem>>, vector<8x128xf32>
    tpu.vector_store %arg22[%c0_157, %c0_158], %372 {strides = array<i32>} : memref<8x128xf32, #tpu.memory_space<vmem>>, vector<8x128xf32>,
    return
  }
  func.func @transform_0(%arg0: i32) -> (i32, i32, i32) {
    %c0_i32 = arith.constant 0 : i32
    %c0_i32_0 = arith.constant 0 : i32
    %c0_i32_1 = arith.constant 0 : i32
    return %arg0, %c0_i32, %c0_i32_0 : i32, i32, i32
  }
  func.func @transform_1(%arg0: i32) -> (i32, i32) {
    %c0_i32 = arith.constant 0 : i32
    %c0_i32_0 = arith.constant 0 : i32
    %c0_i32_1 = arith.constant 0 : i32
    return %c0_i32, %c0_i32_0 : i32, i32
  }
  func.func @transform_2(%arg0: i32) -> (i32, i32) {
    %c0_i32 = arith.constant 0 : i32
    %c0_i32_0 = arith.constant 0 : i32
    %c0_i32_1 = arith.constant 0 : i32
    return %c0_i32, %c0_i32_0 : i32, i32
  }
  func.func @transform_3(%arg0: i32) -> (i32, i32) {
    %c0_i32 = arith.constant 0 : i32
    %c0_i32_0 = arith.constant 0 : i32
    %c0_i32_1 = arith.constant 0 : i32
    return %c0_i32, %c0_i32_0 : i32, i32
  }
  func.func @transform_4(%arg0: i32) -> (i32, i32) {
    %c0_i32 = arith.constant 0 : i32
    %c0_i32_0 = arith.constant 0 : i32
    %c0_i32_1 = arith.constant 0 : i32
    return %c0_i32, %c0_i32_0 : i32, i32
  }
  func.func @transform_5(%arg0: i32) -> (i32, i32) {
    %c0_i32 = arith.constant 0 : i32
    %c0_i32_0 = arith.constant 0 : i32
    %c0_i32_1 = arith.constant 0 : i32
    return %c0_i32, %c0_i32_0 : i32, i32
  }
  func.func @transform_6(%arg0: i32) -> (i32, i32, i32) {
    %c0_i32 = arith.constant 0 : i32
    %c0_i32_0 = arith.constant 0 : i32
    %c0_i32_1 = arith.constant 0 : i32
    %c0_i32_2 = arith.constant 0 : i32
    return %c0_i32, %c0_i32_0, %c0_i32_1 : i32, i32, i32
  }
  func.func @transform_7(%arg0: i32) -> (i32, i32) {
    %c0_i32 = arith.constant 0 : i32
    %c0_i32_0 = arith.constant 0 : i32
    %c0_i32_1 = arith.constant 0 : i32
    return %c0_i32, %c0_i32_0 : i32, i32
  }
  func.func @transform_8(%arg0: i32) -> (i32, i32, i32) {
    %c0_i32 = arith.constant 0 : i32
    %c0_i32_0 = arith.constant 0 : i32
    %c0_i32_1 = arith.constant 0 : i32
    %c0_i32_2 = arith.constant 0 : i32
    return %c0_i32, %c0_i32_0, %c0_i32_1 : i32, i32, i32
  }
  func.func @transform_9(%arg0: i32) -> (i32, i32) {
    %c0_i32 = arith.constant 0 : i32
    %c0_i32_0 = arith.constant 0 : i32
    %c0_i32_1 = arith.constant 0 : i32
    return %c0_i32, %c0_i32_0 : i32, i32
  }
  func.func @transform_10(%arg0: i32) -> (i32, i32) {
    %c0_i32 = arith.constant 0 : i32
    %c0_i32_0 = arith.constant 0 : i32
    %c0_i32_1 = arith.constant 0 : i32
    return %c0_i32, %c0_i32_0 : i32, i32
  }
  func.func @transform_11(%arg0: i32) -> (i32, i32) {
    %c0_i32 = arith.constant 0 : i32
    %c0_i32_0 = arith.constant 0 : i32
    %c0_i32_1 = arith.constant 0 : i32
    return %c0_i32, %c0_i32_0 : i32, i32
  }
  func.func @transform_12(%arg0: i32) -> (i32, i32, i32) {
    %c0_i32 = arith.constant 0 : i32
    %c0_i32_0 = arith.constant 0 : i32
    %c0_i32_1 = arith.constant 0 : i32
    %c0_i32_2 = arith.constant 0 : i32
    return %c0_i32, %c0_i32_0, %c0_i32_1 : i32, i32, i32
  }
  func.func @transform_13(%arg0: i32) -> (i32, i32) {
    %c0_i32 = arith.constant 0 : i32
    %c0_i32_0 = arith.constant 0 : i32
    %c0_i32_1 = arith.constant 0 : i32
    return %c0_i32, %c0_i32_0 : i32, i32
  }
  func.func @transform_14(%arg0: i32) -> (i32, i32, i32) {
    %c0_i32 = arith.constant 0 : i32
    %c0_i32_0 = arith.constant 0 : i32
    %c0_i32_1 = arith.constant 0 : i32
    %c0_i32_2 = arith.constant 0 : i32
    return %c0_i32, %c0_i32_0, %c0_i32_1 : i32, i32, i32
  }
  func.func @transform_15(%arg0: i32) -> (i32, i32) {
    %c0_i32 = arith.constant 0 : i32
    %c0_i32_0 = arith.constant 0 : i32
    %c0_i32_1 = arith.constant 0 : i32
    return %c0_i32, %c0_i32_0 : i32, i32
  }
  func.func @transform_16(%arg0: i32) -> (i32, i32) {
    %c0_i32 = arith.constant 0 : i32
    %c0_i32_0 = arith.constant 0 : i32
    %c0_i32_1 = arith.constant 0 : i32
    return %c0_i32, %c0_i32_0 : i32, i32
  }
  func.func @transform_17(%arg0: i32) -> (i32, i32) {
    %c0_i32 = arith.constant 0 : i32
    %c0_i32_0 = arith.constant 0 : i32
    %c0_i32_1 = arith.constant 0 : i32
    return %c0_i32, %c0_i32_0 : i32, i32
  }
  func.func @transform_18(%arg0: i32) -> (i32, i32) {
    %c0_i32 = arith.constant 0 : i32
    %c0_i32_0 = arith.constant 0 : i32
    %c0_i32_1 = arith.constant 0 : i32
    return %c0_i32, %c0_i32_0 : i32, i32
  }
  func.func @transform_19(%arg0: i32) -> (i32, i32) {
    %c0_i32 = arith.constant 0 : i32
    %c0_i32_0 = arith.constant 0 : i32
    %c0_i32_1 = arith.constant 0 : i32
    return %c0_i32, %c0_i32_0 : i32, i32
  }
  func.func @transform_20(%arg0: i32) -> (i32, i32) {
    %c0_i32 = arith.constant 0 : i32
    %c0_i32_0 = arith.constant 0 : i32
    %c0_i32_1 = arith.constant 0 : i32
    return %c0_i32, %c0_i32_0 : i32, i32
  }
  func.func @transform_21(%arg0: i32) -> (i32, i32) {
    %c0_i32 = arith.constant 0 : i32
    %c0_i32_0 = arith.constant 0 : i32
    return %arg0, %c0_i32 : i32, i32
  }
}

</mosaic_0001>

<bundles_post_ra>
// kernel: tpu_custom_call.1
= control target key start
LH: loop header
LB: loop body
LE: loop exit
PB: predicated region body
PF: predicated region fallthrough
CT: control target
= control target key end

     0   :  { %s20277_s0 = inlined_call_operand.vmem [shape: f32[16,8,32], index: 0, kind: input, shape index: {}]   ;;  %s20278_s1 = inlined_call_operand.hbm [shape: f32[32,32], index: 1, kind: input, shape index: {}]   ;;  %s20279_s2 = inlined_call_operand.hbm [shape: f32[1,32], index: 2, kind: input, shape index: {}]   ;;  %s20280_s3 = inlined_call_operand.hbm [shape: f32[16,32], index: 3, kind: input, shape index: {}]   ;;  %s20281_s4 = inlined_call_operand.hbm [shape: f32[2,32], index: 4, kind: input, shape index: {}]   ;;  %s20282_s5 = inlined_call_operand.hbm [shape: f32[2,32], index: 5, kind: input, shape index: {}]   ;;  %s20283_s6 = inlined_call_operand.hbm [shape: f32[2,32,96], index: 6, kind: input, shape index: {}]   ;;  %s20284_s7 = inlined_call_operand.hbm [shape: f32[2,96], index: 7, kind: input, shape index: {}]   ;;  %s20285_s8 = inlined_call_operand.hbm [shape: f32[2,32,32], index: 8, kind: input, shape index: {}]   ;;  %s20286_s9 = inlined_call_operand.hbm [shape: f32[2,32], index: 9, kind: input, shape index: {}]   ;;  %s20287_s10 = inlined_call_operand.hbm [shape: f32[2,32], index: 10, kind: input, shape index: {}]   ;;  %s20288_s11 = inlined_call_operand.hbm [shape: f32[2,32], index: 11, kind: input, shape index: {}]   ;;  %s20289_s12 = inlined_call_operand.hbm [shape: f32[2,32,64], index: 12, kind: input, shape index: {}]   ;;  %s20290_s13 = inlined_call_operand.hbm [shape: f32[2,64], index: 13, kind: input, shape index: {}]   ;;  %s20291_s14 = inlined_call_operand.vmem [shape: f32[2,64,32], index: 14, kind: input, shape index: {}]   ;;  %s20292_s15 = inlined_call_operand.hbm [shape: f32[2,32], index: 15, kind: input, shape index: {}]   ;;  %s20293_s16 = inlined_call_operand.hbm [shape: f32[1,32], index: 16, kind: input, shape index: {}]   ;;  %s20294_s17 = inlined_call_operand.hbm [shape: f32[1,32], index: 17, kind: input, shape index: {}]   ;;  %s20295_s18 = inlined_call_operand.hbm [shape: f32[32,128], index: 18, kind: input, shape index: {}]   ;;  %s20296_s19 = inlined_call_operand.vmem [shape: f32[1,128], index: 19, kind: input, shape index: {}]   ;;  %s20297_s20 = inlined_call_operand.vmem [shape: f32[128,128], index: 20, kind: input, shape index: {}]   ;;  %s20298_s21 = inlined_call_operand.hbm [shape: f32[16,128], index: 21, kind: output, shape index: {}]  }
   0x1   :  { %20422 = sst [smem:[#allocation109_spill]] %s20277_s0 }
   0x2   :  { %20423 = sst [smem:[#allocation110_spill]] %s20278_s1 }
   0x3   :  { %20424 = sst [smem:[#allocation111_spill]] %s20279_s2 }
   0x4   :  { %20425 = sst [smem:[#allocation112_spill]] %s20280_s3 }
   0x5   :  { %20426 = sst [smem:[#allocation113_spill]] %s20281_s4 }
   0x6   :  { %20427 = sst [smem:[#allocation114_spill]] %s20282_s5 }
   0x7   :  { %20428 = sst [smem:[#allocation115_spill]] %s20283_s6 }
   0x8   :  { %20429 = sst [smem:[#allocation116_spill]] %s20291_s14 }
   0x9   :  { %20430 = sst [smem:[#allocation117_spill]] %s20296_s19 }
   0xa   :  { %20431 = sst [smem:[#allocation118_spill]] %s20297_s20 }
   0xb   :  { %20432 = sst [smem:[#allocation119_spill]] %s20298_s21 }
   0xc   :  { %26 = vsyncpa [#allocation3], 0 }
   0xd   :  { %27 = vsyncpa [#allocation6], 0 }
   0xe   :  { %28 = vsyncpa [#allocation9], 0 }
   0xf   :  { %29 = vsyncpa [#allocation12], 0 }
  0x10   :  { %30 = vsyncpa [#allocation15], 0 }
  0x11   :  { %31 = vsyncpa [#allocation18], 0 }
  0x12   :  { %32 = vsyncpa [#allocation21], 0 }
  0x13   :  { %33 = vsyncpa [#allocation24], 0 }
  0x14   :  { %34 = vsyncpa [#allocation27], 0 }
  0x15   :  { %35 = vsyncpa [#allocation4], 0 }
  0x16   :  { %37 = vsyncpa [#allocation4 + $0x1], 0  ;;  %s15519_s2 = smov 0   ;;  %s15521_s25 = smov 0  }
  0x17   :  { %s15523_s26 = smov 0   ;;  %s15525_s27 = smov 0  }
  0x18 LB: > { %20433 = sst [smem:[#allocation40_spill]] %s15357_s2  ;;  %s15540_s3 = sadd.s32 4294967295, %s15369_s27   ;;  %s15369_s27 = sphi %s15525_s27, %s20788_s27   ;;  %s15365_s26 = sphi %s15523_s26, %s20791_s26   ;;  %s15361_s25 = sphi %s15521_s25, %s20790_s25   ;;  %s15357_s2 = sphi %s15519_s2, %s20789_s2  }
  0x19   : > { %20434 = sst [smem:[#allocation41_spill]] %s15361_s25  ;;  %s9994_s28 = sadd.s32 4294967294, %s15369_s27  }
  0x1a   : > { %20435 = sst [smem:[#allocation42_spill]] %s15365_s26  ;;  %s15544_s29 = sadd.s32 1, %s15369_s27  }
  0x1b   : > { %20436 = sst [smem:[#allocation43_spill]] %s15369_s27  ;;  %s496_s0 = sadd.s32 1, %s15365_s26 }
  0x1c   : > { %20437 = sst [smem:[#allocation44_spill]] %s15540_s3  ;;  %s493_s4 = ssub.s32 %s15369_s27, %s15544_s29 }
  0x1d   : > { %20438 = sst [smem:[#allocation45_spill]] %s15544_s29  ;;  %p506_p0 = scmp.ne.s32.totalorder %s15365_s26, %s15361_s25 }
  0x1e   : > { %p494_p1 = scmp.eq.s32.totalorder %s493_s4, 0  ;;  %p507_p2 = scmp.eq.s32.totalorder %s15540_s3, 1 }
  0x1f   : > { %p512_p3 = scmp.ne.s32.totalorder %s15361_s25, %s15357_s2  ;;  %p513_p4 = scmp.eq.s32.totalorder %s9994_s28, 1 }
  0x20   : > { %s15555_s30 = scalar_select %p494_p1, %s15365_s26, %s496_s0  }
  0x21   : > { %p15557_p5 = por %p507_p2, %p506_p0  ;;  %p15561_p6 = por %p513_p4, %p512_p3 }
  0x22   : > { %20439 = sst [smem:[#allocation46_spill]] %s15555_s30  ;;  %p9995_p7 = scmp.ge.s32.totalorder %s15369_s27, 1 }
  0x23   : > { %s20440_s5 = scalar_select %p15557_p5, 1, 0 }
  0x24   : > { %s20442_s22 = scalar_select %p15561_p6, 1, 0 }
  0x25   : > { %20441 = sst [smem:[#allocation47_spill]] %s20440_s5  ;;  %p520_p8 = scmp.lt.s32.totalorder %s15369_s27, 3 }
  0x26   : > { %20443 = sst [smem:[#allocation48_spill]] %s20442_s22  ;;  %p20313_p9 = scmp.eq.s32.totalorder %s15540_s3, 0 }
  0x27   : > { %p15568_p10 = pnand %p9995_p7, %p520_p8  ;;  %s15371_s1 = smov [#allocation5]  }
  0x28   : > { %s546_s24 = sshll.u32 %s15371_s1, 4  ;;  %s15372_s28 = smov [#allocation8]   ;;  %s547_s24 = int_to_ptr.vmem [resolvable:$true] %s546_s24 }
  0x29   : > { %s20444_s23 = scalar_select %p15568_p10, 1, 0 }
  0x2a   : > { %p13254_p11 = pneg %p15568_p10  ;;  %s570_s0 = sshll.u32 %s15372_s28, 4  ;;  %s15580_s0 = int_to_ptr.vmem [resolvable:$true] %s570_s0 }
  0x2b   : > { %s15373_s30 = smov [#allocation11]   ;;  %s20446_s2 = sld [smem:[#allocation111_spill]] }
  0x2c   : > { %p15576_p12 = pnand %p20313_p9, %p13254_p11  ;;  %s15582_s26 = sshll.u32 %s15373_s30, 4  ;;  %s592_s26 = int_to_ptr.vmem [resolvable:$true] %s15582_s26 }
  0x2e   : > { %p15592_p0 = pneg %p15576_p12 }
  0x31   : > { %s20447_s21 = smov %s20446_s2  ;;  %s14795_s1 = scalar_lea.hbm %s20446_s2, 16 }
  0x32   : > { %p14796_p13 = scmp.ne.s32.totalorder %s20447_s21, %s14795_s1  ;;  %p14802_p3 = scmp.lt.u32.totalorder %s14795_s1, %s20447_s21 }
  0x34   : > { %p14798_p1 = pnand %p15592_p0, %p14796_p13 }
  0x36   : > { %p14799_p2 = pneg %p14798_p1 }
  0x38   : > { %p14804_p4 = pnand %p14802_p3, %p14799_p2 }
  0x3a   : > { %14807 = shalt.err (!%p14804_p4)
}
  0x3b   : > { %s14808_s2 = scalar_lea.vmem %s547_s24, 16  ;;  %s14815_s19 = scalar_lea.vmem %s547_s24, 32 }
  0x3c   : > { %p14809_p7 = scmp.ne.s32.totalorder %s547_s24, %s14808_s2  ;;  %p14816_p9 = scmp.lt.s32.totalorder %s547_s24, %s547_s24 }
  0x3d   : > { %p14817_p6 = scmp.lt.s32.totalorder %s14815_s19, %s14808_s2 }
  0x3e   : > { %p14811_p8 = pnand %p14809_p7, %p15592_p0 }
  0x3f   : > { %p14818_p5 = por %p14817_p6, %p14816_p9 }
  0x40   : > { %p14812_p11 = pneg %p14811_p8 }
  0x42   : > { %p14819_p10 = pnand %p14818_p5, %p14812_p11 }
  0x44   : > { %14822 = shalt.err (!%p14819_p10)
}
  0x45   : > { %13260 = dma.hbm_to_vmem [thread:$0]  (!%p15576_p12), %s20447_s21, 16, %s547_s24, [#allocation6]  }
  0x46   : > { %s20449_s1 = sld [smem:[#allocation113_spill]] }
  0x4c   : > { %s14823_s30 = scalar_lea.hbm %s20449_s1, 32 }
  0x4d   : > { %p14824_p13 = scmp.ne.s32.totalorder %s20449_s1, %s14823_s30  ;;  %p14830_p5 = scmp.lt.u32.totalorder %s14823_s30, %s20449_s1 }
  0x4f   : > { %p14826_p1 = pnand %p14824_p13, %p15592_p0 }
  0x51   : > { %p14827_p6 = pneg %p14826_p1 }
  0x53   : > { %p14832_p9 = pnand %p14830_p5, %p14827_p6 }
  0x55   : > { %14835 = shalt.err (!%p14832_p9)
}
  0x56   : > { %s14836_s24 = scalar_lea.vmem %s15580_s0, 32  ;;  %p14844_p4 = scmp.lt.s32.totalorder %s15580_s0, %s15580_s0 }
  0x57   : > { %p14837_p10 = scmp.ne.s32.totalorder %s15580_s0, %s14836_s24  ;;  %p14845_p7 = scmp.lt.s32.totalorder %s14836_s24, %s14836_s24 }
  0x59   : > { %p14839_p2 = pnand %p14837_p10, %p15592_p0  ;;  %p14846_p8 = por %p14845_p7, %p14844_p4 }
  0x5b   : > { %p14840_p3 = pneg %p14839_p2 }
  0x5d   : > { %p14847_p11 = pnand %p14846_p8, %p14840_p3 }
  0x5f   : > { %14850 = shalt.err (!%p14847_p11)
}
  0x60   : > { %13266 = dma.hbm_to_vmem [thread:$0]  (!%p15576_p12), %s20449_s1, 32, %s15580_s0, [#allocation9]  }
  0x61   : > { %s20450_s6 = sld [smem:[#allocation115_spill]] }
  0x67   : > { %s14851_s5 = scalar_lea.hbm %s20450_s6, 1024 }
  0x68   : > { %p14852_p13 = scmp.ne.s32.totalorder %s20450_s6, %s14851_s5  ;;  %p14858_p5 = scmp.lt.u32.totalorder %s14851_s5, %s20450_s6 }
  0x6a   : > { %p14854_p1 = pnand %p14852_p13, %p15592_p0 }
  0x6c   : > { %p14855_p6 = pneg %p14854_p1 }
  0x6e   : > { %p14860_p9 = pnand %p14858_p5, %p14855_p6 }
  0x70   : > { %14863 = shalt.err (!%p14860_p9)
}
  0x71   : > { %s14864_s24 = scalar_lea.vmem %s592_s26, 1024  ;;  %p14872_p4 = scmp.lt.s32.totalorder %s592_s26, %s592_s26 }
  0x72   : > { %p14865_p10 = scmp.ne.s32.totalorder %s592_s26, %s14864_s24  ;;  %p14873_p7 = scmp.lt.s32.totalorder %s14864_s24, %s14864_s24 }
  0x74   : > { %p14867_p2 = pnand %p14865_p10, %p15592_p0  ;;  %p14874_p8 = por %p14873_p7, %p14872_p4 }
  0x76   : > { %p14868_p3 = pneg %p14867_p2 }
  0x78   : > { %p14875_p11 = pnand %p14874_p8, %p14868_p3 }
  0x7a   : > { %14878 = shalt.err (!%p14875_p11)
}
  0x7b   : > { %s20323_s0 = smov 128   ;;  %s15375_s14 = smov 8  }
  0x7c   : > { %13272 = dma.hbm_to_vmem [thread:$0]  (!%p15576_p12), %s20450_s6, 1024, %s592_s26, [#allocation12], %s20323_s0, %s20323_s0, %s15375_s14  }
  0x7d   : > { %s15376_s29 = smov [#allocation14]   ;;  %s15377_s22 = smov [#allocation17]  }
  0x7e   : > { %s615_s5 = sshll.u32 %s15376_s29, 4  ;;  %s640_s30 = sshll.u32 %s15377_s22, 4  ;;  %s616_s5 = int_to_ptr.vmem [resolvable:$true] %s615_s5  ;;  %s641_s30 = int_to_ptr.vmem [resolvable:$true] %s640_s30 }
  0x7f   : > { %s14879_s24 = scalar_lea.hbm %s20285_s8, 1024 }
  0x80   : > { %p14880_p13 = scmp.ne.s32.totalorder %s20285_s8, %s14879_s24  ;;  %p14886_p5 = scmp.lt.u32.totalorder %s14879_s24, %s20285_s8 }
  0x82   : > { %p14882_p1 = pnand %p14880_p13, %p15592_p0 }
  0x84   : > { %p14883_p6 = pneg %p14882_p1 }
  0x86   : > { %p14888_p9 = pnand %p14886_p5, %p14883_p6 }
  0x88   : > { %14891 = shalt.err (!%p14888_p9)
}
  0x89   : > { %s14892_s26 = scalar_lea.vmem %s616_s5, 1024  ;;  %p14900_p4 = scmp.lt.s32.totalorder %s616_s5, %s616_s5 }
  0x8a   : > { %p14893_p10 = scmp.ne.s32.totalorder %s616_s5, %s14892_s26  ;;  %p14901_p7 = scmp.lt.s32.totalorder %s14892_s26, %s14892_s26 }
  0x8c   : > { %p14895_p2 = pnand %p14893_p10, %p15592_p0  ;;  %p14902_p8 = por %p14901_p7, %p14900_p4 }
  0x8e   : > { %p14896_p3 = pneg %p14895_p2 }
  0x90   : > { %p14903_p11 = pnand %p14902_p8, %p14896_p3 }
  0x92   : > { %14906 = shalt.err (!%p14903_p11)
}
  0x93   : > { %13278 = dma.hbm_to_vmem [thread:$0]  (!%p15576_p12), %s20285_s8, 1024, %s616_s5, [#allocation15], %s20323_s0, %s20323_s0, %s15375_s14  }
  0x94   : > { %s14907_s25 = scalar_lea.hbm %s20287_s10, 32 }
  0x95   : > { %p14908_p13 = scmp.ne.s32.totalorder %s20287_s10, %s14907_s25  ;;  %p14914_p5 = scmp.lt.u32.totalorder %s14907_s25, %s20287_s10 }
  0x97   : > { %p14910_p1 = pnand %p14908_p13, %p15592_p0 }
  0x99   : > { %p14911_p6 = pneg %p14910_p1 }
  0x9b   : > { %p14916_p9 = pnand %p14914_p5, %p14911_p6 }
  0x9d   : > { %14919 = shalt.err (!%p14916_p9)
}
  0x9e   : > { %s14920_s19 = scalar_lea.vmem %s641_s30, 32  ;;  %p14928_p4 = scmp.lt.s32.totalorder %s641_s30, %s641_s30 }
  0x9f   : > { %p14921_p10 = scmp.ne.s32.totalorder %s641_s30, %s14920_s19  ;;  %p14929_p7 = scmp.lt.s32.totalorder %s14920_s19, %s14920_s19 }
  0xa1   : > { %p14923_p2 = pnand %p14921_p10, %p15592_p0  ;;  %p14930_p8 = por %p14929_p7, %p14928_p4 }
  0xa3   : > { %p14924_p3 = pneg %p14923_p2 }
  0xa5   : > { %p14931_p11 = pnand %p14930_p8, %p14924_p3 }
  0xa7   : > { %14934 = shalt.err (!%p14931_p11)
}
  0xa8   : > { %13284 = dma.hbm_to_vmem [thread:$0]  (!%p15576_p12), %s20287_s10, 32, %s641_s30, [#allocation18]  }
  0xa9   : > { %s15378_s26 = smov [#allocation20]   ;;  %s15379_s21 = smov [#allocation23]  }
  0xaa   : > { %s661_s20 = sshll.u32 %s15378_s26, 4  ;;  %s689_s3 = sshll.u32 %s15379_s21, 4  ;;  %s662_s20 = int_to_ptr.vmem [resolvable:$true] %s661_s20  ;;  %s690_s3 = int_to_ptr.vmem [resolvable:$true] %s689_s3 }
  0xab   : > { %s14935_s27 = scalar_lea.hbm %s20289_s12, 1024 }
  0xac   : > { %p14936_p13 = scmp.ne.s32.totalorder %s20289_s12, %s14935_s27  ;;  %p14942_p5 = scmp.lt.u32.totalorder %s14935_s27, %s20289_s12 }
  0xae   : > { %p14938_p1 = pnand %p14936_p13, %p15592_p0 }
  0xb0   : > { %p14939_p6 = pneg %p14938_p1 }
  0xb2   : > { %p14944_p9 = pnand %p14942_p5, %p14939_p6 }
  0xb4   : > { %14947 = shalt.err (!%p14944_p9)
}
  0xb5   : > { %s14948_s30 = scalar_lea.vmem %s662_s20, 1024  ;;  %p14956_p4 = scmp.lt.s32.totalorder %s662_s20, %s662_s20 }
  0xb6   : > { %p14949_p10 = scmp.ne.s32.totalorder %s662_s20, %s14948_s30  ;;  %p14957_p7 = scmp.lt.s32.totalorder %s14948_s30, %s14948_s30 }
  0xb8   : > { %p14951_p2 = pnand %p14949_p10, %p15592_p0  ;;  %p14958_p8 = por %p14957_p7, %p14956_p4 }
  0xba   : > { %p14952_p3 = pneg %p14951_p2 }
  0xbc   : > { %p14959_p11 = pnand %p14958_p8, %p14952_p3 }
  0xbe   : > { %14962 = shalt.err (!%p14959_p11)
}
  0xbf   : > { %13290 = dma.hbm_to_vmem [thread:$0]  (!%p15576_p12), %s20289_s12, 1024, %s662_s20, [#allocation21], %s20323_s0, %s20323_s0, %s15375_s14  }
  0xc0   : > { %s14963_s1 = scalar_lea.hbm %s20292_s15, 32 }
  0xc1   : > { %p14964_p13 = scmp.ne.s32.totalorder %s20292_s15, %s14963_s1  ;;  %p14970_p5 = scmp.lt.u32.totalorder %s14963_s1, %s20292_s15 }
  0xc3   : > { %p14966_p1 = pnand %p14964_p13, %p15592_p0 }
  0xc5   : > { %p14967_p6 = pneg %p14966_p1 }
  0xc7   : > { %p14972_p9 = pnand %p14970_p5, %p14967_p6 }
  0xc9   : > { %14975 = shalt.err (!%p14972_p9)
}
  0xca   : > { %s14976_s2 = scalar_lea.vmem %s690_s3, 32  ;;  %p14984_p4 = scmp.lt.s32.totalorder %s690_s3, %s690_s3 }
  0xcb   : > { %p14977_p10 = scmp.ne.s32.totalorder %s690_s3, %s14976_s2  ;;  %p14985_p7 = scmp.lt.s32.totalorder %s14976_s2, %s14976_s2 }
  0xcd   : > { %p14979_p2 = pnand %p14977_p10, %p15592_p0  ;;  %p14986_p8 = por %p14985_p7, %p14984_p4 }
  0xcf   : > { %p14980_p3 = pneg %p14979_p2 }
  0xd1   : > { %p14987_p11 = pnand %p14986_p8, %p14980_p3 }
  0xd3   : > { %14990 = shalt.err (!%p14987_p11)
}
  0xd4   : > { %13296 = dma.hbm_to_vmem [thread:$0]  (!%p15576_p12), %s20292_s15, 32, %s690_s3, [#allocation24]  }
  0xd5   : > { %s15380_s30 = smov [#allocation26]   ;;  %s15381_s24 = smov [#allocation2]  }
  0xd6   : > { %s711_s5 = sshll.u32 %s15380_s30, 4  ;;  %s532_s26 = sshll.u32 %s15381_s24, 4  ;;  %s712_s5 = int_to_ptr.vmem [resolvable:$true] %s711_s5  ;;  %s533_s26 = int_to_ptr.vmem [resolvable:$true] %s532_s26 }
  0xd7   : > { %s14991_s25 = scalar_lea.hbm %s20294_s17, 16 }
  0xd8   : > { %p14992_p13 = scmp.ne.s32.totalorder %s20294_s17, %s14991_s25  ;;  %p14998_p5 = scmp.lt.u32.totalorder %s14991_s25, %s20294_s17 }
  0xda   : > { %p14994_p1 = pnand %p14992_p13, %p15592_p0 }
  0xdc   : > { %p14995_p6 = pneg %p14994_p1 }
  0xde   : > { %p15000_p9 = pnand %p14998_p5, %p14995_p6 }
  0xe0   : > { %15003 = shalt.err (!%p15000_p9)
}
  0xe1   : > { %s15004_s3 = scalar_lea.vmem %s712_s5, 16  ;;  %s15011_s20 = scalar_lea.vmem %s712_s5, 32 }
  0xe2   : > { %p15005_p10 = scmp.ne.s32.totalorder %s712_s5, %s15004_s3  ;;  %p15012_p4 = scmp.lt.s32.totalorder %s712_s5, %s712_s5 }
  0xe3   : > { %p15013_p7 = scmp.lt.s32.totalorder %s15011_s20, %s15004_s3 }
  0xe4   : > { %p15007_p2 = pnand %p15005_p10, %p15592_p0 }
  0xe5   : > { %p15014_p8 = por %p15013_p7, %p15012_p4 }
  0xe6   : > { %p15008_p3 = pneg %p15007_p2 }
  0xe8   : > { %p15015_p11 = pnand %p15014_p8, %p15008_p3 }
  0xea   : > { %15018 = shalt.err (!%p15015_p11)
}
  0xeb   : > { %13302 = dma.hbm_to_vmem [thread:$0]  (!%p15576_p12), %s20294_s17, 16, %s712_s5, [#allocation27]  }
  0xec   : > { %s20451_s1 = sld [smem:[#allocation110_spill]] }
  0xf2   : > { %s15019_s25 = scalar_lea.hbm %s20451_s1, 512 }
  0xf3   : > { %p15020_p13 = scmp.ne.s32.totalorder %s20451_s1, %s15019_s25  ;;  %p15026_p5 = scmp.lt.u32.totalorder %s15019_s25, %s20451_s1 }
  0xf5   : > { %p15022_p1 = pnand %p15020_p13, %p15592_p0 }
  0xf7   : > { %p15023_p6 = pneg %p15022_p1 }
  0xf9   : > { %p15028_p9 = pnand %p15026_p5, %p15023_p6 }
  0xfb   : > { %15031 = shalt.err (!%p15028_p9)
}
  0xfc   : > { %s15032_s3 = scalar_lea.vmem %s533_s26, 512  ;;  %p15040_p4 = scmp.lt.s32.totalorder %s533_s26, %s533_s26 }
  0xfd   : > { %p15033_p10 = scmp.ne.s32.totalorder %s533_s26, %s15032_s3  ;;  %p15041_p7 = scmp.lt.s32.totalorder %s15032_s3, %s15032_s3 }
  0xff   : > { %p15035_p2 = pnand %p15033_p10, %p15592_p0  ;;  %p15042_p8 = por %p15041_p7, %p15040_p4 }
 0x101   : > { %p15036_p3 = pneg %p15035_p2 }
 0x103   : > { %p15043_p11 = pnand %p15042_p8, %p15036_p3 }
 0x105   : > { %15046 = shalt.err (!%p15043_p11)
}
 0x106   : > { %13257 = dma.hbm_to_vmem [thread:$0]  (!%p15576_p12), %s20451_s1, 512, %s533_s26, [#allocation3], %s20323_s0, %s20323_s0, %s15375_s14  }
 0x107   : > { %s15382_s19 = smov [#allocation7]   ;;  %s15383_s24 = smov [#allocation10]  }
 0x108   : > { %s556_s30 = sshll.u32 %s15382_s19, 4  ;;  %s581_s21 = sshll.u32 %s15383_s24, 4  ;;  %s557_s30 = int_to_ptr.vmem [resolvable:$true] %s556_s30  ;;  %s582_s21 = int_to_ptr.vmem [resolvable:$true] %s581_s21 }
 0x109   : > { %s20452_s29 = sld [smem:[#allocation112_spill]] }
 0x10f   : > { %s15047_s22 = scalar_lea.hbm %s20452_s29, 256 }
 0x110   : > { %p15048_p13 = scmp.ne.s32.totalorder %s20452_s29, %s15047_s22  ;;  %p15054_p5 = scmp.lt.u32.totalorder %s15047_s22, %s20452_s29 }
 0x112   : > { %p15050_p1 = pnand %p15048_p13, %p15592_p0 }
 0x114   : > { %p15051_p6 = pneg %p15050_p1 }
 0x116   : > { %p15056_p9 = pnand %p15054_p5, %p15051_p6 }
 0x118   : > { %15059 = shalt.err (!%p15056_p9)
}
 0x119   : > { %s15060_s26 = scalar_lea.vmem %s557_s30, 256  ;;  %p15068_p4 = scmp.lt.s32.totalorder %s557_s30, %s557_s30 }
 0x11a   : > { %p15061_p10 = scmp.ne.s32.totalorder %s557_s30, %s15060_s26  ;;  %p15069_p7 = scmp.lt.s32.totalorder %s15060_s26, %s15060_s26 }
 0x11c   : > { %p15063_p2 = pnand %p15061_p10, %p15592_p0  ;;  %p15070_p8 = por %p15069_p7, %p15068_p4 }
 0x11e   : > { %p15064_p3 = pneg %p15063_p2 }
 0x120   : > { %p15071_p11 = pnand %p15070_p8, %p15064_p3 }
 0x122   : > { %15074 = shalt.err (!%p15071_p11)
}
 0x123   : > { %13263 = dma.hbm_to_vmem [thread:$0]  (!%p15576_p12), %s20452_s29, 256, %s557_s30, [#allocation6], %s20323_s0, %s20323_s0, %s15375_s14  }
 0x124   : > { %s20453_s25 = sld [smem:[#allocation114_spill]] }
 0x12a   : > { %s20454_s22 = smov %s20453_s25  ;;  %s15075_s27 = scalar_lea.hbm %s20453_s25, 32 }
 0x12b   : > { %p15076_p13 = scmp.ne.s32.totalorder %s20454_s22, %s15075_s27  ;;  %p15082_p5 = scmp.lt.u32.totalorder %s15075_s27, %s20454_s22 }
 0x12d   : > { %p15078_p1 = pnand %p15076_p13, %p15592_p0 }
 0x12f   : > { %p15079_p6 = pneg %p15078_p1 }
 0x131   : > { %p15084_p9 = pnand %p15082_p5, %p15079_p6 }
 0x133   : > { %15087 = shalt.err (!%p15084_p9)
}
 0x134   : > { %s15088_s6 = scalar_lea.vmem %s582_s21, 32  ;;  %p15096_p4 = scmp.lt.s32.totalorder %s582_s21, %s582_s21 }
 0x135   : > { %p15089_p10 = scmp.ne.s32.totalorder %s582_s21, %s15088_s6  ;;  %p15097_p7 = scmp.lt.s32.totalorder %s15088_s6, %s15088_s6 }
 0x137   : > { %p15091_p2 = pnand %p15089_p10, %p15592_p0  ;;  %p15098_p8 = por %p15097_p7, %p15096_p4 }
 0x139   : > { %p15092_p3 = pneg %p15091_p2 }
 0x13b   : > { %p15099_p11 = pnand %p15098_p8, %p15092_p3 }
 0x13d   : > { %15102 = shalt.err (!%p15099_p11)
}
 0x13e   : > { %13269 = dma.hbm_to_vmem [thread:$0]  (!%p15576_p12), %s20454_s22, 32, %s582_s21, [#allocation9]  }
 0x13f   : > { %s15384_s19 = smov [#allocation13]   ;;  %s15385_s25 = smov [#allocation16]  }
 0x140   : > { %s605_s24 = sshll.u32 %s15384_s19, 4  ;;  %s629_s27 = sshll.u32 %s15385_s25, 4  ;;  %s606_s24 = int_to_ptr.vmem [resolvable:$true] %s605_s24  ;;  %s630_s27 = int_to_ptr.vmem [resolvable:$true] %s629_s27 }
 0x141   : > { %s15103_s5 = scalar_lea.hbm %s20284_s7, 32 }
 0x142   : > { %p15104_p13 = scmp.ne.s32.totalorder %s20284_s7, %s15103_s5  ;;  %p15110_p5 = scmp.lt.u32.totalorder %s15103_s5, %s20284_s7 }
 0x144   : > { %p15106_p1 = pnand %p15104_p13, %p15592_p0 }
 0x146   : > { %p15107_p6 = pneg %p15106_p1 }
 0x148   : > { %p15112_p9 = pnand %p15110_p5, %p15107_p6 }
 0x14a   : > { %15115 = shalt.err (!%p15112_p9)
}
 0x14b   : > { %s15116_s21 = scalar_lea.vmem %s606_s24, 32  ;;  %p15124_p4 = scmp.lt.s32.totalorder %s606_s24, %s606_s24 }
 0x14c   : > { %p15117_p10 = scmp.ne.s32.totalorder %s606_s24, %s15116_s21  ;;  %p15125_p7 = scmp.lt.s32.totalorder %s15116_s21, %s15116_s21 }
 0x14e   : > { %p15119_p2 = pnand %p15117_p10, %p15592_p0  ;;  %p15126_p8 = por %p15125_p7, %p15124_p4 }
 0x150   : > { %p15120_p3 = pneg %p15119_p2 }
 0x152   : > { %p15127_p11 = pnand %p15126_p8, %p15120_p3 }
 0x154   : > { %15130 = shalt.err (!%p15127_p11)
}
 0x155   : > { %13275 = dma.hbm_to_vmem [thread:$0]  (!%p15576_p12), %s20284_s7, 32, %s606_s24, [#allocation12]  }
 0x156   : > { %s15131_s2 = scalar_lea.hbm %s20286_s9, 32 }
 0x157   : > { %p15132_p13 = scmp.ne.s32.totalorder %s20286_s9, %s15131_s2  ;;  %p15138_p5 = scmp.lt.u32.totalorder %s15131_s2, %s20286_s9 }
 0x159   : > { %p15134_p1 = pnand %p15132_p13, %p15592_p0 }
 0x15b   : > { %p15135_p6 = pneg %p15134_p1 }
 0x15d   : > { %p15140_p9 = pnand %p15138_p5, %p15135_p6 }
 0x15f   : > { %15143 = shalt.err (!%p15140_p9)
}
 0x160   : > { %s15144_s30 = scalar_lea.vmem %s630_s27, 32  ;;  %p15152_p4 = scmp.lt.s32.totalorder %s630_s27, %s630_s27 }
 0x161   : > { %p15145_p10 = scmp.ne.s32.totalorder %s630_s27, %s15144_s30  ;;  %p15153_p7 = scmp.lt.s32.totalorder %s15144_s30, %s15144_s30 }
 0x163   : > { %p15147_p2 = pnand %p15145_p10, %p15592_p0  ;;  %p15154_p8 = por %p15153_p7, %p15152_p4 }
 0x165   : > { %p15148_p3 = pneg %p15147_p2 }
 0x167   : > { %p15155_p11 = pnand %p15154_p8, %p15148_p3 }
 0x169   : > { %15158 = shalt.err (!%p15155_p11)
}
 0x16a   : > { %13281 = dma.hbm_to_vmem [thread:$0]  (!%p15576_p12), %s20286_s9, 32, %s630_s27, [#allocation15]  }
 0x16b   : > { %s15386_s20 = smov [#allocation19]   ;;  %s15387_s0 = smov [#allocation22]  }
 0x16c   : > { %s651_s19 = sshll.u32 %s15386_s20, 4  ;;  %s675_s25 = sshll.u32 %s15387_s0, 4  ;;  %s652_s19 = int_to_ptr.vmem [resolvable:$true] %s651_s19  ;;  %s676_s25 = int_to_ptr.vmem [resolvable:$true] %s675_s25 }
 0x16d   : > { %s15159_s5 = scalar_lea.hbm %s20288_s11, 32 }
 0x16e   : > { %p15160_p13 = scmp.ne.s32.totalorder %s20288_s11, %s15159_s5  ;;  %p15166_p5 = scmp.lt.u32.totalorder %s15159_s5, %s20288_s11 }
 0x170   : > { %p15162_p1 = pnand %p15160_p13, %p15592_p0 }
 0x172   : > { %p15163_p6 = pneg %p15162_p1 }
 0x174   : > { %p15168_p9 = pnand %p15166_p5, %p15163_p6 }
 0x176   : > { %15171 = shalt.err (!%p15168_p9)
}
 0x177   : > { %s15172_s27 = scalar_lea.vmem %s652_s19, 32  ;;  %p15180_p4 = scmp.lt.s32.totalorder %s652_s19, %s652_s19 }
 0x178   : > { %p15173_p10 = scmp.ne.s32.totalorder %s652_s19, %s15172_s27  ;;  %p15181_p7 = scmp.lt.s32.totalorder %s15172_s27, %s15172_s27 }
 0x17a   : > { %p15175_p2 = pnand %p15173_p10, %p15592_p0  ;;  %p15182_p8 = por %p15181_p7, %p15180_p4 }
 0x17c   : > { %p15176_p3 = pneg %p15175_p2 }
 0x17e   : > { %p15183_p11 = pnand %p15182_p8, %p15176_p3 }
 0x180   : > { %15186 = shalt.err (!%p15183_p11)
}
 0x181   : > { %13287 = dma.hbm_to_vmem [thread:$0]  (!%p15576_p12), %s20288_s11, 32, %s652_s19, [#allocation18]  }
 0x182   : > { %s15187_s3 = scalar_lea.hbm %s20290_s13, 32 }
 0x183   : > { %p15188_p13 = scmp.ne.s32.totalorder %s20290_s13, %s15187_s3  ;;  %p15194_p5 = scmp.lt.u32.totalorder %s15187_s3, %s20290_s13 }
 0x185   : > { %p15190_p1 = pnand %p15188_p13, %p15592_p0 }
 0x187   : > { %p15191_p6 = pneg %p15190_p1 }
 0x189   : > { %p15196_p9 = pnand %p15194_p5, %p15191_p6 }
 0x18b   : > { %15199 = shalt.err (!%p15196_p9)
}
 0x18c   : > { %s15200_s24 = scalar_lea.vmem %s676_s25, 32  ;;  %p15208_p4 = scmp.lt.s32.totalorder %s676_s25, %s676_s25 }
 0x18d   : > { %p15201_p10 = scmp.ne.s32.totalorder %s676_s25, %s15200_s24  ;;  %p15209_p7 = scmp.lt.s32.totalorder %s15200_s24, %s15200_s24 }
 0x18f   : > { %p15203_p2 = pnand %p15201_p10, %p15592_p0  ;;  %p15210_p8 = por %p15209_p7, %p15208_p4 }
 0x191   : > { %p15204_p3 = pneg %p15203_p2 }
 0x193   : > { %p15211_p11 = pnand %p15210_p8, %p15204_p3 }
 0x195   : > { %15214 = shalt.err (!%p15211_p11)
}
 0x196   : > { %13293 = dma.hbm_to_vmem [thread:$0]  (!%p15576_p12), %s20290_s13, 32, %s676_s25, [#allocation21]  }
 0x197   : > { %s15388_s21 = smov [#allocation25]   ;;  %s15389_s0 = smov [#allocation28]  }
 0x198   : > { %s700_s20 = sshll.u32 %s15388_s21, 4  ;;  %s721_s2 = sshll.u32 %s15389_s0, 4  ;;  %s701_s20 = int_to_ptr.vmem [resolvable:$true] %s700_s20  ;;  %s722_s2 = int_to_ptr.vmem [resolvable:$true] %s721_s2 }
 0x199   : > { %s15215_s26 = scalar_lea.hbm %s20293_s16, 16 }
 0x19a   : > { %p15216_p13 = scmp.ne.s32.totalorder %s20293_s16, %s15215_s26  ;;  %p15222_p5 = scmp.lt.u32.totalorder %s15215_s26, %s20293_s16 }
 0x19c   : > { %p15218_p1 = pnand %p15216_p13, %p15592_p0 }
 0x19e   : > { %p15219_p6 = pneg %p15218_p1 }
 0x1a0   : > { %p15224_p9 = pnand %p15222_p5, %p15219_p6 }
 0x1a2   : > { %15227 = shalt.err (!%p15224_p9)
}
 0x1a3   : > { %s15228_s25 = scalar_lea.vmem %s701_s20, 16  ;;  %s15235_s27 = scalar_lea.vmem %s701_s20, 32 }
 0x1a4   : > { %p15229_p10 = scmp.ne.s32.totalorder %s701_s20, %s15228_s25  ;;  %p15236_p4 = scmp.lt.s32.totalorder %s701_s20, %s701_s20 }
 0x1a5   : > { %p15237_p7 = scmp.lt.s32.totalorder %s15235_s27, %s15228_s25 }
 0x1a6   : > { %p15231_p2 = pnand %p15229_p10, %p15592_p0 }
 0x1a7   : > { %p15238_p8 = por %p15237_p7, %p15236_p4 }
 0x1a8   : > { %p15232_p3 = pneg %p15231_p2 }
 0x1aa   : > { %p15239_p11 = pnand %p15238_p8, %p15232_p3 }
 0x1ac   : > { %15242 = shalt.err (!%p15239_p11)
}
 0x1ad   : > { %13299 = dma.hbm_to_vmem [thread:$0]  (!%p15576_p12), %s20293_s16, 16, %s701_s20, [#allocation24]  }
 0x1ae   : > { %s15243_s26 = scalar_lea.hbm %s20295_s18, 512 }
 0x1af   : > { %p15244_p13 = scmp.ne.s32.totalorder %s20295_s18, %s15243_s26  ;;  %p15250_p5 = scmp.lt.u32.totalorder %s15243_s26, %s20295_s18 }
 0x1b1   : > { %p15246_p1 = pnand %p15244_p13, %p15592_p0 }
 0x1b3   : > { %p15247_p6 = pneg %p15246_p1 }
 0x1b5   : > { %p15252_p9 = pnand %p15250_p5, %p15247_p6 }
 0x1b7   : > { %15255 = shalt.err (!%p15252_p9)
}
 0x1b8   : > { %s15256_s25 = scalar_lea.vmem %s722_s2, 512  ;;  %p15264_p4 = scmp.lt.s32.totalorder %s722_s2, %s722_s2 }
 0x1b9   : > { %p15257_p10 = scmp.ne.s32.totalorder %s722_s2, %s15256_s25  ;;  %p15265_p7 = scmp.lt.s32.totalorder %s15256_s25, %s15256_s25 }
 0x1bb   : > { %p15259_p2 = pnand %p15257_p10, %p15592_p0  ;;  %p15266_p8 = por %p15265_p7, %p15264_p4 }
 0x1bd   : > { %p15260_p3 = pneg %p15259_p2 }
 0x1bf   : > { %p15267_p11 = pnand %p15266_p8, %p15260_p3 }
 0x1c1   : > { %15270 = shalt.err (!%p15267_p11)
}
 0x1c2   : > { %s20455_s20 = smov 128   ;;  %p20456_p13 = scmp.ne.s32.totalorder %s20444_s23, 0 }
 0x1c3   : > { %13305 = dma.hbm_to_vmem [thread:$0]  (!%p15576_p12), %s20295_s18, 512, %s722_s2, [#allocation27], %s20455_s20, %s20455_s20, %s15375_s14  }
 0x1c4   : > { %752 = sbr.rel (%p20456_p13) target bundleno = 10420 (0x28b4), region = 104 }
 0x1cb   : > { %s20457_s28 = sld [smem:[#allocation44_spill]] }
 0x1d1   : > { %p20458_p0 = scmp.eq.s32.totalorder %s20457_s28, 0 }
 0x1d3   : > { %15316 = dma.done.wait (%p20458_p0), [#allocation3], 512   ;;  %p20459_p1 = pmov %p20458_p0 }
 0x1d4   : > { %p20460_p6 = pmov %p20458_p0 }
 0x1d5   : > { %15318 = vsyncadd (%p20459_p1), [#allocation3], 4294966784 }
 0x1d6   : > { %15320 = dma.done.wait (%p20460_p6), [#allocation6], 272   ;;  %p20461_p5 = pmov %p20458_p0 }
 0x1d7   : > { %p20462_p9 = pmov %p20458_p0 }
 0x1d8   : > { %15322 = vsyncadd (%p20461_p5), [#allocation6], 4294967024 }
 0x1d9   : > { %15324 = dma.done.wait (%p20462_p9), [#allocation9], 64   ;;  %p20463_p12 = pmov %p20458_p0 }
 0x1da   : > { %p20464_p10 = pmov %p20458_p0 }
 0x1db   : > { %15326 = vsyncadd (%p20463_p12), [#allocation9], 4294967232 }
 0x1dc   : > { %15328 = dma.done.wait (%p20464_p10), [#allocation12], 1056   ;;  %p20465_p2 = pmov %p20458_p0 }
 0x1dd   : > { %p20466_p3 = pmov %p20458_p0 }
 0x1de   : > { %15330 = vsyncadd (%p20465_p2), [#allocation12], 4294966240 }
 0x1df   : > { %15332 = dma.done.wait (%p20466_p3), [#allocation15], 1056   ;;  %p20467_p4 = pmov %p20458_p0 }
 0x1e0   : > { %p20468_p7 = pmov %p20458_p0 }
 0x1e1   : > { %15334 = vsyncadd (%p20467_p4), [#allocation15], 4294966240 }
 0x1e2   : > { %15336 = dma.done.wait (%p20468_p7), [#allocation18], 64   ;;  %p20469_p8 = pmov %p20458_p0 }
 0x1e3   : > { %p20470_p11 = pmov %p20458_p0 }
 0x1e4   : > { %15338 = vsyncadd (%p20469_p8), [#allocation18], 4294967232 }
 0x1e5   : > { %15340 = dma.done.wait (%p20470_p11), [#allocation21], 1056   ;;  %p20471_p13 = pmov %p20458_p0 }
 0x1e7   : > { %15342 = vsyncadd (%p20471_p13), [#allocation21], 4294966240 }
 0x1e8   : > { %15344 = dma.done.wait (%p20458_p0), [#allocation24], 48   ;;  %p20472_p1 = pmov %p20458_p0 }
 0x1e9   : > { %p20473_p6 = pmov %p20458_p0 }
 0x1ea   : > { %15346 = vsyncadd (%p20472_p1), [#allocation24], 4294967248 }
 0x1eb   : > { %15348 = dma.done.wait (%p20473_p6), [#allocation27], 528   ;;  %p20474_p5 = pmov %p20458_p0 }
 0x1ec   : > { %s10033_s23 = sshll.u32 %s20457_s28, 3  ;;  %s20475_s0 = sld [smem:[#allocation109_spill]]  ;;  %vm901_vm0 = vcmask 261120   ;;  %v890_v0 = vld [vmem:[#allocation2] sm:$0xff]  ;;  %v891_v1 = vld [vmem:[#allocation2 + $0x8] sm:$0xff]  ;;  %v892_v2 = vld [vmem:[#allocation2 + $0x10] sm:$0xff] }
 0x1ed   : > { %15350 = vsyncadd (%p20474_p5), [#allocation27], 4294966768  ;;  %p877_p9 = scmp.lt.s32.totalorder %s10033_s23, 15  ;;  %v12410_v3 = vpack.c.bf16 %v891_v1, %v890_v0  ;;  %v893_v4 = vld [vmem:[#allocation2 + $0x18] sm:$0xff]  ;;  %v10035_v14 = vld [vmem:[#allocation5] ss:$0 sm:$0xff] }
 0x1ee   : > { %v12414_v6 = vpack.c.bf16 %v893_v4, %v892_v2  ;;  %v1031_v16 = vld [vmem:[#allocation7] sm:$0xff]  ;;  %v1032_v26 = vld [vmem:[#allocation7 + $0x8] sm:$0xff]  ;;  %vm1433_vm1 = vcmask 64512   ;;  %s15390_s5 = smov 96   ;;  %s15391_s26 = smov 64   ;;  %vm4146_vm3 = vcmask 130048  }
 0x1ef   : > { %s20793_s23 = smov (!%p877_p9, %s10033_s23), 15  ;;  %12411 = vmatprep.subr.bf16.mxu0 %v12410_v3  ;;  %v1063_v32 = vsel %vm901_vm0, %v1032_v26, 0.0  ;;  %s15392_s6 = smov 88   ;;  %vm16187_vm2 = vmpackc.low %vm1433_vm1, %vm1433_vm1  ;;  %vm4163_vm4 = vcmask 195584   ;;  %vm5018_vm5 = vcmask 523264   ;;  %vm15405_vm6 = vmmov 0  }
 0x1f0   : > { %s10034_s4 = sshll.u32 %s20793_s23, 3  ;;  %12413 = vmatpush3.bf16.msra.mxu0 %v12410_v3  ;;  %s20489_s19 = sld [smem:[#allocation118_spill]] }
 0x1f1   : > { %12415 = vmatprep.subr.bf16.mxu0 %v12414_v6  ;;  %s15393_s14 = smov 120   ;;  %s15394_s2 = smov 56  }
 0x1f2   : > { %s880_s3 = scalar_lea.vmem %s20475_s0, %s10034_s4  ;;  %s15395_s0 = smov 80  }
 0x1f3   : > { %v882_v5 = vld [vmem:[%s880_s3] sm:$0xff]  ;;  %v883_v7 = vld [vmem:[%s880_s3 + $0x8] sm:$0xff]  ;;  %v884_v8 = vld [vmem:[%s880_s3 + $0x10] sm:$0xff]  ;;  %s20374_s30 = smov 48   ;;  %s20372_s24 = smov 72  }
 0x1f4   : > { %11184 = vmatprep.mubr.msk.f32.mxu0 %vm901_vm0, %v882_v5  ;;  %12417 = vmatpush3.bf16.msra.mxu0 %v12414_v6  ;;  %v885_v9 = vld [vmem:[%s880_s3 + $0x18] sm:$0xff]  ;;  %v886_v10 = vld [vmem:[%s880_s3 + $0x20] sm:$0xff]  ;;  %v887_v11 = vld [vmem:[%s880_s3 + $0x28] sm:$0xff]  ;;  %s20370_s27 = smov 104   ;;  %s20368_s21 = smov 40  }
 0x1f5   : > { %v888_v12 = vld [vmem:[%s880_s3 + $0x30] sm:$0xff]  ;;  %v889_v13 = vld [vmem:[%s880_s3 + $0x38] sm:$0xff]  ;;  %s20376_s3 = smov 112   ;;  %s20366_s23 = smov 8  }
 0x1f6   : > { %s20364_s4 = smov 16   ;;  %s20362_s25 = smov 24  }
 0x1f7   : > { %11185 = vmatmul.mubr.msk.f32.vlgmr.msra.gmra.mrb[0].mxu0 %vm901_vm0, %v883_v7 }
 0x1f8   : > { %11187 = vmatprep.mubr.msk.f32.mxu0 %vm901_vm0, %v884_v8 }
 0x1fb   : > { %11188 = vmatmul.mubr.msk.f32.gmra.mrb[2].mxu0 %vm901_vm0, %v885_v9 }
 0x1fc   : > { %11190 = vmatprep.mubr.msk.f32.mxu0 %vm901_vm0, %v886_v10 }
 0x1ff   : > { %11191 = vmatmul.mubr.msk.f32.gmra.mrb[4].mxu0 %vm901_vm0, %v887_v11 }
 0x200   : > { %11193 = vmatprep.mubr.msk.f32.mxu0 %vm901_vm0, %v888_v12 }
 0x203   : > { %11194 = vmatmul.mubr.msk.f32.gmra.mrb[6].mxu0 %vm901_vm0, %v889_v13 }
 0x2ca   : > { %v11186_v15 = vpop.f32.mrb[0].mxu0 }
 0x2cb   : > { %v998_v17 = vadd.f32 %v11186_v15, %v10035_v14  ;;  %v992_v18 = vpop.f32.mrb[1].mxu0 }
 0x2cc   : > { %v993_v19 = vadd.f32 %v10035_v14, %v992_v18 }
 0x2cd   : > { %v15970_v20 = vadd.f32 %v1031_v16, %v998_v17 }
 0x2ce   : > { %v15972_v21 = vadd.f32 %v1031_v16, %v993_v19  ;;  %v11189_v22 = vpop.f32.mrb[2].mxu0 }
 0x2cf   : > { %20476 = vst [vmem:[#allocation49_spill] sm:$0xff] %v15970_v20  ;;  %v1008_v23 = vadd.f32 %v11189_v22, %v10035_v14  ;;  %v1002_v24 = vpop.f32.mrb[3].mxu0  ;;  %v1066_v25 = vsel %vm901_vm0, %v15970_v20, 0.0 }
 0x2d0   : > { %20477 = vst [vmem:[#allocation50_spill] sm:$0xff] %v15972_v21  ;;  %v1003_v27 = vadd.f32 %v10035_v14, %v1002_v24  ;;  %1067 = vadd.xlane.f32.xlu1 %v1066_v25  ;;  %v1060_v28 = vsel %vm901_vm0, %v15972_v21, 0.0 }
 0x2d1   : > { %1061 = vadd.xlane.f32.xlu0 %v1060_v28  ;;  %v15978_v29 = vadd.f32 %v1031_v16, %v1008_v23 }
 0x2d2   : > { %v15980_v30 = vadd.f32 %v1031_v16, %v1003_v27  ;;  %v11192_v31 = vpop.f32.mrb[4].mxu0 }
 0x2d3   : > { %20478 = vst [vmem:[#allocation51_spill] sm:$0xff] %v15978_v29  ;;  %v1018_v33 = vadd.f32 %v11192_v31, %v10035_v14  ;;  %v1012_v34 = vpop.f32.mrb[5].mxu0  ;;  %v1072_v40 = vsel %vm901_vm0, %v15978_v29, 0.0 }
 0x2d4   : > { %20479 = vst [vmem:[#allocation52_spill] sm:$0xff] %v15980_v30  ;;  %v1013_v35 = vadd.f32 %v10035_v14, %v1012_v34  ;;  %v1069_v36 = vsel %vm901_vm0, %v15980_v30, 0.0 }
 0x2d5   : > { %1070 = vadd.xlane.f32.xlu1 %v1069_v36  ;;  %1064 = vadd.xlane.f32.xlu0 %v1063_v32  ;;  %v15985_v37 = vadd.f32 %v1031_v16, %v1018_v33  ;;  %v1205_v36 = vld [vmem:[#allocation11 + $0x8] sm:$0xff] }
 0x2d6   : > { %v15987_v38 = vadd.f32 %v1031_v16, %v1013_v35  ;;  %v11195_v39 = vpop.f32.mrb[6].mxu0  ;;  %v1204_v35 = vld [vmem:[#allocation11] sm:$0xff] }
 0x2d7   : > { %20480 = vst [vmem:[#allocation53_spill] sm:$0xff] %v15985_v37  ;;  %v1028_v41 = vadd.f32 %v11195_v39, %v10035_v14  ;;  %v1022_v42 = vpop.f32.mrb[7].mxu0  ;;  %v1078_v47 = vsel %vm901_vm0, %v15985_v37, 0.0  ;;  %v12418_v39 = vpack.c.bf16 %v1205_v36, %v1204_v35 }
 0x2d8   : > { %20481 = vst [vmem:[#allocation54_spill] sm:$0xff] %v15987_v38  ;;  %v1023_v43 = vadd.f32 %v10035_v14, %v1022_v42  ;;  %v1075_v44 = vsel %vm901_vm0, %v15987_v38, 0.0 }
 0x2d9   : > { %1076 = vadd.xlane.f32.xlu1 %v1075_v44  ;;  %1073 = vadd.xlane.f32.xlu0 %v1072_v40  ;;  %v15993_v45 = vadd.f32 %v1031_v16, %v1028_v41  ;;  %v1206_v40 = vld [vmem:[#allocation11 + $0x10] sm:$0xff]  ;;  %v1207_v41 = vld [vmem:[#allocation11 + $0x18] sm:$0xff] }
 0x2da   : > { %v15995_v46 = vadd.f32 %v1031_v16, %v1023_v43  ;;  %12419 = vmatprep.subr.bf16.mxu1 %v12418_v39  ;;  %v12422_v42 = vpack.c.bf16 %v1207_v41, %v1206_v40 }
 0x2db   : > { %20482 = vst [vmem:[#allocation55_spill] sm:$0xff] %v15993_v45  ;;  %v1084_v49 = vsel %vm901_vm0, %v15993_v45, 0.0  ;;  %12421 = vmatpush3.bf16.msra.mxu1 %v12418_v39 }
 0x2dc   : > { %20483 = vst [vmem:[#allocation56_spill] sm:$0xff] %v15995_v46  ;;  %v1081_v48 = vsel %vm901_vm0, %v15995_v46, 0.0  ;;  %12423 = vmatprep.subr.bf16.mxu1 %v12422_v42 }
 0x2dd   : > { %1082 = vadd.xlane.f32.xlu1 %v1081_v48  ;;  %1079 = vadd.xlane.f32.xlu0 %v1078_v47 }
 0x2df   : > { %12425 = vmatpush3.bf16.msra.mxu1 %v12422_v42 }
 0x2e1   : > { %1085 = vadd.xlane.f32.xlu0 %v1084_v49 }
 0x35d   : > { %v1068_v50 = vpop.xlane.xlu1 %1067 }
 0x35e   : > { %v1090_v51 = vmul.f32 0.03125, %v1068_v50  ;;  %v1062_v52 = vpop.xlane.xlu0 %1061 }
 0x35f   : > { %v1088_v53 = vmul.f32 0.03125, %v1062_v52 }
 0x360   : > { %v16004_v54 = vsub.f32 %v15970_v20, %v1090_v51  ;;  %v16392_v20 = vld [vmem:[%s20489_s19 + $0x78] sm:$0xff] }
 0x361   : > { %v16007_v55 = vsub.f32 %v15972_v21, %v1088_v53  ;;  %20504 = vst [vmem:[#allocation74_spill] sm:$0xff] %v16392_v20 }
 0x362   : > { %v1071_v56 = vpop.xlane.xlu1 %1070  ;;  %v1065_v57 = vpop.xlane.xlu0 %1064  ;;  %v1108_v0 = vmul.f32 %v16004_v54, %v16004_v54 }
 0x363   : > { %v1091_v58 = vmul.f32 0.03125, %v1071_v56  ;;  %v1089_v59 = vmul.f32 0.03125, %v1065_v57  ;;  %v1106_v60 = vmul.f32 %v16007_v55, %v16007_v55 }
 0x364   : > { %v1121_v9 = vsel %vm901_vm0, %v1108_v0, 0.0 }
 0x365   : > { %v16012_v61 = vsub.f32 %v15980_v30, %v1091_v58  ;;  %v16014_v62 = vsub.f32 %v1032_v26, %v1089_v59  ;;  %v1115_v63 = vsel %vm901_vm0, %v1106_v60, 0.0 }
 0x366   : > { %v1077_v1 = vpop.xlane.xlu1 %1076  ;;  %1116 = vadd.xlane.f32.xlu1 %v1115_v63  ;;  %v1074_v2 = vpop.xlane.xlu0 %1073 }
 0x367   : > { %v1093_v3 = vmul.f32 0.03125, %v1077_v1  ;;  %v1092_v4 = vmul.f32 0.03125, %v1074_v2  ;;  %v1107_v5 = vmul.f32 %v16014_v62, %v16014_v62  ;;  %v1109_v6 = vmul.f32 %v16012_v61, %v16012_v61 }
 0x369   : > { %v16024_v7 = vsub.f32 %v15987_v38, %v1093_v3  ;;  %v16027_v8 = vsub.f32 %v15978_v29, %v1092_v4  ;;  %v1118_v10 = vsel %vm901_vm0, %v1107_v5, 0.0  ;;  %v1124_v16 = vsel %vm901_vm0, %v1109_v6, 0.0  ;;  %v10044_v5 = vld [vmem:[#allocation8] ss:$0 sm:$0xff]  ;;  %v16375_v29 = vld [vmem:[%s20489_s19 + $0x58] sm:$0xff] }
 0x36a   : > { %v1083_v11 = vpop.xlane.xlu1 %1082  ;;  %1122 = vadd.xlane.f32.xlu1 %v1121_v9  ;;  %1119 = vadd.xlane.f32.xlu0 %v1118_v10  ;;  %v1080_v12 = vpop.xlane.xlu0 %1079  ;;  %20502 = vst [vmem:[#allocation72_spill] sm:$0xff] %v16375_v29 }
 0x36b   : > { %v1095_v13 = vmul.f32 0.03125, %v1083_v11  ;;  %v1094_v14 = vmul.f32 0.03125, %v1080_v12  ;;  %v1110_v15 = vmul.f32 %v16027_v8, %v16027_v8  ;;  %v1111_v22 = vmul.f32 %v16024_v7, %v16024_v7  ;;  %v10045_v11 = vld [vmem:[#allocation10] ss:$0 sm:$0xff] }
 0x36d   : > { %v16035_v17 = vsub.f32 %v15995_v46, %v1095_v13  ;;  %v16038_v18 = vsub.f32 %v15985_v37, %v1094_v14  ;;  %v1127_v19 = vsel %vm901_vm0, %v1110_v15, 0.0  ;;  %v1130_v27 = vsel %vm901_vm0, %v1111_v22, 0.0  ;;  %v16361_v37 = vld [vmem:[%s20489_s19 + $0x38] sm:$0xff] }
 0x36e   : > { %1125 = vadd.xlane.f32.xlu0 %v1124_v16  ;;  %1128 = vadd.xlane.f32.xlu1 %v1127_v19  ;;  %v1086_v23 = vpop.xlane.xlu0 %1085  ;;  %20500 = vst [vmem:[#allocation70_spill] sm:$0xff] %v16361_v37 }
 0x36f   : > { %v1096_v24 = vmul.f32 0.03125, %v1086_v23  ;;  %v1112_v25 = vmul.f32 %v16038_v18, %v16038_v18  ;;  %v1113_v31 = vmul.f32 %v16035_v17, %v16035_v17 }
 0x371   : > { %v16046_v26 = vsub.f32 %v15993_v45, %v1096_v24  ;;  %v1133_v28 = vsel %vm901_vm0, %v1112_v25, 0.0  ;;  %v1136_v33 = vsel %vm901_vm0, %v1113_v31, 0.0 }
 0x372   : > { %1131 = vadd.xlane.f32.xlu0 %v1130_v27  ;;  %1134 = vadd.xlane.f32.xlu1 %v1133_v28 }
 0x373   : > { %v1114_v32 = vmul.f32 %v16046_v26, %v16046_v26 }
 0x375   : > { %v1139_v34 = vsel %vm901_vm0, %v1114_v32, 0.0 }
 0x376   : > { %1137 = vadd.xlane.f32.xlu0 %v1136_v33  ;;  %1140 = vadd.xlane.f32.xlu1 %v1139_v34 }
 0x3f3   : > { %v1117_v43 = vpop.xlane.xlu1 %1116 }
 0x3f4   : > { %v1142_v44 = vmul.f32 0.03125, %v1117_v43 }
 0x3f6   : > { %v1151_v47 = vadd.f32 1e-05, %v1142_v44 }
 0x3f7   : > { %v1123_v48 = vpop.xlane.xlu1 %1122  ;;  %v1120_v49 = vpop.xlane.xlu0 %1119 }
 0x3f8   : > { %14054 = vrsqrt.f32 %v1151_v47  ;;  %v1144_v50 = vmul.f32 0.03125, %v1123_v48  ;;  %v1143_v51 = vmul.f32 0.03125, %v1120_v49 }
 0x3fa   : > { %v1153_v52 = vadd.f32 1e-05, %v1144_v50  ;;  %v1152_v53 = vadd.f32 1e-05, %v1143_v51 }
 0x3fb   : > { %v1129_v56 = vpop.xlane.xlu1 %1128  ;;  %v1126_v57 = vpop.xlane.xlu0 %1125 }
 0x3fc   : > { %14056 = vrsqrt.f32 %v1153_v52  ;;  %v1146_v58 = vmul.f32 0.03125, %v1129_v56  ;;  %v1145_v59 = vmul.f32 0.03125, %v1126_v57  ;;  %v10046_v57 = vld [vmem:[#allocation13] ss:$0 sm:$0xff] }
 0x3fd   : > { %14058 = vrsqrt.f32 %v1152_v53 }
 0x3fe   : > { %v1155_v60 = vadd.f32 1e-05, %v1146_v58  ;;  %v1154_v63 = vadd.f32 1e-05, %v1145_v59 }
 0x3ff   : > { %v1135_v0 = vpop.xlane.xlu1 %1134  ;;  %v1132_v1 = vpop.xlane.xlu0 %1131 }
 0x400   : > { %14060 = vrsqrt.f32 %v1155_v60  ;;  %v1148_v2 = vmul.f32 0.03125, %v1135_v0  ;;  %v1147_v3 = vmul.f32 0.03125, %v1132_v1 }
 0x401   : > { %14062 = vrsqrt.f32 %v1154_v63 }
 0x402   : > { %v14055_v4 = vpop.eup %14054  ;;  %v1156_v6 = vadd.f32 1e-05, %v1147_v3  ;;  %v1157_v12 = vadd.f32 1e-05, %v1148_v2 }
 0x403   : > { %v1138_v9 = vpop.xlane.xlu0 %1137  ;;  %v1169_v10 = vmul.f32 %v14055_v4, %v16007_v55  ;;  %v1141_v14 = vpop.xlane.xlu1 %1140 }
 0x404   : > { %v1149_v13 = vmul.f32 0.03125, %v1138_v9  ;;  %14064 = vrsqrt.f32 %v1156_v6  ;;  %v1150_v25 = vmul.f32 0.03125, %v1141_v14 }
 0x405   : > { %v1182_v15 = vmul.f32 %v10044_v5, %v1169_v10  ;;  %14066 = vrsqrt.f32 %v1157_v12 }
 0x406   : > { %v14057_v16 = vpop.eup %14056  ;;  %v1158_v27 = vadd.f32 1e-05, %v1149_v13  ;;  %v1159_v35 = vadd.f32 1e-05, %v1150_v25 }
 0x407   : > { %v14059_v19 = vpop.eup %14058  ;;  %v1195_v22 = vadd.f32 %v10045_v11, %v1182_v15  ;;  %v1171_v23 = vmul.f32 %v14057_v16, %v16004_v54 }
 0x408   : > { %v1170_v24 = vmul.f32 %v14059_v19, %v16014_v62  ;;  %14068 = vrsqrt.f32 %v1158_v27 }
 0x409   : > { %11204 = vmatprep.mubr.msk.f32.mxu1 %vm901_vm0, %v1195_v22  ;;  %v1184_v28 = vmul.f32 %v10044_v5, %v1171_v23  ;;  %14070 = vrsqrt.f32 %v1159_v35 }
 0x40a   : > { %v14061_v55 = vpop.eup %14060  ;;  %v1183_v31 = vmul.f32 %v10044_v5, %v1170_v24 }
 0x40b   : > { %v14063_v32 = vpop.eup %14062  ;;  %v1197_v33 = vadd.f32 %v10045_v11, %v1184_v28  ;;  %v1173_v39 = vmul.f32 %v14061_v55, %v16027_v8 }
 0x40c   : > { %v1196_v34 = vadd.f32 %v10045_v11, %v1183_v31  ;;  %v1172_v36 = vmul.f32 %v14063_v32, %v16012_v61 }
 0x40d   : > { %v1186_v41 = vmul.f32 %v10044_v5, %v1173_v39 }
 0x40e   : > { %11205 = vmatmul.mubr.msk.f32.vlgmr.msra.gmra.mrb[0].mxu1 %vm901_vm0, %v1196_v34  ;;  %v1185_v54 = vmul.f32 %v10044_v5, %v1172_v36  ;;  %v14065_v62 = vpop.eup %14064 }
 0x40f   : > { %11207 = vmatprep.mubr.msk.f32.mxu1 %vm901_vm0, %v1197_v33  ;;  %v1174_v42 = vmul.f32 %v14065_v62, %v16024_v7  ;;  %v14067_v43 = vpop.eup %14066  ;;  %v1199_v44 = vadd.f32 %v10045_v11, %v1186_v41 }
 0x410   : > { %v1198_v40 = vadd.f32 %v10045_v11, %v1185_v54  ;;  %v1175_v8 = vmul.f32 %v14067_v43, %v16038_v18 }
 0x411   : > { %v1187_v61 = vmul.f32 %v10044_v5, %v1174_v42 }
 0x412   : > { %11208 = vmatmul.mubr.msk.f32.gmra.mrb[2].mxu1 %vm901_vm0, %v1196_v34  ;;  %v14069_v47 = vpop.eup %14068  ;;  %v1188_v49 = vmul.f32 %v10044_v5, %v1175_v8 }
 0x413   : > { %11210 = vmatprep.mubr.msk.f32.mxu1 %vm901_vm0, %v1198_v40  ;;  %v1200_v48 = vadd.f32 %v10045_v11, %v1187_v61  ;;  %v1176_v50 = vmul.f32 %v14069_v47, %v16035_v17  ;;  %v14071_v51 = vpop.eup %14070 }
 0x414   : > { %v1201_v7 = vadd.f32 %v10045_v11, %v1188_v49  ;;  %v1177_v53 = vmul.f32 %v14071_v51, %v16046_v26 }
 0x415   : > { %v1189_v52 = vmul.f32 %v10044_v5, %v1176_v50 }
 0x416   : > { %11211 = vmatmul.mubr.msk.f32.gmra.mrb[4].mxu1 %vm901_vm0, %v1196_v34  ;;  %v1190_v56 = vmul.f32 %v10044_v5, %v1177_v53 }
 0x417   : > { %11213 = vmatprep.mubr.msk.f32.mxu1 %vm901_vm0, %v1199_v44  ;;  %v1202_v18 = vadd.f32 %v10045_v11, %v1189_v52 }
 0x418   : > { %v1203_v17 = vadd.f32 %v10045_v11, %v1190_v56 }
 0x41a   : > { %11214 = vmatmul.mubr.msk.f32.gmra.mrb[6].mxu1 %vm901_vm0, %v1196_v34 }
 0x41b   : > { %11216 = vmatprep.mubr.msk.f32.mxu1 %vm901_vm0, %v1200_v48 }
 0x41e   : > { %11217 = vmatmul.mubr.msk.f32.gmra.mrb[8].mxu1 %vm901_vm0, %v1196_v34 }
 0x41f   : > { %11219 = vmatprep.mubr.msk.f32.mxu1 %vm901_vm0, %v1201_v7 }
 0x422   : > { %11220 = vmatmul.mubr.msk.f32.gmra.mrb[10].mxu1 %vm901_vm0, %v1196_v34 }
 0x423   : > { %11222 = vmatprep.mubr.msk.f32.mxu1 %vm901_vm0, %v1202_v18 }
 0x426   : > { %11223 = vmatmul.mubr.msk.f32.gmra.mrb[12].mxu1 %vm901_vm0, %v1196_v34 }
 0x427   : > { %11225 = vmatprep.mubr.msk.f32.mxu1 %vm901_vm0, %v1203_v17 }
 0x42a   : > { %11226 = vmatmul.mubr.msk.f32.gmra.mrb[14].mxu1 %vm901_vm0, %v1196_v34 }
 0x4e1   : > { %v11206_v58 = vpop.f32.mrb[0].mxu1 }
 0x4e2   : > { %v16081_v26 = vadd.f32 %v11206_v58, %v10046_v57  ;;  %v1306_v59 = vpop.f32.mrb[1].mxu1 }
 0x4e3   : > { %v16083_v60 = vadd.f32 %v10046_v57, %v1306_v59 }
 0x4e5   : > { %v11209_v63 = vpop.f32.mrb[2].mxu1  ;;  %11260 = vmatprep.mubr.msk.f32.mxu0 %vm1433_vm1, %v16083_v60  ;;  %v16089_v0 = vpack.i.bf16 %v16081_v26, %v16083_v60 }
 0x4e6   : > { %v16091_v1 = vadd.f32 %v11209_v63, %v10046_v57  ;;  %v1316_v2 = vpop.f32.mrb[3].mxu1 }
 0x4e7   : > { %v16093_v3 = vadd.f32 %v10046_v57, %v1316_v2  ;;  %13415 = vrot.lane.b32.xlu0 %v16089_v0, %s15390_s5 }
 0x4e9   : > { %v11212_v4 = vpop.f32.mrb[4].mxu1  ;;  %v16099_v5 = vpack.i.bf16 %v16091_v1, %v16093_v3 }
 0x4ea   : > { %v16101_v6 = vadd.f32 %v11212_v4, %v10046_v57  ;;  %v1326_v9 = vpop.f32.mrb[5].mxu1 }
 0x4eb   : > { %v16103_v10 = vadd.f32 %v10046_v57, %v1326_v9  ;;  %13420 = vrot.lane.b32.xlu1 %v16099_v5, %s15390_s5 }
 0x4ed   : > { %v11215_v11 = vpop.f32.mrb[6].mxu1  ;;  %v16109_v12 = vpack.i.bf16 %v16101_v6, %v16103_v10 }
 0x4ee   : > { %v16111_v13 = vadd.f32 %v11215_v11, %v10046_v57  ;;  %v1336_v14 = vpop.f32.mrb[7].mxu1 }
 0x4ef   : > { %v16113_v15 = vadd.f32 %v10046_v57, %v1336_v14  ;;  %13425 = vrot.lane.b32.xlu1 %v16109_v12, %s15390_s5 }
 0x4f1   : > { %v11218_v16 = vpop.f32.mrb[8].mxu1  ;;  %v16119_v19 = vpack.i.bf16 %v16111_v13, %v16113_v15 }
 0x4f2   : > { %v16121_v22 = vadd.f32 %v11218_v16, %v10046_v57  ;;  %v1346_v23 = vpop.f32.mrb[9].mxu1 }
 0x4f3   : > { %v16123_v24 = vadd.f32 %v10046_v57, %v1346_v23  ;;  %13430 = vrot.lane.b32.xlu1 %v16119_v19, %s15390_s5 }
 0x4f5   : > { %v11221_v25 = vpop.f32.mrb[10].mxu1  ;;  %v16129_v27 = vpack.i.bf16 %v16121_v22, %v16123_v24 }
 0x4f6   : > { %v16131_v28 = vadd.f32 %v11221_v25, %v10046_v57  ;;  %v1356_v55 = vpop.f32.mrb[11].mxu1 }
 0x4f7   : > { %20484 = vst [vmem:[#allocation57_spill] sm:$0xff] %v16129_v27  ;;  %v16133_v31 = vadd.f32 %v10046_v57, %v1356_v55  ;;  %13435 = vrot.lane.b32.xlu0 %v16129_v27, %s15390_s5 }
 0x4f9   : > { %v11224_v32 = vpop.f32.mrb[12].mxu1  ;;  %v16139_v33 = vpack.i.bf16 %v16131_v28, %v16133_v31 }
 0x4fa   : > { %v16141_v34 = vadd.f32 %v11224_v32, %v10046_v57  ;;  %v1366_v35 = vpop.f32.mrb[13].mxu1 }
 0x4fb   : > { %20485 = vst [vmem:[#allocation58_spill] sm:$0xff] %v16139_v33  ;;  %v16143_v36 = vadd.f32 %v10046_v57, %v1366_v35  ;;  %13440 = vrot.lane.b32.xlu1 %v16139_v33, %s15390_s5 }
 0x4fd   : > { %v11227_v39 = vpop.f32.mrb[14].mxu1  ;;  %v16149_v54 = vpack.i.bf16 %v16141_v34, %v16143_v36 }
 0x4fe   : > { %v16151_v62 = vadd.f32 %v11227_v39, %v10046_v57  ;;  %v1376_v40 = vpop.f32.mrb[15].mxu1 }
 0x4ff   : > { %20486 = vst [vmem:[#allocation59_spill] sm:$0xff] %v16149_v54  ;;  %v16153_v41 = vadd.f32 %v10046_v57, %v1376_v40  ;;  %13445 = vrot.lane.b32.xlu0 %v16149_v54, %s15390_s5 }
 0x501   : > { %v16159_v42 = vpack.i.bf16 %v16151_v62, %v16153_v41 }
 0x503   : > { %13450 = vrot.lane.b32.xlu1 %v16159_v42, %s15390_s5  ;;  %13455 = vrot.lane.b32.xlu0 %v16089_v0, %s15391_s26 }
 0x507   : > { %13460 = vrot.lane.b32.xlu1 %v16099_v5, %s15391_s26  ;;  %13470 = vrot.lane.b32.xlu0 %v16119_v19, %s15391_s26 }
 0x50b   : > { %13465 = vrot.lane.b32.xlu1 %v16109_v12, %s15391_s26  ;;  %13475 = vrot.lane.b32.xlu0 %v16129_v27, %s15391_s26 }
 0x50f   : > { %13480 = vrot.lane.b32.xlu1 %v16139_v33, %s15391_s26  ;;  %13490 = vrot.lane.b32.xlu0 %v16089_v0, %s15392_s6 }
 0x513   : > { %13485 = vrot.lane.b32.xlu1 %v16149_v54, %s15391_s26  ;;  %13500 = vrot.lane.b32.xlu0 %v16109_v12, %s15392_s6 }
 0x517   : > { %13495 = vrot.lane.b32.xlu1 %v16099_v5, %s15392_s6 }
 0x51b   : > { %13505 = vrot.lane.b32.xlu1 %v16159_v42, %s15391_s26 }
 0x559   : > { %v13416_v43 = vpop.permute.xlu0 %13415 }
 0x55a   : > { %v13418_v44 = vunpack.i.h.bf16 %v13416_v43  ;;  %v13417_v61 = vunpack.i.l.bf16 %v13416_v43 }
 0x55c   : > { %v12426_v47 = vpack.c.bf16 %v13418_v44, %v13417_v61 }
 0x55d   : > { %v13421_v48 = vpop.permute.xlu1 %13420 }
 0x55e   : > { %v13423_v49 = vunpack.i.h.bf16 %v13421_v48  ;;  %v13422_v50 = vunpack.i.l.bf16 %v13421_v48  ;;  %12428 = vmatprep.subr.msk.bf16.mxu0 %vm16187_vm2, %v12426_v47 }
 0x55f   : > { %12431 = vmatpush3.bf16.xpose.msk.msra.mxu0 %vm16187_vm2, %v12426_v47 }
 0x560   : > { %v12432_v51 = vpack.c.bf16 %v13423_v49, %v13422_v50 }
 0x561   : > { %v13426_v7 = vpop.permute.xlu1 %13425 }
 0x562   : > { %v13428_v52 = vunpack.i.h.bf16 %v13426_v7  ;;  %v13427_v53 = vunpack.i.l.bf16 %v13426_v7  ;;  %12434 = vmatprep.subr.msk.bf16.mxu0 %vm16187_vm2, %v12432_v51 }
 0x564   : > { %v12438_v18 = vpack.c.bf16 %v13428_v52, %v13427_v53 }
 0x565   : > { %v13431_v56 = vpop.permute.xlu1 %13430 }
 0x566   : > { %v13433_v17 = vunpack.i.h.bf16 %v13431_v56  ;;  %v13432_v57 = vunpack.i.l.bf16 %v13431_v56 }
 0x567   : > { %12437 = vmatpush3.bf16.xpose.msk.msra.mxu0 %vm16187_vm2, %v12432_v51 }
 0x568   : > { %12440 = vmatprep.subr.msk.bf16.mxu0 %vm16187_vm2, %v12438_v18  ;;  %v12444_v59 = vpack.c.bf16 %v13433_v17, %v13432_v57 }
 0x569   : > { %v13436_v58 = vpop.permute.xlu0 %13435 }
 0x56a   : > { %v13438_v4 = vunpack.i.h.bf16 %v13436_v58  ;;  %v13437_v9 = vunpack.i.l.bf16 %v13436_v58 }
 0x56c   : > { %v12450_v16 = vpack.c.bf16 %v13438_v4, %v13437_v9 }
 0x56d   : > { %v13441_v63 = vpop.permute.xlu1 %13440 }
 0x56e   : > { %v13443_v32 = vunpack.i.h.bf16 %v13441_v63  ;;  %v13442_v35 = vunpack.i.l.bf16 %v13441_v63 }
 0x56f   : > { %12443 = vmatpush3.bf16.xpose.msk.msra.mxu0 %vm16187_vm2, %v12438_v18 }
 0x570   : > { %12446 = vmatprep.subr.msk.bf16.mxu0 %vm16187_vm2, %v12444_v59  ;;  %v12456_v47 = vpack.c.bf16 %v13443_v32, %v13442_v35 }
 0x571   : > { %v13446_v2 = vpop.permute.xlu0 %13445 }
 0x572   : > { %v13448_v18 = vunpack.i.h.bf16 %v13446_v2  ;;  %v13447_v17 = vunpack.i.l.bf16 %v13446_v2 }
 0x574   : > { %v12462_v4 = vpack.c.bf16 %v13448_v18, %v13447_v17  ;;  %v16268_v18 = vld [vmem:[%s20489_s19] sm:$0xff] }
 0x575   : > { %v13451_v11 = vpop.permute.xlu1 %13450  ;;  %v13456_v14 = vpop.permute.xlu0 %13455  ;;  %20490 = vst [vmem:[#allocation60_spill] sm:$0xff] %v16268_v18 }
 0x576   : > { %v13458_v23 = vunpack.i.h.bf16 %v13456_v14  ;;  %v13457_v25 = vunpack.i.l.bf16 %v13456_v14  ;;  %v13453_v2 = vunpack.i.h.bf16 %v13451_v11 }
 0x577   : > { %12449 = vmatpush3.bf16.xpose.msk.msra.mxu0 %vm16187_vm2, %v12444_v59 }
 0x578   : > { %12452 = vmatprep.subr.msk.bf16.mxu0 %vm16187_vm2, %v12450_v16  ;;  %v12474_v55 = vpack.c.bf16 %v13458_v23, %v13457_v25  ;;  %v13452_v25 = vunpack.i.l.bf16 %v13451_v11 }
 0x579   : > { %v13461_v39 = vpop.permute.xlu1 %13460  ;;  %v13471_v40 = vpop.permute.xlu0 %13470 }
 0x57a   : > { %v13463_v43 = vunpack.i.h.bf16 %v13461_v39  ;;  %v13462_v44 = vunpack.i.l.bf16 %v13461_v39  ;;  %12475 = vmatprep.subr.bf16.mxu1 %v12474_v55  ;;  %v13473_v49 = vunpack.i.h.bf16 %v13471_v40  ;;  %v13472_v50 = vunpack.i.l.bf16 %v13471_v40 }
 0x57b   : > { %12477 = vmatpush3.bf16.msra.mxu1 %v12474_v55  ;;  %v12468_v40 = vpack.c.bf16 %v13453_v2, %v13452_v25  ;;  %v16289_v25 = vld [vmem:[%s20489_s19 + $0x10] sm:$0xff] }
 0x57c   : > { %v12478_v61 = vpack.c.bf16 %v13463_v43, %v13462_v44  ;;  %v12486_v59 = vpack.c.bf16 %v13473_v49, %v13472_v50  ;;  %20492 = vst [vmem:[#allocation62_spill] sm:$0xff] %v16289_v25 }
 0x57d   : > { %v13466_v48 = vpop.permute.xlu1 %13465  ;;  %v13476_v52 = vpop.permute.xlu0 %13475 }
 0x57e   : > { %v13468_v51 = vunpack.i.h.bf16 %v13466_v48  ;;  %v13467_v7 = vunpack.i.l.bf16 %v13466_v48  ;;  %12479 = vmatprep.subr.bf16.mxu1 %v12478_v61  ;;  %v13478_v57 = vunpack.i.h.bf16 %v13476_v52  ;;  %v13477_v58 = vunpack.i.l.bf16 %v13476_v52 }
 0x57f   : > { %12455 = vmatpush3.bf16.xpose.msk.msra.mxu0 %vm16187_vm2, %v12450_v16  ;;  %12481 = vmatpush3.bf16.msra.mxu1 %v12478_v61 }
 0x580   : > { %12458 = vmatprep.subr.msk.bf16.mxu0 %vm16187_vm2, %v12456_v47  ;;  %v12482_v53 = vpack.c.bf16 %v13468_v51, %v13467_v7  ;;  %v12490_v23 = vpack.c.bf16 %v13478_v57, %v13477_v58  ;;  %v16263_v7 = vld [vmem:[%s20489_s19 + $0x8] sm:$0xff] }
 0x581   : > { %v13481_v56 = vpop.permute.xlu1 %13480 }
 0x582   : > { %12483 = vmatprep.subr.bf16.mxu1 %v12482_v53  ;;  %v13483_v9 = vunpack.i.h.bf16 %v13481_v56  ;;  %v13482_v14 = vunpack.i.l.bf16 %v13481_v56 }
 0x583   : > { %12485 = vmatpush3.bf16.msra.mxu1 %v12482_v53 }
 0x584   : > { %12487 = vmatprep.subr.bf16.mxu1 %v12486_v59  ;;  %v12494_v35 = vpack.c.bf16 %v13483_v9, %v13482_v14 }
 0x585   : > { %v13486_v63 = vpop.permute.xlu1 %13485 }
 0x586   : > { %v13488_v55 = vunpack.i.h.bf16 %v13486_v63  ;;  %v13487_v32 = vunpack.i.l.bf16 %v13486_v63 }
 0x587   : > { %12461 = vmatpush3.bf16.xpose.msk.msra.mxu0 %vm16187_vm2, %v12456_v47  ;;  %12489 = vmatpush3.bf16.msra.mxu1 %v12486_v59  ;;  %v13491_v47 = vpop.permute.xlu0 %13490  ;;  %v16279_v59 = vld [vmem:[%s20489_s19 + $0x18] sm:$0xff] }
 0x588   : > { %12464 = vmatprep.subr.msk.bf16.mxu0 %vm16187_vm2, %v12462_v4  ;;  %12491 = vmatprep.subr.bf16.mxu1 %v12490_v23  ;;  %v12498_v61 = vpack.c.bf16 %v13488_v55, %v13487_v32  ;;  %v13493_v11 = vunpack.i.h.bf16 %v13491_v47  ;;  %v13492_v48 = vunpack.i.l.bf16 %v13491_v47  ;;  %20491 = vst [vmem:[#allocation61_spill] sm:$0xff] %v16279_v59 }
 0x589   : > { %v16217_v16 = vpop.permute.xlu1 %13495 }
 0x58a   : > { %v16223_v50 = vpack.c.bf16 %v13493_v11, %v13492_v48  ;;  %v16307_v11 = vld [vmem:[%s20489_s19 + $0x30] sm:$0xff] }
 0x58b   : > { %12493 = vmatpush3.bf16.msra.mxu1 %v12490_v23  ;;  %20494 = vst [vmem:[#allocation64_spill] sm:$0xff] %v16307_v11 }
 0x58c   : > { %12495 = vmatprep.subr.bf16.mxu1 %v12494_v35 }
 0x58d   : > { %v13506_v39 = vpop.permute.xlu1 %13505 }
 0x58e   : > { %v13508_v43 = vunpack.i.h.bf16 %v13506_v39  ;;  %v13507_v44 = vunpack.i.l.bf16 %v13506_v39 }
 0x58f   : > { %12467 = vmatpush3.bf16.xpose.msk.msra.mxu0 %vm16187_vm2, %v12462_v4  ;;  %12497 = vmatpush3.bf16.msra.mxu1 %v12494_v35 }
 0x590   : > { %12470 = vmatprep.subr.msk.bf16.mxu0 %vm16187_vm2, %v12468_v40  ;;  %12499 = vmatprep.subr.bf16.mxu1 %v12498_v61  ;;  %v12502_v49 = vpack.c.bf16 %v13508_v43, %v13507_v44 }
 0x593   : > { %12501 = vmatpush3.bf16.msra.mxu1 %v12498_v61 }
 0x594   : > { %12503 = vmatprep.subr.bf16.mxu1 %v12502_v49 }
 0x597   : > { %12473 = vmatpush3.bf16.xpose.msk.msra.mxu0 %vm16187_vm2, %v12468_v40  ;;  %12505 = vmatpush3.bf16.msra.mxu1 %v12502_v49  ;;  %v16298_v40 = vld [vmem:[%s20489_s19 + $0x20] sm:$0xff] }
 0x598   : > { %12508 = vmatprep.subr.msk.bf16.mxu1 %vm16187_vm2, %v16223_v50  ;;  %20493 = vst [vmem:[#allocation63_spill] sm:$0xff] %v16298_v40 }
 0x59e   : > { %11261 = vmatmul.mubr.msk.f32.vlgmr.msra.gmra.mrb[8].mxu0 %vm1433_vm1, %v16081_v26 }
 0x59f   : > { %11263 = vmatprep.mubr.msk.f32.mxu0 %vm1433_vm1, %v16093_v3 }
 0x5a2   : > { %11264 = vmatmul.mubr.msk.f32.gmra.mrb[10].mxu0 %vm1433_vm1, %v16091_v1 }
 0x5a3   : > { %11266 = vmatprep.mubr.msk.f32.mxu0 %vm1433_vm1, %v16103_v10 }
 0x5a6   : > { %11267 = vmatmul.mubr.msk.f32.gmra.mrb[12].mxu0 %vm1433_vm1, %v16101_v6 }
 0x5a7   : > { %11269 = vmatprep.mubr.msk.f32.mxu0 %vm1433_vm1, %v16113_v15 }
 0x5aa   : > { %11270 = vmatmul.mubr.msk.f32.gmra.mrb[14].mxu0 %vm1433_vm1, %v16111_v13 }
 0x5ab   : > { %11272 = vmatprep.mubr.msk.f32.mxu0 %vm1433_vm1, %v16123_v24 }
 0x5ae   : > { %11273 = vmatmul.mubr.msk.f32.gmra.mrb[16].mxu0 %vm1433_vm1, %v16121_v22 }
 0x5af   : > { %11275 = vmatprep.mubr.msk.f32.mxu0 %vm1433_vm1, %v16133_v31 }
 0x5b2   : > { %11276 = vmatmul.mubr.msk.f32.gmra.mrb[18].mxu0 %vm1433_vm1, %v16131_v28 }
 0x5b3   : > { %11278 = vmatprep.mubr.msk.f32.mxu0 %vm1433_vm1, %v16143_v36 }
 0x5b6   : > { %11279 = vmatmul.mubr.msk.f32.gmra.mrb[20].mxu0 %vm1433_vm1, %v16141_v34 }
 0x5b7   : > { %11281 = vmatprep.mubr.msk.f32.mxu0 %vm1433_vm1, %v16153_v41 }
 0x5ba   : > { %11282 = vmatmul.mubr.msk.f32.gmra.mrb[22].mxu0 %vm1433_vm1, %v16151_v62 }
 0x671   : > { %v11262_v51 = vpop.f32.mrb[8].mxu0 }
 0x672   : > { %v1644_v52 = vmul.f32 0.35355338, %v11262_v51  ;;  %v1564_v53 = vpop.f32.mrb[9].mxu0 }
 0x673   : > { %v1643_v56 = vmul.f32 0.35355338, %v1564_v53  ;;  %v16316_v53 = vld [vmem:[%s20489_s19 + $0x40] sm:$0xff] }
 0x674   : > { %v16271_v17 = vadd.f32 %v1644_v52, %v16263_v7  ;;  %20495 = vst [vmem:[#allocation65_spill] sm:$0xff] %v16316_v53 }
 0x675   : > { %v11265_v57 = vpop.f32.mrb[10].mxu0  ;;  %v16274_v58 = vadd.f32 %v1643_v56, %v16268_v18 }
 0x676   : > { %v1646_v63 = vmul.f32 0.35355338, %v11265_v57  ;;  %1677 = vmax.xlane.f32.xlu1 %v16271_v17  ;;  %v1574_v4 = vpop.f32.mrb[11].mxu0 }
 0x677   : > { %1675 = vmax.xlane.f32.xlu0 %v16274_v58  ;;  %v1645_v14 = vmul.f32 0.35355338, %v1574_v4 }
 0x678   : > { %v16284_v9 = vadd.f32 %v1646_v63, %v16279_v59 }
 0x679   : > { %v11268_v23 = vpop.f32.mrb[12].mxu0  ;;  %v16293_v35 = vadd.f32 %v1645_v14, %v16289_v25  ;;  %v16327_v14 = vld [vmem:[%s20489_s19 + $0x50] sm:$0xff] }
 0x67a   : > { %v1584_v2 = vpop.f32.mrb[13].mxu0  ;;  %20496 = vst [vmem:[#allocation66_spill] sm:$0xff] %v16327_v14  ;;  %v1648_v45 = vmul.f32 0.35355338, %v11268_v23 }
 0x67b   : > { %1681 = vmax.xlane.f32.xlu0 %v16284_v9  ;;  %v1647_v55 = vmul.f32 0.35355338, %v1584_v2 }
 0x67d   : > { %v11271_v32 = vpop.f32.mrb[14].mxu0  ;;  %v16302_v61 = vadd.f32 %v1647_v55, %v16298_v40 }
 0x67e   : > { %v1594_v39 = vpop.f32.mrb[15].mxu0 }
 0x67f   : > { %1679 = vmax.xlane.f32.xlu0 %v16293_v35  ;;  %v1649_v43 = vmul.f32 0.35355338, %v1594_v39 }
 0x681   : > { %v11274_v44 = vpop.f32.mrb[16].mxu0  ;;  %v16311_v51 = vadd.f32 %v1649_v43, %v16307_v11 }
 0x682   : > { %v1604_v47 = vpop.f32.mrb[17].mxu0  ;;  %v1652_v38 = vmul.f32 0.35355338, %v11274_v44 }
 0x683   : > { %1683 = vmax.xlane.f32.xlu0 %v16302_v61  ;;  %v1651_v48 = vmul.f32 0.35355338, %v1604_v47  ;;  %v16336_v47 = vld [vmem:[%s20489_s19 + $0x60] sm:$0xff] }
 0x684   : > { %20497 = vst [vmem:[#allocation67_spill] sm:$0xff] %v16336_v47 }
 0x685   : > { %v11277_v49 = vpop.f32.mrb[18].mxu0  ;;  %v16322_v63 = vadd.f32 %v1651_v48, %v16316_v53 }
 0x686   : > { %v1614_v52 = vpop.f32.mrb[19].mxu0 }
 0x687   : > { %13510 = vrot.lane.b32.xlu1 %v16119_v19, %s15392_s6  ;;  %1687 = vmax.xlane.f32.xlu0 %v16311_v51  ;;  %v1653_v56 = vmul.f32 0.35355338, %v1614_v52 }
 0x689   : > { %v11280_v57 = vpop.f32.mrb[20].mxu0  ;;  %v16331_v39 = vadd.f32 %v1653_v56, %v16327_v14 }
 0x68a   : > { %v1624_v4 = vpop.f32.mrb[21].mxu0  ;;  %v1656_v44 = vmul.f32 0.35355338, %v11280_v57 }
 0x68b   : > { %1691 = vmax.xlane.f32.xlu0 %v16322_v63  ;;  %v1655_v2 = vmul.f32 0.35355338, %v1624_v4  ;;  %v16345_v4 = vld [vmem:[%s20489_s19 + $0x70] sm:$0xff] }
 0x68c   : > { %20498 = vst [vmem:[#allocation68_spill] sm:$0xff] %v16345_v4 }
 0x68d   : > { %v11283_v55 = vpop.f32.mrb[22].mxu0  ;;  %v16340_v52 = vadd.f32 %v1655_v2, %v16336_v47  ;;  %v1650_v2 = vmul.f32 0.35355338, %v11271_v32  ;;  %v1654_v32 = vmul.f32 0.35355338, %v11277_v49 }
 0x68e   : > { %v1634_v43 = vpop.f32.mrb[23].mxu0  ;;  %v1658_v49 = vmul.f32 0.35355338, %v11283_v55 }
 0x68f   : > { %1695 = vmax.xlane.f32.xlu0 %v16331_v39  ;;  %v1657_v48 = vmul.f32 0.35355338, %v1634_v43  ;;  %v16355_v43 = vld [vmem:[%s20489_s19 + $0x28] sm:$0xff]  ;;  %v1666_v23 = vadd.f32 %v1650_v2, %v16361_v37  ;;  %v16378_v30 = vadd.f32 %v1654_v32, %v16375_v29  ;;  %v16399_v32 = vpop.permute.xlu0 %13500 }
 0x690   : > { %20499 = vst [vmem:[#allocation69_spill] sm:$0xff] %v16355_v43  ;;  %v1664_v46 = vadd.f32 %v1648_v45, %v16355_v43  ;;  %v16383_v2 = vld [vmem:[%s20489_s19 + $0x68] sm:$0xff]  ;;  %v16396_v57 = vadd.f32 %v1658_v49, %v16392_v20 }
 0x691   : > { %v16349_v56 = vadd.f32 %v1657_v48, %v16345_v4  ;;  %v16369_v48 = vld [vmem:[%s20489_s19 + $0x48] sm:$0xff]  ;;  %20503 = vst [vmem:[#allocation73_spill] sm:$0xff] %v16383_v2 }
 0x692   : > { %20501 = vst [vmem:[#allocation71_spill] sm:$0xff] %v16369_v48  ;;  %v1668_v45 = vadd.f32 %v1652_v38, %v16369_v48  ;;  %v16387_v38 = vadd.f32 %v1656_v44, %v16383_v2 }
 0x693   : > { %1699 = vmax.xlane.f32.xlu0 %v16340_v52 }
 0x697   : > { %1703 = vmax.xlane.f32.xlu0 %v16349_v56 }
 0x6ab   : > { %1685 = vmax.xlane.f32.xlu1 %v1664_v46 }
 0x6ad   : > { %13515 = vrot.lane.b32.xlu0 %v16129_v27, %s15392_s6 }
 0x6af   : > { %1689 = vmax.xlane.f32.xlu1 %v1666_v23 }
 0x6b3   : > { %1693 = vmax.xlane.f32.xlu1 %v1668_v45 }
 0x6b7   : > { %1697 = vmax.xlane.f32.xlu1 %v16378_v30 }
 0x6bb   : > { %1701 = vmax.xlane.f32.xlu1 %v16387_v38 }
 0x6bf   : > { %1705 = vmax.xlane.f32.xlu1 %v16396_v57 }
 0x703   : > { %v1678_v21 = vpop.xlane.xlu1 %1677 }
 0x704   : > { %v1708_v55 = vsub.f32 %v16271_v17, %v1678_v21  ;;  %v1676_v29 = vpop.xlane.xlu0 %1675 }
 0x705   : > { %v1707_v44 = vsub.f32 %v16274_v58, %v1676_v29 }
 0x706   : > { %v1725_v2 = vmul.f32 1.442695, %v1708_v55 }
 0x707   : > { %v1723_v48 = vmul.f32 1.442695, %v1707_v44  ;;  %v16413_v58 = vpop.permute.xlu1 %13510 }
 0x708   : > { %14072 = vpow2.f32 %v1725_v2  ;;  %v1682_v49 = vpop.xlane.xlu0 %1681 }
 0x709   : > { %14074 = vpow2.f32 %v1723_v48  ;;  %v1710_v2 = vsub.f32 %v16284_v9, %v1682_v49 }
 0x70b   : > { %v1729_v47 = vmul.f32 1.442695, %v1710_v2 }
 0x70c   : > { %v1680_v21 = vpop.xlane.xlu0 %1679 }
 0x70d   : > { %v1709_v48 = vsub.f32 %v16293_v35, %v1680_v21 }
 0x70f   : > { %v1727_v20 = vmul.f32 1.442695, %v1709_v48 }
 0x710   : > { %v1684_v29 = vpop.xlane.xlu0 %1683 }
 0x711   : > { %14076 = vpow2.f32 %v1727_v20  ;;  %v1711_v11 = vsub.f32 %v16302_v61, %v1684_v29 }
 0x712   : > { %v16403_v37 = vpop.eup %14072  ;;  %14078 = vpow2.f32 %v1729_v47 }
 0x713   : > { %v16405_v43 = vpop.eup %14074  ;;  %1757 = vadd.xlane.f32.xlu0 %v16403_v37  ;;  %v1731_v21 = vmul.f32 1.442695, %v1711_v11 }
 0x714   : > { %1755 = vadd.xlane.f32.xlu1 %v16405_v43  ;;  %v1688_v17 = vpop.xlane.xlu0 %1687 }
 0x715   : > { %v1713_v25 = vsub.f32 %v16311_v51, %v1688_v17 }
 0x717   : > { %v1735_v49 = vmul.f32 1.442695, %v1713_v25 }
 0x718   : > { %v1692_v55 = vpop.xlane.xlu0 %1691 }
 0x719   : > { %v1715_v20 = vsub.f32 %v16322_v63, %v1692_v55 }
 0x71b   : > { %v16421_v47 = vpop.eup %14076  ;;  %v1739_v11 = vmul.f32 1.442695, %v1715_v20 }
 0x71c   : > { %v1696_v59 = vpop.xlane.xlu0 %1695  ;;  %v16423_v51 = vpop.eup %14078 }
 0x71d   : > { %v1717_v9 = vsub.f32 %v16331_v39, %v1696_v59 }
 0x720   : > { %v1700_v61 = vpop.xlane.xlu0 %1699 }
 0x724   : > { %v1704_v17 = vpop.xlane.xlu0 %1703 }
 0x725   : > { %13520 = vrot.lane.b32.xlu1 %v16139_v33, %s15392_s6 }
 0x729   : > { %13525 = vrot.lane.b32.xlu0 %v16149_v54, %s15392_s6 }
 0x738   : > { %v1686_v44 = vpop.xlane.xlu1 %1685 }
 0x739   : > { %v1712_v4 = vsub.f32 %v1664_v46, %v1686_v44 }
 0x73b   : > { %v1733_v14 = vmul.f32 1.442695, %v1712_v4  ;;  %v1743_v4 = vmul.f32 1.442695, %v1717_v9 }
 0x73c   : > { %v1690_v53 = vpop.xlane.xlu1 %1689 }
 0x73d   : > { %v1714_v40 = vsub.f32 %v1666_v23, %v1690_v53  ;;  %14080 = vpow2.f32 %v1733_v14 }
 0x73f   : > { %v1737_v18 = vmul.f32 1.442695, %v1714_v40 }
 0x740   : > { %v1694_v35 = vpop.xlane.xlu1 %1693 }
 0x741   : > { %14082 = vpow2.f32 %v1737_v18  ;;  %v1716_v46 = vsub.f32 %v1668_v45, %v1694_v35  ;;  %v1719_v18 = vsub.f32 %v16340_v52, %v1700_v61 }
 0x742   : > { %14084 = vpow2.f32 %v1731_v21 }
 0x743   : > { %14086 = vpow2.f32 %v1735_v49  ;;  %v1741_v53 = vmul.f32 1.442695, %v1716_v46  ;;  %v1747_v45 = vmul.f32 1.442695, %v1719_v18  ;;  %v13498_v18 = vunpack.i.h.bf16 %v16217_v16 }
 0x744   : > { %v1698_v48 = vpop.xlane.xlu1 %1697  ;;  %14088 = vpow2.f32 %v1743_v4  ;;  %v13516_v4 = vpop.permute.xlu0 %13515 }
 0x745   : > { %14090 = vpow2.f32 %v1741_v53  ;;  %v1718_v63 = vsub.f32 %v16378_v30, %v1698_v48  ;;  %v1721_v30 = vsub.f32 %v16349_v56, %v1704_v17 }
 0x747   : > { %v16429_v25 = vpop.eup %14080  ;;  %v1745_v52 = vmul.f32 1.442695, %v1718_v63 }
 0x748   : > { %v1702_v40 = vpop.xlane.xlu1 %1701  ;;  %1759 = vadd.xlane.f32.xlu0 %v16421_v47 }
 0x749   : > { %v1720_v59 = vsub.f32 %v16387_v38, %v1702_v40  ;;  %1761 = vadd.xlane.f32.xlu1 %v16423_v51 }
 0x74b   : > { %v16432_v14 = vpop.eup %14082  ;;  %v1749_v39 = vmul.f32 1.442695, %v1720_v59  ;;  %v13497_v59 = vunpack.i.l.bf16 %v16217_v16  ;;  %v13512_v16 = vunpack.i.l.bf16 %v16413_v58 }
 0x74c   : > { %v1706_v23 = vpop.xlane.xlu1 %1705  ;;  %1765 = vadd.xlane.f32.xlu0 %v16429_v25  ;;  %v16437_v29 = vpop.eup %14084 }
 0x74d   : > { %14092 = vpow2.f32 %v1749_v39  ;;  %1769 = vadd.xlane.f32.xlu1 %v16432_v14  ;;  %v1722_v38 = vsub.f32 %v16396_v57, %v1706_v23  ;;  %v16439_v2 = vpop.eup %14086  ;;  %v1751_v57 = vmul.f32 1.442695, %v1721_v30  ;;  %v12512_v39 = vpack.c.bf16 %v13498_v18, %v13497_v59 }
 0x74e   : > { %14094 = vpow2.f32 %v1739_v11  ;;  %v16444_v44 = vpop.eup %14088  ;;  %v13503_v23 = vunpack.i.h.bf16 %v16399_v32 }
 0x74f   : > { %14096 = vpow2.f32 %v1747_v45  ;;  %v1753_v55 = vmul.f32 1.442695, %v1722_v38  ;;  %v16446_v35 = vpop.eup %14090  ;;  %v13502_v45 = vunpack.i.l.bf16 %v16399_v32  ;;  %v13517_v32 = vunpack.i.l.bf16 %v13516_v4 }
 0x750   : > { %1763 = vadd.xlane.f32.xlu0 %v16437_v29  ;;  %14098 = vpow2.f32 %v1745_v52 }
 0x751   : > { %1767 = vadd.xlane.f32.xlu1 %v16439_v2  ;;  %14100 = vpow2.f32 %v1753_v55  ;;  %v12518_v52 = vpack.c.bf16 %v13503_v23, %v13502_v45 }
 0x752   : > { %14102 = vpow2.f32 %v1751_v57 }
 0x754   : > { %1775 = vadd.xlane.f32.xlu0 %v16444_v44 }
 0x755   : > { %1773 = vadd.xlane.f32.xlu1 %v16446_v35 }
 0x757   : > { %v16450_v21 = vpop.eup %14092 }
 0x758   : > { %v16452_v9 = vpop.eup %14094  ;;  %1781 = vadd.xlane.f32.xlu0 %v16450_v21 }
 0x759   : > { %1771 = vadd.xlane.f32.xlu1 %v16452_v9  ;;  %v16456_v56 = vpop.eup %14096 }
 0x75a   : > { %v16458_v49 = vpop.eup %14098 }
 0x75b   : > { %v16462_v46 = vpop.eup %14100 }
 0x75c   : > { %1779 = vadd.xlane.f32.xlu0 %v16456_v56  ;;  %v16465_v48 = vpop.eup %14102 }
 0x75d   : > { %1777 = vadd.xlane.f32.xlu1 %v16458_v49 }
 0x761   : > { %1785 = vadd.xlane.f32.xlu1 %v16462_v46 }
 0x765   : > { %1783 = vadd.xlane.f32.xlu1 %v16465_v48 }
 0x772   : > { %13530 = vrot.lane.b32.xlu0 %v16159_v42, %s15392_s6 }
 0x776   : > { %2012 = vrot.lane.b32.xlu0 %v16083_v60, %s15393_s14  ;;  %2014 = vrot.lane.b32.xlu1 %v16081_v26, %s15393_s14 }
 0x77a   : > { %2016 = vrot.lane.b32.xlu0 %v16093_v3, %s15393_s14  ;;  %2018 = vrot.lane.b32.xlu1 %v16091_v1, %s15393_s14 }
 0x77e   : > { %2020 = vrot.lane.b32.xlu0 %v16103_v10, %s15393_s14  ;;  %2022 = vrot.lane.b32.xlu1 %v16101_v6, %s15393_s14 }
 0x782   : > { %2024 = vrot.lane.b32.xlu0 %v16113_v15, %s15393_s14  ;;  %2026 = vrot.lane.b32.xlu1 %v16111_v13, %s15393_s14 }
 0x786   : > { %2028 = vrot.lane.b32.xlu0 %v16123_v24, %s15393_s14  ;;  %2030 = vrot.lane.b32.xlu1 %v16121_v22, %s15393_s14 }
 0x78a   : > { %2032 = vrot.lane.b32.xlu0 %v16133_v31, %s15393_s14  ;;  %2034 = vrot.lane.b32.xlu1 %v16131_v28, %s15393_s14 }
 0x78e   : > { %2036 = vrot.lane.b32.xlu0 %v16143_v36, %s15393_s14  ;;  %2038 = vrot.lane.b32.xlu1 %v16141_v34, %s15393_s14 }
 0x792   : > { %2040 = vrot.lane.b32.xlu0 %v16153_v41, %s15393_s14  ;;  %2042 = vrot.lane.b32.xlu1 %v16151_v62, %s15393_s14 }
 0x796   : > { %13535 = vrot.lane.b32.xlu0 %v16089_v0, %s15394_s2  ;;  %13540 = vrot.lane.b32.xlu1 %v16099_v5, %s15394_s2 }
 0x79a   : > { %13550 = vrot.lane.b32.xlu0 %v16119_v19, %s15394_s2  ;;  %13545 = vrot.lane.b32.xlu1 %v16109_v12, %s15394_s2 }
 0x79e   : > { %13555 = vrot.lane.b32.xlu0 %v16129_v27, %s15394_s2  ;;  %13560 = vrot.lane.b32.xlu1 %v16139_v33, %s15394_s2 }
 0x7a0   : > { %v1758_v20 = vpop.xlane.xlu0 %1757 }
 0x7a1   : > { %14104 = vrcp.f32 %v1758_v20  ;;  %v1756_v61 = vpop.xlane.xlu1 %1755 }
 0x7a2   : > { %14106 = vrcp.f32 %v1756_v61  ;;  %13575 = vrot.lane.b32.xlu0 %v16089_v0, %s15395_s0  ;;  %13565 = vrot.lane.b32.xlu1 %v16149_v54, %s15394_s2 }
 0x7a4   : > { %v13526_v57 = vpop.permute.xlu0 %13525 }
 0x7a5   : > { %v13521_v17 = vpop.permute.xlu1 %13520  ;;  %v13528_v20 = vunpack.i.h.bf16 %v13526_v57 }
 0x7a6   : > { %13585 = vrot.lane.b32.xlu0 %v16109_v12, %s15395_s0  ;;  %13570 = vrot.lane.b32.xlu1 %v16159_v42, %s15394_s2  ;;  %v13523_v30 = vunpack.i.h.bf16 %v13521_v17  ;;  %v13522_v55 = vunpack.i.l.bf16 %v13521_v17 }
 0x7aa   : > { %13580 = vrot.lane.b32.xlu1 %v16099_v5, %s15395_s0 }
 0x7ab   : > { %v14105_v53 = vpop.eup %14104 }
 0x7ac   : > { %v14107_v40 = vpop.eup %14106  ;;  %v1804_v63 = vmul.f32 %v14105_v53, %v16403_v37  ;;  %v13513_v37 = vunpack.i.h.bf16 %v16413_v58  ;;  %v12536_v58 = vpack.c.bf16 %v13523_v30, %v13522_v55 }
 0x7ad   : > { %v1803_v11 = vmul.f32 %v14107_v40, %v16405_v43 }
 0x7ae   : > { %v12524_v43 = vpack.c.bf16 %v13513_v37, %v13512_v16 }
 0x7af   : > { %11316 = vmatprep.mubr.f32.mxu1 %v1803_v11 }
 0x7b0   : > { %11317 = vmatmul.mubr.f32.vlgmr.msra.gmra.mrb[16].mxu1 %v1804_v63 }
 0x7b1   : > { %12511 = vmatpush3.bf16.xpose.msk.msra.mxu1 %vm16187_vm2, %v16223_v50  ;;  %v13518_v50 = vunpack.i.h.bf16 %v13516_v4  ;;  %v13527_v4 = vunpack.i.l.bf16 %v13526_v57 }
 0x7b2   : > { %12514 = vmatprep.subr.msk.bf16.mxu1 %vm16187_vm2, %v12512_v39 }
 0x7b3   : > { %v12530_v38 = vpack.c.bf16 %v13518_v50, %v13517_v32  ;;  %v12542_v40 = vpack.c.bf16 %v13528_v20, %v13527_v4 }
 0x7b9   : > { %12517 = vmatpush3.bf16.xpose.msk.msra.mxu1 %vm16187_vm2, %v12512_v39 }
 0x7ba   : > { %12520 = vmatprep.subr.msk.bf16.mxu1 %vm16187_vm2, %v12518_v52 }
 0x7c1   : > { %12523 = vmatpush3.bf16.xpose.msk.msra.mxu1 %vm16187_vm2, %v12518_v52 }
 0x7c2   : > { %12526 = vmatprep.subr.msk.bf16.mxu1 %vm16187_vm2, %v12524_v43 }
 0x7c9   : > { %12529 = vmatpush3.bf16.xpose.msk.msra.mxu1 %vm16187_vm2, %v12524_v43 }
 0x7ca   : > { %12532 = vmatprep.subr.msk.bf16.mxu1 %vm16187_vm2, %v12530_v38 }
 0x7d1   : > { %12535 = vmatpush3.bf16.xpose.msk.msra.mxu1 %vm16187_vm2, %v12530_v38 }
 0x7d2   : > { %12538 = vmatprep.subr.msk.bf16.mxu1 %vm16187_vm2, %v12536_v58 }
 0x7d5   : > { %v1760_v61 = vpop.xlane.xlu0 %1759 }
 0x7d6   : > { %14108 = vrcp.f32 %v1760_v61  ;;  %v1762_v53 = vpop.xlane.xlu1 %1761 }
 0x7d7   : > { %14110 = vrcp.f32 %v1762_v53 }
 0x7d9   : > { %12541 = vmatpush3.bf16.xpose.msk.msra.mxu1 %vm16187_vm2, %v12536_v58  ;;  %v1766_v18 = vpop.xlane.xlu0 %1765 }
 0x7da   : > { %12544 = vmatprep.subr.msk.bf16.mxu1 %vm16187_vm2, %v12542_v40  ;;  %v1770_v59 = vpop.xlane.xlu1 %1769  ;;  %14112 = vrcp.f32 %v1766_v18 }
 0x7dd   : > { %v1764_v11 = vpop.xlane.xlu0 %1763 }
 0x7de   : > { %14114 = vrcp.f32 %v1764_v11  ;;  %v1768_v63 = vpop.xlane.xlu1 %1767 }
 0x7df   : > { %14116 = vrcp.f32 %v1768_v63 }
 0x7e0   : > { %v14109_v39 = vpop.eup %14108  ;;  %14118 = vrcp.f32 %v1770_v59 }
 0x7e1   : > { %v14111_v23 = vpop.eup %14110  ;;  %12547 = vmatpush3.bf16.xpose.msk.msra.mxu1 %vm16187_vm2, %v12542_v40  ;;  %v1776_v45 = vpop.xlane.xlu0 %1775  ;;  %v1805_v52 = vmul.f32 %v14109_v39, %v16421_v47 }
 0x7e2   : > { %v1774_v37 = vpop.xlane.xlu1 %1773  ;;  %v1806_v16 = vmul.f32 %v14111_v23, %v16423_v51  ;;  %14120 = vrcp.f32 %v1776_v45 }
 0x7e3   : > { %11319 = vmatprep.mubr.f32.mxu1 %v1805_v52  ;;  %14122 = vrcp.f32 %v1774_v37 }
 0x7e4   : > { %11320 = vmatmul.mubr.f32.gmra.mrb[18].mxu1 %v1806_v16  ;;  %v14113_v32 = vpop.eup %14112 }
 0x7e5   : > { %v1782_v43 = vpop.xlane.xlu0 %1781  ;;  %v1808_v47 = vmul.f32 %v14113_v32, %v16429_v25 }
 0x7e6   : > { %v1772_v50 = vpop.xlane.xlu1 %1771 }
 0x7e7   : > { %14124 = vrcp.f32 %v1772_v50 }
 0x7e8   : > { %v14115_v38 = vpop.eup %14114 }
 0x7e9   : > { %v14117_v17 = vpop.eup %14116  ;;  %v1780_v30 = vpop.xlane.xlu0 %1779  ;;  %v1807_v55 = vmul.f32 %v14115_v38, %v16437_v29 }
 0x7ea   : > { %14126 = vrcp.f32 %v1780_v30  ;;  %v1778_v58 = vpop.xlane.xlu1 %1777  ;;  %v1809_v57 = vmul.f32 %v14117_v17, %v16439_v2  ;;  %v14119_v51 = vpop.eup %14118 }
 0x7eb   : > { %14128 = vrcp.f32 %v1778_v58  ;;  %11322 = vmatprep.mubr.f32.mxu1 %v1807_v55  ;;  %v1810_v40 = vmul.f32 %v14119_v51, %v16432_v14 }
 0x7ec   : > { %11323 = vmatmul.mubr.f32.gmra.mrb[20].mxu1 %v1808_v47  ;;  %14130 = vrcp.f32 %v1782_v43  ;;  %v14121_v18 = vpop.eup %14120 }
 0x7ed   : > { %11325 = vmatprep.mubr.f32.mxu1 %v1809_v57  ;;  %v13531_v20 = vpop.permute.xlu0 %13530  ;;  %v14123_v29 = vpop.eup %14122  ;;  %v1813_v23 = vmul.f32 %v14121_v18, %v16444_v44 }
 0x7ee   : > { %v13533_v4 = vunpack.i.h.bf16 %v13531_v20  ;;  %v13532_v61 = vunpack.i.l.bf16 %v13531_v20  ;;  %v1786_v53 = vpop.xlane.xlu1 %1785  ;;  %v1812_v39 = vmul.f32 %v14123_v29, %v16446_v35 }
 0x7ef   : > { %14132 = vrcp.f32 %v1786_v53 }
 0x7f0   : > { %v12548_v59 = vpack.c.bf16 %v13533_v4, %v13532_v61  ;;  %11326 = vmatmul.mubr.f32.gmra.mrb[22].mxu1 %v1810_v40 }
 0x7f1   : > { %v14125_v11 = vpop.eup %14124  ;;  %v2013_v25 = vpop.permute.xlu0 %2012 }
 0x7f2   : > { %v1784_v2 = vpop.xlane.xlu1 %1783  ;;  %12550 = vmatprep.subr.msk.bf16.mxu1 %vm16187_vm2, %v12548_v59  ;;  %v1811_v63 = vmul.f32 %v14125_v11, %v16452_v9 }
 0x7f3   : > { %14134 = vrcp.f32 %v1784_v2  ;;  %12553 = vmatpush3.bf16.xpose.msk.msra.mxu1 %vm16187_vm2, %v12548_v59 }
 0x7f4   : > { %v14127_v14 = vpop.eup %14126  ;;  %11328 = vmatprep.mubr.f32.mxu1 %v1811_v63 }
 0x7f5   : > { %v14129_v45 = vpop.eup %14128  ;;  %11329 = vmatmul.mubr.f32.gmra.mrb[24].mxu1 %v1812_v39  ;;  %v2017_v52 = vpop.permute.xlu0 %2016  ;;  %v1815_v9 = vmul.f32 %v14127_v14, %v16456_v56 }
 0x7f6   : > { %v2015_v37 = vpop.permute.xlu1 %2014  ;;  %11331 = vmatprep.mubr.f32.mxu1 %v1813_v23  ;;  %v1814_v16 = vmul.f32 %v14129_v45, %v16458_v49  ;;  %v14131_v43 = vpop.eup %14130 }
 0x7f7   : > { %v1816_v35 = vmul.f32 %v14131_v43, %v16450_v21 }
 0x7f9   : > { %11332 = vmatmul.mubr.f32.gmra.mrb[26].mxu1 %v1814_v16  ;;  %v2021_v50 = vpop.permute.xlu0 %2020  ;;  %v14133_v38 = vpop.eup %14132 }
 0x7fa   : > { %v2019_v32 = vpop.permute.xlu1 %2018  ;;  %11334 = vmatprep.mubr.f32.mxu1 %v1815_v9  ;;  %v1818_v58 = vmul.f32 %v14133_v38, %v16462_v46 }
 0x7fd   : > { %v14135_v17 = vpop.eup %14134  ;;  %11335 = vmatmul.mubr.f32.gmra.mrb[28].mxu1 %v1816_v35  ;;  %v2025_v44 = vpop.permute.xlu0 %2024 }
 0x7fe   : > { %v2023_v30 = vpop.permute.xlu1 %2022  ;;  %v1817_v55 = vmul.f32 %v14135_v17, %v16465_v48 }
 0x800   : > { %11337 = vmatprep.mubr.f32.mxu1 %v1817_v55 }
 0x801   : > { %11338 = vmatmul.mubr.f32.gmra.mrb[30].mxu1 %v1818_v58  ;;  %v2029_v49 = vpop.permute.xlu0 %2028 }
 0x802   : > { %v2027_v47 = vpop.permute.xlu1 %2026  ;;  %11372 = vmatprep.mubr.msk.f32.mxu1 %vm1433_vm1, %v2013_v25 }
 0x805   : > { %v2033_v56 = vpop.permute.xlu0 %2032  ;;  %11373 = vmatmul.mubr.msk.f32.vlgmr.msra.gmra.mrb[32].mxu1 %vm1433_vm1, %v2015_v37 }
 0x806   : > { %v2031_v57 = vpop.permute.xlu1 %2030  ;;  %11375 = vmatprep.mubr.msk.f32.mxu1 %vm1433_vm1, %v2017_v52 }
 0x809   : > { %v2037_v21 = vpop.permute.xlu0 %2036  ;;  %11376 = vmatmul.mubr.msk.f32.gmra.mrb[34].mxu1 %vm1433_vm1, %v2019_v32 }
 0x80a   : > { %v2035_v51 = vpop.permute.xlu1 %2034  ;;  %11378 = vmatprep.mubr.msk.f32.mxu1 %vm1433_vm1, %v2021_v50 }
 0x80d   : > { %v2041_v48 = vpop.permute.xlu0 %2040  ;;  %11379 = vmatmul.mubr.msk.f32.gmra.mrb[36].mxu1 %vm1433_vm1, %v2023_v30 }
 0x80e   : > { %v2039_v46 = vpop.permute.xlu1 %2038  ;;  %11381 = vmatprep.mubr.msk.f32.mxu1 %vm1433_vm1, %v2025_v44 }
 0x811   : > { %v13536_v20 = vpop.permute.xlu0 %13535  ;;  %11382 = vmatmul.mubr.msk.f32.gmra.mrb[38].mxu1 %vm1433_vm1, %v2027_v47 }
 0x812   : > { %v13538_v4 = vunpack.i.h.bf16 %v13536_v20  ;;  %v13537_v61 = vunpack.i.l.bf16 %v13536_v20  ;;  %v2043_v53 = vpop.permute.xlu1 %2042  ;;  %11384 = vmatprep.mubr.msk.f32.mxu1 %vm1433_vm1, %v2029_v49 }
 0x814   : > { %v12554_v40 = vpack.c.bf16 %v13538_v4, %v13537_v61 }
 0x815   : > { %11385 = vmatmul.mubr.msk.f32.gmra.mrb[40].mxu1 %vm1433_vm1, %v2031_v57  ;;  %v13551_v18 = vpop.permute.xlu0 %13550 }
 0x816   : > { %v13541_v29 = vpop.permute.xlu1 %13540  ;;  %11387 = vmatprep.mubr.msk.f32.mxu1 %vm1433_vm1, %v2033_v56  ;;  %12555 = vmatprep.subr.bf16.mxu0 %v12554_v40  ;;  %v13553_v63 = vunpack.i.h.bf16 %v13551_v18  ;;  %v13552_v39 = vunpack.i.l.bf16 %v13551_v18 }
 0x817   : > { %v13543_v59 = vunpack.i.h.bf16 %v13541_v29  ;;  %v13542_v11 = vunpack.i.l.bf16 %v13541_v29  ;;  %12557 = vmatpush3.bf16.msra.mxu0 %v12554_v40 }
 0x818   : > { %v12566_v9 = vpack.c.bf16 %v13553_v63, %v13552_v39 }
 0x819   : > { %11388 = vmatmul.mubr.msk.f32.gmra.mrb[42].mxu1 %vm1433_vm1, %v2035_v51  ;;  %v12558_v25 = vpack.c.bf16 %v13543_v59, %v13542_v11  ;;  %v13556_v45 = vpop.permute.xlu0 %13555 }
 0x81a   : > { %v13546_v2 = vpop.permute.xlu1 %13545  ;;  %11390 = vmatprep.mubr.msk.f32.mxu1 %vm1433_vm1, %v2037_v21  ;;  %v13558_v16 = vunpack.i.h.bf16 %v13556_v45  ;;  %v13557_v43 = vunpack.i.l.bf16 %v13556_v45 }
 0x81b   : > { %v13548_v14 = vunpack.i.h.bf16 %v13546_v2  ;;  %v13547_v23 = vunpack.i.l.bf16 %v13546_v2  ;;  %12559 = vmatprep.subr.bf16.mxu0 %v12558_v25 }
 0x81c   : > { %12561 = vmatpush3.bf16.msra.mxu0 %v12558_v25  ;;  %v12570_v38 = vpack.c.bf16 %v13558_v16, %v13557_v43 }
 0x81d   : > { %11391 = vmatmul.mubr.msk.f32.gmra.mrb[44].mxu1 %vm1433_vm1, %v2039_v46  ;;  %v12562_v52 = vpack.c.bf16 %v13548_v14, %v13547_v23  ;;  %v13576_v56 = vpop.permute.xlu0 %13575 }
 0x81e   : > { %v13561_v37 = vpop.permute.xlu1 %13560  ;;  %11393 = vmatprep.mubr.msk.f32.mxu1 %vm1433_vm1, %v2041_v48  ;;  %v13578_v57 = vunpack.i.h.bf16 %v13576_v56  ;;  %v13577_v21 = vunpack.i.l.bf16 %v13576_v56 }
 0x81f   : > { %12563 = vmatprep.subr.bf16.mxu0 %v12562_v52  ;;  %v13563_v32 = vunpack.i.h.bf16 %v13561_v37  ;;  %v13562_v35 = vunpack.i.l.bf16 %v13561_v37 }
 0x820   : > { %12565 = vmatpush3.bf16.msra.mxu0 %v12562_v52  ;;  %v16593_v48 = vpack.c.bf16 %v13578_v57, %v13577_v21  ;;  %v20524_v21 = vld [vmem:[#allocation63_spill] sm:$0xff] }
 0x821   : > { %11394 = vmatmul.mubr.msk.f32.gmra.mrb[46].mxu1 %vm1433_vm1, %v2043_v53  ;;  %12567 = vmatprep.subr.bf16.mxu0 %v12566_v9  ;;  %v12574_v30 = vpack.c.bf16 %v13563_v32, %v13562_v35 }
 0x822   : > { %v13566_v50 = vpop.permute.xlu1 %13565 }
 0x823   : > { %v13568_v17 = vunpack.i.h.bf16 %v13566_v50  ;;  %v13567_v44 = vunpack.i.l.bf16 %v13566_v50 }
 0x824   : > { %12569 = vmatpush3.bf16.msra.mxu0 %v12566_v9  ;;  %v20521_v9 = vld [vmem:[#allocation60_spill] sm:$0xff] }
 0x825   : > { %12571 = vmatprep.subr.bf16.mxu0 %v12570_v38  ;;  %v12578_v47 = vpack.c.bf16 %v13568_v17, %v13567_v44  ;;  %v20522_v17 = vld [vmem:[#allocation61_spill] sm:$0xff] }
 0x826   : > { %v13571_v55 = vpop.permute.xlu1 %13570 }
 0x827   : > { %v13573_v58 = vunpack.i.h.bf16 %v13571_v55  ;;  %v13572_v49 = vunpack.i.l.bf16 %v13571_v55 }
 0x828   : > { %12573 = vmatpush3.bf16.msra.mxu0 %v12570_v38 }
 0x829   : > { %12575 = vmatprep.subr.bf16.mxu0 %v12574_v30  ;;  %v12582_v51 = vpack.c.bf16 %v13573_v58, %v13572_v49 }
 0x82c   : > { %12577 = vmatpush3.bf16.msra.mxu0 %v12574_v30 }
 0x82d   : > { %12579 = vmatprep.subr.bf16.mxu0 %v12578_v47 }
 0x830   : > { %12581 = vmatpush3.bf16.msra.mxu0 %v12578_v47 }
 0x831   : > { %12583 = vmatprep.subr.bf16.mxu0 %v12582_v51 }
 0x834   : > { %12585 = vmatpush3.bf16.msra.mxu0 %v12582_v51 }
 0x835   : > { %12588 = vmatprep.subr.msk.bf16.mxu0 %vm16187_vm2, %v16593_v48 }
 0x883   : > { %v16598_v46 = vpop.f32.mrb[16].mxu1 }
 0x884   : > { %20505 = vst [vmem:[#allocation75_spill] sm:$0xff] %v16598_v46  ;;  %v16600_v20 = vpop.f32.mrb[17].mxu1 }
 0x885   : > { %20506 = vst [vmem:[#allocation76_spill] sm:$0xff] %v16600_v20 }
 0x8b7   : > { %v16602_v4 = vpop.f32.mrb[18].mxu1 }
 0x8b8   : > { %20507 = vst [vmem:[#allocation77_spill] sm:$0xff] %v16602_v4  ;;  %v16604_v61 = vpop.f32.mrb[19].mxu1 }
 0x8b9   : > { %20508 = vst [vmem:[#allocation78_spill] sm:$0xff] %v16604_v61 }
 0x8bf   : > { %v16606_v53 = vpop.f32.mrb[20].mxu1 }
 0x8c0   : > { %20509 = vst [vmem:[#allocation79_spill] sm:$0xff] %v16606_v53  ;;  %v16608_v40 = vpop.f32.mrb[21].mxu1 }
 0x8c1   : > { %20510 = vst [vmem:[#allocation80_spill] sm:$0xff] %v16608_v40 }
 0x8c3   : > { %v16610_v18 = vpop.f32.mrb[22].mxu1 }
 0x8c4   : > { %20511 = vst [vmem:[#allocation81_spill] sm:$0xff] %v16610_v18  ;;  %v16612_v29 = vpop.f32.mrb[23].mxu1 }
 0x8c5   : > { %20512 = vst [vmem:[#allocation82_spill] sm:$0xff] %v16612_v29 }
 0x8c8   : > { %v16614_v59 = vpop.f32.mrb[24].mxu1 }
 0x8c9   : > { %20513 = vst [vmem:[#allocation83_spill] sm:$0xff] %v16614_v59  ;;  %v16616_v11 = vpop.f32.mrb[25].mxu1 }
 0x8ca   : > { %20514 = vst [vmem:[#allocation84_spill] sm:$0xff] %v16616_v11 }
 0x8cc   : > { %v16618_v25 = vpop.f32.mrb[26].mxu1 }
 0x8cd   : > { %20515 = vst [vmem:[#allocation85_spill] sm:$0xff] %v16618_v25  ;;  %v16620_v2 = vpop.f32.mrb[27].mxu1 }
 0x8ce   : > { %20516 = vst [vmem:[#allocation86_spill] sm:$0xff] %v16620_v2 }
 0x8d0   : > { %v16622_v63 = vpop.f32.mrb[28].mxu1 }
 0x8d1   : > { %20517 = vst [vmem:[#allocation87_spill] sm:$0xff] %v16622_v63  ;;  %v16624_v39 = vpop.f32.mrb[29].mxu1 }
 0x8d2   : > { %20518 = vst [vmem:[#allocation88_spill] sm:$0xff] %v16624_v39  ;;  %v20530_v39 = vld [vmem:[#allocation69_spill] sm:$0xff] }
 0x8d4   : > { %v16626_v14 = vpop.f32.mrb[30].mxu1 }
 0x8d5   : > { %20519 = vst [vmem:[#allocation89_spill] sm:$0xff] %v16626_v14  ;;  %v16628_v23 = vpop.f32.mrb[31].mxu1  ;;  %v20528_v14 = vld [vmem:[#allocation67_spill] sm:$0xff] }
 0x8d6   : > { %20520 = vst [vmem:[#allocation90_spill] sm:$0xff] %v16628_v23 }
 0x8d8   : > { %v11374_v45 = vpop.f32.mrb[32].mxu1 }
 0x8d9   : > { %v2286_v52 = vmul.f32 0.35355338, %v11374_v45  ;;  %v2206_v37 = vpop.f32.mrb[33].mxu1 }
 0x8da   : > { %v2285_v16 = vmul.f32 0.35355338, %v2206_v37 }
 0x8db   : > { %v16631_v43 = vadd.f32 %v2286_v52, %v16263_v7  ;;  %v20523_v7 = vld [vmem:[#allocation62_spill] sm:$0xff] }
 0x8dc   : > { %v16634_v50 = vadd.f32 %v2285_v16, %v20521_v9  ;;  %v11377_v32 = vpop.f32.mrb[34].mxu1  ;;  %v20525_v16 = vld [vmem:[#allocation64_spill] sm:$0xff] }
 0x8dd   : > { %v2288_v35 = vmul.f32 0.35355338, %v11377_v32  ;;  %2319 = vmax.xlane.f32.xlu1 %v16631_v43  ;;  %v2216_v38 = vpop.f32.mrb[35].mxu1 }
 0x8de   : > { %2317 = vmax.xlane.f32.xlu0 %v16634_v50  ;;  %v2287_v30 = vmul.f32 0.35355338, %v2216_v38 }
 0x8df   : > { %v16639_v44 = vadd.f32 %v2288_v35, %v20522_v17  ;;  %v20526_v17 = vld [vmem:[#allocation65_spill] sm:$0xff] }
 0x8e0   : > { %v11380_v55 = vpop.f32.mrb[36].mxu1  ;;  %v16643_v49 = vadd.f32 %v2287_v30, %v20523_v7 }
 0x8e1   : > { %v2226_v58 = vpop.f32.mrb[37].mxu1 }
 0x8e2   : > { %2323 = vmax.xlane.f32.xlu0 %v16639_v44  ;;  %v2289_v47 = vmul.f32 0.35355338, %v2226_v58 }
 0x8e4   : > { %v11383_v56 = vpop.f32.mrb[38].mxu1  ;;  %v16647_v51 = vadd.f32 %v2289_v47, %v20524_v21 }
 0x8e5   : > { %v2236_v57 = vpop.f32.mrb[39].mxu1 }
 0x8e6   : > { %2321 = vmax.xlane.f32.xlu0 %v16643_v49  ;;  %v2291_v45 = vmul.f32 0.35355338, %v2236_v57  ;;  %v20527_v57 = vld [vmem:[#allocation66_spill] sm:$0xff] }
 0x8e8   : > { %v11386_v52 = vpop.f32.mrb[40].mxu1  ;;  %v16651_v9 = vadd.f32 %v2291_v45, %v20525_v16 }
 0x8e9   : > { %v2246_v37 = vpop.f32.mrb[41].mxu1  ;;  %v2294_v2 = vmul.f32 0.35355338, %v11386_v52  ;;  %v20535_v52 = vld [vmem:[#allocation74_spill] sm:$0xff] }
 0x8ea   : > { %2325 = vmax.xlane.f32.xlu0 %v16647_v51  ;;  %v2293_v32 = vmul.f32 0.35355338, %v2246_v37 }
 0x8ec   : > { %v11389_v35 = vpop.f32.mrb[42].mxu1  ;;  %v16657_v30 = vadd.f32 %v2293_v32, %v20526_v17  ;;  %v20529_v32 = vld [vmem:[#allocation68_spill] sm:$0xff]  ;;  %v2290_v17 = vmul.f32 0.35355338, %v11380_v55 }
 0x8ed   : > { %v2256_v38 = vpop.f32.mrb[43].mxu1 }
 0x8ee   : > { %13590 = vrot.lane.b32.xlu1 %v16119_v19, %s15395_s0  ;;  %2329 = vmax.xlane.f32.xlu0 %v16651_v9  ;;  %v2295_v58 = vmul.f32 0.35355338, %v2256_v38 }
 0x8f0   : > { %v11392_v7 = vpop.f32.mrb[44].mxu1  ;;  %v16661_v21 = vadd.f32 %v2295_v58, %v20527_v57  ;;  %v2306_v58 = vadd.f32 %v2290_v17, %v20530_v39  ;;  %v2292_v57 = vmul.f32 0.35355338, %v11383_v56  ;;  %v20534_v39 = vld [vmem:[#allocation73_spill] sm:$0xff] }
 0x8f1   : > { %v2266_v47 = vpop.f32.mrb[45].mxu1  ;;  %v2298_v59 = vmul.f32 0.35355338, %v11392_v7 }
 0x8f2   : > { %2333 = vmax.xlane.f32.xlu0 %v16657_v30  ;;  %v2297_v45 = vmul.f32 0.35355338, %v2266_v47  ;;  %v20531_v47 = vld [vmem:[#allocation70_spill] sm:$0xff] }
 0x8f3   : > { %v2308_v25 = vadd.f32 %v2292_v57, %v20531_v47  ;;  %v16682_v55 = vadd.f32 %v2298_v59, %v20534_v39 }
 0x8f4   : > { %v11395_v37 = vpop.f32.mrb[46].mxu1  ;;  %v16665_v23 = vadd.f32 %v2297_v45, %v20528_v14  ;;  %v20532_v14 = vld [vmem:[#allocation71_spill] sm:$0xff] }
 0x8f5   : > { %v2276_v16 = vpop.f32.mrb[47].mxu1  ;;  %v2310_v45 = vadd.f32 %v2294_v2, %v20532_v14  ;;  %v2300_v56 = vmul.f32 0.35355338, %v11395_v37  ;;  %v16689_v2 = vpop.permute.xlu1 %13580 }
 0x8f6   : > { %2337 = vmax.xlane.f32.xlu0 %v16661_v21  ;;  %v2299_v63 = vmul.f32 0.35355338, %v2276_v16  ;;  %v2296_v16 = vmul.f32 0.35355338, %v11389_v35  ;;  %v16691_v35 = vpop.permute.xlu0 %13585 }
 0x8f7   : > { %v16686_v17 = vadd.f32 %v2300_v56, %v20535_v52 }
 0x8f8   : > { %v16669_v38 = vadd.f32 %v2299_v63, %v20529_v32  ;;  %v20533_v63 = vld [vmem:[#allocation72_spill] sm:$0xff] }
 0x8f9   : > { %v16678_v32 = vadd.f32 %v2296_v16, %v20533_v63 }
 0x8fa   : > { %2341 = vmax.xlane.f32.xlu0 %v16665_v23 }
 0x8fe   : > { %2345 = vmax.xlane.f32.xlu0 %v16669_v38 }
 0x912   : > { %2327 = vmax.xlane.f32.xlu1 %v2306_v58 }
 0x914   : > { %13595 = vrot.lane.b32.xlu0 %v16129_v27, %s15395_s0 }
 0x916   : > { %2331 = vmax.xlane.f32.xlu1 %v2308_v25 }
 0x91a   : > { %2335 = vmax.xlane.f32.xlu1 %v2310_v45 }
 0x91e   : > { %2339 = vmax.xlane.f32.xlu1 %v16678_v32 }
 0x922   : > { %2343 = vmax.xlane.f32.xlu1 %v16682_v55 }
 0x926   : > { %2347 = vmax.xlane.f32.xlu1 %v16686_v17 }
 0x96a   : > { %v2320_v57 = vpop.xlane.xlu1 %2319 }
 0x96b   : > { %v2350_v7 = vsub.f32 %v16631_v43, %v2320_v57  ;;  %v2318_v47 = vpop.xlane.xlu0 %2317 }
 0x96c   : > { %v2349_v14 = vsub.f32 %v16634_v50, %v2318_v47 }
 0x96d   : > { %v2367_v59 = vmul.f32 1.442695, %v2350_v7 }
 0x96e   : > { %v2365_v16 = vmul.f32 1.442695, %v2349_v14  ;;  %v16705_v52 = vpop.permute.xlu1 %13590 }
 0x96f   : > { %14136 = vpow2.f32 %v2367_v59  ;;  %v2324_v39 = vpop.xlane.xlu0 %2323 }
 0x970   : > { %14138 = vpow2.f32 %v2365_v16  ;;  %v2352_v7 = vsub.f32 %v16639_v44, %v2324_v39 }
 0x972   : > { %v2371_v11 = vmul.f32 1.442695, %v2352_v7 }
 0x973   : > { %v2322_v43 = vpop.xlane.xlu0 %2321 }
 0x974   : > { %v2351_v57 = vsub.f32 %v16643_v49, %v2322_v43 }
 0x976   : > { %v2369_v59 = vmul.f32 1.442695, %v2351_v57 }
 0x977   : > { %v2326_v50 = vpop.xlane.xlu0 %2325 }
 0x978   : > { %14140 = vpow2.f32 %v2369_v59  ;;  %v2353_v53 = vsub.f32 %v16647_v51, %v2326_v50 }
 0x979   : > { %v16695_v37 = vpop.eup %14136  ;;  %14142 = vpow2.f32 %v2371_v11 }
 0x97a   : > { %v16697_v63 = vpop.eup %14138  ;;  %2399 = vadd.xlane.f32.xlu0 %v16695_v37  ;;  %v2373_v43 = vmul.f32 1.442695, %v2353_v53 }
 0x97b   : > { %2397 = vadd.xlane.f32.xlu1 %v16697_v63  ;;  %v2330_v56 = vpop.xlane.xlu0 %2329 }
 0x97c   : > { %v2355_v4 = vsub.f32 %v16651_v9, %v2330_v56 }
 0x97e   : > { %v2377_v39 = vmul.f32 1.442695, %v2355_v4 }
 0x97f   : > { %v2334_v47 = vpop.xlane.xlu0 %2333 }
 0x980   : > { %v2357_v51 = vsub.f32 %v16657_v30, %v2334_v47 }
 0x982   : > { %v2381_v53 = vmul.f32 1.442695, %v2357_v51 }
 0x983   : > { %v2338_v61 = vpop.xlane.xlu0 %2337 }
 0x984   : > { %v2359_v44 = vsub.f32 %v16661_v21, %v2338_v61 }
 0x986   : > { %v2385_v7 = vmul.f32 1.442695, %v2359_v44 }
 0x98c   : > { %13600 = vrot.lane.b32.xlu1 %v16139_v33, %s15395_s0 }
 0x990   : > { %13605 = vrot.lane.b32.xlu0 %v16149_v54, %s15395_s0 }
 0x99f   : > { %v2328_v14 = vpop.xlane.xlu1 %2327 }
 0x9a0   : > { %v2354_v16 = vsub.f32 %v2306_v58, %v2328_v14 }
 0x9a2   : > { %v2375_v18 = vmul.f32 1.442695, %v2354_v16 }
 0x9a3   : > { %v2332_v29 = vpop.xlane.xlu1 %2331 }
 0x9a4   : > { %v2356_v40 = vsub.f32 %v2308_v25, %v2332_v29  ;;  %14144 = vpow2.f32 %v2375_v18  ;;  %v2342_v29 = vpop.xlane.xlu0 %2341  ;;  %v16713_v25 = vpop.eup %14140 }
 0x9a5   : > { %v16715_v9 = vpop.eup %14142 }
 0x9a6   : > { %v2379_v46 = vmul.f32 1.442695, %v2356_v40 }
 0x9a7   : > { %v2336_v49 = vpop.xlane.xlu1 %2335 }
 0x9a8   : > { %14146 = vpow2.f32 %v2379_v46  ;;  %v2358_v58 = vsub.f32 %v2310_v45, %v2336_v49  ;;  %v2361_v46 = vsub.f32 %v16665_v23, %v2342_v29  ;;  %v2346_v47 = vpop.xlane.xlu0 %2345 }
 0x9a9   : > { %14148 = vpow2.f32 %v2373_v43 }
 0x9aa   : > { %14150 = vpow2.f32 %v2377_v39  ;;  %v2383_v11 = vmul.f32 1.442695, %v2358_v58  ;;  %v2389_v50 = vmul.f32 1.442695, %v2361_v46  ;;  %v13583_v46 = vunpack.i.h.bf16 %v16689_v2 }
 0x9ab   : > { %v2340_v57 = vpop.xlane.xlu1 %2339  ;;  %14152 = vpow2.f32 %v2385_v7 }
 0x9ac   : > { %14154 = vpow2.f32 %v2383_v11  ;;  %v2360_v18 = vsub.f32 %v16678_v32, %v2340_v57  ;;  %v2363_v32 = vsub.f32 %v16669_v38, %v2346_v47  ;;  %v13596_v7 = vpop.permute.xlu0 %13595 }
 0x9ae   : > { %v16721_v61 = vpop.eup %14144  ;;  %v2387_v23 = vmul.f32 1.442695, %v2360_v18 }
 0x9af   : > { %v2344_v40 = vpop.xlane.xlu1 %2343  ;;  %2401 = vadd.xlane.f32.xlu0 %v16713_v25 }
 0x9b0   : > { %v2362_v4 = vsub.f32 %v16682_v55, %v2344_v40  ;;  %2403 = vadd.xlane.f32.xlu1 %v16715_v9 }
 0x9b2   : > { %v16724_v30 = vpop.eup %14146  ;;  %v2391_v21 = vmul.f32 1.442695, %v2362_v4  ;;  %v13582_v4 = vunpack.i.l.bf16 %v16689_v2  ;;  %v13593_v2 = vunpack.i.h.bf16 %v16705_v52 }
 0x9b3   : > { %v2348_v45 = vpop.xlane.xlu1 %2347  ;;  %2407 = vadd.xlane.f32.xlu0 %v16721_v61  ;;  %v16729_v56 = vpop.eup %14148 }
 0x9b4   : > { %14156 = vpow2.f32 %v2391_v21  ;;  %2411 = vadd.xlane.f32.xlu1 %v16724_v30  ;;  %v2364_v55 = vsub.f32 %v16686_v17, %v2348_v45  ;;  %v16731_v14 = vpop.eup %14150  ;;  %v2393_v17 = vmul.f32 1.442695, %v2363_v32  ;;  %v12592_v21 = vpack.c.bf16 %v13583_v46, %v13582_v4 }
 0x9b5   : > { %14158 = vpow2.f32 %v2381_v53  ;;  %v16736_v16 = vpop.eup %14152  ;;  %v13588_v45 = vunpack.i.h.bf16 %v16691_v35 }
 0x9b6   : > { %14160 = vpow2.f32 %v2389_v50  ;;  %v2395_v59 = vmul.f32 1.442695, %v2364_v55  ;;  %v16738_v49 = vpop.eup %14154  ;;  %v13587_v50 = vunpack.i.l.bf16 %v16691_v35  ;;  %v13597_v35 = vunpack.i.l.bf16 %v13596_v7 }
 0x9b7   : > { %2405 = vadd.xlane.f32.xlu0 %v16729_v56  ;;  %14162 = vpow2.f32 %v2387_v23 }
 0x9b8   : > { %2409 = vadd.xlane.f32.xlu1 %v16731_v14  ;;  %14164 = vpow2.f32 %v2395_v59  ;;  %v12598_v23 = vpack.c.bf16 %v13588_v45, %v13587_v50 }
 0x9b9   : > { %14166 = vpow2.f32 %v2393_v17 }
 0x9bb   : > { %2417 = vadd.xlane.f32.xlu0 %v16736_v16 }
 0x9bc   : > { %2415 = vadd.xlane.f32.xlu1 %v16738_v49 }
 0x9be   : > { %v16742_v43 = vpop.eup %14156 }
 0x9bf   : > { %v16744_v44 = vpop.eup %14158  ;;  %2423 = vadd.xlane.f32.xlu0 %v16742_v43 }
 0x9c0   : > { %2413 = vadd.xlane.f32.xlu1 %v16744_v44  ;;  %v16748_v38 = vpop.eup %14160 }
 0x9c1   : > { %v16750_v39 = vpop.eup %14162 }
 0x9c2   : > { %v16754_v58 = vpop.eup %14164 }
 0x9c3   : > { %2421 = vadd.xlane.f32.xlu0 %v16748_v38  ;;  %v16757_v57 = vpop.eup %14166 }
 0x9c4   : > { %2419 = vadd.xlane.f32.xlu1 %v16750_v39 }
 0x9c8   : > { %2427 = vadd.xlane.f32.xlu1 %v16754_v58 }
 0x9cc   : > { %2425 = vadd.xlane.f32.xlu1 %v16757_v57 }
 0x9d9   : > { %13610 = vrot.lane.b32.xlu0 %v16159_v42, %s15395_s0 }
 0x9dd   : > { %2654 = vrot.lane.b32.xlu0 %v16083_v60, %s20376_s3  ;;  %2656 = vrot.lane.b32.xlu1 %v16081_v26, %s20376_s3 }
 0x9e1   : > { %2658 = vrot.lane.b32.xlu0 %v16093_v3, %s20376_s3  ;;  %2660 = vrot.lane.b32.xlu1 %v16091_v1, %s20376_s3 }
 0x9e5   : > { %2662 = vrot.lane.b32.xlu0 %v16103_v10, %s20376_s3  ;;  %2664 = vrot.lane.b32.xlu1 %v16101_v6, %s20376_s3 }
 0x9e9   : > { %2666 = vrot.lane.b32.xlu0 %v16113_v15, %s20376_s3  ;;  %2668 = vrot.lane.b32.xlu1 %v16111_v13, %s20376_s3 }
 0x9ed   : > { %2670 = vrot.lane.b32.xlu0 %v16123_v24, %s20376_s3  ;;  %2672 = vrot.lane.b32.xlu1 %v16121_v22, %s20376_s3 }
 0x9f1   : > { %2674 = vrot.lane.b32.xlu0 %v16133_v31, %s20376_s3  ;;  %2676 = vrot.lane.b32.xlu1 %v16131_v28, %s20376_s3 }
 0x9f5   : > { %2678 = vrot.lane.b32.xlu0 %v16143_v36, %s20376_s3  ;;  %2680 = vrot.lane.b32.xlu1 %v16141_v34, %s20376_s3 }
 0x9f9   : > { %2682 = vrot.lane.b32.xlu0 %v16153_v41, %s20376_s3  ;;  %2684 = vrot.lane.b32.xlu1 %v16151_v62, %s20376_s3  ;;  %s20727_s3 = smov 8  }
 0x9fd   : > { %13615 = vrot.lane.b32.xlu0 %v16089_v0, %s20374_s30  ;;  %13620 = vrot.lane.b32.xlu1 %v16099_v5, %s20374_s30 }
 0xa01   : > { %13630 = vrot.lane.b32.xlu0 %v16119_v19, %s20374_s30  ;;  %13625 = vrot.lane.b32.xlu1 %v16109_v12, %s20374_s30 }
 0xa05   : > { %13635 = vrot.lane.b32.xlu0 %v16129_v27, %s20374_s30  ;;  %13640 = vrot.lane.b32.xlu1 %v16139_v33, %s20374_s30 }
 0xa07   : > { %v2400_v51 = vpop.xlane.xlu0 %2399 }
 0xa08   : > { %14168 = vrcp.f32 %v2400_v51  ;;  %v2398_v29 = vpop.xlane.xlu1 %2397 }
 0xa09   : > { %14170 = vrcp.f32 %v2398_v29  ;;  %13655 = vrot.lane.b32.xlu0 %v16089_v0, %s20372_s24  ;;  %13645 = vrot.lane.b32.xlu1 %v16149_v54, %s20374_s30 }
 0xa0b   : > { %v13606_v17 = vpop.permute.xlu0 %13605 }
 0xa0c   : > { %v13601_v47 = vpop.permute.xlu1 %13600  ;;  %v13608_v51 = vunpack.i.h.bf16 %v13606_v17 }
 0xa0d   : > { %13665 = vrot.lane.b32.xlu0 %v16109_v12, %s20372_s24  ;;  %13650 = vrot.lane.b32.xlu1 %v16159_v42, %s20374_s30  ;;  %v13603_v32 = vunpack.i.h.bf16 %v13601_v47  ;;  %v13602_v59 = vunpack.i.l.bf16 %v13601_v47  ;;  %s20730_s30 = smov 16  }
 0xa11   : > { %13660 = vrot.lane.b32.xlu1 %v16099_v5, %s20372_s24 }
 0xa12   : > { %v14169_v11 = vpop.eup %14168 }
 0xa13   : > { %v14171_v40 = vpop.eup %14170  ;;  %v2446_v18 = vmul.f32 %v14169_v11, %v16695_v37  ;;  %v13592_v37 = vunpack.i.l.bf16 %v16705_v52  ;;  %v12616_v52 = vpack.c.bf16 %v13603_v32, %v13602_v59 }
 0xa14   : > { %v2445_v53 = vmul.f32 %v14171_v40, %v16697_v63 }
 0xa15   : > { %v12604_v63 = vpack.c.bf16 %v13593_v2, %v13592_v37 }
 0xa16   : > { %11428 = vmatprep.mubr.f32.mxu0 %v2445_v53 }
 0xa17   : > { %11429 = vmatmul.mubr.f32.vlgmr.msra.gmra.mrb[24].mxu0 %v2446_v18 }
 0xa18   : > { %12591 = vmatpush3.bf16.xpose.msk.msra.mxu0 %vm16187_vm2, %v16593_v48  ;;  %v13598_v48 = vunpack.i.h.bf16 %v13596_v7  ;;  %v13607_v7 = vunpack.i.l.bf16 %v13606_v17 }
 0xa19   : > { %12594 = vmatprep.subr.msk.bf16.mxu0 %vm16187_vm2, %v12592_v21 }
 0xa1a   : > { %v12610_v55 = vpack.c.bf16 %v13598_v48, %v13597_v35  ;;  %v12622_v40 = vpack.c.bf16 %v13608_v51, %v13607_v7 }
 0xa20   : > { %12597 = vmatpush3.bf16.xpose.msk.msra.mxu0 %vm16187_vm2, %v12592_v21 }
 0xa21   : > { %12600 = vmatprep.subr.msk.bf16.mxu0 %vm16187_vm2, %v12598_v23 }
 0xa28   : > { %12603 = vmatpush3.bf16.xpose.msk.msra.mxu0 %vm16187_vm2, %v12598_v23 }
 0xa29   : > { %12606 = vmatprep.subr.msk.bf16.mxu0 %vm16187_vm2, %v12604_v63 }
 0xa30   : > { %12609 = vmatpush3.bf16.xpose.msk.msra.mxu0 %vm16187_vm2, %v12604_v63 }
 0xa31   : > { %12612 = vmatprep.subr.msk.bf16.mxu0 %vm16187_vm2, %v12610_v55 }
 0xa38   : > { %12615 = vmatpush3.bf16.xpose.msk.msra.mxu0 %vm16187_vm2, %v12610_v55 }
 0xa39   : > { %12618 = vmatprep.subr.msk.bf16.mxu0 %vm16187_vm2, %v12616_v52 }
 0xa3c   : > { %v2402_v29 = vpop.xlane.xlu0 %2401 }
 0xa3d   : > { %14172 = vrcp.f32 %v2402_v29  ;;  %v2404_v11 = vpop.xlane.xlu1 %2403 }
 0xa3e   : > { %14174 = vrcp.f32 %v2404_v11 }
 0xa40   : > { %12621 = vmatpush3.bf16.xpose.msk.msra.mxu0 %vm16187_vm2, %v12616_v52  ;;  %v2408_v46 = vpop.xlane.xlu0 %2407 }
 0xa41   : > { %12624 = vmatprep.subr.msk.bf16.mxu0 %vm16187_vm2, %v12622_v40  ;;  %v2412_v4 = vpop.xlane.xlu1 %2411  ;;  %14176 = vrcp.f32 %v2408_v46 }
 0xa44   : > { %v2406_v53 = vpop.xlane.xlu0 %2405 }
 0xa45   : > { %14178 = vrcp.f32 %v2406_v53  ;;  %v2410_v18 = vpop.xlane.xlu1 %2409 }
 0xa46   : > { %14180 = vrcp.f32 %v2410_v18 }
 0xa47   : > { %v14173_v21 = vpop.eup %14172  ;;  %14182 = vrcp.f32 %v2412_v4 }
 0xa48   : > { %v14175_v45 = vpop.eup %14174  ;;  %12627 = vmatpush3.bf16.xpose.msk.msra.mxu0 %vm16187_vm2, %v12622_v40  ;;  %v2418_v50 = vpop.xlane.xlu0 %2417  ;;  %v2447_v23 = vmul.f32 %v14173_v21, %v16713_v25 }
 0xa49   : > { %v2416_v2 = vpop.xlane.xlu1 %2415  ;;  %v2448_v37 = vmul.f32 %v14175_v45, %v16715_v9  ;;  %14184 = vrcp.f32 %v2418_v50 }
 0xa4a   : > { %11431 = vmatprep.mubr.f32.mxu0 %v2447_v23  ;;  %14186 = vrcp.f32 %v2416_v2 }
 0xa4b   : > { %11432 = vmatmul.mubr.f32.gmra.mrb[26].mxu0 %v2448_v37  ;;  %v14177_v35 = vpop.eup %14176 }
 0xa4c   : > { %v2424_v63 = vpop.xlane.xlu0 %2423  ;;  %v2450_v25 = vmul.f32 %v14177_v35, %v16721_v61 }
 0xa4d   : > { %v2414_v48 = vpop.xlane.xlu1 %2413 }
 0xa4e   : > { %14188 = vrcp.f32 %v2414_v48 }
 0xa4f   : > { %v14179_v55 = vpop.eup %14178 }
 0xa50   : > { %v14181_v47 = vpop.eup %14180  ;;  %v2422_v32 = vpop.xlane.xlu0 %2421  ;;  %v2449_v59 = vmul.f32 %v14179_v55, %v16729_v56 }
 0xa51   : > { %14190 = vrcp.f32 %v2422_v32  ;;  %v2420_v52 = vpop.xlane.xlu1 %2419  ;;  %v2451_v17 = vmul.f32 %v14181_v47, %v16731_v14  ;;  %v14183_v9 = vpop.eup %14182 }
 0xa52   : > { %14192 = vrcp.f32 %v2420_v52  ;;  %11434 = vmatprep.mubr.f32.mxu0 %v2449_v59  ;;  %v2452_v40 = vmul.f32 %v14183_v9, %v16724_v30 }
 0xa53   : > { %11435 = vmatmul.mubr.f32.gmra.mrb[28].mxu0 %v2450_v25  ;;  %14194 = vrcp.f32 %v2424_v63  ;;  %v14185_v46 = vpop.eup %14184 }
 0xa54   : > { %11437 = vmatprep.mubr.f32.mxu0 %v2451_v17  ;;  %v13611_v51 = vpop.permute.xlu0 %13610  ;;  %v14187_v56 = vpop.eup %14186  ;;  %v2455_v45 = vmul.f32 %v14185_v46, %v16736_v16 }
 0xa55   : > { %v13613_v7 = vunpack.i.h.bf16 %v13611_v51  ;;  %v13612_v29 = vunpack.i.l.bf16 %v13611_v51  ;;  %v2428_v11 = vpop.xlane.xlu1 %2427  ;;  %v2454_v21 = vmul.f32 %v14187_v56, %v16738_v49 }
 0xa56   : > { %14196 = vrcp.f32 %v2428_v11 }
 0xa57   : > { %v12628_v4 = vpack.c.bf16 %v13613_v7, %v13612_v29  ;;  %11438 = vmatmul.mubr.f32.gmra.mrb[30].mxu0 %v2452_v40 }
 0xa58   : > { %v14189_v53 = vpop.eup %14188  ;;  %v2655_v61 = vpop.permute.xlu0 %2654 }
 0xa59   : > { %v2426_v14 = vpop.xlane.xlu1 %2425  ;;  %12630 = vmatprep.subr.msk.bf16.mxu0 %vm16187_vm2, %v12628_v4  ;;  %v2453_v18 = vmul.f32 %v14189_v53, %v16744_v44 }
 0xa5a   : > { %14198 = vrcp.f32 %v2426_v14  ;;  %12633 = vmatpush3.bf16.xpose.msk.msra.mxu0 %vm16187_vm2, %v12628_v4 }
 0xa5b   : > { %v14191_v30 = vpop.eup %14190  ;;  %11440 = vmatprep.mubr.f32.mxu0 %v2453_v18 }
 0xa5c   : > { %v14193_v50 = vpop.eup %14192  ;;  %11441 = vmatmul.mubr.f32.gmra.mrb[32].mxu0 %v2454_v21  ;;  %v2659_v23 = vpop.permute.xlu0 %2658  ;;  %v2457_v44 = vmul.f32 %v14191_v30, %v16748_v38 }
 0xa5d   : > { %v2657_v2 = vpop.permute.xlu1 %2656  ;;  %11443 = vmatprep.mubr.f32.mxu0 %v2455_v45  ;;  %v2456_v37 = vmul.f32 %v14193_v50, %v16750_v39  ;;  %v14195_v63 = vpop.eup %14194 }
 0xa5e   : > { %v2458_v49 = vmul.f32 %v14195_v63, %v16742_v43 }
 0xa60   : > { %11444 = vmatmul.mubr.f32.gmra.mrb[34].mxu0 %v2456_v37  ;;  %v2663_v48 = vpop.permute.xlu0 %2662  ;;  %v14197_v55 = vpop.eup %14196 }
 0xa61   : > { %v2661_v35 = vpop.permute.xlu1 %2660  ;;  %11446 = vmatprep.mubr.f32.mxu0 %v2457_v44  ;;  %v2460_v52 = vmul.f32 %v14197_v55, %v16754_v58 }
 0xa64   : > { %v14199_v47 = vpop.eup %14198  ;;  %11447 = vmatmul.mubr.f32.gmra.mrb[36].mxu0 %v2458_v49  ;;  %v2667_v16 = vpop.permute.xlu0 %2666 }
 0xa65   : > { %v2665_v32 = vpop.permute.xlu1 %2664  ;;  %v2459_v59 = vmul.f32 %v14199_v47, %v16757_v57 }
 0xa67   : > { %11449 = vmatprep.mubr.f32.mxu0 %v2459_v59 }
 0xa68   : > { %11450 = vmatmul.mubr.f32.gmra.mrb[38].mxu0 %v2460_v52  ;;  %v2671_v39 = vpop.permute.xlu0 %2670 }
 0xa69   : > { %v2669_v25 = vpop.permute.xlu1 %2668  ;;  %11484 = vmatprep.mubr.msk.f32.mxu0 %vm1433_vm1, %v2655_v61 }
 0xa6c   : > { %v2675_v38 = vpop.permute.xlu0 %2674  ;;  %11485 = vmatmul.mubr.msk.f32.vlgmr.msra.gmra.mrb[40].mxu0 %vm1433_vm1, %v2657_v2 }
 0xa6d   : > { %v2673_v17 = vpop.permute.xlu1 %2672  ;;  %11487 = vmatprep.mubr.msk.f32.mxu0 %vm1433_vm1, %v2659_v23 }
 0xa70   : > { %v2679_v43 = vpop.permute.xlu0 %2678  ;;  %11488 = vmatmul.mubr.msk.f32.gmra.mrb[42].mxu0 %vm1433_vm1, %v2661_v35 }
 0xa71   : > { %v2677_v9 = vpop.permute.xlu1 %2676  ;;  %11490 = vmatprep.mubr.msk.f32.mxu0 %vm1433_vm1, %v2663_v48 }
 0xa74   : > { %v2683_v57 = vpop.permute.xlu0 %2682  ;;  %11491 = vmatmul.mubr.msk.f32.gmra.mrb[44].mxu0 %vm1433_vm1, %v2665_v32 }
 0xa75   : > { %v2681_v58 = vpop.permute.xlu1 %2680  ;;  %11493 = vmatprep.mubr.msk.f32.mxu0 %vm1433_vm1, %v2667_v16 }
 0xa78   : > { %v13616_v51 = vpop.permute.xlu0 %13615  ;;  %11494 = vmatmul.mubr.msk.f32.gmra.mrb[46].mxu0 %vm1433_vm1, %v2669_v25 }
 0xa79   : > { %v13618_v7 = vunpack.i.h.bf16 %v13616_v51  ;;  %v13617_v29 = vunpack.i.l.bf16 %v13616_v51  ;;  %v2685_v11 = vpop.permute.xlu1 %2684  ;;  %11496 = vmatprep.mubr.msk.f32.mxu0 %vm1433_vm1, %v2671_v39 }
 0xa7b   : > { %v12634_v40 = vpack.c.bf16 %v13618_v7, %v13617_v29 }
 0xa7c   : > { %11497 = vmatmul.mubr.msk.f32.gmra.mrb[48].mxu0 %vm1433_vm1, %v2673_v17  ;;  %v13631_v46 = vpop.permute.xlu0 %13630 }
 0xa7d   : > { %v13621_v56 = vpop.permute.xlu1 %13620  ;;  %11499 = vmatprep.mubr.msk.f32.mxu0 %vm1433_vm1, %v2675_v38  ;;  %12635 = vmatprep.subr.bf16.mxu1 %v12634_v40  ;;  %v13633_v18 = vunpack.i.h.bf16 %v13631_v46  ;;  %v13632_v21 = vunpack.i.l.bf16 %v13631_v46 }
 0xa7e   : > { %v13623_v4 = vunpack.i.h.bf16 %v13621_v56  ;;  %v13622_v53 = vunpack.i.l.bf16 %v13621_v56  ;;  %12637 = vmatpush3.bf16.msra.mxu1 %v12634_v40 }
 0xa7f   : > { %v12646_v44 = vpack.c.bf16 %v13633_v18, %v13632_v21 }
 0xa80   : > { %11500 = vmatmul.mubr.msk.f32.gmra.mrb[50].mxu0 %vm1433_vm1, %v2677_v9  ;;  %v12638_v61 = vpack.c.bf16 %v13623_v4, %v13622_v53  ;;  %v13636_v50 = vpop.permute.xlu0 %13635 }
 0xa81   : > { %v13626_v14 = vpop.permute.xlu1 %13625  ;;  %11502 = vmatprep.mubr.msk.f32.mxu0 %vm1433_vm1, %v2679_v43  ;;  %v13638_v37 = vunpack.i.h.bf16 %v13636_v50  ;;  %v13637_v63 = vunpack.i.l.bf16 %v13636_v50 }
 0xa82   : > { %v13628_v30 = vunpack.i.h.bf16 %v13626_v14  ;;  %v13627_v45 = vunpack.i.l.bf16 %v13626_v14  ;;  %12639 = vmatprep.subr.bf16.mxu1 %v12638_v61 }
 0xa83   : > { %12641 = vmatpush3.bf16.msra.mxu1 %v12638_v61  ;;  %v12650_v55 = vpack.c.bf16 %v13638_v37, %v13637_v63  ;;  %v16925_v63 = vld [vmem:[%s20489_s19 + $0x8] sm:$0xff] }
 0xa84   : > { %11503 = vmatmul.mubr.msk.f32.gmra.mrb[52].mxu0 %vm1433_vm1, %v2681_v58  ;;  %v12642_v23 = vpack.c.bf16 %v13628_v30, %v13627_v45  ;;  %v13656_v38 = vpop.permute.xlu0 %13655 }
 0xa85   : > { %v13641_v2 = vpop.permute.xlu1 %13640  ;;  %11505 = vmatprep.mubr.msk.f32.mxu0 %vm1433_vm1, %v2683_v57  ;;  %v13658_v17 = vunpack.i.h.bf16 %v13656_v38  ;;  %v13657_v43 = vunpack.i.l.bf16 %v13656_v38 }
 0xa86   : > { %12643 = vmatprep.subr.bf16.mxu1 %v12642_v23  ;;  %v13643_v35 = vunpack.i.h.bf16 %v13641_v2  ;;  %v13642_v49 = vunpack.i.l.bf16 %v13641_v2 }
 0xa87   : > { %12645 = vmatpush3.bf16.msra.mxu1 %v12642_v23  ;;  %v16885_v57 = vpack.c.bf16 %v13658_v17, %v13657_v43 }
 0xa88   : > { %11506 = vmatmul.mubr.msk.f32.gmra.mrb[54].mxu0 %vm1433_vm1, %v2685_v11  ;;  %12647 = vmatprep.subr.bf16.mxu1 %v12646_v44  ;;  %v12654_v32 = vpack.c.bf16 %v13643_v35, %v13642_v49 }
 0xa89   : > { %v13646_v48 = vpop.permute.xlu1 %13645 }
 0xa8a   : > { %v13648_v47 = vunpack.i.h.bf16 %v13646_v48  ;;  %v13647_v16 = vunpack.i.l.bf16 %v13646_v48  ;;  %v16933_v48 = vld [vmem:[%s20489_s19] sm:$0xff] }
 0xa8b   : > { %12649 = vmatpush3.bf16.msra.mxu1 %v12646_v44 }
 0xa8c   : > { %12651 = vmatprep.subr.bf16.mxu1 %v12650_v55  ;;  %v12658_v25 = vpack.c.bf16 %v13648_v47, %v13647_v16  ;;  %v16943_v16 = vld [vmem:[%s20489_s19 + $0x18] sm:$0xff] }
 0xa8d   : > { %v13651_v59 = vpop.permute.xlu1 %13650 }
 0xa8e   : > { %v13653_v52 = vunpack.i.h.bf16 %v13651_v59  ;;  %v13652_v39 = vunpack.i.l.bf16 %v13651_v59 }
 0xa8f   : > { %12653 = vmatpush3.bf16.msra.mxu1 %v12650_v55 }
 0xa90   : > { %12655 = vmatprep.subr.bf16.mxu1 %v12654_v32  ;;  %v12662_v9 = vpack.c.bf16 %v13653_v52, %v13652_v39 }
 0xa93   : > { %12657 = vmatpush3.bf16.msra.mxu1 %v12654_v32 }
 0xa94   : > { %12659 = vmatprep.subr.bf16.mxu1 %v12658_v25 }
 0xa97   : > { %12661 = vmatpush3.bf16.msra.mxu1 %v12658_v25  ;;  %v16952_v25 = vld [vmem:[%s20489_s19 + $0x10] sm:$0xff] }
 0xa98   : > { %12663 = vmatprep.subr.bf16.mxu1 %v12662_v9  ;;  %20552 = vst [vmem:[#allocation92_spill] sm:$0xff] %v16952_v25 }
 0xa9b   : > { %12665 = vmatpush3.bf16.msra.mxu1 %v12662_v9 }
 0xa9c   : > { %12668 = vmatprep.subr.msk.bf16.mxu1 %vm16187_vm2, %v16885_v57 }
 0xaea   : > { %v16890_v58 = vpop.f32.mrb[24].mxu0 }
 0xaeb   : > { %20536 = vst [vmem:[#allocation60_spill] sm:$0xff] %v16890_v58  ;;  %v16892_v51 = vpop.f32.mrb[25].mxu0 }
 0xaec   : > { %20537 = vst [vmem:[#allocation61_spill] sm:$0xff] %v16892_v51  ;;  %v17066_v51 = vpop.permute.xlu0 %13665 }
 0xb1e   : > { %v16894_v7 = vpop.f32.mrb[26].mxu0 }
 0xb1f   : > { %20538 = vst [vmem:[#allocation62_spill] sm:$0xff] %v16894_v7  ;;  %v16896_v29 = vpop.f32.mrb[27].mxu0  ;;  %v17049_v7 = vld [vmem:[%s20489_s19 + $0x68] sm:$0xff] }
 0xb20   : > { %20539 = vst [vmem:[#allocation63_spill] sm:$0xff] %v16896_v29  ;;  %20562 = vst [vmem:[#allocation102_spill] sm:$0xff] %v17049_v7  ;;  %v17058_v29 = vld [vmem:[%s20489_s19 + $0x78] sm:$0xff] }
 0xb21   : > { %20563 = vst [vmem:[#allocation103_spill] sm:$0xff] %v17058_v29 }
 0xb26   : > { %v16898_v11 = vpop.f32.mrb[28].mxu0 }
 0xb27   : > { %20540 = vst [vmem:[#allocation64_spill] sm:$0xff] %v16898_v11  ;;  %v16900_v40 = vpop.f32.mrb[29].mxu0 }
 0xb28   : > { %20541 = vst [vmem:[#allocation65_spill] sm:$0xff] %v16900_v40 }
 0xb2a   : > { %v16902_v46 = vpop.f32.mrb[30].mxu0 }
 0xb2b   : > { %20542 = vst [vmem:[#allocation66_spill] sm:$0xff] %v16902_v46  ;;  %v16904_v56 = vpop.f32.mrb[31].mxu0  ;;  %v17017_v46 = vld [vmem:[%s20489_s19 + $0x28] sm:$0xff] }
 0xb2c   : > { %20543 = vst [vmem:[#allocation67_spill] sm:$0xff] %v16904_v56  ;;  %v17023_v56 = vld [vmem:[%s20489_s19 + $0x38] sm:$0xff] }
 0xb2d   : > { %20559 = vst [vmem:[#allocation99_spill] sm:$0xff] %v17023_v56 }
 0xb2f   : > { %v16906_v4 = vpop.f32.mrb[32].mxu0 }
 0xb30   : > { %20544 = vst [vmem:[#allocation68_spill] sm:$0xff] %v16906_v4  ;;  %v16908_v53 = vpop.f32.mrb[33].mxu0 }
 0xb31   : > { %20545 = vst [vmem:[#allocation69_spill] sm:$0xff] %v16908_v53 }
 0xb33   : > { %v16910_v61 = vpop.f32.mrb[34].mxu0 }
 0xb34   : > { %20546 = vst [vmem:[#allocation70_spill] sm:$0xff] %v16910_v61  ;;  %v16912_v14 = vpop.f32.mrb[35].mxu0 }
 0xb35   : > { %20547 = vst [vmem:[#allocation71_spill] sm:$0xff] %v16912_v14 }
 0xb37   : > { %v16914_v18 = vpop.f32.mrb[36].mxu0 }
 0xb38   : > { %20548 = vst [vmem:[#allocation72_spill] sm:$0xff] %v16914_v18  ;;  %v16916_v21 = vpop.f32.mrb[37].mxu0 }
 0xb39   : > { %20549 = vst [vmem:[#allocation73_spill] sm:$0xff] %v16916_v21 }
 0xb3b   : > { %v16918_v30 = vpop.f32.mrb[38].mxu0 }
 0xb3c   : > { %20550 = vst [vmem:[#allocation74_spill] sm:$0xff] %v16918_v30  ;;  %v16920_v45 = vpop.f32.mrb[39].mxu0 }
 0xb3d   : > { %20551 = vst [vmem:[#allocation91_spill] sm:$0xff] %v16920_v45 }
 0xb3f   : > { %v11486_v50 = vpop.f32.mrb[40].mxu0 }
 0xb40   : > { %v2928_v23 = vmul.f32 0.35355338, %v11486_v50  ;;  %v2848_v2 = vpop.f32.mrb[41].mxu0  ;;  %v16961_v50 = vld [vmem:[%s20489_s19 + $0x20] sm:$0xff] }
 0xb41   : > { %v2927_v37 = vmul.f32 0.35355338, %v2848_v2  ;;  %20553 = vst [vmem:[#allocation93_spill] sm:$0xff] %v16961_v50 }
 0xb42   : > { %v16928_v44 = vadd.f32 %v16925_v63, %v2928_v23 }
 0xb43   : > { %v16936_v35 = vadd.f32 %v16933_v48, %v2927_v37  ;;  %v11489_v49 = vpop.f32.mrb[42].mxu0 }
 0xb44   : > { %v2930_v55 = vmul.f32 0.35355338, %v11489_v49  ;;  %2961 = vmax.xlane.f32.xlu1 %v16928_v44  ;;  %v2858_v47 = vpop.f32.mrb[43].mxu0 }
 0xb45   : > { %2959 = vmax.xlane.f32.xlu0 %v16936_v35  ;;  %v2929_v59 = vmul.f32 0.35355338, %v2858_v47 }
 0xb46   : > { %v16946_v32 = vadd.f32 %v16943_v16, %v2930_v55  ;;  %v16970_v55 = vld [vmem:[%s20489_s19 + $0x30] sm:$0xff] }
 0xb47   : > { %v11492_v52 = vpop.f32.mrb[44].mxu0  ;;  %v16955_v38 = vadd.f32 %v16952_v25, %v2929_v59  ;;  %20554 = vst [vmem:[#allocation94_spill] sm:$0xff] %v16970_v55 }
 0xb48   : > { %v2868_v39 = vpop.f32.mrb[45].mxu0  ;;  %v2932_v53 = vmul.f32 0.35355338, %v11492_v52  ;;  %v17031_v52 = vld [vmem:[%s20489_s19 + $0x48] sm:$0xff] }
 0xb49   : > { %2965 = vmax.xlane.f32.xlu0 %v16946_v32  ;;  %v2931_v17 = vmul.f32 0.35355338, %v2868_v39  ;;  %20560 = vst [vmem:[#allocation100_spill] sm:$0xff] %v17031_v52 }
 0xb4b   : > { %v11495_v43 = vpop.f32.mrb[46].mxu0  ;;  %v16964_v23 = vadd.f32 %v16961_v50, %v2931_v17  ;;  %v16981_v17 = vld [vmem:[%s20489_s19 + $0x40] sm:$0xff] }
 0xb4c   : > { %v2878_v9 = vpop.f32.mrb[47].mxu0  ;;  %20555 = vst [vmem:[#allocation95_spill] sm:$0xff] %v16981_v17 }
 0xb4d   : > { %2963 = vmax.xlane.f32.xlu0 %v16955_v38  ;;  %v2933_v2 = vmul.f32 0.35355338, %v2878_v9 }
 0xb4f   : > { %v11498_v37 = vpop.f32.mrb[48].mxu0  ;;  %v16973_v47 = vadd.f32 %v16970_v55, %v2933_v2 }
 0xb50   : > { %v2888_v49 = vpop.f32.mrb[49].mxu0  ;;  %v2936_v11 = vmul.f32 0.35355338, %v11498_v37 }
 0xb51   : > { %2967 = vmax.xlane.f32.xlu0 %v16964_v23  ;;  %v2935_v59 = vmul.f32 0.35355338, %v2888_v49  ;;  %v16990_v49 = vld [vmem:[%s20489_s19 + $0x50] sm:$0xff] }
 0xb52   : > { %20556 = vst [vmem:[#allocation96_spill] sm:$0xff] %v16990_v49 }
 0xb53   : > { %v11501_v39 = vpop.f32.mrb[50].mxu0  ;;  %v16984_v9 = vadd.f32 %v16981_v17, %v2935_v59 }
 0xb54   : > { %v2898_v20 = vpop.f32.mrb[51].mxu0 }
 0xb55   : > { %13670 = vrot.lane.b32.xlu1 %v16119_v19, %s20372_s24  ;;  %2971 = vmax.xlane.f32.xlu0 %v16973_v47  ;;  %v2937_v45 = vmul.f32 0.35355338, %v2898_v20  ;;  %v16999_v20 = vld [vmem:[%s20489_s19 + $0x60] sm:$0xff] }
 0xb56   : > { %20557 = vst [vmem:[#allocation97_spill] sm:$0xff] %v16999_v20 }
 0xb57   : > { %v11504_v30 = vpop.f32.mrb[52].mxu0  ;;  %v16993_v21 = vadd.f32 %v16990_v49, %v2937_v45  ;;  %v17008_v45 = vld [vmem:[%s20489_s19 + $0x70] sm:$0xff] }
 0xb58   : > { %v2908_v2 = vpop.f32.mrb[53].mxu0  ;;  %20558 = vst [vmem:[#allocation98_spill] sm:$0xff] %v17008_v45  ;;  %v2940_v40 = vmul.f32 0.35355338, %v11504_v30 }
 0xb59   : > { %2975 = vmax.xlane.f32.xlu0 %v16984_v9  ;;  %v2939_v18 = vmul.f32 0.35355338, %v2908_v2 }
 0xb5b   : > { %v11507_v14 = vpop.f32.mrb[54].mxu0  ;;  %v17002_v59 = vadd.f32 %v16999_v20, %v2939_v18  ;;  %v2934_v18 = vmul.f32 0.35355338, %v11495_v43  ;;  %v2938_v43 = vmul.f32 0.35355338, %v11501_v39 }
 0xb5c   : > { %v2918_v61 = vpop.f32.mrb[55].mxu0  ;;  %v2942_v39 = vmul.f32 0.35355338, %v11507_v14 }
 0xb5d   : > { %2979 = vmax.xlane.f32.xlu0 %v16993_v21  ;;  %v2941_v4 = vmul.f32 0.35355338, %v2918_v61  ;;  %v2948_v61 = vadd.f32 %v17017_v46, %v2932_v53  ;;  %v17034_v53 = vadd.f32 %v17031_v52, %v2936_v11  ;;  %v17052_v11 = vadd.f32 %v17049_v7, %v2940_v40 }
 0xb5e   : > { %v17061_v30 = vadd.f32 %v17058_v29, %v2942_v39 }
 0xb5f   : > { %v17011_v2 = vadd.f32 %v17008_v45, %v2941_v4  ;;  %v2950_v4 = vadd.f32 %v17023_v56, %v2934_v18  ;;  %v17040_v18 = vld [vmem:[%s20489_s19 + $0x58] sm:$0xff] }
 0xb60   : > { %20561 = vst [vmem:[#allocation101_spill] sm:$0xff] %v17040_v18  ;;  %v17043_v37 = vadd.f32 %v17040_v18, %v2938_v43  ;;  %v17064_v43 = vpop.permute.xlu1 %13660 }
 0xb61   : > { %2983 = vmax.xlane.f32.xlu0 %v17002_v59 }
 0xb65   : > { %2987 = vmax.xlane.f32.xlu0 %v17011_v2 }
 0xb79   : > { %2969 = vmax.xlane.f32.xlu1 %v2948_v61 }
 0xb7b   : > { %13675 = vrot.lane.b32.xlu0 %v16129_v27, %s20372_s24 }
 0xb7d   : > { %2973 = vmax.xlane.f32.xlu1 %v2950_v4 }
 0xb81   : > { %2977 = vmax.xlane.f32.xlu1 %v17034_v53 }
 0xb85   : > { %2981 = vmax.xlane.f32.xlu1 %v17043_v37 }
 0xb89   : > { %2985 = vmax.xlane.f32.xlu1 %v17052_v11 }
 0xb8d   : > { %2989 = vmax.xlane.f32.xlu1 %v17061_v30 }
 0xbd1   : > { %v2962_v58 = vpop.xlane.xlu1 %2961 }
 0xbd2   : > { %v2992_v40 = vsub.f32 %v16928_v44, %v2962_v58  ;;  %v2960_v14 = vpop.xlane.xlu0 %2959 }
 0xbd3   : > { %v2991_v45 = vsub.f32 %v16936_v35, %v2960_v14 }
 0xbd4   : > { %v3009_v20 = vmul.f32 1.442695, %v2992_v40 }
 0xbd5   : > { %v3007_v49 = vmul.f32 1.442695, %v2991_v45 }
 0xbd6   : > { %14200 = vpow2.f32 %v3009_v20  ;;  %v2966_v29 = vpop.xlane.xlu0 %2965  ;;  %v17080_v20 = vpop.permute.xlu1 %13670 }
 0xbd7   : > { %14202 = vpow2.f32 %v3007_v49  ;;  %v2994_v45 = vsub.f32 %v16946_v32, %v2966_v29 }
 0xbd9   : > { %v3013_v17 = vmul.f32 1.442695, %v2994_v45 }
 0xbda   : > { %v2964_v58 = vpop.xlane.xlu0 %2963 }
 0xbdb   : > { %v2993_v49 = vsub.f32 %v16955_v38, %v2964_v58 }
 0xbdd   : > { %v3011_v18 = vmul.f32 1.442695, %v2993_v49 }
 0xbde   : > { %v2968_v44 = vpop.xlane.xlu0 %2967 }
 0xbdf   : > { %14204 = vpow2.f32 %v3011_v18 }
 0xbe0   : > { %v17070_v7 = vpop.eup %14200  ;;  %14206 = vpow2.f32 %v3013_v17 }
 0xbe1   : > { %v17072_v39 = vpop.eup %14202  ;;  %3041 = vadd.xlane.f32.xlu0 %v17070_v7 }
 0xbe2   : > { %3039 = vadd.xlane.f32.xlu1 %v17072_v39  ;;  %v2972_v35 = vpop.xlane.xlu0 %2971 }
 0xbe6   : > { %v2976_v40 = vpop.xlane.xlu0 %2975 }
 0xbea   : > { %v2980_v56 = vpop.xlane.xlu0 %2979 }
 0xbeb   : > { %v3001_v29 = vsub.f32 %v16993_v21, %v2980_v56 }
 0xbed   : > { %v3027_v18 = vmul.f32 1.442695, %v3001_v29 }
 0xbee   : > { %v2984_v17 = vpop.xlane.xlu0 %2983 }
 0xbf2   : > { %v2988_v49 = vpop.xlane.xlu0 %2987 }
 0xbf3   : > { %13680 = vrot.lane.b32.xlu1 %v16139_v33, %s20372_s24  ;;  %v2995_v33 = vsub.f32 %v16964_v23, %v2968_v44  ;;  %v2999_v23 = vsub.f32 %v16984_v9, %v2976_v40 }
 0xbf5   : > { %v3015_v58 = vmul.f32 1.442695, %v2995_v33  ;;  %v3003_v33 = vsub.f32 %v17002_v59, %v2984_v17  ;;  %v3023_v21 = vmul.f32 1.442695, %v2999_v23 }
 0xbf7   : > { %13685 = vrot.lane.b32.xlu0 %v16149_v54, %s20372_s24  ;;  %v2997_v54 = vsub.f32 %v16973_v47, %v2972_v35  ;;  %v17089_v47 = vpop.eup %14204  ;;  %v3031_v44 = vmul.f32 1.442695, %v3003_v33 }
 0xbf9   : > { %v3019_v32 = vmul.f32 1.442695, %v2997_v54 }
 0xc06   : > { %v2970_v14 = vpop.xlane.xlu1 %2969 }
 0xc07   : > { %v2996_v27 = vsub.f32 %v2948_v61, %v2970_v14 }
 0xc09   : > { %v3017_v55 = vmul.f32 1.442695, %v2996_v27 }
 0xc0a   : > { %v2974_v52 = vpop.xlane.xlu1 %2973 }
 0xc0b   : > { %v2998_v50 = vsub.f32 %v2950_v4, %v2974_v52  ;;  %14208 = vpow2.f32 %v3017_v55 }
 0xc0d   : > { %v3021_v25 = vmul.f32 1.442695, %v2998_v50  ;;  %v17091_v50 = vpop.eup %14206 }
 0xc0e   : > { %v2978_v38 = vpop.xlane.xlu1 %2977 }
 0xc0f   : > { %14210 = vpow2.f32 %v3021_v25  ;;  %v3000_v61 = vsub.f32 %v17034_v53, %v2978_v38 }
 0xc10   : > { %14212 = vpow2.f32 %v3015_v58 }
 0xc11   : > { %14214 = vpow2.f32 %v3019_v32  ;;  %v3025_v4 = vmul.f32 1.442695, %v3000_v61 }
 0xc12   : > { %v2982_v27 = vpop.xlane.xlu1 %2981  ;;  %14216 = vpow2.f32 %v3027_v18 }
 0xc13   : > { %14218 = vpow2.f32 %v3025_v4  ;;  %v3002_v25 = vsub.f32 %v17043_v37, %v2982_v27  ;;  %v3005_v37 = vsub.f32 %v17011_v2, %v2988_v49 }
 0xc15   : > { %v17097_v56 = vpop.eup %14208  ;;  %v3029_v59 = vmul.f32 1.442695, %v3002_v25 }
 0xc16   : > { %v2986_v55 = vpop.xlane.xlu1 %2985  ;;  %3043 = vadd.xlane.f32.xlu0 %v17089_v47 }
 0xc17   : > { %v3004_v54 = vsub.f32 %v17052_v11, %v2986_v55  ;;  %3045 = vadd.xlane.f32.xlu1 %v17091_v50 }
 0xc19   : > { %v17100_v9 = vpop.eup %14210  ;;  %v3033_v52 = vmul.f32 1.442695, %v3004_v54 }
 0xc1a   : > { %v2990_v53 = vpop.xlane.xlu1 %2989  ;;  %3049 = vadd.xlane.f32.xlu0 %v17097_v56  ;;  %v17105_v35 = vpop.eup %14212 }
 0xc1b   : > { %14220 = vpow2.f32 %v3033_v52  ;;  %3053 = vadd.xlane.f32.xlu1 %v17100_v9  ;;  %v3006_v11 = vsub.f32 %v17061_v30, %v2990_v53  ;;  %v17107_v45 = vpop.eup %14214  ;;  %v3035_v30 = vmul.f32 1.442695, %v3005_v37 }
 0xc1c   : > { %14222 = vpow2.f32 %v3023_v21  ;;  %v17112_v14 = vpop.eup %14216 }
 0xc1d   : > { %14224 = vpow2.f32 %v3031_v44  ;;  %v3037_v40 = vmul.f32 1.442695, %v3006_v11  ;;  %v17114_v38 = vpop.eup %14218 }
 0xc1e   : > { %3047 = vadd.xlane.f32.xlu0 %v17105_v35  ;;  %14226 = vpow2.f32 %v3029_v59 }
 0xc1f   : > { %3051 = vadd.xlane.f32.xlu1 %v17107_v45  ;;  %14228 = vpow2.f32 %v3037_v40 }
 0xc20   : > { %14230 = vpow2.f32 %v3035_v30 }
 0xc22   : > { %3059 = vadd.xlane.f32.xlu0 %v17112_v14 }
 0xc23   : > { %3057 = vadd.xlane.f32.xlu1 %v17114_v38 }
 0xc25   : > { %v17118_v58 = vpop.eup %14220 }
 0xc26   : > { %v17120_v29 = vpop.eup %14222  ;;  %3065 = vadd.xlane.f32.xlu0 %v17118_v58 }
 0xc27   : > { %3055 = vadd.xlane.f32.xlu1 %v17120_v29  ;;  %v17124_v2 = vpop.eup %14224 }
 0xc28   : > { %v17126_v32 = vpop.eup %14226 }
 0xc29   : > { %v17130_v61 = vpop.eup %14228 }
 0xc2a   : > { %3063 = vadd.xlane.f32.xlu0 %v17124_v2  ;;  %v17133_v27 = vpop.eup %14230 }
 0xc2b   : > { %3061 = vadd.xlane.f32.xlu1 %v17126_v32 }
 0xc2f   : > { %3069 = vadd.xlane.f32.xlu1 %v17130_v61 }
 0xc33   : > { %3067 = vadd.xlane.f32.xlu1 %v17133_v27 }
 0xc40   : > { %13690 = vrot.lane.b32.xlu0 %v16159_v42, %s20372_s24  ;;  %s20780_s24 = sld [smem:[#allocation117_spill]] }
 0xc44   : > { %3296 = vrot.lane.b32.xlu0 %v16083_v60, %s20370_s27  ;;  %3298 = vrot.lane.b32.xlu1 %v16081_v26, %s20370_s27  ;;  %v13676_v26 = vpop.permute.xlu0 %13675 }
 0xc48   : > { %3300 = vrot.lane.b32.xlu0 %v16093_v3, %s20370_s27  ;;  %3302 = vrot.lane.b32.xlu1 %v16091_v1, %s20370_s27 }
 0xc4c   : > { %3304 = vrot.lane.b32.xlu0 %v16103_v10, %s20370_s27  ;;  %3306 = vrot.lane.b32.xlu1 %v16101_v6, %s20370_s27  ;;  %v13663_v10 = vunpack.i.h.bf16 %v17064_v43 }
 0xc50   : > { %3308 = vrot.lane.b32.xlu0 %v16113_v15, %s20370_s27  ;;  %3310 = vrot.lane.b32.xlu1 %v16111_v13, %s20370_s27  ;;  %v13668_v15 = vunpack.i.h.bf16 %v17066_v51 }
 0xc54   : > { %3312 = vrot.lane.b32.xlu0 %v16123_v24, %s20370_s27  ;;  %3314 = vrot.lane.b32.xlu1 %v16121_v22, %s20370_s27  ;;  %v13673_v24 = vunpack.i.h.bf16 %v17080_v20 }
 0xc58   : > { %3316 = vrot.lane.b32.xlu0 %v16133_v31, %s20370_s27  ;;  %3318 = vrot.lane.b32.xlu1 %v16131_v28, %s20370_s27  ;;  %v13672_v28 = vunpack.i.l.bf16 %v17080_v20 }
 0xc5a   : > { %v12684_v31 = vpack.c.bf16 %v13673_v24, %v13672_v28 }
 0xc5c   : > { %3320 = vrot.lane.b32.xlu0 %v16143_v36, %s20370_s27  ;;  %3322 = vrot.lane.b32.xlu1 %v16141_v34, %s20370_s27  ;;  %v13678_v34 = vunpack.i.h.bf16 %v13676_v26  ;;  %v13677_v36 = vunpack.i.l.bf16 %v13676_v26 }
 0xc60   : > { %3324 = vrot.lane.b32.xlu0 %v16153_v41, %s20370_s27  ;;  %3326 = vrot.lane.b32.xlu1 %v16151_v62, %s20370_s27  ;;  %v12690_v62 = vpack.c.bf16 %v13678_v34, %v13677_v36  ;;  %s20713_s27 = smov 104  }
 0xc64   : > { %13695 = vrot.lane.b32.xlu0 %v16089_v0, %s20368_s21  ;;  %13700 = vrot.lane.b32.xlu1 %v16099_v5, %s20368_s21  ;;  %v13662_v0 = vunpack.i.l.bf16 %v17064_v43 }
 0xc68   : > { %13705 = vrot.lane.b32.xlu0 %v16109_v12, %s20368_s21  ;;  %13710 = vrot.lane.b32.xlu1 %v16119_v19, %s20368_s21  ;;  %v12672_v12 = vpack.c.bf16 %v13663_v10, %v13662_v0  ;;  %v13667_v19 = vunpack.i.l.bf16 %v17066_v51 }
 0xc6a   : > { %v12678_v22 = vpack.c.bf16 %v13668_v15, %v13667_v19 }
 0xc6e   : > { %v3042_v60 = vpop.xlane.xlu0 %3041 }
 0xc6f   : > { %14232 = vrcp.f32 %v3042_v60  ;;  %v3040_v1 = vpop.xlane.xlu1 %3039 }
 0xc70   : > { %14234 = vrcp.f32 %v3040_v1 }
 0xc72   : > { %v13686_v43 = vpop.permute.xlu0 %13685 }
 0xc73   : > { %v13681_v41 = vpop.permute.xlu1 %13680  ;;  %v13687_v20 = vunpack.i.l.bf16 %v13686_v43 }
 0xc74   : > { %v13682_v51 = vunpack.i.l.bf16 %v13681_v41 }
 0xc79   : > { %v14233_v3 = vpop.eup %14232 }
 0xc7a   : > { %v14235_v6 = vpop.eup %14234  ;;  %v3088_v5 = vmul.f32 %v14233_v3, %v17070_v7 }
 0xc7b   : > { %v3087_v13 = vmul.f32 %v14235_v6, %v17072_v39  ;;  %v13688_v39 = vunpack.i.h.bf16 %v13686_v43 }
 0xc7d   : > { %11540 = vmatprep.mubr.f32.mxu1 %v3087_v13  ;;  %v12702_v17 = vpack.c.bf16 %v13688_v39, %v13687_v20 }
 0xc7e   : > { %11541 = vmatmul.mubr.f32.vlgmr.msra.gmra.mrb[48].mxu1 %v3088_v5 }
 0xc7f   : > { %12671 = vmatpush3.bf16.xpose.msk.msra.mxu1 %vm16187_vm2, %v16885_v57  ;;  %v13683_v57 = vunpack.i.h.bf16 %v13681_v41 }
 0xc80   : > { %12674 = vmatprep.subr.msk.bf16.mxu1 %vm16187_vm2, %v12672_v12 }
 0xc81   : > { %v12696_v7 = vpack.c.bf16 %v13683_v57, %v13682_v51 }
 0xc87   : > { %12677 = vmatpush3.bf16.xpose.msk.msra.mxu1 %vm16187_vm2, %v12672_v12 }
 0xc88   : > { %12680 = vmatprep.subr.msk.bf16.mxu1 %vm16187_vm2, %v12678_v22 }
 0xc8f   : > { %12683 = vmatpush3.bf16.xpose.msk.msra.mxu1 %vm16187_vm2, %v12678_v22 }
 0xc90   : > { %12686 = vmatprep.subr.msk.bf16.mxu1 %vm16187_vm2, %v12684_v31 }
 0xc97   : > { %12689 = vmatpush3.bf16.xpose.msk.msra.mxu1 %vm16187_vm2, %v12684_v31 }
 0xc98   : > { %12692 = vmatprep.subr.msk.bf16.mxu1 %vm16187_vm2, %v12690_v62 }
 0xc9f   : > { %12695 = vmatpush3.bf16.xpose.msk.msra.mxu1 %vm16187_vm2, %v12690_v62 }
 0xca0   : > { %12698 = vmatprep.subr.msk.bf16.mxu1 %vm16187_vm2, %v12696_v7 }
 0xca3   : > { %v3044_v18 = vpop.xlane.xlu0 %3043 }
 0xca4   : > { %14236 = vrcp.f32 %v3044_v18  ;;  %v3046_v23 = vpop.xlane.xlu1 %3045 }
 0xca5   : > { %14238 = vrcp.f32 %v3046_v23 }
 0xca7   : > { %12701 = vmatpush3.bf16.xpose.msk.msra.mxu1 %vm16187_vm2, %v12696_v7  ;;  %v3050_v4 = vpop.xlane.xlu0 %3049 }
 0xca8   : > { %12704 = vmatprep.subr.msk.bf16.mxu1 %vm16187_vm2, %v12702_v17  ;;  %v3054_v55 = vpop.xlane.xlu1 %3053  ;;  %14240 = vrcp.f32 %v3050_v4 }
 0xcab   : > { %v3048_v33 = vpop.xlane.xlu0 %3047 }
 0xcac   : > { %14242 = vrcp.f32 %v3048_v33  ;;  %v3052_v54 = vpop.xlane.xlu1 %3051 }
 0xcad   : > { %14244 = vrcp.f32 %v3052_v54 }
 0xcae   : > { %v14237_v21 = vpop.eup %14236  ;;  %14246 = vrcp.f32 %v3054_v55 }
 0xcaf   : > { %v14239_v25 = vpop.eup %14238  ;;  %12707 = vmatpush3.bf16.xpose.msk.msra.mxu1 %vm16187_vm2, %v12702_v17  ;;  %v3060_v52 = vpop.xlane.xlu0 %3059  ;;  %v3089_v53 = vmul.f32 %v14237_v21, %v17089_v47 }
 0xcb0   : > { %v3058_v44 = vpop.xlane.xlu1 %3057  ;;  %v3090_v59 = vmul.f32 %v14239_v25, %v17091_v50  ;;  %14248 = vrcp.f32 %v3060_v52 }
 0xcb1   : > { %11543 = vmatprep.mubr.f32.mxu1 %v3089_v53  ;;  %14250 = vrcp.f32 %v3058_v44 }
 0xcb2   : > { %11544 = vmatmul.mubr.f32.gmra.mrb[50].mxu1 %v3090_v59  ;;  %v14241_v37 = vpop.eup %14240 }
 0xcb3   : > { %v3066_v11 = vpop.xlane.xlu0 %3065  ;;  %v3092_v47 = vmul.f32 %v14241_v37, %v17097_v56 }
 0xcb4   : > { %v3056_v49 = vpop.xlane.xlu1 %3055 }
 0xcb5   : > { %14252 = vrcp.f32 %v3056_v49 }
 0xcb6   : > { %v14243_v40 = vpop.eup %14242 }
 0xcb7   : > { %v14245_v30 = vpop.eup %14244  ;;  %v3064_v26 = vpop.xlane.xlu0 %3063  ;;  %v3091_v60 = vmul.f32 %v14243_v40, %v17105_v35 }
 0xcb8   : > { %14254 = vrcp.f32 %v3064_v26  ;;  %v3062_v1 = vpop.xlane.xlu1 %3061  ;;  %v3093_v3 = vmul.f32 %v14245_v30, %v17107_v45  ;;  %v14247_v50 = vpop.eup %14246 }
 0xcb9   : > { %14256 = vrcp.f32 %v3062_v1  ;;  %11546 = vmatprep.mubr.f32.mxu1 %v3091_v60  ;;  %v3094_v5 = vmul.f32 %v14247_v50, %v17100_v9 }
 0xcba   : > { %11547 = vmatmul.mubr.f32.gmra.mrb[52].mxu1 %v3092_v47  ;;  %14258 = vrcp.f32 %v3066_v11  ;;  %v14249_v12 = vpop.eup %14248 }
 0xcbb   : > { %11549 = vmatprep.mubr.f32.mxu1 %v3093_v3  ;;  %v13691_v6 = vpop.permute.xlu0 %13690  ;;  %v14251_v35 = vpop.eup %14250  ;;  %v3097_v28 = vmul.f32 %v14249_v12, %v17112_v14 }
 0xcbc   : > { %v13693_v10 = vunpack.i.h.bf16 %v13691_v6  ;;  %v13692_v0 = vunpack.i.l.bf16 %v13691_v6  ;;  %v3070_v13 = vpop.xlane.xlu1 %3069  ;;  %v3096_v24 = vmul.f32 %v14251_v35, %v17114_v38 }
 0xcbd   : > { %14260 = vrcp.f32 %v3070_v13 }
 0xcbe   : > { %v12708_v15 = vpack.c.bf16 %v13693_v10, %v13692_v0  ;;  %11550 = vmatmul.mubr.f32.gmra.mrb[54].mxu1 %v3094_v5 }
 0xcbf   : > { %v14253_v19 = vpop.eup %14252  ;;  %v3297_v56 = vpop.permute.xlu0 %3296 }
 0xcc0   : > { %v3068_v45 = vpop.xlane.xlu1 %3067  ;;  %12710 = vmatprep.subr.msk.bf16.mxu1 %vm16187_vm2, %v12708_v15  ;;  %v3095_v22 = vmul.f32 %v14253_v19, %v17120_v29 }
 0xcc1   : > { %14262 = vrcp.f32 %v3068_v45  ;;  %12713 = vmatpush3.bf16.xpose.msk.msra.mxu1 %vm16187_vm2, %v12708_v15 }
 0xcc2   : > { %v14255_v9 = vpop.eup %14254  ;;  %11552 = vmatprep.mubr.f32.mxu1 %v3095_v22 }
 0xcc3   : > { %v14257_v31 = vpop.eup %14256  ;;  %11553 = vmatmul.mubr.f32.gmra.mrb[56].mxu1 %v3096_v24  ;;  %v3301_v34 = vpop.permute.xlu0 %3300  ;;  %v3099_v29 = vmul.f32 %v14255_v9, %v17124_v2 }
 0xcc4   : > { %v3299_v36 = vpop.permute.xlu1 %3298  ;;  %11555 = vmatprep.mubr.f32.mxu1 %v3097_v28  ;;  %v3098_v62 = vmul.f32 %v14257_v31, %v17126_v32  ;;  %v14259_v41 = vpop.eup %14258 }
 0xcc5   : > { %v3100_v38 = vmul.f32 %v14259_v41, %v17118_v58 }
 0xcc7   : > { %11556 = vmatmul.mubr.f32.gmra.mrb[58].mxu1 %v3098_v62  ;;  %v3305_v57 = vpop.permute.xlu0 %3304  ;;  %v14261_v7 = vpop.eup %14260 }
 0xcc8   : > { %v3303_v51 = vpop.permute.xlu1 %3302  ;;  %11558 = vmatprep.mubr.f32.mxu1 %v3099_v29  ;;  %v3102_v18 = vmul.f32 %v14261_v7, %v17130_v61 }
 0xccb   : > { %v14263_v43 = vpop.eup %14262  ;;  %11559 = vmatmul.mubr.f32.gmra.mrb[60].mxu1 %v3100_v38  ;;  %v3309_v14 = vpop.permute.xlu0 %3308 }
 0xccc   : > { %v3307_v39 = vpop.permute.xlu1 %3306  ;;  %v3101_v20 = vmul.f32 %v14263_v43, %v17133_v27 }
 0xcce   : > { %11561 = vmatprep.mubr.f32.mxu1 %v3101_v20 }
 0xccf   : > { %11562 = vmatmul.mubr.f32.gmra.mrb[62].mxu1 %v3102_v18  ;;  %v3313_v32 = vpop.permute.xlu0 %3312 }
 0xcd0   : > { %v3311_v23 = vpop.permute.xlu1 %3310  ;;  %11596 = vmatprep.mubr.msk.f32.mxu1 %vm1433_vm1, %v3297_v56 }
 0xcd3   : > { %v3317_v2 = vpop.permute.xlu0 %3316  ;;  %11597 = vmatmul.mubr.msk.f32.vlgmr.msra.gmra.mrb[64].mxu1 %vm1433_vm1, %v3299_v36 }
 0xcd4   : > { %v3315_v17 = vpop.permute.xlu1 %3314  ;;  %11599 = vmatprep.mubr.msk.f32.mxu1 %vm1433_vm1, %v3301_v34 }
 0xcd7   : > { %v3321_v58 = vpop.permute.xlu0 %3320  ;;  %11600 = vmatmul.mubr.msk.f32.gmra.mrb[66].mxu1 %vm1433_vm1, %v3303_v51 }
 0xcd8   : > { %v3319_v4 = vpop.permute.xlu1 %3318  ;;  %11602 = vmatprep.mubr.msk.f32.mxu1 %vm1433_vm1, %v3305_v57 }
 0xcdb   : > { %v3325_v27 = vpop.permute.xlu0 %3324  ;;  %11603 = vmatmul.mubr.msk.f32.gmra.mrb[68].mxu1 %vm1433_vm1, %v3307_v39 }
 0xcdc   : > { %v3323_v61 = vpop.permute.xlu1 %3322  ;;  %11605 = vmatprep.mubr.msk.f32.mxu1 %vm1433_vm1, %v3309_v14 }
 0xcdf   : > { %v13696_v55 = vpop.permute.xlu0 %13695  ;;  %11606 = vmatmul.mubr.msk.f32.gmra.mrb[70].mxu1 %vm1433_vm1, %v3311_v23 }
 0xce0   : > { %v13698_v33 = vunpack.i.h.bf16 %v13696_v55  ;;  %v13697_v54 = vunpack.i.l.bf16 %v13696_v55  ;;  %v3327_v21 = vpop.permute.xlu1 %3326  ;;  %11608 = vmatprep.mubr.msk.f32.mxu1 %vm1433_vm1, %v3313_v32  ;;  %v20567_v55 = vld [vmem:[#allocation100_spill] sm:$0xff] }
 0xce2   : > { %v12714_v25 = vpack.c.bf16 %v13698_v33, %v13697_v54  ;;  %v20568_v54 = vld [vmem:[#allocation94_spill] sm:$0xff] }
 0xce3   : > { %v13706_v52 = vpop.permute.xlu0 %13705  ;;  %11609 = vmatmul.mubr.msk.f32.gmra.mrb[72].mxu1 %vm1433_vm1, %v3315_v17  ;;  %v20566_v17 = vld [vmem:[#allocation93_spill] sm:$0xff] }
 0xce4   : > { %v13701_v53 = vpop.permute.xlu1 %13700  ;;  %11611 = vmatprep.mubr.msk.f32.mxu1 %vm1433_vm1, %v3317_v2  ;;  %12715 = vmatprep.subr.bf16.mxu0 %v12714_v25  ;;  %v13708_v44 = vunpack.i.h.bf16 %v13706_v52  ;;  %v13707_v59 = vunpack.i.l.bf16 %v13706_v52 }
 0xce5   : > { %v13703_v11 = vunpack.i.h.bf16 %v13701_v53  ;;  %v13702_v49 = vunpack.i.l.bf16 %v13701_v53  ;;  %13168 = vmatprep.subr.bf16.mxu1 %v12714_v25  ;;  %12717 = vmatpush3.bf16.msra.mxu0 %v12714_v25 }
 0xce6   : > { %13176 = vmatpush3.bf16.msra.mxu1 %v12714_v25  ;;  %v12722_v30 = vpack.c.bf16 %v13708_v44, %v13707_v59  ;;  %v20569_v44 = vld [vmem:[#allocation95_spill] sm:$0xff] }
 0xce7   : > { %v12718_v37 = vpack.c.bf16 %v13703_v11, %v13702_v49  ;;  %11612 = vmatmul.mubr.msk.f32.gmra.mrb[74].mxu1 %vm1433_vm1, %v3319_v4 }
 0xce8   : > { %v13711_v40 = vpop.permute.xlu1 %13710  ;;  %11614 = vmatprep.mubr.msk.f32.mxu1 %vm1433_vm1, %v3321_v58 }
 0xce9   : > { %v13713_v26 = vunpack.i.h.bf16 %v13711_v40  ;;  %v13712_v60 = vunpack.i.l.bf16 %v13711_v40  ;;  %12719 = vmatprep.subr.bf16.mxu0 %v12718_v37  ;;  %13169 = vmatprep.subr.bf16.mxu1 %v12718_v37 }
 0xcea   : > { %12721 = vmatpush3.bf16.msra.mxu0 %v12718_v37  ;;  %13177 = vmatpush3.bf16.msra.mxu1 %v12718_v37 }
 0xceb   : > { %11615 = vmatmul.mubr.msk.f32.gmra.mrb[76].mxu1 %vm1433_vm1, %v3323_v61  ;;  %12723 = vmatprep.subr.bf16.mxu0 %v12722_v30  ;;  %v12726_v1 = vpack.c.bf16 %v13713_v26, %v13712_v60  ;;  %v20571_v26 = vld [vmem:[#allocation57_spill] sm:$0xff] }
 0xcec   : > { %13170 = vmatprep.subr.bf16.mxu1 %v12722_v30  ;;  %11617 = vmatprep.mubr.msk.f32.mxu1 %vm1433_vm1, %v3325_v27 }
 0xcee   : > { %12725 = vmatpush3.bf16.msra.mxu0 %v12722_v30  ;;  %13178 = vmatpush3.bf16.msra.mxu1 %v12722_v30  ;;  %v20570_v30 = vld [vmem:[#allocation58_spill] sm:$0xff] }
 0xcef   : > { %11618 = vmatmul.mubr.msk.f32.gmra.mrb[78].mxu1 %vm1433_vm1, %v3327_v21  ;;  %12727 = vmatprep.subr.bf16.mxu0 %v12726_v1 }
 0xcf0   : > { %13171 = vmatprep.subr.bf16.mxu1 %v12726_v1 }
 0xcf2   : > { %12729 = vmatpush3.bf16.msra.mxu0 %v12726_v1  ;;  %13179 = vmatpush3.bf16.msra.mxu1 %v12726_v1  ;;  %v20572_v1 = vld [vmem:[#allocation101_spill] sm:$0xff] }
 0xd51   : > { %v17247_v47 = vpop.f32.mrb[48].mxu1 }
 0xd52   : > { %v17249_v3 = vpop.f32.mrb[49].mxu1 }
 0xd85   : > { %v17251_v50 = vpop.f32.mrb[50].mxu1 }
 0xd86   : > { %v17253_v6 = vpop.f32.mrb[51].mxu1 }
 0xd8d   : > { %v17255_v10 = vpop.f32.mrb[52].mxu1 }
 0xd8e   : > { %v17257_v0 = vpop.f32.mrb[53].mxu1 }
 0xd91   : > { %v17259_v13 = vpop.f32.mrb[54].mxu1 }
 0xd92   : > { %v17261_v5 = vpop.f32.mrb[55].mxu1 }
 0xd96   : > { %v17263_v12 = vpop.f32.mrb[56].mxu1 }
 0xd97   : > { %v17265_v35 = vpop.f32.mrb[57].mxu1 }
 0xd9a   : > { %v17267_v15 = vpop.f32.mrb[58].mxu1 }
 0xd9b   : > { %v17269_v19 = vpop.f32.mrb[59].mxu1 }
 0xd9e   : > { %v17271_v56 = vpop.f32.mrb[60].mxu1 }
 0xd9f   : > { %v17273_v45 = vpop.f32.mrb[61].mxu1 }
 0xda2   : > { %v17275_v22 = vpop.f32.mrb[62].mxu1 }
 0xda3   : > { %v17277_v24 = vpop.f32.mrb[63].mxu1 }
 0xda6   : > { %v11598_v9 = vpop.f32.mrb[64].mxu1 }
 0xda7   : > { %v3570_v28 = vmul.f32 0.35355338, %v11598_v9  ;;  %v3490_v31 = vpop.f32.mrb[65].mxu1 }
 0xda8   : > { %v3569_v34 = vmul.f32 0.35355338, %v3490_v31 }
 0xda9   : > { %v17280_v36 = vadd.f32 %v16925_v63, %v3570_v28 }
 0xdaa   : > { %v17283_v62 = vadd.f32 %v16933_v48, %v3569_v34  ;;  %v11601_v41 = vpop.f32.mrb[66].mxu1  ;;  %v20564_v48 = vld [vmem:[#allocation92_spill] sm:$0xff]  ;;  %v20573_v34 = vld [vmem:[#allocation102_spill] sm:$0xff] }
 0xdab   : > { %v3572_v29 = vmul.f32 0.35355338, %v11601_v41  ;;  %3603 = vmax.xlane.f32.xlu1 %v17280_v36  ;;  %v3500_v57 = vpop.f32.mrb[67].mxu1 }
 0xdac   : > { %3601 = vmax.xlane.f32.xlu0 %v17283_v62  ;;  %v3571_v38 = vmul.f32 0.35355338, %v3500_v57  ;;  %v20574_v57 = vld [vmem:[#allocation96_spill] sm:$0xff] }
 0xdad   : > { %v17288_v51 = vadd.f32 %v16943_v16, %v3572_v29  ;;  %v20565_v16 = vld [vmem:[#allocation99_spill] sm:$0xff] }
 0xdae   : > { %v11604_v7 = vpop.f32.mrb[68].mxu1  ;;  %v17295_v39 = vadd.f32 %v20564_v48, %v3571_v38  ;;  %v20576_v48 = vld [vmem:[#allocation97_spill] sm:$0xff] }
 0xdaf   : > { %v3574_v43 = vmul.f32 0.35355338, %v11604_v7  ;;  %v3510_v14 = vpop.f32.mrb[69].mxu1 }
 0xdb0   : > { %3607 = vmax.xlane.f32.xlu0 %v17288_v51  ;;  %v3573_v20 = vmul.f32 0.35355338, %v3510_v14 }
 0xdb1   : > { %v17292_v63 = vadd.f32 %v17017_v46, %v3574_v43  ;;  %v20575_v43 = vld [vmem:[#allocation103_spill] sm:$0xff] }
 0xdb2   : > { %v11607_v18 = vpop.f32.mrb[70].mxu1  ;;  %v17303_v58 = vadd.f32 %v20566_v17, %v3573_v20 }
 0xdb3   : > { %v3576_v32 = vmul.f32 0.35355338, %v11607_v18  ;;  %3611 = vmax.xlane.f32.xlu1 %v17292_v63  ;;  %v3520_v23 = vpop.f32.mrb[71].mxu1 }
 0xdb4   : > { %3605 = vmax.xlane.f32.xlu0 %v17295_v39  ;;  %v3575_v4 = vmul.f32 0.35355338, %v3520_v23 }
 0xdb5   : > { %v17300_v2 = vadd.f32 %v20565_v16, %v3576_v32  ;;  %v20577_v32 = vld [vmem:[#allocation98_spill] sm:$0xff] }
 0xdb6   : > { %v11610_v46 = vpop.f32.mrb[72].mxu1  ;;  %v17311_v21 = vadd.f32 %v20568_v54, %v3575_v4 }
 0xdb7   : > { %v3578_v27 = vmul.f32 0.35355338, %v11610_v46  ;;  %3615 = vmax.xlane.f32.xlu1 %v17300_v2  ;;  %v3530_v61 = vpop.f32.mrb[73].mxu1 }
 0xdb8   : > { %3609 = vmax.xlane.f32.xlu0 %v17303_v58  ;;  %v3577_v25 = vmul.f32 0.35355338, %v3530_v61 }
 0xdb9   : > { %v17308_v33 = vadd.f32 %v20567_v55, %v3578_v27 }
 0xdba   : > { %v11613_v52 = vpop.f32.mrb[74].mxu1  ;;  %v17316_v59 = vadd.f32 %v20569_v44, %v3577_v25 }
 0xdbb   : > { %3619 = vmax.xlane.f32.xlu1 %v17308_v33  ;;  %v3540_v53 = vpop.f32.mrb[75].mxu1  ;;  %v3580_v60 = vmul.f32 0.35355338, %v11613_v52 }
 0xdbc   : > { %3613 = vmax.xlane.f32.xlu0 %v17311_v21  ;;  %v3579_v31 = vmul.f32 0.35355338, %v3540_v53 }
 0xdbd   : > { %v17324_v9 = vadd.f32 %v20572_v1, %v3580_v60 }
 0xdbe   : > { %v11616_v11 = vpop.f32.mrb[76].mxu1  ;;  %v17331_v38 = vadd.f32 %v20574_v57, %v3579_v31 }
 0xdbf   : > { %v3550_v49 = vpop.f32.mrb[77].mxu1  ;;  %v3582_v28 = vmul.f32 0.35355338, %v11616_v11 }
 0xdc0   : > { %3617 = vmax.xlane.f32.xlu0 %v17316_v59  ;;  %v3581_v7 = vmul.f32 0.35355338, %v3550_v49 }
 0xdc1   : > { %v17328_v41 = vadd.f32 %v20573_v34, %v3582_v28 }
 0xdc2   : > { %v11619_v37 = vpop.f32.mrb[78].mxu1  ;;  %v17339_v20 = vadd.f32 %v20576_v48, %v3581_v7 }
 0xdc3   : > { %v3560_v40 = vpop.f32.mrb[79].mxu1  ;;  %v3584_v29 = vmul.f32 0.35355338, %v11619_v37 }
 0xdc4   : > { %v3583_v18 = vmul.f32 0.35355338, %v3560_v40 }
 0xdc5   : > { %v17336_v14 = vadd.f32 %v20575_v43, %v3584_v29 }
 0xdc6   : > { %v17344_v23 = vadd.f32 %v20577_v32, %v3583_v18 }
 0xdcc   : > { %13720 = vrot.lane.b32.xlu1 %v20570_v30, %s20368_s21 }
 0xdd6   : > { %13715 = vrot.lane.b32.xlu0 %v20571_v26, %s20368_s21 }
 0xdf0   : > { %3623 = vmax.xlane.f32.xlu1 %v17324_v9 }
 0xdf4   : > { %3627 = vmax.xlane.f32.xlu1 %v17328_v41 }
 0xdf5   : > { %3621 = vmax.xlane.f32.xlu0 %v17331_v38 }
 0xdf8   : > { %3631 = vmax.xlane.f32.xlu1 %v17336_v14 }
 0xdf9   : > { %3625 = vmax.xlane.f32.xlu0 %v17339_v20 }
 0xdfd   : > { %3629 = vmax.xlane.f32.xlu0 %v17344_v23 }
 0xe38   : > { %v3604_v16 = vpop.xlane.xlu1 %3603 }
 0xe39   : > { %v3634_v17 = vsub.f32 %v17280_v36, %v3604_v16  ;;  %v3602_v4 = vpop.xlane.xlu0 %3601  ;;  %v20578_v16 = vld [vmem:[#allocation59_spill] sm:$0xff] }
 0xe3a   : > { %v3633_v46 = vsub.f32 %v17283_v62, %v3602_v4 }
 0xe3b   : > { %v3651_v27 = vmul.f32 1.442695, %v3634_v17 }
 0xe3c   : > { %v3649_v61 = vmul.f32 1.442695, %v3633_v46 }
 0xe3d   : > { %14264 = vpow2.f32 %v3651_v27  ;;  %v3608_v55 = vpop.xlane.xlu0 %3607 }
 0xe3e   : > { %14266 = vpow2.f32 %v3649_v61  ;;  %v3636_v54 = vsub.f32 %v17288_v51, %v3608_v55 }
 0xe40   : > { %v3655_v25 = vmul.f32 1.442695, %v3636_v54  ;;  %v3612_v52 = vpop.xlane.xlu1 %3611 }
 0xe41   : > { %v3638_v53 = vsub.f32 %v17292_v63, %v3612_v52  ;;  %v3606_v44 = vpop.xlane.xlu0 %3605 }
 0xe42   : > { %14268 = vpow2.f32 %v3655_v25  ;;  %v3635_v11 = vsub.f32 %v17295_v39, %v3606_v44 }
 0xe43   : > { %v3659_v49 = vmul.f32 1.442695, %v3638_v53 }
 0xe44   : > { %v3653_v36 = vmul.f32 1.442695, %v3635_v11  ;;  %v3616_v37 = vpop.xlane.xlu1 %3615 }
 0xe45   : > { %14270 = vpow2.f32 %v3659_v49  ;;  %v3610_v62 = vpop.xlane.xlu0 %3609  ;;  %v3640_v17 = vsub.f32 %v17300_v2, %v3616_v37 }
 0xe46   : > { %14272 = vpow2.f32 %v3653_v36  ;;  %v3637_v40 = vsub.f32 %v17303_v58, %v3610_v62 }
 0xe47   : > { %v17353_v30 = vpop.eup %14264  ;;  %v3663_v46 = vmul.f32 1.442695, %v3640_v17 }
 0xe48   : > { %v17355_v26 = vpop.eup %14266  ;;  %v3657_v51 = vmul.f32 1.442695, %v3637_v40  ;;  %3683 = vadd.xlane.f32.xlu0 %v17353_v30  ;;  %v3620_v63 = vpop.xlane.xlu1 %3619 }
 0xe49   : > { %v3614_v60 = vpop.xlane.xlu0 %3613  ;;  %3681 = vadd.xlane.f32.xlu1 %v17355_v26  ;;  %v3642_v55 = vsub.f32 %v17308_v33, %v3620_v63 }
 0xe4a   : > { %14274 = vpow2.f32 %v3657_v51  ;;  %v3639_v4 = vsub.f32 %v17311_v21, %v3614_v60 }
 0xe4b   : > { %14276 = vpow2.f32 %v3663_v46 }
 0xe4c   : > { %v17359_v39 = vpop.eup %14268  ;;  %v13721_v58 = vpop.permute.xlu1 %13720  ;;  %v3661_v61 = vmul.f32 1.442695, %v3639_v4 }
 0xe4d   : > { %v3618_v1 = vpop.xlane.xlu0 %3617  ;;  %3687 = vadd.xlane.f32.xlu0 %v17359_v39  ;;  %v13723_v29 = vunpack.i.h.bf16 %v13721_v58  ;;  %v13722_v57 = vunpack.i.l.bf16 %v13721_v58 }
 0xe4e   : > { %v3641_v27 = vsub.f32 %v17316_v59, %v3618_v1  ;;  %14278 = vpow2.f32 %v3661_v61 }
 0xe4f   : > { %v17362_v28 = vpop.eup %14270  ;;  %v12734_v32 = vpack.c.bf16 %v13723_v29, %v13722_v57 }
 0xe50   : > { %v17364_v31 = vpop.eup %14272  ;;  %v3665_v54 = vmul.f32 1.442695, %v3641_v27 }
 0xe51   : > { %v13716_v34 = vpop.permute.xlu0 %13715  ;;  %3685 = vadd.xlane.f32.xlu1 %v17364_v31  ;;  %3691 = vadd.xlane.f32.xlu0 %v17362_v28 }
 0xe52   : > { %v13718_v7 = vunpack.i.h.bf16 %v13716_v34  ;;  %v13717_v43 = vunpack.i.l.bf16 %v13716_v34  ;;  %14280 = vpow2.f32 %v3665_v54 }
 0xe54   : > { %v17368_v48 = vpop.eup %14274  ;;  %v12730_v18 = vpack.c.bf16 %v13718_v7, %v13717_v43  ;;  %v20579_v7 = vld [vmem:[#allocation60_spill] sm:$0xff]  ;;  %v20580_v43 = vld [vmem:[#allocation61_spill] sm:$0xff] }
 0xe55   : > { %3689 = vadd.xlane.f32.xlu1 %v17368_v48  ;;  %v17382_v59 = vpop.eup %14276 }
 0xe56   : > { %12731 = vmatprep.subr.bf16.mxu0 %v12730_v18  ;;  %13172 = vmatprep.subr.bf16.mxu1 %v12730_v18 }
 0xe57   : > { %12733 = vmatpush3.bf16.msra.mxu0 %v12730_v18  ;;  %13180 = vmatpush3.bf16.msra.mxu1 %v12730_v18  ;;  %v20581_v18 = vld [vmem:[#allocation63_spill] sm:$0xff] }
 0xe58   : > { %12735 = vmatprep.subr.bf16.mxu0 %v12734_v32  ;;  %13173 = vmatprep.subr.bf16.mxu1 %v12734_v32  ;;  %v17387_v40 = vpop.eup %14278 }
 0xe5b   : > { %12737 = vmatpush3.bf16.msra.mxu0 %v12734_v32  ;;  %13181 = vmatpush3.bf16.msra.mxu1 %v12734_v32  ;;  %v20582_v32 = vld [vmem:[#allocation62_spill] sm:$0xff] }
 0xe66   : > { %13730 = vrot.lane.b32.xlu1 %v16159_v42, %s20368_s21  ;;  %v3667_v42 = vmul.f32 1.442695, %v3642_v55 }
 0xe67   : > { %13725 = vrot.lane.b32.xlu0 %v20578_v16, %s20368_s21  ;;  %v20584_v16 = vld [vmem:[#allocation64_spill] sm:$0xff] }
 0xe68   : > { %14282 = vpow2.f32 %v3667_v42 }
 0xe7d   : > { %v3624_v25 = vpop.xlane.xlu1 %3623 }
 0xe7e   : > { %v3644_v52 = vsub.f32 %v17324_v9, %v3624_v25 }
 0xe80   : > { %v3671_v44 = vmul.f32 1.442695, %v3644_v52 }
 0xe81   : > { %v3628_v53 = vpop.xlane.xlu1 %3627 }
 0xe82   : > { %v3646_v2 = vsub.f32 %v17328_v41, %v3628_v53  ;;  %v3622_v11 = vpop.xlane.xlu0 %3621  ;;  %14284 = vpow2.f32 %v3671_v44  ;;  %v17389_v41 = vpop.eup %14280 }
 0xe83   : > { %v3643_v21 = vsub.f32 %v17331_v38, %v3622_v11  ;;  %v17394_v60 = vpop.eup %14282 }
 0xe84   : > { %v3675_v33 = vmul.f32 1.442695, %v3646_v2 }
 0xe85   : > { %v3669_v49 = vmul.f32 1.442695, %v3643_v21  ;;  %v3632_v36 = vpop.xlane.xlu1 %3631 }
 0xe86   : > { %v3648_v37 = vsub.f32 %v17336_v14, %v3632_v36  ;;  %v3626_v62 = vpop.xlane.xlu0 %3625  ;;  %3695 = vadd.xlane.f32.xlu0 %v17382_v59 }
 0xe87   : > { %14286 = vpow2.f32 %v3669_v49  ;;  %v3645_v9 = vsub.f32 %v17339_v20, %v3626_v62 }
 0xe88   : > { %14288 = vpow2.f32 %v3675_v33  ;;  %v3679_v38 = vmul.f32 1.442695, %v3648_v37 }
 0xe89   : > { %v3673_v51 = vmul.f32 1.442695, %v3645_v9 }
 0xe8a   : > { %3693 = vadd.xlane.f32.xlu1 %v17387_v40  ;;  %3697 = vadd.xlane.f32.xlu0 %v17389_v41  ;;  %v3630_v63 = vpop.xlane.xlu0 %3629 }
 0xe8b   : > { %14290 = vpow2.f32 %v3673_v51  ;;  %v3647_v14 = vsub.f32 %v17344_v23, %v3630_v63 }
 0xe8c   : > { %14292 = vpow2.f32 %v3679_v38  ;;  %v17397_v20 = vpop.eup %14284 }
 0xe8d   : > { %v3677_v1 = vmul.f32 1.442695, %v3647_v14 }
 0xe8e   : > { %3699 = vadd.xlane.f32.xlu1 %v17394_v60 }
 0xe8f   : > { %14294 = vpow2.f32 %v3677_v1 }
 0xe91   : > { %v17399_v58 = vpop.eup %14286 }
 0xe92   : > { %3703 = vadd.xlane.f32.xlu1 %v17397_v20  ;;  %3701 = vadd.xlane.f32.xlu0 %v17399_v58  ;;  %v17403_v34 = vpop.eup %14288 }
 0xe95   : > { %v17405_v29 = vpop.eup %14290 }
 0xe96   : > { %3707 = vadd.xlane.f32.xlu1 %v17403_v34  ;;  %3705 = vadd.xlane.f32.xlu0 %v17405_v29  ;;  %v17409_v23 = vpop.eup %14292 }
 0xe99   : > { %v17411_v57 = vpop.eup %14294 }
 0xe9a   : > { %3711 = vadd.xlane.f32.xlu1 %v17409_v23  ;;  %3709 = vadd.xlane.f32.xlu0 %v17411_v57 }
 0xeab   : > { %3956 = vrot.lane.b32.xlu1 %v20579_v7, %s20366_s23 }
 0xeaf   : > { %4018 = vrot.lane.b32.xlu1 %v17249_v3, %s20364_s4  ;;  %v20583_v3 = vld [vmem:[#allocation65_spill] sm:$0xff] }
 0xeb0   : > { %3954 = vrot.lane.b32.xlu0 %v20580_v43, %s20366_s23 }
 0xeb3   : > { %4020 = vrot.lane.b32.xlu1 %v17247_v47, %s20364_s4  ;;  %v20585_v47 = vld [vmem:[#allocation67_spill] sm:$0xff] }
 0xeb4   : > { %3958 = vrot.lane.b32.xlu0 %v20581_v18, %s20366_s23 }
 0xeb7   : > { %3960 = vrot.lane.b32.xlu1 %v20582_v32, %s20366_s23 }
 0xeb8   : > { %4022 = vrot.lane.b32.xlu0 %v17253_v6, %s20364_s4  ;;  %v20586_v6 = vld [vmem:[#allocation66_spill] sm:$0xff] }
 0xebb   : > { %4024 = vrot.lane.b32.xlu1 %v17251_v50, %s20364_s4  ;;  %v20587_v50 = vld [vmem:[#allocation69_spill] sm:$0xff] }
 0xebc   : > { %3962 = vrot.lane.b32.xlu0 %v20583_v3, %s20366_s23 }
 0xebf   : > { %3964 = vrot.lane.b32.xlu1 %v20584_v16, %s20366_s23 }
 0xec0   : > { %4026 = vrot.lane.b32.xlu0 %v17257_v0, %s20364_s4  ;;  %v20588_v0 = vld [vmem:[#allocation68_spill] sm:$0xff] }
 0xec3   : > { %4028 = vrot.lane.b32.xlu1 %v17255_v10, %s20364_s4 }
 0xec4   : > { %3966 = vrot.lane.b32.xlu0 %v20585_v47, %s20366_s23 }
 0xec7   : > { %3968 = vrot.lane.b32.xlu1 %v20586_v6, %s20366_s23 }
 0xec8   : > { %4030 = vrot.lane.b32.xlu0 %v17261_v5, %s20364_s4 }
 0xecb   : > { %4032 = vrot.lane.b32.xlu1 %v17259_v13, %s20364_s4 }
 0xecc   : > { %3970 = vrot.lane.b32.xlu0 %v20587_v50, %s20366_s23 }
 0xecf   : > { %3972 = vrot.lane.b32.xlu1 %v20588_v0, %s20366_s23 }
 0xed5   : > { %v3684_v17 = vpop.xlane.xlu0 %3683 }
 0xed6   : > { %v3682_v10 = vpop.xlane.xlu1 %3681 }
 0xed7   : > { %14296 = vrcp.f32 %v3682_v10 }
 0xed8   : > { %14298 = vrcp.f32 %v3684_v17 }
 0xeda   : > { %v3688_v4 = vpop.xlane.xlu0 %3687 }
 0xede   : > { %v3686_v46 = vpop.xlane.xlu1 %3685  ;;  %v3692_v27 = vpop.xlane.xlu0 %3691 }
 0xedf   : > { %14300 = vrcp.f32 %v3686_v46 }
 0xee0   : > { %14302 = vrcp.f32 %v3688_v4 }
 0xee1   : > { %v14297_v61 = vpop.eup %14296 }
 0xee2   : > { %v3690_v55 = vpop.xlane.xlu1 %3689  ;;  %v13726_v5 = vpop.permute.xlu0 %13725  ;;  %v3729_v54 = vmul.f32 %v14297_v61, %v17355_v26 }
 0xee3   : > { %v13728_v13 = vunpack.i.h.bf16 %v13726_v5  ;;  %v13727_v25 = vunpack.i.l.bf16 %v13726_v5  ;;  %14304 = vrcp.f32 %v3690_v55  ;;  %v14299_v11 = vpop.eup %14298  ;;  %v4182_v5 = vld [vmem:[#allocation14 + $0x10] sm:$0xff] }
 0xee4   : > { %11652 = vmatprep.mubr.f32.mxu0 %v3729_v54  ;;  %14306 = vrcp.f32 %v3692_v27  ;;  %v3730_v26 = vmul.f32 %v14299_v11, %v17353_v30 }
 0xee5   : > { %v12738_v52 = vpack.c.bf16 %v13728_v13, %v13727_v25  ;;  %v4183_v13 = vld [vmem:[#allocation14 + $0x18] sm:$0xff] }
 0xee6   : > { %v13731_v42 = vpop.permute.xlu1 %13730  ;;  %v12750_v25 = vpack.c.bf16 %v4183_v13, %v4182_v5 }
 0xee7   : > { %v13733_v53 = vunpack.i.h.bf16 %v13731_v42  ;;  %v13732_v44 = vunpack.i.l.bf16 %v13731_v42  ;;  %12739 = vmatprep.subr.bf16.mxu0 %v12738_v52  ;;  %13174 = vmatprep.subr.bf16.mxu1 %v12738_v52 }
 0xee8   : > { %12741 = vmatpush3.bf16.msra.mxu0 %v12738_v52  ;;  %13182 = vmatpush3.bf16.msra.mxu1 %v12738_v52 }
 0xee9   : > { %v12742_v2 = vpack.c.bf16 %v13733_v53, %v13732_v44  ;;  %v14301_v21 = vpop.eup %14300  ;;  %v20589_v53 = vld [vmem:[#allocation70_spill] sm:$0xff]  ;;  %v20590_v44 = vld [vmem:[#allocation71_spill] sm:$0xff] }
 0xeea   : > { %v14303_v49 = vpop.eup %14302  ;;  %v3731_v36 = vmul.f32 %v14301_v21, %v17364_v31  ;;  %v20591_v21 = vld [vmem:[#allocation72_spill] sm:$0xff] }
 0xeeb   : > { %12743 = vmatprep.subr.bf16.mxu0 %v12742_v2  ;;  %13175 = vmatprep.subr.bf16.mxu1 %v12742_v2  ;;  %v3732_v37 = vmul.f32 %v14303_v49, %v17359_v39  ;;  %v20592_v49 = vld [vmem:[#allocation73_spill] sm:$0xff] }
 0xeec   : > { %12745 = vmatpush3.bf16.msra.mxu0 %v12742_v2  ;;  %13183 = vmatpush3.bf16.msra.mxu1 %v12742_v2 }
 0xeed   : > { %v14305_v33 = vpop.eup %14304 }
 0xeee   : > { %v14307_v62 = vpop.eup %14306  ;;  %v3733_v9 = vmul.f32 %v14305_v33, %v17368_v48 }
 0xeef   : > { %11653 = vmatmul.mubr.f32.vlgmr.msra.gmra.mrb[56].mxu0 %v3730_v26  ;;  %v3734_v51 = vmul.f32 %v14307_v62, %v17362_v28 }
 0xef0   : > { %11655 = vmatprep.mubr.f32.mxu0 %v3731_v36 }
 0xef3   : > { %11656 = vmatmul.mubr.f32.gmra.mrb[58].mxu0 %v3732_v37 }
 0xef4   : > { %11658 = vmatprep.mubr.f32.mxu0 %v3733_v9 }
 0xef7   : > { %11659 = vmatmul.mubr.f32.gmra.mrb[60].mxu0 %v3734_v51 }
 0xf13   : > { %v3696_v38 = vpop.xlane.xlu0 %3695 }
 0xf14   : > { %14308 = vrcp.f32 %v3696_v38 }
 0xf17   : > { %v3694_v63 = vpop.xlane.xlu1 %3693  ;;  %v3698_v30 = vpop.xlane.xlu0 %3697 }
 0xf18   : > { %14310 = vrcp.f32 %v3694_v63 }
 0xf19   : > { %14312 = vrcp.f32 %v3698_v30 }
 0xf1b   : > { %v3700_v31 = vpop.xlane.xlu1 %3699 }
 0xf1c   : > { %14314 = vrcp.f32 %v3700_v31  ;;  %v20593_v31 = vld [vmem:[#allocation74_spill] sm:$0xff] }
 0xf1e   : > { %v14309_v39 = vpop.eup %14308 }
 0xf1f   : > { %v3704_v14 = vpop.xlane.xlu1 %3703  ;;  %v3702_v1 = vpop.xlane.xlu0 %3701  ;;  %v3736_v32 = vmul.f32 %v14309_v39, %v17382_v59 }
 0xf20   : > { %14316 = vrcp.f32 %v3704_v14  ;;  %v20594_v14 = vld [vmem:[#allocation91_spill] sm:$0xff] }
 0xf21   : > { %14318 = vrcp.f32 %v3702_v1 }
 0xf22   : > { %v14311_v7 = vpop.eup %14310 }
 0xf23   : > { %v14313_v48 = vpop.eup %14312  ;;  %v3708_v43 = vpop.xlane.xlu1 %3707  ;;  %v3735_v28 = vmul.f32 %v14311_v7, %v17387_v40 }
 0xf24   : > { %v3706_v18 = vpop.xlane.xlu0 %3705  ;;  %14320 = vrcp.f32 %v3708_v43  ;;  %v3737_v3 = vmul.f32 %v14313_v48, %v17389_v41 }
 0xf25   : > { %14322 = vrcp.f32 %v3706_v18  ;;  %11661 = vmatprep.mubr.f32.mxu0 %v3735_v28 }
 0xf26   : > { %v14315_v16 = vpop.eup %14314  ;;  %11662 = vmatmul.mubr.f32.gmra.mrb[62].mxu0 %v3736_v32 }
 0xf27   : > { %v3712_v47 = vpop.xlane.xlu1 %3711  ;;  %11664 = vmatprep.mubr.f32.mxu0 %v3737_v3  ;;  %v3738_v50 = vmul.f32 %v14315_v16, %v17394_v60 }
 0xf28   : > { %v3710_v6 = vpop.xlane.xlu0 %3709  ;;  %14324 = vrcp.f32 %v3712_v47 }
 0xf29   : > { %14326 = vrcp.f32 %v3710_v6  ;;  %v20596_v6 = vld [vmem:[#allocation75_spill] sm:$0xff] }
 0xf2a   : > { %v14317_v0 = vpop.eup %14316  ;;  %11665 = vmatmul.mubr.f32.gmra.mrb[64].mxu0 %v3738_v50 }
 0xf2b   : > { %v14319_v17 = vpop.eup %14318  ;;  %v3740_v40 = vmul.f32 %v14317_v0, %v17397_v20  ;;  %v4180_v20 = vld [vmem:[#allocation14] sm:$0xff]  ;;  %v3957_v2 = vpop.permute.xlu1 %3956 }
 0xf2c   : > { %v3739_v59 = vmul.f32 %v14319_v17, %v17399_v58  ;;  %v4181_v58 = vld [vmem:[#allocation14 + $0x8] sm:$0xff]  ;;  %v3955_v9 = vpop.permute.xlu0 %3954  ;;  %v4131_v50 = vsel %vm1433_vm1, %v20596_v6, %v3957_v2 }
 0xf2d   : > { %v12746_v54 = vpack.c.bf16 %v4181_v58, %v4180_v20 }
 0xf2e   : > { %v14321_v10 = vpop.eup %14320  ;;  %11667 = vmatprep.mubr.f32.mxu0 %v3739_v59 }
 0xf2f   : > { %v14323_v4 = vpop.eup %14322  ;;  %11668 = vmatmul.mubr.f32.gmra.mrb[66].mxu0 %v3740_v40  ;;  %v3742_v41 = vmul.f32 %v14321_v10, %v17403_v34  ;;  %12747 = vmatprep.subr.bf16.mxu0 %v12746_v54  ;;  %v4019_v36 = vpop.permute.xlu1 %4018 }
 0xf30   : > { %v3741_v46 = vmul.f32 %v14323_v4, %v17405_v29  ;;  %12749 = vmatpush3.bf16.msra.mxu0 %v12746_v54  ;;  %v3959_v30 = vpop.permute.xlu0 %3958 }
 0xf31   : > { %12751 = vmatprep.subr.bf16.mxu0 %v12750_v25 }
 0xf32   : > { %v14325_v27 = vpop.eup %14324  ;;  %11670 = vmatprep.mubr.f32.mxu1 %v3741_v46  ;;  %v20597_v46 = vld [vmem:[#allocation78_spill] sm:$0xff] }
 0xf33   : > { %v14327_v60 = vpop.eup %14326  ;;  %11671 = vmatmul.mubr.f32.vlgmr.msra.gmra.mrb[80].mxu1 %v3742_v41  ;;  %v3744_v61 = vmul.f32 %v14325_v27, %v17409_v23  ;;  %v4021_v37 = vpop.permute.xlu1 %4020  ;;  %v4132_v27 = vsel %vm1433_vm1, %v20597_v46, %v3959_v30  ;;  %v20603_v30 = vld [vmem:[#allocation84_spill] sm:$0xff]  ;;  %v20608_v46 = vld [vmem:[#allocation87_spill] sm:$0xff] }
 0xf34   : > { %v3743_v55 = vmul.f32 %v14327_v60, %v17411_v57  ;;  %12753 = vmatpush3.bf16.msra.mxu0 %v12750_v25  ;;  %v4148_v40 = vsel %vm4146_vm3, %v4131_v50, %v4021_v37 }
 0xf36   : > { %11673 = vmatprep.mubr.f32.mxu1 %v3743_v55  ;;  %v20598_v55 = vld [vmem:[#allocation77_spill] sm:$0xff] }
 0xf37   : > { %11674 = vmatmul.mubr.f32.gmra.mrb[82].mxu1 %v3744_v61  ;;  %v3961_v63 = vpop.permute.xlu1 %3960 }
 0xf38   : > { %v4133_v20 = vsel %vm1433_vm1, %v20598_v55, %v3961_v63 }
 0xfc2   : > { %v11654_v34 = vpop.f32.mrb[56].mxu0 }
 0xfc3   : > { %4084 = vrot.lane.b32.xlu1 %v11654_v34, %s20362_s25  ;;  %v3859_v29 = vpop.f32.mrb[57].mxu0 }
 0xfc4   : > { %4082 = vrot.lane.b32.xlu0 %v3859_v29, %s20362_s25  ;;  %v20599_v29 = vld [vmem:[#allocation80_spill] sm:$0xff] }
 0xfc6   : > { %v11657_v23 = vpop.f32.mrb[58].mxu0 }
 0xfc7   : > { %4036 = vrot.lane.b32.xlu1 %v17263_v12, %s20364_s4  ;;  %v3869_v57 = vpop.f32.mrb[59].mxu0 }
 0xfc8   : > { %4034 = vrot.lane.b32.xlu0 %v17265_v35, %s20364_s4 }
 0xfca   : > { %v11660_v52 = vpop.f32.mrb[60].mxu0 }
 0xfcb   : > { %4088 = vrot.lane.b32.xlu1 %v11657_v23, %s20362_s25  ;;  %v3879_v42 = vpop.f32.mrb[61].mxu0 }
 0xfcc   : > { %4086 = vrot.lane.b32.xlu0 %v3869_v57, %s20362_s25 }
 0xfcf   : > { %3976 = vrot.lane.b32.xlu1 %v20589_v53, %s20366_s23 }
 0xfd0   : > { %3974 = vrot.lane.b32.xlu0 %v20590_v44, %s20366_s23 }
 0xfd3   : > { %4092 = vrot.lane.b32.xlu1 %v11660_v52, %s20362_s25 }
 0xfd4   : > { %4090 = vrot.lane.b32.xlu0 %v3879_v42, %s20362_s25  ;;  %v20600_v42 = vld [vmem:[#allocation79_spill] sm:$0xff] }
 0xfd7   : > { %4040 = vrot.lane.b32.xlu1 %v17267_v15, %s20364_s4 }
 0xfd8   : > { %4038 = vrot.lane.b32.xlu0 %v17269_v19, %s20364_s4 }
 0xff9   : > { %v11663_v12 = vpop.f32.mrb[62].mxu0 }
 0xffa   : > { %4096 = vrot.lane.b32.xlu1 %v11663_v12, %s20362_s25  ;;  %v3889_v35 = vpop.f32.mrb[63].mxu0 }
 0xffb   : > { %4094 = vrot.lane.b32.xlu0 %v3889_v35, %s20362_s25 }
 0xffd   : > { %v11666_v11 = vpop.f32.mrb[64].mxu0 }
 0xffe   : > { %3980 = vrot.lane.b32.xlu1 %v20591_v21, %s20366_s23  ;;  %v3899_v26 = vpop.f32.mrb[65].mxu0 }
 0xfff   : > { %3978 = vrot.lane.b32.xlu0 %v20592_v49, %s20366_s23 }
0x1002   : > { %v11669_v15 = vpop.f32.mrb[66].mxu0  ;;  %4100 = vrot.lane.b32.xlu1 %v11666_v11, %s20362_s25 }
0x1003   : > { %v3909_v19 = vpop.f32.mrb[67].mxu0  ;;  %4098 = vrot.lane.b32.xlu0 %v3899_v26, %s20362_s25  ;;  %v20601_v26 = vld [vmem:[#allocation82_spill] sm:$0xff] }
0x1006   : > { %v11672_v33 = vpop.f32.mrb[80].mxu1  ;;  %4044 = vrot.lane.b32.xlu1 %v17271_v56, %s20364_s4  ;;  %v4025_v56 = vpop.permute.xlu1 %4024 }
0x1007   : > { %v3919_v62 = vpop.f32.mrb[81].mxu1  ;;  %4042 = vrot.lane.b32.xlu0 %v17273_v45, %s20364_s4  ;;  %v4023_v45 = vpop.permute.xlu0 %4022  ;;  %v4150_v5 = vsel %vm4146_vm3, %v4133_v20, %v4025_v56  ;;  %v20604_v56 = vld [vmem:[#allocation83_spill] sm:$0xff] }
0x1008   : > { %v4149_v61 = vsel %vm4146_vm3, %v4132_v27, %v4023_v45 }
0x100a   : > { %v11675_v51 = vpop.f32.mrb[82].mxu1  ;;  %4104 = vrot.lane.b32.xlu1 %v11669_v15, %s20362_s25  ;;  %v3965_v1 = vpop.permute.xlu1 %3964 }
0x100b   : > { %v3929_v38 = vpop.f32.mrb[83].mxu1  ;;  %4102 = vrot.lane.b32.xlu0 %v3909_v19, %s20362_s25  ;;  %v3963_v39 = vpop.permute.xlu0 %3962  ;;  %v4135_v53 = vsel %vm1433_vm1, %v20600_v42, %v3965_v1  ;;  %v20602_v19 = vld [vmem:[#allocation81_spill] sm:$0xff] }
0x100c   : > { %v4134_v23 = vsel %vm1433_vm1, %v20599_v29, %v3963_v39  ;;  %v20610_v29 = vld [vmem:[#allocation89_spill] sm:$0xff] }
0x100e   : > { %3984 = vrot.lane.b32.xlu1 %v20593_v31, %s20366_s23  ;;  %v4029_v7 = vpop.permute.xlu1 %4028 }
0x100f   : > { %3982 = vrot.lane.b32.xlu0 %v20594_v14, %s20366_s23  ;;  %v4027_v48 = vpop.permute.xlu0 %4026  ;;  %v4152_v12 = vsel %vm4146_vm3, %v4135_v53, %v4029_v7 }
0x1010   : > { %v4151_v52 = vsel %vm4146_vm3, %v4134_v23, %v4027_v48 }
0x1012   : > { %4108 = vrot.lane.b32.xlu1 %v11672_v33, %s20362_s25  ;;  %v3969_v43 = vpop.permute.xlu1 %3968 }
0x1013   : > { %4106 = vrot.lane.b32.xlu0 %v3919_v62, %s20362_s25  ;;  %v3967_v18 = vpop.permute.xlu0 %3966  ;;  %v4137_v33 = vsel %vm1433_vm1, %v20602_v19, %v3969_v43 }
0x1014   : > { %v4136_v49 = vsel %vm1433_vm1, %v20601_v26, %v3967_v18  ;;  %v20611_v26 = vld [vmem:[#allocation50_spill] sm:$0xff] }
0x1016   : > { %4048 = vrot.lane.b32.xlu1 %v17275_v22, %s20364_s4  ;;  %v4033_v28 = vpop.permute.xlu1 %4032  ;;  %v20595_v22 = vld [vmem:[#allocation76_spill] sm:$0xff] }
0x1017   : > { %4046 = vrot.lane.b32.xlu0 %v17277_v24, %s20364_s4  ;;  %v4031_v32 = vpop.permute.xlu0 %4030  ;;  %v4130_v47 = vsel %vm1433_vm1, %v20595_v22, %v3955_v9  ;;  %v4154_v62 = vsel %vm4146_vm3, %v4137_v33, %v4033_v28  ;;  %s20619_s4 = sld [smem:[#allocation116_spill]] }
0x1018   : > { %v4147_v0 = vsel %vm4146_vm3, %v4130_v47, %v4019_v36  ;;  %v4153_v15 = vsel %vm4146_vm3, %v4136_v49, %v4031_v32  ;;  %v20605_v32 = vld [vmem:[#allocation86_spill] sm:$0xff] }
0x101a   : > { %4112 = vrot.lane.b32.xlu1 %v11675_v51, %s20362_s25  ;;  %v3973_v3 = vpop.permute.xlu1 %3972 }
0x101b   : > { %4110 = vrot.lane.b32.xlu0 %v3929_v38, %s20362_s25  ;;  %v3971_v16 = vpop.permute.xlu0 %3970  ;;  %v4139_v45 = vsel %vm1433_vm1, %v20604_v56, %v3973_v3  ;;  %v20606_v3 = vld [vmem:[#allocation85_spill] sm:$0xff] }
0x101c   : > { %v4138_v31 = vsel %vm1433_vm1, %v20603_v30, %v3971_v16 }
0x1035   : > { %v4085_v24 = vpop.permute.xlu1 %4084 }
0x1036   : > { %v4083_v17 = vpop.permute.xlu0 %4082  ;;  %v4165_v10 = vsel %vm4163_vm4, %v4148_v40, %v4085_v24 }
0x1037   : > { %v4164_v59 = vsel %vm4163_vm4, %v4147_v0, %v4083_v17 }
0x1038   : > { %11684 = vmatprep.mubr.msk.f32.mxu0 %vm901_vm0, %v4164_v59 }
0x1039   : > { %v4037_v4 = vpop.permute.xlu1 %4036  ;;  %11685 = vmatmul.mubr.msk.f32.vlgmr.msra.gmra.mrb[68].mxu0 %vm901_vm0, %v4165_v10  ;;  %v20607_v10 = vld [vmem:[#allocation88_spill] sm:$0xff] }
0x103a   : > { %v4035_v41 = vpop.permute.xlu0 %4034  ;;  %v4156_v7 = vsel %vm4146_vm3, %v4139_v45, %v4037_v4 }
0x103b   : > { %v4155_v1 = vsel %vm4146_vm3, %v4138_v31, %v4035_v41 }
0x103d   : > { %v4089_v60 = vpop.permute.xlu1 %4088 }
0x103e   : > { %v4087_v58 = vpop.permute.xlu0 %4086  ;;  %v4167_v13 = vsel %vm4163_vm4, %v4150_v5, %v4089_v60 }
0x103f   : > { %v4166_v54 = vsel %vm4163_vm4, %v4149_v61, %v4087_v58 }
0x1040   : > { %11687 = vmatprep.mubr.msk.f32.mxu0 %vm901_vm0, %v4166_v54 }
0x1041   : > { %v3977_v25 = vpop.permute.xlu1 %3976  ;;  %11688 = vmatmul.mubr.msk.f32.gmra.mrb[70].mxu0 %vm901_vm0, %v4167_v13  ;;  %v20609_v13 = vld [vmem:[#allocation90_spill] sm:$0xff] }
0x1042   : > { %v3975_v34 = vpop.permute.xlu0 %3974  ;;  %v4141_v47 = vsel %vm1433_vm1, %v20606_v3, %v3977_v25  ;;  %v20614_v3 = vld [vmem:[#allocation51_spill] sm:$0xff] }
0x1043   : > { %v4140_v16 = vsel %vm1433_vm1, %v20605_v32, %v3975_v34 }
0x1045   : > { %v4093_v57 = vpop.permute.xlu1 %4092 }
0x1046   : > { %v4091_v44 = vpop.permute.xlu0 %4090  ;;  %v4169_v2 = vsel %vm4163_vm4, %v4152_v12, %v4093_v57 }
0x1047   : > { %v4168_v35 = vsel %vm4163_vm4, %v4151_v52, %v4091_v44 }
0x1048   : > { %11690 = vmatprep.mubr.msk.f32.mxu0 %vm901_vm0, %v4168_v35  ;;  %v17591_v35 = vld [vmem:[#allocation16] ss:$0 sm:$0xff] }
0x1049   : > { %11691 = vmatmul.mubr.msk.f32.gmra.mrb[72].mxu0 %vm901_vm0, %v4169_v2  ;;  %v4041_v11 = vpop.permute.xlu1 %4040  ;;  %v17593_v2 = vld [vmem:[#allocation7 + $0x8] sm:$0xff] }
0x104a   : > { %v4039_v21 = vpop.permute.xlu0 %4038  ;;  %v4158_v50 = vsel %vm4146_vm3, %v4141_v47, %v4041_v11 }
0x104b   : > { %v4157_v24 = vsel %vm4146_vm3, %v4140_v16, %v4039_v21 }
0x106c   : > { %v4097_v36 = vpop.permute.xlu1 %4096 }
0x106d   : > { %v4095_v37 = vpop.permute.xlu0 %4094  ;;  %v4171_v51 = vsel %vm4163_vm4, %v4154_v62, %v4097_v36 }
0x106e   : > { %v4170_v9 = vsel %vm4163_vm4, %v4153_v15, %v4095_v37 }
0x106f   : > { %11693 = vmatprep.mubr.msk.f32.mxu0 %vm901_vm0, %v4170_v9 }
0x1070   : > { %v3981_v38 = vpop.permute.xlu1 %3980  ;;  %11694 = vmatmul.mubr.msk.f32.gmra.mrb[74].mxu0 %vm901_vm0, %v4171_v51  ;;  %v20612_v51 = vld [vmem:[#allocation49_spill] sm:$0xff] }
0x1071   : > { %v3979_v63 = vpop.permute.xlu0 %3978  ;;  %v4143_v27 = vsel %vm1433_vm1, %v20608_v46, %v3981_v38 }
0x1072   : > { %v4142_v4 = vsel %vm1433_vm1, %v20607_v10, %v3979_v63  ;;  %v20615_v10 = vld [vmem:[#allocation54_spill] sm:$0xff] }
0x1074   : > { %v4101_v14 = vpop.permute.xlu1 %4100 }
0x1075   : > { %v4099_v39 = vpop.permute.xlu0 %4098  ;;  %v4173_v43 = vsel %vm4163_vm4, %v4156_v7, %v4101_v14 }
0x1076   : > { %v4172_v48 = vsel %vm4163_vm4, %v4155_v1, %v4099_v39  ;;  %v20613_v1 = vld [vmem:[#allocation52_spill] sm:$0xff] }
0x1077   : > { %11696 = vmatprep.mubr.msk.f32.mxu0 %vm901_vm0, %v4172_v48 }
0x1078   : > { %v4045_v18 = vpop.permute.xlu1 %4044  ;;  %11697 = vmatmul.mubr.msk.f32.gmra.mrb[76].mxu0 %vm901_vm0, %v4173_v43 }
0x1079   : > { %v4043_v28 = vpop.permute.xlu0 %4042  ;;  %v4160_v55 = vsel %vm4146_vm3, %v4143_v27, %v4045_v18 }
0x107a   : > { %v4159_v60 = vsel %vm4146_vm3, %v4142_v4, %v4043_v28 }
0x107c   : > { %v4105_v22 = vpop.permute.xlu1 %4104 }
0x107d   : > { %v4103_v6 = vpop.permute.xlu0 %4102  ;;  %v4175_v17 = vsel %vm4163_vm4, %v4158_v50, %v4105_v22 }
0x107e   : > { %v4174_v0 = vsel %vm4163_vm4, %v4157_v24, %v4103_v6 }
0x107f   : > { %11699 = vmatprep.mubr.msk.f32.mxu0 %vm901_vm0, %v4174_v0 }
0x1080   : > { %v3985_v40 = vpop.permute.xlu1 %3984  ;;  %11700 = vmatmul.mubr.msk.f32.gmra.mrb[78].mxu0 %vm901_vm0, %v4175_v17 }
0x1081   : > { %v3983_v59 = vpop.permute.xlu0 %3982  ;;  %v4145_v23 = vsel %vm1433_vm1, %v20610_v29, %v3985_v40 }
0x1082   : > { %v4144_v25 = vsel %vm1433_vm1, %v20609_v13, %v3983_v59 }
0x1084   : > { %v4109_v41 = vpop.permute.xlu1 %4108 }
0x1085   : > { %v4107_v61 = vpop.permute.xlu0 %4106  ;;  %v4177_v58 = vsel %vm4163_vm4, %v4160_v55, %v4109_v41 }
0x1086   : > { %v4176_v20 = vsel %vm4163_vm4, %v4159_v60, %v4107_v61 }
0x1087   : > { %11702 = vmatprep.mubr.msk.f32.mxu0 %vm901_vm0, %v4176_v20 }
0x1088   : > { %v4049_v5 = vpop.permute.xlu1 %4048  ;;  %11703 = vmatmul.mubr.msk.f32.gmra.mrb[80].mxu0 %vm901_vm0, %v4177_v58  ;;  %v20616_v58 = vld [vmem:[#allocation53_spill] sm:$0xff] }
0x1089   : > { %v4047_v54 = vpop.permute.xlu0 %4046  ;;  %v4162_v42 = vsel %vm4146_vm3, %v4145_v23, %v4049_v5 }
0x108a   : > { %v4161_v57 = vsel %vm4146_vm3, %v4144_v25, %v4047_v54 }
0x108c   : > { %v4113_v34 = vpop.permute.xlu1 %4112 }
0x108d   : > { %v4111_v52 = vpop.permute.xlu0 %4110  ;;  %v4179_v44 = vsel %vm4163_vm4, %v4162_v42, %v4113_v34 }
0x108e   : > { %v4178_v53 = vsel %vm4163_vm4, %v4161_v57, %v4111_v52  ;;  %v20617_v52 = vld [vmem:[#allocation56_spill] sm:$0xff] }
0x108f   : > { %11705 = vmatprep.mubr.msk.f32.mxu0 %vm901_vm0, %v4178_v53 }
0x1090   : > { %11706 = vmatmul.mubr.msk.f32.gmra.mrb[82].mxu0 %vm901_vm0, %v4179_v44 }
0x110c   : > { %v11686_v12 = vpop.f32.mrb[68].mxu0 }
0x110d   : > { %v4378_v11 = vadd.f32 %v17593_v2, %v11686_v12  ;;  %v4298_v21 = vpop.f32.mrb[69].mxu0 }
0x110e   : > { %v4377_v49 = vadd.f32 %v4298_v21, %v20611_v26 }
0x110f   : > { %v17598_v36 = vadd.f32 %v17591_v35, %v4378_v11 }
0x1110   : > { %v17601_v15 = vadd.f32 %v17591_v35, %v4377_v49 }
0x1111   : > { %v4419_v19 = vsel %vm901_vm0, %v17598_v36, 0.0 }
0x1112   : > { %4420 = vadd.xlane.f32.xlu1 %v4419_v19  ;;  %v4416_v33 = vsel %vm901_vm0, %v17601_v15, 0.0  ;;  %v20618_v19 = vld [vmem:[#allocation55_spill] sm:$0xff] }
0x1113   : > { %4417 = vadd.xlane.f32.xlu0 %v4416_v33 }
0x1114   : > { %v11689_v37 = vpop.f32.mrb[70].mxu0 }
0x1115   : > { %v4308_v62 = vpop.f32.mrb[71].mxu0  ;;  %v4380_v9 = vadd.f32 %v17593_v2, %v11689_v37 }
0x1116   : > { %v4379_v38 = vadd.f32 %v4308_v62, %v20612_v51 }
0x1117   : > { %v17613_v30 = vadd.f32 %v17591_v35, %v4380_v9 }
0x1118   : > { %v17610_v63 = vadd.f32 %v17591_v35, %v4379_v38 }
0x1119   : > { %v4425_v7 = vsel %vm901_vm0, %v17613_v30, 0.0 }
0x111a   : > { %v4422_v31 = vsel %vm901_vm0, %v17610_v63, 0.0 }
0x111b   : > { %4423 = vadd.xlane.f32.xlu0 %v4422_v31 }
0x111c   : > { %v11692_v14 = vpop.f32.mrb[72].mxu0 }
0x111d   : > { %v4382_v56 = vadd.f32 %v17593_v2, %v11692_v14  ;;  %v4318_v45 = vpop.f32.mrb[73].mxu0 }
0x111e   : > { %v4381_v39 = vadd.f32 %v4318_v45, %v20613_v1 }
0x111f   : > { %v17622_v48 = vadd.f32 %v17591_v35, %v4382_v56  ;;  %4426 = vadd.xlane.f32.xlu0 %v4425_v7 }
0x1120   : > { %v17625_v43 = vadd.f32 %v17591_v35, %v4381_v39 }
0x1121   : > { %v4431_v18 = vsel %vm901_vm0, %v17622_v48, 0.0 }
0x1122   : > { %4432 = vadd.xlane.f32.xlu1 %v4431_v18  ;;  %v4428_v28 = vsel %vm901_vm0, %v17625_v43, 0.0 }
0x1123   : > { %4429 = vadd.xlane.f32.xlu0 %v4428_v28 }
0x1143   : > { %v11695_v32 = vpop.f32.mrb[74].mxu0 }
0x1144   : > { %v4384_v16 = vadd.f32 %v17593_v2, %v11695_v32  ;;  %v4328_v22 = vpop.f32.mrb[75].mxu0 }
0x1145   : > { %v4383_v47 = vadd.f32 %v4328_v22, %v20614_v3 }
0x1146   : > { %v17634_v24 = vadd.f32 %v17591_v35, %v4384_v16 }
0x1147   : > { %v17637_v6 = vadd.f32 %v17591_v35, %v4383_v47 }
0x1148   : > { %v4437_v50 = vsel %vm901_vm0, %v17634_v24, 0.0 }
0x1149   : > { %4438 = vadd.xlane.f32.xlu1 %v4437_v50  ;;  %v4434_v0 = vsel %vm901_vm0, %v17637_v6, 0.0 }
0x114a   : > { %4435 = vadd.xlane.f32.xlu0 %v4434_v0 }
0x114b   : > { %v11698_v17 = vpop.f32.mrb[76].mxu0 }
0x114c   : > { %v4386_v40 = vadd.f32 %v17593_v2, %v11698_v17  ;;  %v4338_v59 = vpop.f32.mrb[77].mxu0 }
0x114d   : > { %v4385_v4 = vadd.f32 %v4338_v59, %v20615_v10 }
0x114e   : > { %v17646_v41 = vadd.f32 %v17591_v35, %v4386_v40 }
0x114f   : > { %v17649_v46 = vadd.f32 %v17591_v35, %v4385_v4 }
0x1150   : > { %v4443_v27 = vsel %vm901_vm0, %v17646_v41, 0.0 }
0x1151   : > { %4444 = vadd.xlane.f32.xlu1 %v4443_v27  ;;  %v4440_v60 = vsel %vm901_vm0, %v17649_v46, 0.0 }
0x1152   : > { %4441 = vadd.xlane.f32.xlu0 %v4440_v60 }
0x1153   : > { %v11701_v61 = vpop.f32.mrb[78].mxu0 }
0x1154   : > { %v4388_v55 = vadd.f32 %v17593_v2, %v11701_v61  ;;  %v4348_v20 = vpop.f32.mrb[79].mxu0 }
0x1155   : > { %v4387_v5 = vadd.f32 %v4348_v20, %v20616_v58 }
0x1156   : > { %v17658_v54 = vadd.f32 %v17591_v35, %v4388_v55 }
0x1157   : > { %v17661_v13 = vadd.f32 %v17591_v35, %v4387_v5  ;;  %v4664_v5 = vld [vmem:[#allocation20] sm:$0xff] }
0x1158   : > { %v4449_v25 = vsel %vm901_vm0, %v17658_v54, 0.0 }
0x1159   : > { %4450 = vadd.xlane.f32.xlu1 %v4449_v25  ;;  %v4446_v34 = vsel %vm901_vm0, %v17661_v13, 0.0  ;;  %v4665_v25 = vld [vmem:[#allocation20 + $0x8] sm:$0xff] }
0x115a   : > { %4447 = vadd.xlane.f32.xlu0 %v4446_v34  ;;  %v12754_v34 = vpack.c.bf16 %v4665_v25, %v4664_v5 }
0x115b   : > { %v11704_v29 = vpop.f32.mrb[80].mxu0 }
0x115c   : > { %v4390_v23 = vadd.f32 %v17593_v2, %v11704_v29  ;;  %v4358_v57 = vpop.f32.mrb[81].mxu0  ;;  %12755 = vmatprep.subr.bf16.mxu1 %v12754_v34  ;;  %v4666_v29 = vld [vmem:[#allocation20 + $0x10] sm:$0xff] }
0x115d   : > { %v4389_v42 = vadd.f32 %v4358_v57, %v20617_v52  ;;  %12757 = vmatpush3.bf16.msra.mxu1 %v12754_v34 }
0x115e   : > { %v17670_v53 = vadd.f32 %v17591_v35, %v4390_v23  ;;  %v4667_v23 = vld [vmem:[#allocation20 + $0x18] sm:$0xff] }
0x115f   : > { %v17673_v44 = vadd.f32 %v17591_v35, %v4389_v42  ;;  %v12758_v57 = vpack.c.bf16 %v4667_v23, %v4666_v29 }
0x1160   : > { %v4455_v12 = vsel %vm901_vm0, %v17670_v53, 0.0 }
0x1161   : > { %4456 = vadd.xlane.f32.xlu1 %v4455_v12  ;;  %v4452_v11 = vsel %vm901_vm0, %v17673_v44, 0.0  ;;  %12759 = vmatprep.subr.bf16.mxu1 %v12758_v57 }
0x1162   : > { %4453 = vadd.xlane.f32.xlu0 %v4452_v11  ;;  %12761 = vmatpush3.bf16.msra.mxu1 %v12758_v57 }
0x1163   : > { %v11707_v21 = vpop.f32.mrb[82].mxu0 }
0x1164   : > { %v4392_v26 = vadd.f32 %v17593_v2, %v11707_v21  ;;  %v4368_v49 = vpop.f32.mrb[83].mxu0 }
0x1165   : > { %v4391_v33 = vadd.f32 %v4368_v49, %v20618_v19 }
0x1166   : > { %v17682_v37 = vadd.f32 %v17591_v35, %v4392_v26 }
0x1167   : > { %v17685_v62 = vadd.f32 %v17591_v35, %v4391_v33 }
0x1168   : > { %v4461_v9 = vsel %vm901_vm0, %v17682_v37, 0.0 }
0x1169   : > { %4462 = vadd.xlane.f32.xlu1 %v4461_v9  ;;  %v4458_v51 = vsel %vm901_vm0, %v17685_v62, 0.0 }
0x116a   : > { %4459 = vadd.xlane.f32.xlu0 %v4458_v51 }
0x119f   : > { %v4421_v38 = vpop.xlane.xlu1 %4420 }
0x11a0   : > { %v4465_v31 = vmul.f32 0.03125, %v4421_v38  ;;  %v4418_v2 = vpop.xlane.xlu0 %4417 }
0x11a1   : > { %v4464_v14 = vmul.f32 0.03125, %v4418_v2 }
0x11a2   : > { %v17692_v56 = vsub.f32 %v17598_v36, %v4465_v31 }
0x11a3   : > { %v17695_v45 = vsub.f32 %v17601_v15, %v4464_v14 }
0x11a4   : > { %v4497_v35 = vmul.f32 %v17692_v56, %v17692_v56 }
0x11a5   : > { %v4496_v1 = vmul.f32 %v17695_v45, %v17695_v45 }
0x11a6   : > { %v4515_v39 = vsel %vm901_vm0, %v4497_v35, 0.0 }
0x11a7   : > { %4516 = vadd.xlane.f32.xlu1 %v4515_v39  ;;  %v4512_v7 = vsel %vm901_vm0, %v4496_v1, 0.0 }
0x11a8   : > { %v4424_v18 = vpop.xlane.xlu0 %4423  ;;  %4513 = vadd.xlane.f32.xlu0 %v4512_v7 }
0x11a9   : > { %v4466_v28 = vmul.f32 0.03125, %v4424_v18 }
0x11ab   : > { %v17704_v32 = vsub.f32 %v17610_v63, %v4466_v28 }
0x11ac   : > { %v4427_v16 = vpop.xlane.xlu0 %4426 }
0x11ad   : > { %v4467_v22 = vmul.f32 0.03125, %v4427_v16  ;;  %v4498_v3 = vmul.f32 %v17704_v32, %v17704_v32 }
0x11af   : > { %v17709_v47 = vsub.f32 %v17613_v30, %v4467_v22  ;;  %v4433_v50 = vpop.xlane.xlu1 %4432  ;;  %v4518_v0 = vsel %vm901_vm0, %v4498_v3, 0.0 }
0x11b0   : > { %v4469_v17 = vmul.f32 0.03125, %v4433_v50  ;;  %v4430_v40 = vpop.xlane.xlu0 %4429  ;;  %4519 = vadd.xlane.f32.xlu0 %v4518_v0 }
0x11b1   : > { %v4468_v59 = vmul.f32 0.03125, %v4430_v40  ;;  %v4499_v10 = vmul.f32 %v17709_v47, %v17709_v47 }
0x11b2   : > { %v17715_v4 = vsub.f32 %v17622_v48, %v4469_v17 }
0x11b3   : > { %v17718_v27 = vsub.f32 %v17625_v43, %v4468_v59  ;;  %v4521_v60 = vsel %vm901_vm0, %v4499_v10, 0.0 }
0x11b4   : > { %4522 = vadd.xlane.f32.xlu1 %v4521_v60  ;;  %v4501_v61 = vmul.f32 %v17715_v4, %v17715_v4 }
0x11b5   : > { %v4500_v55 = vmul.f32 %v17718_v27, %v17718_v27 }
0x11b6   : > { %v4527_v20 = vsel %vm901_vm0, %v4501_v61, 0.0 }
0x11b7   : > { %v4524_v58 = vsel %vm901_vm0, %v4500_v55, 0.0 }
0x11b8   : > { %4528 = vadd.xlane.f32.xlu1 %v4527_v20  ;;  %4525 = vadd.xlane.f32.xlu0 %v4524_v58 }
0x11d6   : > { %v4439_v52 = vpop.xlane.xlu1 %4438 }
0x11d7   : > { %v4471_v42 = vmul.f32 0.03125, %v4439_v52  ;;  %v4436_v12 = vpop.xlane.xlu0 %4435 }
0x11d8   : > { %v4470_v11 = vmul.f32 0.03125, %v4436_v12 }
0x11d9   : > { %v17728_v21 = vsub.f32 %v17634_v24, %v4471_v42 }
0x11da   : > { %v17731_v26 = vsub.f32 %v17637_v6, %v4470_v11 }
0x11db   : > { %v4503_v49 = vmul.f32 %v17728_v21, %v17728_v21 }
0x11dc   : > { %v4502_v19 = vmul.f32 %v17731_v26, %v17731_v26 }
0x11dd   : > { %v4533_v33 = vsel %vm901_vm0, %v4503_v49, 0.0 }
0x11de   : > { %v4445_v9 = vpop.xlane.xlu1 %4444  ;;  %4534 = vadd.xlane.f32.xlu1 %v4533_v33  ;;  %v4530_v51 = vsel %vm901_vm0, %v4502_v19, 0.0 }
0x11df   : > { %v4473_v38 = vmul.f32 0.03125, %v4445_v9  ;;  %v4442_v31 = vpop.xlane.xlu0 %4441  ;;  %4531 = vadd.xlane.f32.xlu0 %v4530_v51 }
0x11e0   : > { %v4472_v2 = vmul.f32 0.03125, %v4442_v31 }
0x11e1   : > { %v17740_v14 = vsub.f32 %v17646_v41, %v4473_v38 }
0x11e2   : > { %v17743_v35 = vsub.f32 %v17649_v46, %v4472_v2 }
0x11e3   : > { %v4505_v1 = vmul.f32 %v17740_v14, %v17740_v14 }
0x11e4   : > { %v4504_v39 = vmul.f32 %v17743_v35, %v17743_v35 }
0x11e5   : > { %v4539_v7 = vsel %vm901_vm0, %v4505_v1, 0.0 }
0x11e6   : > { %v4451_v18 = vpop.xlane.xlu1 %4450  ;;  %4540 = vadd.xlane.f32.xlu1 %v4539_v7  ;;  %v4536_v28 = vsel %vm901_vm0, %v4504_v39, 0.0 }
0x11e7   : > { %v4475_v16 = vmul.f32 0.03125, %v4451_v18  ;;  %v4448_v22 = vpop.xlane.xlu0 %4447  ;;  %4537 = vadd.xlane.f32.xlu0 %v4536_v28 }
0x11e8   : > { %v4474_v3 = vmul.f32 0.03125, %v4448_v22 }
0x11e9   : > { %v17752_v50 = vsub.f32 %v17658_v54, %v4475_v16 }
0x11ea   : > { %v17755_v0 = vsub.f32 %v17661_v13, %v4474_v3 }
0x11eb   : > { %v4507_v17 = vmul.f32 %v17752_v50, %v17752_v50 }
0x11ec   : > { %v4506_v40 = vmul.f32 %v17755_v0, %v17755_v0 }
0x11ed   : > { %v4545_v59 = vsel %vm901_vm0, %v4507_v17, 0.0 }
0x11ee   : > { %v4457_v10 = vpop.xlane.xlu1 %4456  ;;  %4546 = vadd.xlane.f32.xlu1 %v4545_v59  ;;  %v4542_v60 = vsel %vm901_vm0, %v4506_v40, 0.0  ;;  %v17787_v40 = vld [vmem:[#allocation17] ss:$0 sm:$0xff] }
0x11ef   : > { %v4477_v61 = vmul.f32 0.03125, %v4457_v10  ;;  %v4454_v55 = vpop.xlane.xlu0 %4453  ;;  %4543 = vadd.xlane.f32.xlu0 %v4542_v60 }
0x11f0   : > { %v4476_v20 = vmul.f32 0.03125, %v4454_v55 }
0x11f1   : > { %v17764_v58 = vsub.f32 %v17670_v53, %v4477_v61 }
0x11f2   : > { %v17767_v5 = vsub.f32 %v17673_v44, %v4476_v20 }
0x11f3   : > { %v4509_v25 = vmul.f32 %v17764_v58, %v17764_v58 }
0x11f4   : > { %v4508_v34 = vmul.f32 %v17767_v5, %v17767_v5 }
0x11f5   : > { %v4551_v29 = vsel %vm901_vm0, %v4509_v25, 0.0 }
0x11f6   : > { %4552 = vadd.xlane.f32.xlu1 %v4551_v29  ;;  %v4463_v23 = vpop.xlane.xlu1 %4462  ;;  %v4548_v57 = vsel %vm901_vm0, %v4508_v34, 0.0 }
0x11f7   : > { %v4479_v52 = vmul.f32 0.03125, %v4463_v23  ;;  %4549 = vadd.xlane.f32.xlu0 %v4548_v57  ;;  %v4460_v42 = vpop.xlane.xlu0 %4459  ;;  %v17792_v23 = vld [vmem:[#allocation19] ss:$0 sm:$0xff] }
0x11f8   : > { %v4478_v12 = vmul.f32 0.03125, %v4460_v42 }
0x11f9   : > { %v17776_v11 = vsub.f32 %v17682_v37, %v4479_v52 }
0x11fa   : > { %v17779_v49 = vsub.f32 %v17685_v62, %v4478_v12 }
0x11fb   : > { %v4511_v19 = vmul.f32 %v17776_v11, %v17776_v11 }
0x11fc   : > { %v4510_v33 = vmul.f32 %v17779_v49, %v17779_v49 }
0x11fd   : > { %v4557_v9 = vsel %vm901_vm0, %v4511_v19, 0.0 }
0x11fe   : > { %4558 = vadd.xlane.f32.xlu1 %v4557_v9  ;;  %v4554_v51 = vsel %vm901_vm0, %v4510_v33, 0.0 }
0x11ff   : > { %4555 = vadd.xlane.f32.xlu0 %v4554_v51 }
0x1234   : > { %v4517_v38 = vpop.xlane.xlu1 %4516 }
0x1235   : > { %v4561_v31 = vmul.f32 0.03125, %v4517_v38  ;;  %v4514_v2 = vpop.xlane.xlu0 %4513 }
0x1236   : > { %v4560_v1 = vmul.f32 0.03125, %v4514_v2 }
0x1237   : > { %v4577_v39 = vadd.f32 1e-05, %v4561_v31 }
0x1238   : > { %v4576_v7 = vadd.f32 1e-05, %v4560_v1 }
0x1239   : > { %14328 = vrsqrt.f32 %v4577_v39 }
0x123a   : > { %14330 = vrsqrt.f32 %v4576_v7 }
0x123d   : > { %v4520_v18 = vpop.xlane.xlu0 %4519 }
0x123e   : > { %v4562_v28 = vmul.f32 0.03125, %v4520_v18 }
0x1240   : > { %v4578_v16 = vadd.f32 1e-05, %v4562_v28 }
0x1241   : > { %v4523_v22 = vpop.xlane.xlu1 %4522 }
0x1242   : > { %14332 = vrsqrt.f32 %v4578_v16  ;;  %v4563_v3 = vmul.f32 0.03125, %v4523_v22 }
0x1243   : > { %v14329_v17 = vpop.eup %14328 }
0x1244   : > { %v14331_v59 = vpop.eup %14330  ;;  %v4609_v10 = vmul.f32 %v14329_v17, %v17692_v56  ;;  %v4579_v60 = vadd.f32 1e-05, %v4563_v3 }
0x1245   : > { %v4529_v61 = vpop.xlane.xlu1 %4528  ;;  %v4526_v55 = vpop.xlane.xlu0 %4525  ;;  %v4608_v20 = vmul.f32 %v14331_v59, %v17695_v45 }
0x1246   : > { %v4629_v25 = vmul.f32 %v17787_v40, %v4609_v10  ;;  %14334 = vrsqrt.f32 %v4579_v60  ;;  %v4565_v34 = vmul.f32 0.03125, %v4529_v61  ;;  %v4564_v29 = vmul.f32 0.03125, %v4526_v55 }
0x1247   : > { %v4628_v57 = vmul.f32 %v17787_v40, %v4608_v20 }
0x1248   : > { %v4581_v52 = vadd.f32 1e-05, %v4565_v34  ;;  %v4580_v42 = vadd.f32 1e-05, %v4564_v29  ;;  %v4649_v56 = vadd.f32 %v17792_v23, %v4629_v25 }
0x1249   : > { %v4648_v12 = vadd.f32 %v17792_v23, %v4628_v57 }
0x124a   : > { %14336 = vrsqrt.f32 %v4581_v52 }
0x124b   : > { %14338 = vrsqrt.f32 %v4580_v42  ;;  %11716 = vmatprep.mubr.msk.f32.mxu1 %vm901_vm0, %v4648_v12 }
0x124c   : > { %v14333_v45 = vpop.eup %14332  ;;  %11717 = vmatmul.mubr.msk.f32.vlgmr.msra.gmra.mrb[84].mxu1 %vm901_vm0, %v4649_v56 }
0x124d   : > { %v4610_v19 = vmul.f32 %v14333_v45, %v17704_v32 }
0x124f   : > { %v4630_v33 = vmul.f32 %v17787_v40, %v4610_v19 }
0x1250   : > { %v14335_v9 = vpop.eup %14334 }
0x1251   : > { %v4650_v51 = vadd.f32 %v17792_v23, %v4630_v33  ;;  %v4611_v38 = vmul.f32 %v14335_v9, %v17709_v47 }
0x1253   : > { %11719 = vmatprep.mubr.msk.f32.mxu1 %vm901_vm0, %v4650_v51  ;;  %v4631_v31 = vmul.f32 %v17787_v40, %v4611_v38 }
0x1254   : > { %v14337_v2 = vpop.eup %14336 }
0x1255   : > { %v14339_v1 = vpop.eup %14338  ;;  %v4651_v39 = vadd.f32 %v17792_v23, %v4631_v31  ;;  %v4613_v7 = vmul.f32 %v14337_v2, %v17715_v4 }
0x1256   : > { %v4612_v18 = vmul.f32 %v14339_v1, %v17718_v27 }
0x1257   : > { %11720 = vmatmul.mubr.msk.f32.gmra.mrb[86].mxu1 %vm901_vm0, %v4651_v39  ;;  %v4633_v32 = vmul.f32 %v17787_v40, %v4613_v7 }
0x1258   : > { %v4632_v28 = vmul.f32 %v17787_v40, %v4612_v18 }
0x1259   : > { %v4653_v47 = vadd.f32 %v17792_v23, %v4633_v32 }
0x125a   : > { %v4652_v16 = vadd.f32 %v17792_v23, %v4632_v28 }
0x125c   : > { %11722 = vmatprep.mubr.msk.f32.mxu1 %vm901_vm0, %v4652_v16 }
0x125d   : > { %11723 = vmatmul.mubr.msk.f32.gmra.mrb[88].mxu1 %vm901_vm0, %v4653_v47 }
0x126b   : > { %v4535_v22 = vpop.xlane.xlu1 %4534 }
0x126c   : > { %v4567_v3 = vmul.f32 0.03125, %v4535_v22  ;;  %v4532_v17 = vpop.xlane.xlu0 %4531 }
0x126d   : > { %v4566_v4 = vmul.f32 0.03125, %v4532_v17 }
0x126e   : > { %v4583_v59 = vadd.f32 1e-05, %v4567_v3 }
0x126f   : > { %v4582_v27 = vadd.f32 1e-05, %v4566_v4 }
0x1270   : > { %14340 = vrsqrt.f32 %v4583_v59 }
0x1271   : > { %14342 = vrsqrt.f32 %v4582_v27 }
0x1273   : > { %v4541_v10 = vpop.xlane.xlu1 %4540 }
0x1274   : > { %v4569_v60 = vmul.f32 0.03125, %v4541_v10  ;;  %v4538_v61 = vpop.xlane.xlu0 %4537 }
0x1275   : > { %v4568_v55 = vmul.f32 0.03125, %v4538_v61 }
0x1276   : > { %v4585_v20 = vadd.f32 1e-05, %v4569_v60 }
0x1277   : > { %v4584_v25 = vadd.f32 1e-05, %v4568_v55 }
0x1278   : > { %14344 = vrsqrt.f32 %v4585_v20 }
0x1279   : > { %14346 = vrsqrt.f32 %v4584_v25 }
0x127a   : > { %v14341_v34 = vpop.eup %14340 }
0x127b   : > { %v14343_v29 = vpop.eup %14342  ;;  %v4547_v57 = vpop.xlane.xlu1 %4546  ;;  %v4615_v52 = vmul.f32 %v14341_v34, %v17728_v21 }
0x127c   : > { %v4571_v42 = vmul.f32 0.03125, %v4547_v57  ;;  %v4544_v12 = vpop.xlane.xlu0 %4543  ;;  %v4614_v56 = vmul.f32 %v14343_v29, %v17731_v26 }
0x127d   : > { %v4570_v45 = vmul.f32 0.03125, %v4544_v12  ;;  %v4635_v19 = vmul.f32 %v17787_v40, %v4615_v52 }
0x127e   : > { %v4587_v33 = vadd.f32 1e-05, %v4571_v42  ;;  %v4634_v9 = vmul.f32 %v17787_v40, %v4614_v56 }
0x127f   : > { %v4586_v51 = vadd.f32 1e-05, %v4570_v45  ;;  %v4655_v31 = vadd.f32 %v17792_v23, %v4635_v19 }
0x1280   : > { %14348 = vrsqrt.f32 %v4587_v33  ;;  %v4654_v38 = vadd.f32 %v17792_v23, %v4634_v9 }
0x1281   : > { %14350 = vrsqrt.f32 %v4586_v51 }
0x1282   : > { %v14345_v2 = vpop.eup %14344  ;;  %11725 = vmatprep.mubr.msk.f32.mxu1 %vm901_vm0, %v4654_v38 }
0x1283   : > { %v14347_v21 = vpop.eup %14346  ;;  %v4553_v1 = vpop.xlane.xlu1 %4552  ;;  %11726 = vmatmul.mubr.msk.f32.gmra.mrb[90].mxu1 %vm901_vm0, %v4655_v31  ;;  %v4617_v26 = vmul.f32 %v14345_v2, %v17740_v14 }
0x1284   : > { %v4573_v39 = vmul.f32 0.03125, %v4553_v1  ;;  %v4550_v7 = vpop.xlane.xlu0 %4549  ;;  %v4616_v18 = vmul.f32 %v14347_v21, %v17743_v35  ;;  %v5010_v21 = vld [vmem:[%s20619_s4] sm:$0xff] }
0x1285   : > { %v4572_v32 = vmul.f32 0.03125, %v4550_v7  ;;  %v4637_v28 = vmul.f32 %v17787_v40, %v4617_v26  ;;  %v5014_v26 = vld [vmem:[%s20619_s4 + $0x20] sm:$0xff] }
0x1286   : > { %v4589_v47 = vadd.f32 1e-05, %v4573_v39  ;;  %v4636_v16 = vmul.f32 %v17787_v40, %v4616_v18  ;;  %v5015_v39 = vld [vmem:[%s20619_s4 + $0x28] sm:$0xff]  ;;  %v5016_v18 = vld [vmem:[%s20619_s4 + $0x30] sm:$0xff] }
0x1287   : > { %v4588_v22 = vadd.f32 1e-05, %v4572_v32  ;;  %v4657_v17 = vadd.f32 %v17792_v23, %v4637_v28  ;;  %v12770_v7 = vpack.c.bf16 %v5015_v39, %v5014_v26  ;;  %v5017_v32 = vld [vmem:[%s20619_s4 + $0x38] sm:$0xff] }
0x1288   : > { %14352 = vrsqrt.f32 %v4589_v47  ;;  %v4656_v3 = vadd.f32 %v17792_v23, %v4636_v16  ;;  %v12774_v28 = vpack.c.bf16 %v5017_v32, %v5016_v18  ;;  %v17879_v47 = vld [vmem:[#allocation22] ss:$0 sm:$0xff] }
0x1289   : > { %14354 = vrsqrt.f32 %v4588_v22 }
0x128a   : > { %v14349_v4 = vpop.eup %14348  ;;  %11728 = vmatprep.mubr.msk.f32.mxu1 %vm901_vm0, %v4656_v3 }
0x128b   : > { %v14351_v14 = vpop.eup %14350  ;;  %v4559_v59 = vpop.xlane.xlu1 %4558  ;;  %11729 = vmatmul.mubr.msk.f32.gmra.mrb[92].mxu1 %vm901_vm0, %v4657_v17  ;;  %v4619_v35 = vmul.f32 %v14349_v4, %v17752_v50 }
0x128c   : > { %v4575_v27 = vmul.f32 0.03125, %v4559_v59  ;;  %v4556_v10 = vpop.xlane.xlu0 %4555  ;;  %v4618_v60 = vmul.f32 %v14351_v14, %v17755_v0 }
0x128d   : > { %v4574_v61 = vmul.f32 0.03125, %v4556_v10  ;;  %v4639_v55 = vmul.f32 %v17787_v40, %v4619_v35 }
0x128e   : > { %v4591_v20 = vadd.f32 1e-05, %v4575_v27  ;;  %v4638_v25 = vmul.f32 %v17787_v40, %v4618_v60 }
0x128f   : > { %v4590_v34 = vadd.f32 1e-05, %v4574_v61  ;;  %v4659_v57 = vadd.f32 %v17792_v23, %v4639_v55 }
0x1290   : > { %14356 = vrsqrt.f32 %v4591_v20  ;;  %v4658_v29 = vadd.f32 %v17792_v23, %v4638_v25 }
0x1291   : > { %14358 = vrsqrt.f32 %v4590_v34 }
0x1292   : > { %v14353_v52 = vpop.eup %14352  ;;  %11731 = vmatprep.mubr.msk.f32.mxu1 %vm901_vm0, %v4658_v29 }
0x1293   : > { %v14355_v50 = vpop.eup %14354  ;;  %11732 = vmatmul.mubr.msk.f32.gmra.mrb[94].mxu1 %vm901_vm0, %v4659_v57  ;;  %v4621_v0 = vmul.f32 %v14353_v52, %v17764_v58 }
0x1294   : > { %v4620_v42 = vmul.f32 %v14355_v50, %v17767_v5 }
0x1295   : > { %v4641_v12 = vmul.f32 %v17787_v40, %v4621_v0 }
0x1296   : > { %v4640_v56 = vmul.f32 %v17787_v40, %v4620_v42 }
0x1297   : > { %v4661_v19 = vadd.f32 %v17792_v23, %v4641_v12 }
0x1298   : > { %v4660_v45 = vadd.f32 %v17792_v23, %v4640_v56 }
0x129a   : > { %v14357_v33 = vpop.eup %14356  ;;  %11734 = vmatprep.mubr.msk.f32.mxu1 %vm901_vm0, %v4660_v45 }
0x129b   : > { %v14359_v9 = vpop.eup %14358  ;;  %11735 = vmatmul.mubr.msk.f32.gmra.mrb[96].mxu1 %vm901_vm0, %v4661_v19  ;;  %v4623_v51 = vmul.f32 %v14357_v33, %v17776_v11  ;;  %v5011_v11 = vld [vmem:[%s20619_s4 + $0x8] sm:$0xff] }
0x129c   : > { %v4622_v58 = vmul.f32 %v14359_v9, %v17779_v49  ;;  %v12762_v49 = vpack.c.bf16 %v5011_v11, %v5010_v21 }
0x129d   : > { %v4643_v5 = vmul.f32 %v17787_v40, %v4623_v51 }
0x129e   : > { %v4642_v38 = vmul.f32 %v17787_v40, %v4622_v58  ;;  %12763 = vmatprep.subr.bf16.mxu0 %v12762_v49  ;;  %v5012_v40 = vld [vmem:[%s20619_s4 + $0x10] sm:$0xff] }
0x129f   : > { %v4663_v2 = vadd.f32 %v17792_v23, %v4643_v5  ;;  %12765 = vmatpush3.bf16.msra.mxu0 %v12762_v49 }
0x12a0   : > { %v4662_v31 = vadd.f32 %v17792_v23, %v4642_v38  ;;  %v5013_v23 = vld [vmem:[%s20619_s4 + $0x18] sm:$0xff] }
0x12a1   : > { %v12766_v1 = vpack.c.bf16 %v5013_v23, %v5012_v40 }
0x12a2   : > { %11737 = vmatprep.mubr.msk.f32.mxu1 %vm901_vm0, %v4662_v31 }
0x12a3   : > { %11738 = vmatmul.mubr.msk.f32.gmra.mrb[98].mxu1 %vm901_vm0, %v4663_v2  ;;  %12767 = vmatprep.subr.bf16.mxu0 %v12766_v1 }
0x12a4   : > { %12769 = vmatpush3.bf16.msra.mxu0 %v12766_v1 }
0x12a5   : > { %12771 = vmatprep.subr.bf16.mxu0 %v12770_v7 }
0x12a8   : > { %12773 = vmatpush3.bf16.msra.mxu0 %v12770_v7 }
0x12a9   : > { %12775 = vmatprep.subr.bf16.mxu0 %v12774_v28 }
0x12ac   : > { %12777 = vmatpush3.bf16.msra.mxu0 %v12774_v28 }
0x131f   : > { %v11718_v16 = vpop.f32.mrb[84].mxu1 }
0x1320   : > { %v4793_v22 = vadd.f32 %v11718_v16, %v17879_v47  ;;  %v4787_v3 = vpop.f32.mrb[85].mxu1 }
0x1321   : > { %v4788_v17 = vadd.f32 %v17879_v47, %v4787_v3 }
0x1322   : > { %v4883_v4 = vmul.f32 0.044715, %v4793_v22  ;;  %v4867_v18 = vmul.f32 0.5, %v4793_v22 }
0x1323   : > { %v4882_v14 = vmul.f32 0.044715, %v4788_v17  ;;  %v4866_v39 = vmul.f32 0.5, %v4788_v17 }
0x1324   : > { %v4899_v59 = vmul.f32 %v4883_v4, %v4793_v22 }
0x1325   : > { %v4898_v35 = vmul.f32 %v4882_v14, %v4788_v17 }
0x1326   : > { %v4915_v27 = vmul.f32 %v4899_v59, %v4793_v22 }
0x1327   : > { %v4914_v10 = vmul.f32 %v4898_v35, %v4788_v17 }
0x1328   : > { %v4931_v60 = vadd.f32 %v4915_v27, %v4793_v22 }
0x1329   : > { %v4930_v61 = vadd.f32 %v4914_v10, %v4788_v17 }
0x132a   : > { %v4947_v55 = vmul.f32 0.7978846, %v4931_v60  ;;  %v11721_v20 = vpop.f32.mrb[86].mxu1 }
0x132b   : > { %v4803_v25 = vadd.f32 %v11721_v20, %v17879_v47  ;;  %v4797_v34 = vpop.f32.mrb[87].mxu1  ;;  %v4946_v29 = vmul.f32 0.7978846, %v4930_v61 }
0x132c   : > { %14360 = vtanh.f32 %v4947_v55  ;;  %v4798_v57 = vadd.f32 %v17879_v47, %v4797_v34 }
0x132d   : > { %v4885_v52 = vmul.f32 0.044715, %v4803_v25  ;;  %14362 = vtanh.f32 %v4946_v29  ;;  %v4869_v60 = vmul.f32 0.5, %v4803_v25 }
0x132e   : > { %v4884_v50 = vmul.f32 0.044715, %v4798_v57  ;;  %v4868_v17 = vmul.f32 0.5, %v4798_v57 }
0x132f   : > { %v4901_v0 = vmul.f32 %v4885_v52, %v4803_v25 }
0x1330   : > { %v4900_v42 = vmul.f32 %v4884_v50, %v4798_v57  ;;  %v11724_v12 = vpop.f32.mrb[88].mxu1 }
0x1331   : > { %v4917_v56 = vmul.f32 %v4901_v0, %v4803_v25  ;;  %v4813_v45 = vadd.f32 %v11724_v12, %v17879_v47  ;;  %v4807_v19 = vpop.f32.mrb[89].mxu1 }
0x1332   : > { %v4916_v33 = vmul.f32 %v4900_v42, %v4798_v57  ;;  %v4808_v9 = vadd.f32 %v17879_v47, %v4807_v19 }
0x1333   : > { %v4933_v51 = vadd.f32 %v4917_v56, %v4803_v25  ;;  %v4887_v58 = vmul.f32 0.044715, %v4813_v45  ;;  %v4871_v50 = vmul.f32 0.5, %v4813_v45 }
0x1334   : > { %v4932_v5 = vadd.f32 %v4916_v33, %v4798_v57  ;;  %v4886_v38 = vmul.f32 0.044715, %v4808_v9  ;;  %v4870_v29 = vmul.f32 0.5, %v4808_v9 }
0x1335   : > { %v4903_v31 = vmul.f32 %v4887_v58, %v4813_v45  ;;  %v4949_v2 = vmul.f32 0.7978846, %v4933_v51 }
0x1336   : > { %v14361_v21 = vpop.eup %14360  ;;  %v4902_v11 = vmul.f32 %v4886_v38, %v4808_v9  ;;  %v4948_v49 = vmul.f32 0.7978846, %v4932_v5 }
0x1337   : > { %v14363_v40 = vpop.eup %14362  ;;  %v4979_v23 = vadd.f32 1.0, %v14361_v21  ;;  %v4919_v1 = vmul.f32 %v4903_v31, %v4813_v45  ;;  %14364 = vtanh.f32 %v4949_v2 }
0x1338   : > { %v4918_v26 = vmul.f32 %v4902_v11, %v4808_v9  ;;  %v4978_v7 = vadd.f32 1.0, %v14363_v40  ;;  %14366 = vtanh.f32 %v4948_v49 }
0x1339   : > { %v4935_v32 = vadd.f32 %v4919_v1, %v4813_v45  ;;  %v4995_v3 = vmul.f32 %v4979_v23, %v4867_v18 }
0x133a   : > { %v4934_v28 = vadd.f32 %v4918_v26, %v4808_v9  ;;  %v4994_v16 = vmul.f32 %v4978_v7, %v4866_v39 }
0x133b   : > { %v4951_v4 = vmul.f32 0.7978846, %v4935_v32 }
0x133c   : > { %11756 = vmatprep.mubr.msk.f32.mxu0 %vm5018_vm5, %v4994_v16  ;;  %v4950_v14 = vmul.f32 0.7978846, %v4934_v28 }
0x133d   : > { %11757 = vmatmul.mubr.msk.f32.vlgmr.msra.gmra.mrb[84].mxu0 %vm5018_vm5, %v4995_v3  ;;  %14368 = vtanh.f32 %v4951_v4 }
0x133e   : > { %14370 = vtanh.f32 %v4950_v14 }
0x1341   : > { %v14365_v59 = vpop.eup %14364 }
0x1342   : > { %v14367_v35 = vpop.eup %14366  ;;  %v4981_v27 = vadd.f32 1.0, %v14365_v59 }
0x1343   : > { %v4980_v10 = vadd.f32 1.0, %v14367_v35 }
0x1344   : > { %v4997_v61 = vmul.f32 %v4981_v27, %v4869_v60 }
0x1345   : > { %v4996_v22 = vmul.f32 %v4980_v10, %v4868_v17 }
0x1347   : > { %v14369_v55 = vpop.eup %14368  ;;  %11759 = vmatprep.mubr.msk.f32.mxu0 %vm5018_vm5, %v4996_v22 }
0x1348   : > { %v14371_v20 = vpop.eup %14370  ;;  %11760 = vmatmul.mubr.msk.f32.gmra.mrb[86].mxu0 %vm5018_vm5, %v4997_v61  ;;  %v4983_v34 = vadd.f32 1.0, %v14369_v55 }
0x1349   : > { %v4982_v52 = vadd.f32 1.0, %v14371_v20 }
0x134a   : > { %v4999_v42 = vmul.f32 %v4983_v34, %v4871_v50 }
0x134b   : > { %v4998_v0 = vmul.f32 %v4982_v52, %v4870_v29 }
0x134d   : > { %11762 = vmatprep.mubr.msk.f32.mxu0 %vm5018_vm5, %v4998_v0 }
0x134e   : > { %11763 = vmatmul.mubr.msk.f32.gmra.mrb[88].mxu0 %vm5018_vm5, %v4999_v42 }
0x1356   : > { %v11727_v57 = vpop.f32.mrb[90].mxu1 }
0x1357   : > { %v4823_v25 = vadd.f32 %v11727_v57, %v17879_v47  ;;  %v4817_v12 = vpop.f32.mrb[91].mxu1 }
0x1358   : > { %v4818_v56 = vadd.f32 %v17879_v47, %v4817_v12 }
0x1359   : > { %v4889_v19 = vmul.f32 0.044715, %v4823_v25 }
0x135a   : > { %v4888_v33 = vmul.f32 0.044715, %v4818_v56  ;;  %v4872_v42 = vmul.f32 0.5, %v4818_v56 }
0x135b   : > { %v4905_v51 = vmul.f32 %v4889_v19, %v4823_v25 }
0x135c   : > { %v4904_v58 = vmul.f32 %v4888_v33, %v4818_v56  ;;  %v4873_v33 = vmul.f32 0.5, %v4823_v25 }
0x135d   : > { %v4921_v5 = vmul.f32 %v4905_v51, %v4823_v25 }
0x135e   : > { %v4920_v9 = vmul.f32 %v4904_v58, %v4818_v56  ;;  %v11730_v38 = vpop.f32.mrb[92].mxu1 }
0x135f   : > { %v4937_v45 = vadd.f32 %v4921_v5, %v4823_v25  ;;  %v17896_v31 = vadd.f32 %v11730_v38, %v17879_v47  ;;  %v4827_v2 = vpop.f32.mrb[93].mxu1 }
0x1360   : > { %v4936_v21 = vadd.f32 %v4920_v9, %v4818_v56  ;;  %v4828_v11 = vadd.f32 %v17879_v47, %v4827_v2 }
0x1361   : > { %v4891_v49 = vmul.f32 0.044715, %v17896_v31  ;;  %v4953_v40 = vmul.f32 0.7978846, %v4937_v45 }
0x1362   : > { %v4890_v23 = vmul.f32 0.044715, %v4828_v11  ;;  %v4952_v1 = vmul.f32 0.7978846, %v4936_v21 }
0x1363   : > { %v4907_v26 = vmul.f32 %v4891_v49, %v17896_v31  ;;  %14372 = vtanh.f32 %v4953_v40 }
0x1364   : > { %v4906_v39 = vmul.f32 %v4890_v23, %v4828_v11  ;;  %14374 = vtanh.f32 %v4952_v1 }
0x1365   : > { %v4923_v7 = vmul.f32 %v4907_v26, %v17896_v31 }
0x1366   : > { %v4922_v18 = vmul.f32 %v4906_v39, %v4828_v11  ;;  %v11733_v32 = vpop.f32.mrb[94].mxu1 }
0x1367   : > { %v4939_v28 = vadd.f32 %v4923_v7, %v17896_v31  ;;  %v17904_v16 = vadd.f32 %v11733_v32, %v17879_v47  ;;  %v4837_v3 = vpop.f32.mrb[95].mxu1 }
0x1368   : > { %v4938_v4 = vadd.f32 %v4922_v18, %v4828_v11  ;;  %v17907_v14 = vadd.f32 %v17879_v47, %v4837_v3  ;;  %v4874_v18 = vmul.f32 0.5, %v4828_v11 }
0x1369   : > { %v4893_v59 = vmul.f32 0.044715, %v17904_v16  ;;  %v4955_v35 = vmul.f32 0.7978846, %v4939_v28 }
0x136a   : > { %v4892_v27 = vmul.f32 0.044715, %v17907_v14  ;;  %v4954_v17 = vmul.f32 0.7978846, %v4938_v4  ;;  %v4875_v4 = vmul.f32 0.5, %v17896_v31 }
0x136b   : > { %v4909_v10 = vmul.f32 %v4893_v59, %v17904_v16  ;;  %14376 = vtanh.f32 %v4955_v35 }
0x136c   : > { %v4908_v60 = vmul.f32 %v4892_v27, %v17907_v14  ;;  %14378 = vtanh.f32 %v4954_v17 }
0x136d   : > { %v14373_v22 = vpop.eup %14372  ;;  %v4925_v61 = vmul.f32 %v4909_v10, %v17904_v16 }
0x136e   : > { %v14375_v55 = vpop.eup %14374  ;;  %v4924_v20 = vmul.f32 %v4908_v60, %v17907_v14  ;;  %v11736_v34 = vpop.f32.mrb[96].mxu1  ;;  %v4985_v29 = vadd.f32 1.0, %v14373_v22 }
0x136f   : > { %v4941_v52 = vadd.f32 %v4925_v61, %v17904_v16  ;;  %v17917_v50 = vadd.f32 %v11736_v34, %v17879_v47  ;;  %v4847_v0 = vpop.f32.mrb[97].mxu1  ;;  %v4984_v57 = vadd.f32 1.0, %v14375_v55 }
0x1370   : > { %v4940_v12 = vadd.f32 %v4924_v20, %v17907_v14  ;;  %v4848_v19 = vadd.f32 %v17879_v47, %v4847_v0  ;;  %v5001_v38 = vmul.f32 %v4985_v29, %v4873_v33  ;;  %v4876_v29 = vmul.f32 0.5, %v17907_v14 }
0x1371   : > { %v4895_v51 = vmul.f32 0.044715, %v17917_v50  ;;  %v5000_v58 = vmul.f32 %v4984_v57, %v4872_v42  ;;  %v4957_v5 = vmul.f32 0.7978846, %v4941_v52  ;;  %v4877_v42 = vmul.f32 0.5, %v17904_v16 }
0x1372   : > { %v4894_v9 = vmul.f32 0.044715, %v4848_v19  ;;  %v4956_v45 = vmul.f32 0.7978846, %v4940_v12  ;;  %v4879_v14 = vmul.f32 0.5, %v17917_v50 }
0x1373   : > { %v4911_v2 = vmul.f32 %v4895_v51, %v17917_v50  ;;  %11765 = vmatprep.mubr.msk.f32.mxu0 %vm5018_vm5, %v5000_v58  ;;  %14380 = vtanh.f32 %v4957_v5 }
0x1374   : > { %v4910_v21 = vmul.f32 %v4894_v9, %v4848_v19  ;;  %11766 = vmatmul.mubr.msk.f32.gmra.mrb[90].mxu0 %vm5018_vm5, %v5001_v38  ;;  %14382 = vtanh.f32 %v4956_v45  ;;  %v4878_v38 = vmul.f32 0.5, %v4848_v19 }
0x1375   : > { %v14377_v56 = vpop.eup %14376  ;;  %v4927_v49 = vmul.f32 %v4911_v2, %v17917_v50 }
0x1376   : > { %v14379_v25 = vpop.eup %14378  ;;  %v4926_v40 = vmul.f32 %v4910_v21, %v4848_v19  ;;  %v11739_v23 = vpop.f32.mrb[98].mxu1  ;;  %v4987_v1 = vadd.f32 1.0, %v14377_v56 }
0x1377   : > { %v4943_v26 = vadd.f32 %v4927_v49, %v17917_v50  ;;  %v4863_v39 = vadd.f32 %v11739_v23, %v17879_v47  ;;  %v4857_v7 = vpop.f32.mrb[99].mxu1  ;;  %v4986_v32 = vadd.f32 1.0, %v14379_v25  ;;  %v17941_v50 = vld [vmem:[#allocation23] ss:$0 sm:$0xff] }
0x1378   : > { %v4942_v28 = vadd.f32 %v4926_v40, %v4848_v19  ;;  %v4858_v3 = vadd.f32 %v17879_v47, %v4857_v7  ;;  %v5003_v10 = vmul.f32 %v4987_v1, %v4875_v4 }
0x1379   : > { %v4897_v59 = vmul.f32 0.044715, %v4863_v39  ;;  %v5002_v35 = vmul.f32 %v4986_v32, %v4874_v18  ;;  %v4959_v27 = vmul.f32 0.7978846, %v4943_v26  ;;  %v4881_v23 = vmul.f32 0.5, %v4863_v39 }
0x137a   : > { %v4896_v17 = vmul.f32 0.044715, %v4858_v3  ;;  %v4958_v60 = vmul.f32 0.7978846, %v4942_v28  ;;  %v4880_v25 = vmul.f32 0.5, %v4858_v3 }
0x137b   : > { %v4913_v22 = vmul.f32 %v4897_v59, %v4863_v39  ;;  %11768 = vmatprep.mubr.msk.f32.mxu0 %vm5018_vm5, %v5002_v35  ;;  %14384 = vtanh.f32 %v4959_v27 }
0x137c   : > { %v4912_v61 = vmul.f32 %v4896_v17, %v4858_v3  ;;  %11769 = vmatmul.mubr.msk.f32.gmra.mrb[92].mxu0 %vm5018_vm5, %v5003_v10  ;;  %14386 = vtanh.f32 %v4958_v60 }
0x137d   : > { %v14381_v11 = vpop.eup %14380  ;;  %v4929_v55 = vmul.f32 %v4913_v22, %v4863_v39 }
0x137e   : > { %v14383_v20 = vpop.eup %14382  ;;  %v4928_v47 = vmul.f32 %v4912_v61, %v4858_v3  ;;  %v4989_v34 = vadd.f32 1.0, %v14381_v11 }
0x137f   : > { %v4945_v31 = vadd.f32 %v4929_v55, %v4863_v39  ;;  %v4988_v52 = vadd.f32 1.0, %v14383_v20 }
0x1380   : > { %v4944_v0 = vadd.f32 %v4928_v47, %v4858_v3  ;;  %v5005_v33 = vmul.f32 %v4989_v34, %v4877_v42 }
0x1381   : > { %v5004_v57 = vmul.f32 %v4988_v52, %v4876_v29  ;;  %v4961_v12 = vmul.f32 0.7978846, %v4945_v31 }
0x1382   : > { %v4960_v51 = vmul.f32 0.7978846, %v4944_v0 }
0x1383   : > { %11771 = vmatprep.mubr.msk.f32.mxu0 %vm5018_vm5, %v5004_v57  ;;  %14388 = vtanh.f32 %v4961_v12 }
0x1384   : > { %11772 = vmatmul.mubr.msk.f32.gmra.mrb[94].mxu0 %vm5018_vm5, %v5005_v33  ;;  %14390 = vtanh.f32 %v4960_v51 }
0x1385   : > { %v14385_v58 = vpop.eup %14384 }
0x1386   : > { %v14387_v5 = vpop.eup %14386  ;;  %v4991_v9 = vadd.f32 1.0, %v14385_v58 }
0x1387   : > { %v4990_v45 = vadd.f32 1.0, %v14387_v5 }
0x1388   : > { %v5007_v21 = vmul.f32 %v4991_v9, %v4879_v14 }
0x1389   : > { %v5006_v2 = vmul.f32 %v4990_v45, %v4878_v38 }
0x138b   : > { %11774 = vmatprep.mubr.msk.f32.mxu0 %vm5018_vm5, %v5006_v2 }
0x138c   : > { %11775 = vmatmul.mubr.msk.f32.gmra.mrb[96].mxu0 %vm5018_vm5, %v5007_v21 }
0x138d   : > { %v14389_v16 = vpop.eup %14388 }
0x138e   : > { %v14391_v56 = vpop.eup %14390  ;;  %v4993_v49 = vadd.f32 1.0, %v14389_v16 }
0x138f   : > { %v4992_v40 = vadd.f32 1.0, %v14391_v56 }
0x1390   : > { %v5009_v26 = vmul.f32 %v4993_v49, %v4881_v23 }
0x1391   : > { %v5008_v1 = vmul.f32 %v4992_v40, %v4880_v25 }
0x1393   : > { %11777 = vmatprep.mubr.msk.f32.mxu0 %vm5018_vm5, %v5008_v1 }
0x1394   : > { %11778 = vmatmul.mubr.msk.f32.gmra.mrb[98].mxu0 %vm5018_vm5, %v5009_v26 }
0x1410   : > { %v11758_v19 = vpop.f32.mrb[84].mxu0 }
0x1411   : > { %v5213_v7 = vadd.f32 %v11758_v19, %v17598_v36  ;;  %v5133_v18 = vpop.f32.mrb[85].mxu0 }
0x1412   : > { %v5212_v32 = vadd.f32 %v5133_v18, %v17601_v15 }
0x1413   : > { %v17946_v28 = vadd.f32 %v17941_v50, %v5213_v7 }
0x1414   : > { %v17949_v3 = vadd.f32 %v17941_v50, %v5212_v32 }
0x1415   : > { %20620 = vst [vmem:[#allocation92_spill] sm:$0xff] %v17946_v28  ;;  %v5254_v39 = vsel %vm901_vm0, %v17946_v28, 0.0 }
0x1416   : > { %20621 = vst [vmem:[#allocation99_spill] sm:$0xff] %v17949_v3  ;;  %5255 = vadd.xlane.f32.xlu1 %v5254_v39  ;;  %v5251_v4 = vsel %vm901_vm0, %v17949_v3, 0.0 }
0x1417   : > { %5252 = vadd.xlane.f32.xlu0 %v5251_v4 }
0x141b   : > { %v11761_v59 = vpop.f32.mrb[86].mxu0 }
0x141c   : > { %v5215_v36 = vadd.f32 %v11761_v59, %v17613_v30  ;;  %v5143_v35 = vpop.f32.mrb[87].mxu0 }
0x141d   : > { %v5214_v15 = vadd.f32 %v5143_v35, %v17610_v63 }
0x141e   : > { %v17958_v27 = vadd.f32 %v17941_v50, %v5215_v36 }
0x141f   : > { %v17961_v17 = vadd.f32 %v17941_v50, %v5214_v15 }
0x1420   : > { %20622 = vst [vmem:[#allocation93_spill] sm:$0xff] %v17958_v27  ;;  %v5260_v10 = vsel %vm901_vm0, %v17958_v27, 0.0 }
0x1421   : > { %20623 = vst [vmem:[#allocation100_spill] sm:$0xff] %v17961_v17  ;;  %v11764_v60 = vpop.f32.mrb[88].mxu0  ;;  %5261 = vadd.xlane.f32.xlu1 %v5260_v10  ;;  %v5257_v22 = vsel %vm901_vm0, %v17961_v17, 0.0 }
0x1422   : > { %v5217_v61 = vadd.f32 %v11764_v60, %v17622_v48  ;;  %v5153_v30 = vpop.f32.mrb[89].mxu0  ;;  %5258 = vadd.xlane.f32.xlu0 %v5257_v22 }
0x1423   : > { %v5216_v63 = vadd.f32 %v5153_v30, %v17625_v43 }
0x1424   : > { %v17970_v11 = vadd.f32 %v17941_v50, %v5217_v61 }
0x1425   : > { %v17973_v55 = vadd.f32 %v17941_v50, %v5216_v63 }
0x1426   : > { %20624 = vst [vmem:[#allocation94_spill] sm:$0xff] %v17970_v11  ;;  %v5266_v20 = vsel %vm901_vm0, %v17970_v11, 0.0 }
0x1427   : > { %20625 = vst [vmem:[#allocation95_spill] sm:$0xff] %v17973_v55  ;;  %5267 = vadd.xlane.f32.xlu1 %v5266_v20  ;;  %v5263_v47 = vsel %vm901_vm0, %v17973_v55, 0.0 }
0x1428   : > { %5264 = vadd.xlane.f32.xlu0 %v5263_v47 }
0x1447   : > { %v11767_v34 = vpop.f32.mrb[90].mxu0 }
0x1448   : > { %v5219_v48 = vadd.f32 %v11767_v34, %v17634_v24  ;;  %v5163_v31 = vpop.f32.mrb[91].mxu0 }
0x1449   : > { %v5218_v43 = vadd.f32 %v5163_v31, %v17637_v6 }
0x144a   : > { %v17982_v29 = vadd.f32 %v17941_v50, %v5219_v48 }
0x144b   : > { %v17985_v52 = vadd.f32 %v17941_v50, %v5218_v43 }
0x144c   : > { %20626 = vst [vmem:[#allocation58_spill] sm:$0xff] %v17982_v29  ;;  %v5272_v0 = vsel %vm901_vm0, %v17982_v29, 0.0 }
0x144d   : > { %20627 = vst [vmem:[#allocation57_spill] sm:$0xff] %v17985_v52  ;;  %5273 = vadd.xlane.f32.xlu1 %v5272_v0  ;;  %v5269_v42 = vsel %vm901_vm0, %v17985_v52, 0.0 }
0x144e   : > { %5270 = vadd.xlane.f32.xlu0 %v5269_v42 }
0x144f   : > { %v11770_v57 = vpop.f32.mrb[92].mxu0 }
0x1450   : > { %v5221_v24 = vadd.f32 %v11770_v57, %v17646_v41  ;;  %v5173_v12 = vpop.f32.mrb[93].mxu0 }
0x1451   : > { %v5220_v6 = vadd.f32 %v5173_v12, %v17649_v46 }
0x1452   : > { %v17994_v33 = vadd.f32 %v17941_v50, %v5221_v24 }
0x1453   : > { %v17997_v51 = vadd.f32 %v17941_v50, %v5220_v6 }
0x1454   : > { %20628 = vst [vmem:[#allocation101_spill] sm:$0xff] %v17994_v33  ;;  %v5278_v58 = vsel %vm901_vm0, %v17994_v33, 0.0 }
0x1455   : > { %20629 = vst [vmem:[#allocation102_spill] sm:$0xff] %v17997_v51  ;;  %5279 = vadd.xlane.f32.xlu1 %v5278_v58  ;;  %v5275_v5 = vsel %vm901_vm0, %v17997_v51, 0.0 }
0x1456   : > { %5276 = vadd.xlane.f32.xlu0 %v5275_v5 }
0x1457   : > { %v11773_v9 = vpop.f32.mrb[94].mxu0 }
0x1458   : > { %v5223_v41 = vadd.f32 %v11773_v9, %v17658_v54  ;;  %v5183_v38 = vpop.f32.mrb[95].mxu0 }
0x1459   : > { %v5222_v46 = vadd.f32 %v5183_v38, %v17661_v13  ;;  %v5501_v38 = vld [vmem:[#allocation11 + $0x28] sm:$0xff] }
0x145a   : > { %v18006_v45 = vadd.f32 %v17941_v50, %v5223_v41  ;;  %v5500_v41 = vld [vmem:[#allocation11 + $0x20] sm:$0xff] }
0x145b   : > { %v18009_v14 = vadd.f32 %v17941_v50, %v5222_v46  ;;  %v12778_v46 = vpack.c.bf16 %v5501_v38, %v5500_v41 }
0x145c   : > { %20630 = vst [vmem:[#allocation96_spill] sm:$0xff] %v18006_v45  ;;  %v5284_v2 = vsel %vm901_vm0, %v18006_v45, 0.0 }
0x145d   : > { %20631 = vst [vmem:[#allocation103_spill] sm:$0xff] %v18009_v14  ;;  %5285 = vadd.xlane.f32.xlu1 %v5284_v2  ;;  %v5281_v21 = vsel %vm901_vm0, %v18009_v14, 0.0  ;;  %12779 = vmatprep.subr.bf16.mxu1 %v12778_v46  ;;  %v5502_v2 = vld [vmem:[#allocation11 + $0x30] sm:$0xff] }
0x145e   : > { %5282 = vadd.xlane.f32.xlu0 %v5281_v21  ;;  %12781 = vmatpush3.bf16.msra.mxu1 %v12778_v46  ;;  %v5503_v21 = vld [vmem:[#allocation11 + $0x38] sm:$0xff] }
0x145f   : > { %v11776_v16 = vpop.f32.mrb[96].mxu0 }
0x1460   : > { %v5225_v54 = vadd.f32 %v11776_v16, %v17670_v53  ;;  %v5193_v56 = vpop.f32.mrb[97].mxu0  ;;  %v12782_v16 = vpack.c.bf16 %v5503_v21, %v5502_v2 }
0x1461   : > { %v5224_v13 = vadd.f32 %v5193_v56, %v17673_v44 }
0x1462   : > { %v18018_v49 = vadd.f32 %v17941_v50, %v5225_v54  ;;  %12783 = vmatprep.subr.bf16.mxu1 %v12782_v16 }
0x1463   : > { %v18021_v25 = vadd.f32 %v17941_v50, %v5224_v13  ;;  %12785 = vmatpush3.bf16.msra.mxu1 %v12782_v16 }
0x1464   : > { %20632 = vst [vmem:[#allocation97_spill] sm:$0xff] %v18018_v49  ;;  %v5290_v40 = vsel %vm901_vm0, %v18018_v49, 0.0 }
0x1465   : > { %20633 = vst [vmem:[#allocation98_spill] sm:$0xff] %v18021_v25  ;;  %5291 = vadd.xlane.f32.xlu1 %v5290_v40  ;;  %v5287_v23 = vsel %vm901_vm0, %v18021_v25, 0.0 }
0x1466   : > { %5288 = vadd.xlane.f32.xlu0 %v5287_v23 }
0x1467   : > { %v11779_v1 = vpop.f32.mrb[98].mxu0 }
0x1468   : > { %v5227_v53 = vadd.f32 %v11779_v1, %v17682_v37  ;;  %v5203_v26 = vpop.f32.mrb[99].mxu0 }
0x1469   : > { %v5226_v44 = vadd.f32 %v5203_v26, %v17685_v62 }
0x146a   : > { %v18030_v19 = vadd.f32 %v17941_v50, %v5227_v53 }
0x146b   : > { %v18033_v7 = vadd.f32 %v17941_v50, %v5226_v44 }
0x146c   : > { %20634 = vst [vmem:[#allocation59_spill] sm:$0xff] %v18030_v19  ;;  %v5296_v18 = vsel %vm901_vm0, %v18030_v19, 0.0 }
0x146d   : > { %20635 = vst [vmem:[#allocation60_spill] sm:$0xff] %v18033_v7  ;;  %5297 = vadd.xlane.f32.xlu1 %v5296_v18  ;;  %v5293_v32 = vsel %vm901_vm0, %v18033_v7, 0.0 }
0x146e   : > { %5294 = vadd.xlane.f32.xlu0 %v5293_v32 }
0x14a3   : > { %v5256_v39 = vpop.xlane.xlu1 %5255 }
0x14a4   : > { %v5300_v4 = vmul.f32 0.03125, %v5256_v39  ;;  %v5253_v37 = vpop.xlane.xlu0 %5252 }
0x14a5   : > { %v5299_v59 = vmul.f32 0.03125, %v5253_v37 }
0x14a6   : > { %v18040_v62 = vsub.f32 %v17946_v28, %v5300_v4 }
0x14a7   : > { %v18043_v36 = vsub.f32 %v17949_v3, %v5299_v59  ;;  %v18512_v3 = vld [vmem:[%s20489_s19 + $0x78] sm:$0xff] }
0x14a8   : > { %v5332_v50 = vmul.f32 %v18040_v62, %v18040_v62  ;;  %20651 = vst [vmem:[#allocation76_spill] sm:$0xff] %v18512_v3 }
0x14a9   : > { %v5331_v35 = vmul.f32 %v18043_v36, %v18043_v36 }
0x14aa   : > { %v5350_v15 = vsel %vm901_vm0, %v5332_v50, 0.0 }
0x14ab   : > { %5351 = vadd.xlane.f32.xlu1 %v5350_v15  ;;  %v5347_v10 = vsel %vm901_vm0, %v5331_v35, 0.0 }
0x14ac   : > { %5348 = vadd.xlane.f32.xlu0 %v5347_v10 }
0x14ae   : > { %v5262_v60 = vpop.xlane.xlu1 %5261 }
0x14af   : > { %v5302_v22 = vmul.f32 0.03125, %v5262_v60  ;;  %v5259_v61 = vpop.xlane.xlu0 %5258 }
0x14b0   : > { %v5301_v30 = vmul.f32 0.03125, %v5259_v61 }
0x14b1   : > { %v18052_v63 = vsub.f32 %v17958_v27, %v5302_v22  ;;  %v18503_v27 = vld [vmem:[%s20489_s19 + $0x68] sm:$0xff] }
0x14b2   : > { %v18055_v20 = vsub.f32 %v17961_v17, %v5301_v30  ;;  %20650 = vst [vmem:[#allocation91_spill] sm:$0xff] %v18503_v27 }
0x14b3   : > { %v5334_v47 = vmul.f32 %v18052_v63, %v18052_v63 }
0x14b4   : > { %v5268_v34 = vpop.xlane.xlu1 %5267  ;;  %v5333_v48 = vmul.f32 %v18055_v20, %v18055_v20 }
0x14b5   : > { %v5304_v31 = vmul.f32 0.03125, %v5268_v34  ;;  %v5265_v43 = vpop.xlane.xlu0 %5264  ;;  %v5356_v0 = vsel %vm901_vm0, %v5334_v47, 0.0 }
0x14b6   : > { %v5303_v42 = vmul.f32 0.03125, %v5265_v43  ;;  %5357 = vadd.xlane.f32.xlu1 %v5356_v0  ;;  %v5353_v57 = vsel %vm901_vm0, %v5333_v48, 0.0 }
0x14b7   : > { %v18064_v24 = vsub.f32 %v17970_v11, %v5304_v31  ;;  %5354 = vadd.xlane.f32.xlu0 %v5353_v57 }
0x14b8   : > { %v18067_v12 = vsub.f32 %v17973_v55, %v5303_v42  ;;  %v18477_v55 = vld [vmem:[%s20489_s19 + $0x38] sm:$0xff] }
0x14b9   : > { %v5336_v6 = vmul.f32 %v18064_v24, %v18064_v24  ;;  %20647 = vst [vmem:[#allocation72_spill] sm:$0xff] %v18477_v55 }
0x14ba   : > { %v5335_v58 = vmul.f32 %v18067_v12, %v18067_v12 }
0x14bb   : > { %v5362_v5 = vsel %vm901_vm0, %v5336_v6, 0.0 }
0x14bc   : > { %5363 = vadd.xlane.f32.xlu1 %v5362_v5  ;;  %v5359_v9 = vsel %vm901_vm0, %v5335_v58, 0.0 }
0x14bd   : > { %5360 = vadd.xlane.f32.xlu0 %v5359_v9 }
0x14da   : > { %v5274_v54 = vpop.xlane.xlu1 %5273 }
0x14db   : > { %v5306_v56 = vmul.f32 0.03125, %v5274_v54  ;;  %v5271_v13 = vpop.xlane.xlu0 %5270 }
0x14dc   : > { %v5305_v40 = vmul.f32 0.03125, %v5271_v13 }
0x14dd   : > { %v18076_v23 = vsub.f32 %v17982_v29, %v5306_v56  ;;  %v18471_v29 = vld [vmem:[%s20489_s19 + $0x28] sm:$0xff] }
0x14de   : > { %v18079_v1 = vsub.f32 %v17985_v52, %v5305_v40  ;;  %20646 = vst [vmem:[#allocation71_spill] sm:$0xff] %v18471_v29 }
0x14df   : > { %v5338_v53 = vmul.f32 %v18076_v23, %v18076_v23 }
0x14e0   : > { %v5337_v26 = vmul.f32 %v18079_v1, %v18079_v1 }
0x14e1   : > { %v5368_v44 = vsel %vm901_vm0, %v5338_v53, 0.0 }
0x14e2   : > { %v5280_v18 = vpop.xlane.xlu1 %5279  ;;  %5369 = vadd.xlane.f32.xlu1 %v5368_v44  ;;  %v5365_v32 = vsel %vm901_vm0, %v5337_v26, 0.0 }
0x14e3   : > { %v5308_v39 = vmul.f32 0.03125, %v5280_v18  ;;  %5366 = vadd.xlane.f32.xlu0 %v5365_v32  ;;  %v5277_v4 = vpop.xlane.xlu0 %5276 }
0x14e4   : > { %v5307_v37 = vmul.f32 0.03125, %v5277_v4 }
0x14e5   : > { %v18088_v59 = vsub.f32 %v17994_v33, %v5308_v39 }
0x14e6   : > { %v18091_v50 = vsub.f32 %v17997_v51, %v5307_v37 }
0x14e7   : > { %v5340_v35 = vmul.f32 %v18088_v59, %v18088_v59 }
0x14e8   : > { %v5339_v15 = vmul.f32 %v18091_v50, %v18091_v50 }
0x14e9   : > { %v5374_v10 = vsel %vm901_vm0, %v5340_v35, 0.0 }
0x14ea   : > { %v5286_v60 = vpop.xlane.xlu1 %5285  ;;  %5375 = vadd.xlane.f32.xlu1 %v5374_v10  ;;  %v5371_v22 = vsel %vm901_vm0, %v5339_v15, 0.0 }
0x14eb   : > { %v5310_v61 = vmul.f32 0.03125, %v5286_v60  ;;  %5372 = vadd.xlane.f32.xlu0 %v5371_v22  ;;  %v5283_v30 = vpop.xlane.xlu0 %5282 }
0x14ec   : > { %v5309_v47 = vmul.f32 0.03125, %v5283_v30 }
0x14ed   : > { %v18100_v34 = vsub.f32 %v18006_v45, %v5310_v61 }
0x14ee   : > { %v18103_v48 = vsub.f32 %v18009_v14, %v5309_v47 }
0x14ef   : > { %v5342_v31 = vmul.f32 %v18100_v34, %v18100_v34 }
0x14f0   : > { %v5341_v43 = vmul.f32 %v18103_v48, %v18103_v48 }
0x14f1   : > { %v5380_v0 = vsel %vm901_vm0, %v5342_v31, 0.0 }
0x14f2   : > { %v5292_v42 = vpop.xlane.xlu1 %5291  ;;  %5381 = vadd.xlane.f32.xlu1 %v5380_v0  ;;  %v5377_v57 = vsel %vm901_vm0, %v5341_v43, 0.0  ;;  %v18135_v43 = vld [vmem:[#allocation8 + $0x1] ss:$0 sm:$0xff] }
0x14f3   : > { %v5312_v6 = vmul.f32 0.03125, %v5292_v42  ;;  %5378 = vadd.xlane.f32.xlu0 %v5377_v57  ;;  %v5289_v58 = vpop.xlane.xlu0 %5288 }
0x14f4   : > { %v5311_v5 = vmul.f32 0.03125, %v5289_v58 }
0x14f5   : > { %v18112_v9 = vsub.f32 %v18018_v49, %v5312_v6 }
0x14f6   : > { %v18115_v41 = vsub.f32 %v18021_v25, %v5311_v5 }
0x14f7   : > { %v5344_v38 = vmul.f32 %v18112_v9, %v18112_v9 }
0x14f8   : > { %v5343_v46 = vmul.f32 %v18115_v41, %v18115_v41 }
0x14f9   : > { %v5386_v2 = vsel %vm901_vm0, %v5344_v38, 0.0 }
0x14fa   : > { %5387 = vadd.xlane.f32.xlu1 %v5386_v2  ;;  %v5298_v21 = vpop.xlane.xlu1 %5297  ;;  %v5383_v16 = vsel %vm901_vm0, %v5343_v46, 0.0  ;;  %v18140_v2 = vld [vmem:[#allocation10 + $0x1] ss:$0 sm:$0xff] }
0x14fb   : > { %v5314_v54 = vmul.f32 0.03125, %v5298_v21  ;;  %5384 = vadd.xlane.f32.xlu0 %v5383_v16  ;;  %v5295_v56 = vpop.xlane.xlu0 %5294 }
0x14fc   : > { %v5313_v13 = vmul.f32 0.03125, %v5295_v56 }
0x14fd   : > { %v18124_v40 = vsub.f32 %v18030_v19, %v5314_v54 }
0x14fe   : > { %v18127_v53 = vsub.f32 %v18033_v7, %v5313_v13 }
0x14ff   : > { %v5346_v26 = vmul.f32 %v18124_v40, %v18124_v40 }
0x1500   : > { %v5345_v44 = vmul.f32 %v18127_v53, %v18127_v53 }
0x1501   : > { %v5392_v18 = vsel %vm901_vm0, %v5346_v26, 0.0 }
0x1502   : > { %5393 = vadd.xlane.f32.xlu1 %v5392_v18  ;;  %v5389_v32 = vsel %vm901_vm0, %v5345_v44, 0.0 }
0x1503   : > { %5390 = vadd.xlane.f32.xlu0 %v5389_v32 }
0x1538   : > { %v5352_v39 = vpop.xlane.xlu1 %5351 }
0x1539   : > { %v5396_v4 = vmul.f32 0.03125, %v5352_v39  ;;  %v5349_v37 = vpop.xlane.xlu0 %5348 }
0x153a   : > { %v5395_v35 = vmul.f32 0.03125, %v5349_v37 }
0x153b   : > { %v5412_v15 = vadd.f32 1e-05, %v5396_v4 }
0x153c   : > { %v5411_v10 = vadd.f32 1e-05, %v5395_v35 }
0x153d   : > { %14392 = vrsqrt.f32 %v5412_v15 }
0x153e   : > { %14394 = vrsqrt.f32 %v5411_v10 }
0x1543   : > { %v5358_v60 = vpop.xlane.xlu1 %5357 }
0x1544   : > { %v5398_v22 = vmul.f32 0.03125, %v5358_v60  ;;  %v5355_v61 = vpop.xlane.xlu0 %5354 }
0x1545   : > { %v5397_v30 = vmul.f32 0.03125, %v5355_v61 }
0x1546   : > { %v5414_v47 = vadd.f32 1e-05, %v5398_v22 }
0x1547   : > { %v14393_v31 = vpop.eup %14392  ;;  %v5413_v0 = vadd.f32 1e-05, %v5397_v30 }
0x1548   : > { %v14395_v42 = vpop.eup %14394  ;;  %v5444_v57 = vmul.f32 %v14393_v31, %v18040_v62  ;;  %14396 = vrsqrt.f32 %v5414_v47 }
0x1549   : > { %14398 = vrsqrt.f32 %v5413_v0  ;;  %v5364_v6 = vpop.xlane.xlu1 %5363  ;;  %v5443_v58 = vmul.f32 %v14395_v42, %v18043_v36 }
0x154a   : > { %v5464_v5 = vmul.f32 %v18135_v43, %v5444_v57  ;;  %v5400_v38 = vmul.f32 0.03125, %v5364_v6  ;;  %v5361_v46 = vpop.xlane.xlu0 %5360 }
0x154b   : > { %v5399_v21 = vmul.f32 0.03125, %v5361_v46  ;;  %v5463_v16 = vmul.f32 %v18135_v43, %v5443_v58 }
0x154c   : > { %v5416_v54 = vadd.f32 1e-05, %v5400_v38  ;;  %v5484_v62 = vadd.f32 %v18140_v2, %v5464_v5 }
0x154d   : > { %v5415_v56 = vadd.f32 1e-05, %v5399_v21  ;;  %v5483_v13 = vadd.f32 %v18140_v2, %v5463_v16 }
0x154e   : > { %14400 = vrsqrt.f32 %v5416_v54 }
0x154f   : > { %14402 = vrsqrt.f32 %v5415_v56  ;;  %11788 = vmatprep.mubr.msk.f32.mxu1 %vm901_vm0, %v5483_v13 }
0x1550   : > { %11789 = vmatmul.mubr.msk.f32.vlgmr.msra.gmra.mrb[100].mxu1 %vm901_vm0, %v5484_v62 }
0x1552   : > { %v14397_v36 = vpop.eup %14396 }
0x1553   : > { %v14399_v26 = vpop.eup %14398  ;;  %v5446_v44 = vmul.f32 %v14397_v36, %v18052_v63 }
0x1554   : > { %v5445_v18 = vmul.f32 %v14399_v26, %v18055_v20 }
0x1555   : > { %v5466_v32 = vmul.f32 %v18135_v43, %v5446_v44 }
0x1556   : > { %v5465_v39 = vmul.f32 %v18135_v43, %v5445_v18 }
0x1557   : > { %v5486_v15 = vadd.f32 %v18140_v2, %v5466_v32 }
0x1558   : > { %v14401_v4 = vpop.eup %14400  ;;  %v5485_v37 = vadd.f32 %v18140_v2, %v5465_v39 }
0x1559   : > { %v14403_v35 = vpop.eup %14402  ;;  %v5448_v10 = vmul.f32 %v14401_v4, %v18064_v24 }
0x155a   : > { %11791 = vmatprep.mubr.msk.f32.mxu1 %vm901_vm0, %v5485_v37  ;;  %v5447_v60 = vmul.f32 %v14403_v35, %v18067_v12 }
0x155b   : > { %11792 = vmatmul.mubr.msk.f32.gmra.mrb[102].mxu1 %vm901_vm0, %v5486_v15  ;;  %v5468_v63 = vmul.f32 %v18135_v43, %v5448_v10 }
0x155c   : > { %v5467_v20 = vmul.f32 %v18135_v43, %v5447_v60 }
0x155d   : > { %v5488_v61 = vadd.f32 %v18140_v2, %v5468_v63 }
0x155e   : > { %v5487_v22 = vadd.f32 %v18140_v2, %v5467_v20 }
0x1560   : > { %11794 = vmatprep.mubr.msk.f32.mxu1 %vm901_vm0, %v5487_v22 }
0x1561   : > { %11795 = vmatmul.mubr.msk.f32.gmra.mrb[104].mxu1 %vm901_vm0, %v5488_v61 }
0x156f   : > { %v5370_v30 = vpop.xlane.xlu1 %5369 }
0x1570   : > { %v5402_v24 = vmul.f32 0.03125, %v5370_v30  ;;  %v5367_v47 = vpop.xlane.xlu0 %5366 }
0x1571   : > { %v5401_v31 = vmul.f32 0.03125, %v5367_v47 }
0x1572   : > { %v5418_v0 = vadd.f32 1e-05, %v5402_v24 }
0x1573   : > { %v5417_v12 = vadd.f32 1e-05, %v5401_v31 }
0x1574   : > { %14404 = vrsqrt.f32 %v5418_v0 }
0x1575   : > { %14406 = vrsqrt.f32 %v5417_v12 }
0x1577   : > { %v5376_v42 = vpop.xlane.xlu1 %5375 }
0x1578   : > { %v5404_v57 = vmul.f32 0.03125, %v5376_v42  ;;  %v5373_v6 = vpop.xlane.xlu0 %5372 }
0x1579   : > { %v5403_v58 = vmul.f32 0.03125, %v5373_v6 }
0x157a   : > { %v5420_v5 = vadd.f32 1e-05, %v5404_v57 }
0x157b   : > { %v5419_v38 = vadd.f32 1e-05, %v5403_v58 }
0x157c   : > { %14408 = vrsqrt.f32 %v5420_v5 }
0x157d   : > { %14410 = vrsqrt.f32 %v5419_v38 }
0x157e   : > { %v14405_v46 = vpop.eup %14404 }
0x157f   : > { %v14407_v21 = vpop.eup %14406  ;;  %v5382_v16 = vpop.xlane.xlu1 %5381  ;;  %v5450_v54 = vmul.f32 %v14405_v46, %v18076_v23 }
0x1580   : > { %v5406_v56 = vmul.f32 0.03125, %v5382_v16  ;;  %v5379_v13 = vpop.xlane.xlu0 %5378  ;;  %v5449_v62 = vmul.f32 %v14407_v21, %v18079_v1 }
0x1581   : > { %v5405_v36 = vmul.f32 0.03125, %v5379_v13  ;;  %v5470_v26 = vmul.f32 %v18135_v43, %v5450_v54 }
0x1582   : > { %v5422_v44 = vadd.f32 1e-05, %v5406_v56  ;;  %v5469_v18 = vmul.f32 %v18135_v43, %v5449_v62 }
0x1583   : > { %v5421_v32 = vadd.f32 1e-05, %v5405_v36  ;;  %v5490_v4 = vadd.f32 %v18140_v2, %v5470_v26 }
0x1584   : > { %14412 = vrsqrt.f32 %v5422_v44  ;;  %v5489_v39 = vadd.f32 %v18140_v2, %v5469_v18 }
0x1585   : > { %14414 = vrsqrt.f32 %v5421_v32 }
0x1586   : > { %v14409_v37 = vpop.eup %14408  ;;  %11797 = vmatprep.mubr.msk.f32.mxu1 %vm901_vm0, %v5489_v39 }
0x1587   : > { %v14411_v23 = vpop.eup %14410  ;;  %v5388_v35 = vpop.xlane.xlu1 %5387  ;;  %11798 = vmatmul.mubr.msk.f32.gmra.mrb[106].mxu1 %vm901_vm0, %v5490_v4  ;;  %v5452_v1 = vmul.f32 %v14409_v37, %v18088_v59 }
0x1588   : > { %v5408_v15 = vmul.f32 0.03125, %v5388_v35  ;;  %v5385_v10 = vpop.xlane.xlu0 %5384  ;;  %v5451_v60 = vmul.f32 %v14411_v23, %v18091_v50  ;;  %v10246_v23 = vld [vmem:[#allocation13 + $0x1] ss:$0 sm:$0xff] }
0x1589   : > { %v5407_v63 = vmul.f32 0.03125, %v5385_v10  ;;  %v5472_v20 = vmul.f32 %v18135_v43, %v5452_v1 }
0x158a   : > { %v5424_v22 = vadd.f32 1e-05, %v5408_v15  ;;  %v5471_v61 = vmul.f32 %v18135_v43, %v5451_v60 }
0x158b   : > { %v5423_v30 = vadd.f32 1e-05, %v5407_v63  ;;  %v5492_v47 = vadd.f32 %v18140_v2, %v5472_v20 }
0x158c   : > { %14416 = vrsqrt.f32 %v5424_v22  ;;  %v5491_v24 = vadd.f32 %v18140_v2, %v5471_v61 }
0x158d   : > { %14418 = vrsqrt.f32 %v5423_v30 }
0x158e   : > { %v14413_v31 = vpop.eup %14412  ;;  %11800 = vmatprep.mubr.msk.f32.mxu1 %vm901_vm0, %v5491_v24 }
0x158f   : > { %v14415_v59 = vpop.eup %14414  ;;  %v5394_v0 = vpop.xlane.xlu1 %5393  ;;  %11801 = vmatmul.mubr.msk.f32.gmra.mrb[108].mxu1 %vm901_vm0, %v5492_v47  ;;  %v5454_v50 = vmul.f32 %v14413_v31, %v18100_v34 }
0x1590   : > { %v5410_v12 = vmul.f32 0.03125, %v5394_v0  ;;  %v5391_v42 = vpop.xlane.xlu0 %5390  ;;  %v5453_v57 = vmul.f32 %v14415_v59, %v18103_v48 }
0x1591   : > { %v5409_v6 = vmul.f32 0.03125, %v5391_v42  ;;  %v5474_v58 = vmul.f32 %v18135_v43, %v5454_v50 }
0x1592   : > { %v5426_v5 = vadd.f32 1e-05, %v5410_v12  ;;  %v5473_v38 = vmul.f32 %v18135_v43, %v5453_v57 }
0x1593   : > { %v5425_v46 = vadd.f32 1e-05, %v5409_v6  ;;  %v5494_v16 = vadd.f32 %v18140_v2, %v5474_v58 }
0x1594   : > { %14420 = vrsqrt.f32 %v5426_v5  ;;  %v5493_v21 = vadd.f32 %v18140_v2, %v5473_v38 }
0x1595   : > { %14422 = vrsqrt.f32 %v5425_v46 }
0x1596   : > { %v14417_v54 = vpop.eup %14416  ;;  %11803 = vmatprep.mubr.msk.f32.mxu1 %vm901_vm0, %v5493_v21 }
0x1597   : > { %v14419_v34 = vpop.eup %14418  ;;  %11804 = vmatmul.mubr.msk.f32.gmra.mrb[110].mxu1 %vm901_vm0, %v5494_v16  ;;  %v5456_v48 = vmul.f32 %v14417_v54, %v18112_v9 }
0x1598   : > { %v5455_v56 = vmul.f32 %v14419_v34, %v18115_v41 }
0x1599   : > { %v5476_v13 = vmul.f32 %v18135_v43, %v5456_v48 }
0x159a   : > { %v5475_v62 = vmul.f32 %v18135_v43, %v5455_v56 }
0x159b   : > { %v5496_v26 = vadd.f32 %v18140_v2, %v5476_v13 }
0x159c   : > { %v5495_v36 = vadd.f32 %v18140_v2, %v5475_v62 }
0x159e   : > { %v14421_v44 = vpop.eup %14420  ;;  %11806 = vmatprep.mubr.msk.f32.mxu1 %vm901_vm0, %v5495_v36 }
0x159f   : > { %v14423_v18 = vpop.eup %14422  ;;  %11807 = vmatmul.mubr.msk.f32.gmra.mrb[112].mxu1 %vm901_vm0, %v5496_v26  ;;  %v5458_v32 = vmul.f32 %v14421_v44, %v18124_v40 }
0x15a0   : > { %v5457_v9 = vmul.f32 %v14423_v18, %v18127_v53 }
0x15a1   : > { %v5478_v41 = vmul.f32 %v18135_v43, %v5458_v32 }
0x15a2   : > { %v5477_v39 = vmul.f32 %v18135_v43, %v5457_v9 }
0x15a3   : > { %v5498_v37 = vadd.f32 %v18140_v2, %v5478_v41 }
0x15a4   : > { %v5497_v4 = vadd.f32 %v18140_v2, %v5477_v39 }
0x15a6   : > { %11809 = vmatprep.mubr.msk.f32.mxu1 %vm901_vm0, %v5497_v4 }
0x15a7   : > { %11810 = vmatmul.mubr.msk.f32.gmra.mrb[114].mxu1 %vm901_vm0, %v5498_v37 }
0x1623   : > { %v11790_v35 = vpop.f32.mrb[100].mxu1 }
0x1624   : > { %v18203_v1 = vadd.f32 %v11790_v35, %v10246_v23  ;;  %v5623_v15 = vpop.f32.mrb[101].mxu1 }
0x1625   : > { %v18205_v40 = vadd.f32 %v10246_v23, %v5623_v15 }
0x1627   : > { %11844 = vmatprep.mubr.msk.f32.mxu0 %vm1433_vm1, %v18205_v40  ;;  %v18211_v53 = vpack.i.bf16 %v18203_v1, %v18205_v40 }
0x1629   : > { %13735 = vrot.lane.b32.xlu0 %v18211_v53, %s15390_s5 }
0x162e   : > { %v11793_v43 = vpop.f32.mrb[102].mxu1 }
0x162f   : > { %v18215_v2 = vadd.f32 %v11793_v43, %v10246_v23  ;;  %v5633_v10 = vpop.f32.mrb[103].mxu1 }
0x1630   : > { %v18217_v60 = vadd.f32 %v10246_v23, %v5633_v10 }
0x1632   : > { %v18221_v63 = vpack.i.bf16 %v18215_v2, %v18217_v60 }
0x1634   : > { %v11796_v20 = vpop.f32.mrb[104].mxu1  ;;  %13740 = vrot.lane.b32.xlu1 %v18221_v63, %s15390_s5 }
0x1635   : > { %v18225_v22 = vadd.f32 %v11796_v20, %v10246_v23  ;;  %v5643_v61 = vpop.f32.mrb[105].mxu1 }
0x1636   : > { %v18227_v30 = vadd.f32 %v10246_v23, %v5643_v61 }
0x1638   : > { %v18231_v24 = vpack.i.bf16 %v18225_v22, %v18227_v30 }
0x163a   : > { %13745 = vrot.lane.b32.xlu1 %v18231_v24, %s15390_s5 }
0x165a   : > { %v11799_v47 = vpop.f32.mrb[106].mxu1 }
0x165b   : > { %v18235_v31 = vadd.f32 %v11799_v47, %v10246_v23  ;;  %v5653_v59 = vpop.f32.mrb[107].mxu1 }
0x165c   : > { %v18237_v0 = vadd.f32 %v10246_v23, %v5653_v59 }
0x165e   : > { %v18241_v50 = vpack.i.bf16 %v18235_v31, %v18237_v0 }
0x1660   : > { %13750 = vrot.lane.b32.xlu1 %v18241_v50, %s15390_s5 }
0x1662   : > { %v11802_v12 = vpop.f32.mrb[108].mxu1 }
0x1663   : > { %v18245_v42 = vadd.f32 %v11802_v12, %v10246_v23  ;;  %v5663_v57 = vpop.f32.mrb[109].mxu1 }
0x1664   : > { %v18247_v6 = vadd.f32 %v10246_v23, %v5663_v57 }
0x1666   : > { %v18251_v58 = vpack.i.bf16 %v18245_v42, %v18247_v6 }
0x1668   : > { %13755 = vrot.lane.b32.xlu0 %v18251_v58, %s15390_s5 }
0x166a   : > { %v11805_v5 = vpop.f32.mrb[110].mxu1 }
0x166b   : > { %v18255_v38 = vadd.f32 %v11805_v5, %v10246_v23  ;;  %v5673_v46 = vpop.f32.mrb[111].mxu1 }
0x166c   : > { %v18257_v21 = vadd.f32 %v10246_v23, %v5673_v46 }
0x166e   : > { %v18261_v16 = vpack.i.bf16 %v18255_v38, %v18257_v21 }
0x1670   : > { %20636 = vst [vmem:[#allocation61_spill] sm:$0xff] %v18261_v16  ;;  %13760 = vrot.lane.b32.xlu1 %v18261_v16, %s15390_s5 }
0x1672   : > { %v11808_v54 = vpop.f32.mrb[112].mxu1 }
0x1673   : > { %v18265_v34 = vadd.f32 %v11808_v54, %v10246_v23  ;;  %v5683_v48 = vpop.f32.mrb[113].mxu1 }
0x1674   : > { %v18267_v56 = vadd.f32 %v10246_v23, %v5683_v48 }
0x1676   : > { %v18271_v13 = vpack.i.bf16 %v18265_v34, %v18267_v56 }
0x1678   : > { %13765 = vrot.lane.b32.xlu0 %v18271_v13, %s15390_s5 }
0x167a   : > { %v11811_v62 = vpop.f32.mrb[114].mxu1 }
0x167b   : > { %v18275_v36 = vadd.f32 %v11811_v62, %v10246_v23  ;;  %v5693_v26 = vpop.f32.mrb[115].mxu1 }
0x167c   : > { %v18277_v44 = vadd.f32 %v10246_v23, %v5693_v26  ;;  %13775 = vrot.lane.b32.xlu0 %v18211_v53, %s15391_s26 }
0x167e   : > { %v18283_v18 = vpack.i.bf16 %v18275_v36, %v18277_v44 }
0x1680   : > { %13790 = vrot.lane.b32.xlu0 %v18241_v50, %s15391_s26  ;;  %13770 = vrot.lane.b32.xlu1 %v18283_v18, %s15390_s5  ;;  %s20750_s5 = smov 24  }
0x1684   : > { %13795 = vrot.lane.b32.xlu0 %v18251_v58, %s15391_s26  ;;  %13780 = vrot.lane.b32.xlu1 %v18221_v63, %s15391_s26 }
0x1688   : > { %13810 = vrot.lane.b32.xlu0 %v18211_v53, %s15392_s6  ;;  %13785 = vrot.lane.b32.xlu1 %v18231_v24, %s15391_s26 }
0x168c   : > { %13820 = vrot.lane.b32.xlu0 %v18231_v24, %s15392_s6  ;;  %13800 = vrot.lane.b32.xlu1 %v18261_v16, %s15391_s26 }
0x1690   : > { %13805 = vrot.lane.b32.xlu1 %v18271_v13, %s15391_s26 }
0x1694   : > { %13815 = vrot.lane.b32.xlu1 %v18221_v63, %s15392_s6 }
0x1698   : > { %13825 = vrot.lane.b32.xlu1 %v18283_v18, %s15391_s26  ;;  %s20781_s26 = sld [smem:[#allocation119_spill]] }
0x169b   : > { %v13736_v32 = vpop.permute.xlu0 %13735 }
0x169c   : > { %v13738_v9 = vunpack.i.h.bf16 %v13736_v32  ;;  %v13737_v41 = vunpack.i.l.bf16 %v13736_v32 }
0x169e   : > { %v12786_v39 = vpack.c.bf16 %v13738_v9, %v13737_v41 }
0x16a0   : > { %12788 = vmatprep.subr.msk.bf16.mxu0 %vm16187_vm2, %v12786_v39 }
0x16a1   : > { %12791 = vmatpush3.bf16.xpose.msk.msra.mxu0 %vm16187_vm2, %v12786_v39 }
0x16a6   : > { %v13741_v4 = vpop.permute.xlu1 %13740 }
0x16a7   : > { %v13743_v37 = vunpack.i.h.bf16 %v13741_v4  ;;  %v13742_v23 = vunpack.i.l.bf16 %v13741_v4 }
0x16a9   : > { %v12792_v35 = vpack.c.bf16 %v13743_v37, %v13742_v23 }
0x16ab   : > { %12794 = vmatprep.subr.msk.bf16.mxu0 %vm16187_vm2, %v12792_v35 }
0x16ac   : > { %v13746_v15 = vpop.permute.xlu1 %13745  ;;  %12797 = vmatpush3.bf16.xpose.msk.msra.mxu0 %vm16187_vm2, %v12792_v35 }
0x16ad   : > { %v13748_v43 = vunpack.i.h.bf16 %v13746_v15  ;;  %v13747_v10 = vunpack.i.l.bf16 %v13746_v15 }
0x16af   : > { %v12798_v20 = vpack.c.bf16 %v13748_v43, %v13747_v10 }
0x16b1   : > { %12800 = vmatprep.subr.msk.bf16.mxu0 %vm16187_vm2, %v12798_v20 }
0x16b4   : > { %12803 = vmatpush3.bf16.xpose.msk.msra.mxu0 %vm16187_vm2, %v12798_v20 }
0x16d2   : > { %v13751_v61 = vpop.permute.xlu1 %13750 }
0x16d3   : > { %v13753_v47 = vunpack.i.h.bf16 %v13751_v61  ;;  %v13752_v59 = vunpack.i.l.bf16 %v13751_v61 }
0x16d5   : > { %v12804_v12 = vpack.c.bf16 %v13753_v47, %v13752_v59 }
0x16d7   : > { %12806 = vmatprep.subr.msk.bf16.mxu0 %vm16187_vm2, %v12804_v12 }
0x16d8   : > { %12809 = vmatpush3.bf16.xpose.msk.msra.mxu0 %vm16187_vm2, %v12804_v12 }
0x16da   : > { %v13756_v57 = vpop.permute.xlu0 %13755 }
0x16db   : > { %v13758_v5 = vunpack.i.h.bf16 %v13756_v57  ;;  %v13757_v46 = vunpack.i.l.bf16 %v13756_v57 }
0x16dd   : > { %v12810_v54 = vpack.c.bf16 %v13758_v5, %v13757_v46 }
0x16df   : > { %12812 = vmatprep.subr.msk.bf16.mxu0 %vm16187_vm2, %v12810_v54 }
0x16e0   : > { %12815 = vmatpush3.bf16.xpose.msk.msra.mxu0 %vm16187_vm2, %v12810_v54 }
0x16e2   : > { %v13761_v48 = vpop.permute.xlu1 %13760 }
0x16e3   : > { %v13763_v62 = vunpack.i.h.bf16 %v13761_v48  ;;  %v13762_v26 = vunpack.i.l.bf16 %v13761_v48 }
0x16e5   : > { %v12816_v32 = vpack.c.bf16 %v13763_v62, %v13762_v26 }
0x16e7   : > { %12818 = vmatprep.subr.msk.bf16.mxu0 %vm16187_vm2, %v12816_v32 }
0x16e8   : > { %12821 = vmatpush3.bf16.xpose.msk.msra.mxu0 %vm16187_vm2, %v12816_v32 }
0x16ea   : > { %v13766_v9 = vpop.permute.xlu0 %13765 }
0x16eb   : > { %v13768_v41 = vunpack.i.h.bf16 %v13766_v9  ;;  %v13767_v39 = vunpack.i.l.bf16 %v13766_v9 }
0x16ed   : > { %v12822_v4 = vpack.c.bf16 %v13768_v41, %v13767_v39 }
0x16ee   : > { %v13776_v37 = vpop.permute.xlu0 %13775 }
0x16ef   : > { %v13778_v23 = vunpack.i.h.bf16 %v13776_v37  ;;  %v13777_v35 = vunpack.i.l.bf16 %v13776_v37  ;;  %12824 = vmatprep.subr.msk.bf16.mxu0 %vm16187_vm2, %v12822_v4 }
0x16f0   : > { %12827 = vmatpush3.bf16.xpose.msk.msra.mxu0 %vm16187_vm2, %v12822_v4 }
0x16f1   : > { %v12834_v15 = vpack.c.bf16 %v13778_v23, %v13777_v35 }
0x16f2   : > { %v13771_v43 = vpop.permute.xlu1 %13770  ;;  %v13791_v47 = vpop.permute.xlu0 %13790 }
0x16f3   : > { %v13773_v10 = vunpack.i.h.bf16 %v13771_v43  ;;  %v13772_v20 = vunpack.i.l.bf16 %v13771_v43  ;;  %12835 = vmatprep.subr.bf16.mxu1 %v12834_v15  ;;  %v13793_v54 = vunpack.i.h.bf16 %v13791_v47  ;;  %v13792_v48 = vunpack.i.l.bf16 %v13791_v47 }
0x16f4   : > { %12837 = vmatpush3.bf16.msra.mxu1 %v12834_v15 }
0x16f5   : > { %v12828_v61 = vpack.c.bf16 %v13773_v10, %v13772_v20  ;;  %v12846_v37 = vpack.c.bf16 %v13793_v54, %v13792_v48 }
0x16f6   : > { %v13781_v59 = vpop.permute.xlu1 %13780  ;;  %v13796_v32 = vpop.permute.xlu0 %13795 }
0x16f7   : > { %v13783_v12 = vunpack.i.h.bf16 %v13781_v59  ;;  %v13782_v57 = vunpack.i.l.bf16 %v13781_v59  ;;  %12830 = vmatprep.subr.msk.bf16.mxu0 %vm16187_vm2, %v12828_v61  ;;  %v13798_v39 = vunpack.i.h.bf16 %v13796_v32  ;;  %v13797_v4 = vunpack.i.l.bf16 %v13796_v32 }
0x16f8   : > { %12833 = vmatpush3.bf16.xpose.msk.msra.mxu0 %vm16187_vm2, %v12828_v61 }
0x16f9   : > { %v12838_v5 = vpack.c.bf16 %v13783_v12, %v13782_v57  ;;  %v12850_v43 = vpack.c.bf16 %v13798_v39, %v13797_v4  ;;  %v18379_v4 = vld [vmem:[%s20489_s19 + $0x8] sm:$0xff] }
0x16fa   : > { %v13786_v46 = vpop.permute.xlu1 %13785 }
0x16fb   : > { %v13788_v62 = vunpack.i.h.bf16 %v13786_v46  ;;  %v13787_v26 = vunpack.i.l.bf16 %v13786_v46  ;;  %12839 = vmatprep.subr.bf16.mxu1 %v12838_v5  ;;  %v13811_v46 = vpop.permute.xlu0 %13810 }
0x16fc   : > { %12841 = vmatpush3.bf16.msra.mxu1 %v12838_v5  ;;  %v13813_v54 = vunpack.i.h.bf16 %v13811_v46  ;;  %v13812_v48 = vunpack.i.l.bf16 %v13811_v46 }
0x16fd   : > { %v12842_v9 = vpack.c.bf16 %v13788_v62, %v13787_v26 }
0x16fe   : > { %v13801_v41 = vpop.permute.xlu1 %13800  ;;  %v18361_v26 = vpack.c.bf16 %v13813_v54, %v13812_v48 }
0x16ff   : > { %11845 = vmatmul.mubr.msk.f32.vlgmr.msra.gmra.mrb[100].mxu0 %vm1433_vm1, %v18203_v1  ;;  %12843 = vmatprep.subr.bf16.mxu1 %v12842_v9  ;;  %v13803_v35 = vunpack.i.h.bf16 %v13801_v41  ;;  %v13802_v15 = vunpack.i.l.bf16 %v13801_v41 }
0x1700   : > { %11847 = vmatprep.mubr.msk.f32.mxu0 %vm1433_vm1, %v18217_v60  ;;  %12845 = vmatpush3.bf16.msra.mxu1 %v12842_v9 }
0x1701   : > { %12847 = vmatprep.subr.bf16.mxu1 %v12846_v37  ;;  %v12854_v47 = vpack.c.bf16 %v13803_v35, %v13802_v15 }
0x1702   : > { %v13806_v23 = vpop.permute.xlu1 %13805 }
0x1703   : > { %11848 = vmatmul.mubr.msk.f32.gmra.mrb[102].mxu0 %vm1433_vm1, %v18215_v2  ;;  %v13808_v20 = vunpack.i.h.bf16 %v13806_v23  ;;  %v13807_v61 = vunpack.i.l.bf16 %v13806_v23  ;;  %v18387_v23 = vld [vmem:[%s20489_s19] sm:$0xff] }
0x1704   : > { %11850 = vmatprep.mubr.msk.f32.mxu0 %vm1433_vm1, %v18227_v30  ;;  %12849 = vmatpush3.bf16.msra.mxu1 %v12846_v37  ;;  %20637 = vst [vmem:[#allocation63_spill] sm:$0xff] %v18387_v23 }
0x1705   : > { %12851 = vmatprep.subr.bf16.mxu1 %v12850_v43  ;;  %v12858_v5 = vpack.c.bf16 %v13808_v20, %v13807_v61  ;;  %v18397_v61 = vld [vmem:[%s20489_s19 + $0x18] sm:$0xff] }
0x1706   : > { %v18347_v10 = vpop.permute.xlu1 %13815  ;;  %20638 = vst [vmem:[#allocation62_spill] sm:$0xff] %v18397_v61 }
0x1707   : > { %11851 = vmatmul.mubr.msk.f32.gmra.mrb[104].mxu0 %vm1433_vm1, %v18225_v22 }
0x1708   : > { %11853 = vmatprep.mubr.msk.f32.mxu0 %vm1433_vm1, %v18237_v0  ;;  %12853 = vmatpush3.bf16.msra.mxu1 %v12850_v43 }
0x1709   : > { %12855 = vmatprep.subr.bf16.mxu1 %v12854_v47 }
0x170a   : > { %v13826_v59 = vpop.permute.xlu1 %13825 }
0x170b   : > { %v13828_v12 = vunpack.i.h.bf16 %v13826_v59  ;;  %v13827_v57 = vunpack.i.l.bf16 %v13826_v59  ;;  %11854 = vmatmul.mubr.msk.f32.gmra.mrb[106].mxu0 %vm1433_vm1, %v18235_v31 }
0x170c   : > { %11856 = vmatprep.mubr.msk.f32.mxu0 %vm1433_vm1, %v18247_v6  ;;  %12857 = vmatpush3.bf16.msra.mxu1 %v12854_v47 }
0x170d   : > { %12859 = vmatprep.subr.bf16.mxu1 %v12858_v5  ;;  %v12862_v62 = vpack.c.bf16 %v13828_v12, %v13827_v57 }
0x170f   : > { %11857 = vmatmul.mubr.msk.f32.gmra.mrb[108].mxu0 %vm1433_vm1, %v18245_v42 }
0x1710   : > { %11859 = vmatprep.mubr.msk.f32.mxu0 %vm1433_vm1, %v18257_v21  ;;  %12861 = vmatpush3.bf16.msra.mxu1 %v12858_v5  ;;  %v18406_v5 = vld [vmem:[%s20489_s19 + $0x10] sm:$0xff] }
0x1711   : > { %12863 = vmatprep.subr.bf16.mxu1 %v12862_v62  ;;  %20639 = vst [vmem:[#allocation65_spill] sm:$0xff] %v18406_v5 }
0x1713   : > { %11860 = vmatmul.mubr.msk.f32.gmra.mrb[110].mxu0 %vm1433_vm1, %v18255_v38 }
0x1714   : > { %11862 = vmatprep.mubr.msk.f32.mxu0 %vm1433_vm1, %v18267_v56  ;;  %12865 = vmatpush3.bf16.msra.mxu1 %v12862_v62 }
0x1715   : > { %12868 = vmatprep.subr.msk.bf16.mxu1 %vm16187_vm2, %v18361_v26 }
0x1717   : > { %11863 = vmatmul.mubr.msk.f32.gmra.mrb[112].mxu0 %vm1433_vm1, %v18265_v34 }
0x1718   : > { %11865 = vmatprep.mubr.msk.f32.mxu0 %vm1433_vm1, %v18277_v44 }
0x171b   : > { %11866 = vmatmul.mubr.msk.f32.gmra.mrb[114].mxu0 %vm1433_vm1, %v18275_v36 }
0x17d2   : > { %v11846_v32 = vpop.f32.mrb[100].mxu0 }
0x17d3   : > { %v5960_v9 = vmul.f32 0.35355338, %v11846_v32  ;;  %v5880_v41 = vpop.f32.mrb[101].mxu0  ;;  %v18415_v32 = vld [vmem:[%s20489_s19 + $0x20] sm:$0xff] }
0x17d4   : > { %v5959_v39 = vmul.f32 0.35355338, %v5880_v41  ;;  %20640 = vst [vmem:[#allocation64_spill] sm:$0xff] %v18415_v32 }
0x17d5   : > { %v18382_v37 = vadd.f32 %v18379_v4, %v5960_v9 }
0x17d6   : > { %v18390_v35 = vadd.f32 %v18387_v23, %v5959_v39  ;;  %v11849_v15 = vpop.f32.mrb[102].mxu0 }
0x17d7   : > { %v5962_v43 = vmul.f32 0.35355338, %v11849_v15  ;;  %5993 = vmax.xlane.f32.xlu1 %v18382_v37  ;;  %v5890_v20 = vpop.f32.mrb[103].mxu0 }
0x17d8   : > { %5991 = vmax.xlane.f32.xlu0 %v18390_v35  ;;  %v5961_v59 = vmul.f32 0.35355338, %v5890_v20 }
0x17d9   : > { %v18400_v47 = vadd.f32 %v18397_v61, %v5962_v43  ;;  %v18424_v43 = vld [vmem:[%s20489_s19 + $0x30] sm:$0xff] }
0x17da   : > { %v11852_v12 = vpop.f32.mrb[104].mxu0  ;;  %v18409_v46 = vadd.f32 %v18406_v5, %v5961_v59  ;;  %20641 = vst [vmem:[#allocation67_spill] sm:$0xff] %v18424_v43 }
0x17db   : > { %v5900_v57 = vpop.f32.mrb[105].mxu0  ;;  %v5964_v52 = vmul.f32 0.35355338, %v11852_v12  ;;  %v18485_v12 = vld [vmem:[%s20489_s19 + $0x48] sm:$0xff] }
0x17dc   : > { %5997 = vmax.xlane.f32.xlu0 %v18400_v47  ;;  %v5963_v54 = vmul.f32 0.35355338, %v5900_v57  ;;  %20648 = vst [vmem:[#allocation73_spill] sm:$0xff] %v18485_v12 }
0x17de   : > { %v11855_v48 = vpop.f32.mrb[106].mxu0  ;;  %v18418_v9 = vadd.f32 %v18415_v32, %v5963_v54  ;;  %v18435_v54 = vld [vmem:[%s20489_s19 + $0x40] sm:$0xff] }
0x17df   : > { %v5910_v62 = vpop.f32.mrb[107].mxu0  ;;  %20642 = vst [vmem:[#allocation66_spill] sm:$0xff] %v18435_v54 }
0x17e0   : > { %5995 = vmax.xlane.f32.xlu0 %v18409_v46  ;;  %v5965_v41 = vmul.f32 0.35355338, %v5910_v62 }
0x17e2   : > { %v11858_v39 = vpop.f32.mrb[108].mxu0  ;;  %v18427_v20 = vadd.f32 %v18424_v43, %v5965_v41 }
0x17e3   : > { %v5920_v15 = vpop.f32.mrb[109].mxu0  ;;  %v5968_v11 = vmul.f32 0.35355338, %v11858_v39 }
0x17e4   : > { %5999 = vmax.xlane.f32.xlu0 %v18418_v9  ;;  %v5967_v59 = vmul.f32 0.35355338, %v5920_v15  ;;  %v18444_v15 = vld [vmem:[%s20489_s19 + $0x50] sm:$0xff] }
0x17e5   : > { %20643 = vst [vmem:[#allocation69_spill] sm:$0xff] %v18444_v15 }
0x17e6   : > { %v11861_v57 = vpop.f32.mrb[110].mxu0  ;;  %v18438_v62 = vadd.f32 %v18435_v54, %v5967_v59 }
0x17e7   : > { %v5930_v7 = vpop.f32.mrb[111].mxu0 }
0x17e8   : > { %13830 = vrot.lane.b32.xlu1 %v18241_v50, %s15392_s6  ;;  %6003 = vmax.xlane.f32.xlu0 %v18427_v20  ;;  %v5969_v19 = vmul.f32 0.35355338, %v5930_v7  ;;  %v18453_v7 = vld [vmem:[%s20489_s19 + $0x60] sm:$0xff] }
0x17e9   : > { %20644 = vst [vmem:[#allocation68_spill] sm:$0xff] %v18453_v7 }
0x17ea   : > { %v11864_v25 = vpop.f32.mrb[112].mxu0  ;;  %v18447_v49 = vadd.f32 %v18444_v15, %v5969_v19  ;;  %v18462_v19 = vld [vmem:[%s20489_s19 + $0x70] sm:$0xff] }
0x17eb   : > { %v5940_v41 = vpop.f32.mrb[113].mxu0  ;;  %20645 = vst [vmem:[#allocation70_spill] sm:$0xff] %v18462_v19  ;;  %v5972_v17 = vmul.f32 0.35355338, %v11864_v25 }
0x17ec   : > { %6007 = vmax.xlane.f32.xlu0 %v18438_v62  ;;  %v5971_v14 = vmul.f32 0.35355338, %v5940_v41 }
0x17ee   : > { %v11867_v45 = vpop.f32.mrb[114].mxu0  ;;  %v18456_v59 = vadd.f32 %v18453_v7, %v5971_v14  ;;  %v5966_v14 = vmul.f32 0.35355338, %v11855_v48  ;;  %v5970_v48 = vmul.f32 0.35355338, %v11861_v57 }
0x17ef   : > { %v5950_v51 = vpop.f32.mrb[115].mxu0  ;;  %v5974_v57 = vmul.f32 0.35355338, %v11867_v45 }
0x17f0   : > { %6011 = vmax.xlane.f32.xlu0 %v18447_v49  ;;  %v5973_v33 = vmul.f32 0.35355338, %v5950_v51  ;;  %v5980_v51 = vadd.f32 %v18471_v29, %v5964_v52  ;;  %v18488_v52 = vadd.f32 %v18485_v12, %v5968_v11  ;;  %v18506_v11 = vadd.f32 %v18503_v27, %v5972_v17 }
0x17f1   : > { %v18515_v25 = vadd.f32 %v18512_v3, %v5974_v57 }
0x17f2   : > { %v18465_v41 = vadd.f32 %v18462_v19, %v5973_v33  ;;  %v5982_v33 = vadd.f32 %v18477_v55, %v5966_v14  ;;  %v18494_v14 = vld [vmem:[%s20489_s19 + $0x58] sm:$0xff] }
0x17f3   : > { %20649 = vst [vmem:[#allocation74_spill] sm:$0xff] %v18494_v14  ;;  %v18497_v39 = vadd.f32 %v18494_v14, %v5970_v48  ;;  %v18518_v48 = vpop.permute.xlu0 %13820 }
0x17f4   : > { %6015 = vmax.xlane.f32.xlu0 %v18456_v59 }
0x17f8   : > { %6019 = vmax.xlane.f32.xlu0 %v18465_v41 }
0x180c   : > { %6001 = vmax.xlane.f32.xlu1 %v5980_v51 }
0x180e   : > { %13835 = vrot.lane.b32.xlu0 %v18251_v58, %s15392_s6 }
0x1810   : > { %6005 = vmax.xlane.f32.xlu1 %v5982_v33 }
0x1814   : > { %6009 = vmax.xlane.f32.xlu1 %v18488_v52 }
0x1818   : > { %6013 = vmax.xlane.f32.xlu1 %v18497_v39 }
0x181c   : > { %6017 = vmax.xlane.f32.xlu1 %v18506_v11 }
0x1820   : > { %6021 = vmax.xlane.f32.xlu1 %v18515_v25 }
0x1864   : > { %v5994_v28 = vpop.xlane.xlu1 %5993 }
0x1865   : > { %v6024_v14 = vsub.f32 %v18382_v37, %v5994_v28  ;;  %v5992_v17 = vpop.xlane.xlu0 %5991 }
0x1866   : > { %v6023_v45 = vsub.f32 %v18390_v35, %v5992_v17 }
0x1867   : > { %v6041_v27 = vmul.f32 1.442695, %v6024_v14 }
0x1868   : > { %v6039_v12 = vmul.f32 1.442695, %v6023_v45 }
0x1869   : > { %14424 = vpow2.f32 %v6041_v27  ;;  %v5998_v57 = vpop.xlane.xlu0 %5997  ;;  %v18532_v27 = vpop.permute.xlu1 %13830 }
0x186a   : > { %14426 = vpow2.f32 %v6039_v12  ;;  %v6026_v14 = vsub.f32 %v18400_v47, %v5998_v57 }
0x186c   : > { %v6045_v7 = vmul.f32 1.442695, %v6026_v14 }
0x186d   : > { %v5996_v28 = vpop.xlane.xlu0 %5995 }
0x186e   : > { %v6025_v12 = vsub.f32 %v18409_v46, %v5996_v28 }
0x1870   : > { %v6043_v3 = vmul.f32 1.442695, %v6025_v12 }
0x1871   : > { %v6000_v37 = vpop.xlane.xlu0 %5999 }
0x1872   : > { %14428 = vpow2.f32 %v6043_v3  ;;  %v6027_v43 = vsub.f32 %v18418_v9, %v6000_v37 }
0x1873   : > { %v18522_v55 = vpop.eup %14424  ;;  %14430 = vpow2.f32 %v6045_v7 }
0x1874   : > { %v18524_v29 = vpop.eup %14426  ;;  %6073 = vadd.xlane.f32.xlu0 %v18522_v55  ;;  %v6047_v28 = vmul.f32 1.442695, %v6027_v43 }
0x1875   : > { %6071 = vadd.xlane.f32.xlu1 %v18524_v29  ;;  %v6004_v35 = vpop.xlane.xlu0 %6003 }
0x1876   : > { %v6029_v5 = vsub.f32 %v18427_v20, %v6004_v35 }
0x1878   : > { %v6051_v57 = vmul.f32 1.442695, %v6029_v5 }
0x1879   : > { %v6008_v17 = vpop.xlane.xlu0 %6007 }
0x187a   : > { %v6031_v9 = vsub.f32 %v18438_v62, %v6008_v17 }
0x187c   : > { %v18541_v20 = vpop.eup %14428  ;;  %v6055_v5 = vmul.f32 1.442695, %v6031_v9 }
0x187d   : > { %v6012_v61 = vpop.xlane.xlu0 %6011 }
0x187e   : > { %v6033_v47 = vsub.f32 %v18447_v49, %v6012_v61 }
0x1880   : > { %v6059_v3 = vmul.f32 1.442695, %v6033_v47 }
0x1886   : > { %13840 = vrot.lane.b32.xlu1 %v18261_v16, %s15392_s6 }
0x188a   : > { %13845 = vrot.lane.b32.xlu0 %v18271_v13, %s15392_s6 }
0x1899   : > { %v6002_v45 = vpop.xlane.xlu1 %6001 }
0x189a   : > { %v6028_v19 = vsub.f32 %v5980_v51, %v6002_v45 }
0x189c   : > { %v6049_v15 = vmul.f32 1.442695, %v6028_v19 }
0x189d   : > { %v6006_v54 = vpop.xlane.xlu1 %6005 }
0x189e   : > { %v6030_v32 = vsub.f32 %v5982_v33, %v6006_v54  ;;  %14432 = vpow2.f32 %v6049_v15  ;;  %v6016_v54 = vpop.xlane.xlu0 %6015 }
0x189f   : > { %v6035_v49 = vsub.f32 %v18456_v59, %v6016_v54 }
0x18a0   : > { %v6053_v23 = vmul.f32 1.442695, %v6030_v32  ;;  %v18543_v32 = vpop.eup %14430 }
0x18a1   : > { %v6010_v46 = vpop.xlane.xlu1 %6009  ;;  %v6063_v37 = vmul.f32 1.442695, %v6035_v49  ;;  %v13818_v49 = vunpack.i.h.bf16 %v18347_v10 }
0x18a2   : > { %14434 = vpow2.f32 %v6053_v23  ;;  %v6032_v51 = vsub.f32 %v18488_v52, %v6010_v46  ;;  %v6020_v12 = vpop.xlane.xlu0 %6019 }
0x18a3   : > { %14436 = vpow2.f32 %v6047_v28 }
0x18a4   : > { %14438 = vpow2.f32 %v6051_v57  ;;  %v6057_v7 = vmul.f32 1.442695, %v6032_v51 }
0x18a5   : > { %v6014_v19 = vpop.xlane.xlu1 %6013  ;;  %14440 = vpow2.f32 %v6059_v3 }
0x18a6   : > { %14442 = vpow2.f32 %v6057_v7  ;;  %v6034_v43 = vsub.f32 %v18497_v39, %v6014_v19  ;;  %v6037_v39 = vsub.f32 %v18465_v41, %v6020_v12  ;;  %v13836_v3 = vpop.permute.xlu0 %13835 }
0x18a8   : > { %v18549_v61 = vpop.eup %14432  ;;  %v6061_v59 = vmul.f32 1.442695, %v6034_v43 }
0x18a9   : > { %v6018_v15 = vpop.xlane.xlu1 %6017  ;;  %6075 = vadd.xlane.f32.xlu0 %v18541_v20 }
0x18aa   : > { %v6036_v23 = vsub.f32 %v18506_v11, %v6018_v15  ;;  %6077 = vadd.xlane.f32.xlu1 %v18543_v32 }
0x18ac   : > { %v18552_v62 = vpop.eup %14434  ;;  %v6065_v33 = vmul.f32 1.442695, %v6036_v23  ;;  %v13817_v23 = vunpack.i.l.bf16 %v18347_v10 }
0x18ad   : > { %v6022_v52 = vpop.xlane.xlu1 %6021  ;;  %6081 = vadd.xlane.f32.xlu0 %v18549_v61  ;;  %v18557_v35 = vpop.eup %14436 }
0x18ae   : > { %14444 = vpow2.f32 %v6065_v33  ;;  %6085 = vadd.xlane.f32.xlu1 %v18552_v62  ;;  %v6038_v11 = vsub.f32 %v18515_v25, %v6022_v52  ;;  %v18559_v14 = vpop.eup %14438  ;;  %v6067_v25 = vmul.f32 1.442695, %v6037_v39  ;;  %v12872_v33 = vpack.c.bf16 %v13818_v49, %v13817_v23 }
0x18af   : > { %14446 = vpow2.f32 %v6055_v5  ;;  %v18564_v45 = vpop.eup %14440  ;;  %v13823_v52 = vunpack.i.h.bf16 %v18518_v48 }
0x18b0   : > { %14448 = vpow2.f32 %v6063_v37  ;;  %v6069_v17 = vmul.f32 1.442695, %v6038_v11  ;;  %v18566_v46 = vpop.eup %14442  ;;  %v13822_v37 = vunpack.i.l.bf16 %v18518_v48  ;;  %v13837_v48 = vunpack.i.l.bf16 %v13836_v3 }
0x18b1   : > { %6079 = vadd.xlane.f32.xlu0 %v18557_v35  ;;  %14450 = vpow2.f32 %v6061_v59 }
0x18b2   : > { %6083 = vadd.xlane.f32.xlu1 %v18559_v14  ;;  %14452 = vpow2.f32 %v6069_v17  ;;  %v12878_v59 = vpack.c.bf16 %v13823_v52, %v13822_v37 }
0x18b3   : > { %14454 = vpow2.f32 %v6067_v25 }
0x18b5   : > { %6091 = vadd.xlane.f32.xlu0 %v18564_v45 }
0x18b6   : > { %6089 = vadd.xlane.f32.xlu1 %v18566_v46 }
0x18b8   : > { %v18570_v28 = vpop.eup %14444 }
0x18b9   : > { %v18572_v47 = vpop.eup %14446  ;;  %6097 = vadd.xlane.f32.xlu0 %v18570_v28 }
0x18ba   : > { %6087 = vadd.xlane.f32.xlu1 %v18572_v47  ;;  %v18576_v41 = vpop.eup %14448 }
0x18bb   : > { %v18578_v57 = vpop.eup %14450 }
0x18bc   : > { %v18582_v51 = vpop.eup %14452 }
0x18bd   : > { %6095 = vadd.xlane.f32.xlu0 %v18576_v41  ;;  %v18585_v19 = vpop.eup %14454 }
0x18be   : > { %6093 = vadd.xlane.f32.xlu1 %v18578_v57 }
0x18c2   : > { %6101 = vadd.xlane.f32.xlu1 %v18582_v51 }
0x18c6   : > { %6099 = vadd.xlane.f32.xlu1 %v18585_v19 }
0x18d3   : > { %13850 = vrot.lane.b32.xlu0 %v18283_v18, %s15392_s6  ;;  %s20683_s6 = smov 112  }
0x18d7   : > { %6328 = vrot.lane.b32.xlu0 %v18205_v40, %s15393_s14  ;;  %6330 = vrot.lane.b32.xlu1 %v18203_v1, %s15393_s14 }
0x18db   : > { %6332 = vrot.lane.b32.xlu0 %v18217_v60, %s15393_s14  ;;  %6334 = vrot.lane.b32.xlu1 %v18215_v2, %s15393_s14 }
0x18df   : > { %6336 = vrot.lane.b32.xlu0 %v18227_v30, %s15393_s14  ;;  %6338 = vrot.lane.b32.xlu1 %v18225_v22, %s15393_s14 }
0x18e3   : > { %6340 = vrot.lane.b32.xlu0 %v18237_v0, %s15393_s14  ;;  %6342 = vrot.lane.b32.xlu1 %v18235_v31, %s15393_s14 }
0x18e7   : > { %6344 = vrot.lane.b32.xlu0 %v18247_v6, %s15393_s14  ;;  %6346 = vrot.lane.b32.xlu1 %v18245_v42, %s15393_s14 }
0x18eb   : > { %6348 = vrot.lane.b32.xlu0 %v18257_v21, %s15393_s14  ;;  %6350 = vrot.lane.b32.xlu1 %v18255_v38, %s15393_s14 }
0x18ef   : > { %6352 = vrot.lane.b32.xlu0 %v18267_v56, %s15393_s14  ;;  %6354 = vrot.lane.b32.xlu1 %v18265_v34, %s15393_s14 }
0x18f3   : > { %6356 = vrot.lane.b32.xlu0 %v18277_v44, %s15393_s14  ;;  %6358 = vrot.lane.b32.xlu1 %v18275_v36, %s15393_s14  ;;  %s20684_s14 = smov 48  }
0x18f7   : > { %13855 = vrot.lane.b32.xlu0 %v18211_v53, %s15394_s2  ;;  %13860 = vrot.lane.b32.xlu1 %v18221_v63, %s15394_s2 }
0x18fb   : > { %13870 = vrot.lane.b32.xlu0 %v18241_v50, %s15394_s2  ;;  %13865 = vrot.lane.b32.xlu1 %v18231_v24, %s15394_s2 }
0x18ff   : > { %13875 = vrot.lane.b32.xlu0 %v18251_v58, %s15394_s2  ;;  %13880 = vrot.lane.b32.xlu1 %v18261_v16, %s15394_s2 }
0x1901   : > { %v6074_v9 = vpop.xlane.xlu0 %6073 }
0x1902   : > { %14456 = vrcp.f32 %v6074_v9  ;;  %v6072_v54 = vpop.xlane.xlu1 %6071 }
0x1903   : > { %14458 = vrcp.f32 %v6072_v54  ;;  %13895 = vrot.lane.b32.xlu0 %v18211_v53, %s15395_s0  ;;  %13885 = vrot.lane.b32.xlu1 %v18271_v13, %s15394_s2 }
0x1905   : > { %v13846_v25 = vpop.permute.xlu0 %13845 }
0x1906   : > { %v13841_v12 = vpop.permute.xlu1 %13840  ;;  %v13848_v9 = vunpack.i.h.bf16 %v13846_v25 }
0x1907   : > { %13905 = vrot.lane.b32.xlu0 %v18231_v24, %s15395_s0  ;;  %13890 = vrot.lane.b32.xlu1 %v18283_v18, %s15394_s2  ;;  %v13843_v39 = vunpack.i.h.bf16 %v13841_v12  ;;  %v13842_v17 = vunpack.i.l.bf16 %v13841_v12  ;;  %s20685_s2 = smov 72  }
0x190b   : > { %13900 = vrot.lane.b32.xlu1 %v18221_v63, %s15395_s0 }
0x190c   : > { %v14457_v7 = vpop.eup %14456 }
0x190d   : > { %v14459_v15 = vpop.eup %14458  ;;  %v6120_v43 = vmul.f32 %v14457_v7, %v18522_v55  ;;  %v13833_v55 = vunpack.i.h.bf16 %v18532_v27 }
0x190e   : > { %v6119_v5 = vmul.f32 %v14459_v15, %v18524_v29  ;;  %v13832_v29 = vunpack.i.l.bf16 %v18532_v27  ;;  %v12896_v27 = vpack.c.bf16 %v13843_v39, %v13842_v17 }
0x1910   : > { %11900 = vmatprep.mubr.f32.mxu1 %v6119_v5  ;;  %v12884_v10 = vpack.c.bf16 %v13833_v55, %v13832_v29 }
0x1911   : > { %11901 = vmatmul.mubr.f32.vlgmr.msra.gmra.mrb[116].mxu1 %v6120_v43 }
0x1912   : > { %12871 = vmatpush3.bf16.xpose.msk.msra.mxu1 %vm16187_vm2, %v18361_v26  ;;  %v13838_v26 = vunpack.i.h.bf16 %v13836_v3  ;;  %v13847_v3 = vunpack.i.l.bf16 %v13846_v25 }
0x1913   : > { %12874 = vmatprep.subr.msk.bf16.mxu1 %vm16187_vm2, %v12872_v33 }
0x1914   : > { %v12890_v11 = vpack.c.bf16 %v13838_v26, %v13837_v48  ;;  %v12902_v15 = vpack.c.bf16 %v13848_v9, %v13847_v3 }
0x191a   : > { %12877 = vmatpush3.bf16.xpose.msk.msra.mxu1 %vm16187_vm2, %v12872_v33 }
0x191b   : > { %12880 = vmatprep.subr.msk.bf16.mxu1 %vm16187_vm2, %v12878_v59 }
0x1922   : > { %12883 = vmatpush3.bf16.xpose.msk.msra.mxu1 %vm16187_vm2, %v12878_v59 }
0x1923   : > { %12886 = vmatprep.subr.msk.bf16.mxu1 %vm16187_vm2, %v12884_v10 }
0x192a   : > { %12889 = vmatpush3.bf16.xpose.msk.msra.mxu1 %vm16187_vm2, %v12884_v10 }
0x192b   : > { %12892 = vmatprep.subr.msk.bf16.mxu1 %vm16187_vm2, %v12890_v11 }
0x1932   : > { %12895 = vmatpush3.bf16.xpose.msk.msra.mxu1 %vm16187_vm2, %v12890_v11 }
0x1933   : > { %12898 = vmatprep.subr.msk.bf16.mxu1 %vm16187_vm2, %v12896_v27 }
0x1936   : > { %v6076_v54 = vpop.xlane.xlu0 %6075 }
0x1937   : > { %14460 = vrcp.f32 %v6076_v54  ;;  %v6078_v7 = vpop.xlane.xlu1 %6077 }
0x1938   : > { %14462 = vrcp.f32 %v6078_v7 }
0x193a   : > { %12901 = vmatpush3.bf16.xpose.msk.msra.mxu1 %vm16187_vm2, %v12896_v27  ;;  %v6082_v49 = vpop.xlane.xlu0 %6081 }
0x193b   : > { %12904 = vmatprep.subr.msk.bf16.mxu1 %vm16187_vm2, %v12902_v15  ;;  %v6086_v23 = vpop.xlane.xlu1 %6085  ;;  %14464 = vrcp.f32 %v6082_v49 }
0x193e   : > { %v6080_v5 = vpop.xlane.xlu0 %6079 }
0x193f   : > { %14466 = vrcp.f32 %v6080_v5  ;;  %v6084_v43 = vpop.xlane.xlu1 %6083 }
0x1940   : > { %14468 = vrcp.f32 %v6084_v43 }
0x1941   : > { %v14461_v33 = vpop.eup %14460  ;;  %14470 = vrcp.f32 %v6086_v23 }
0x1942   : > { %v14463_v52 = vpop.eup %14462  ;;  %12907 = vmatpush3.bf16.xpose.msk.msra.mxu1 %vm16187_vm2, %v12902_v15  ;;  %v6092_v37 = vpop.xlane.xlu0 %6091  ;;  %v6121_v59 = vmul.f32 %v14461_v33, %v18541_v20 }
0x1943   : > { %v6090_v55 = vpop.xlane.xlu1 %6089  ;;  %v6122_v29 = vmul.f32 %v14463_v52, %v18543_v32  ;;  %14472 = vrcp.f32 %v6092_v37 }
0x1944   : > { %11903 = vmatprep.mubr.f32.mxu1 %v6121_v59  ;;  %14474 = vrcp.f32 %v6090_v55 }
0x1945   : > { %11904 = vmatmul.mubr.f32.gmra.mrb[118].mxu1 %v6122_v29  ;;  %v14465_v48 = vpop.eup %14464 }
0x1946   : > { %v6098_v10 = vpop.xlane.xlu0 %6097  ;;  %v6124_v20 = vmul.f32 %v14465_v48, %v18549_v61 }
0x1947   : > { %v6088_v26 = vpop.xlane.xlu1 %6087 }
0x1948   : > { %14476 = vrcp.f32 %v6088_v26 }
0x1949   : > { %v14467_v11 = vpop.eup %14466 }
0x194a   : > { %v14469_v12 = vpop.eup %14468  ;;  %v6096_v39 = vpop.xlane.xlu0 %6095  ;;  %v6123_v17 = vmul.f32 %v14467_v11, %v18557_v35 }
0x194b   : > { %14478 = vrcp.f32 %v6096_v39  ;;  %v6094_v27 = vpop.xlane.xlu1 %6093  ;;  %v6125_v25 = vmul.f32 %v14469_v12, %v18559_v14  ;;  %v14471_v32 = vpop.eup %14470 }
0x194c   : > { %14480 = vrcp.f32 %v6094_v27  ;;  %11906 = vmatprep.mubr.f32.mxu1 %v6123_v17  ;;  %v6126_v15 = vmul.f32 %v14471_v32, %v18552_v62 }
0x194d   : > { %11907 = vmatmul.mubr.f32.gmra.mrb[120].mxu1 %v6124_v20  ;;  %14482 = vrcp.f32 %v6098_v10  ;;  %v14473_v49 = vpop.eup %14472 }
0x194e   : > { %11909 = vmatprep.mubr.f32.mxu1 %v6125_v25  ;;  %v13851_v9 = vpop.permute.xlu0 %13850  ;;  %v14475_v35 = vpop.eup %14474  ;;  %v6129_v52 = vmul.f32 %v14473_v49, %v18564_v45 }
0x194f   : > { %v13853_v3 = vunpack.i.h.bf16 %v13851_v9  ;;  %v13852_v54 = vunpack.i.l.bf16 %v13851_v9  ;;  %v6102_v7 = vpop.xlane.xlu1 %6101  ;;  %v6128_v33 = vmul.f32 %v14475_v35, %v18566_v46 }
0x1950   : > { %14484 = vrcp.f32 %v6102_v7 }
0x1951   : > { %v12908_v23 = vpack.c.bf16 %v13853_v3, %v13852_v54  ;;  %11910 = vmatmul.mubr.f32.gmra.mrb[122].mxu1 %v6126_v15 }
0x1952   : > { %v14477_v5 = vpop.eup %14476  ;;  %v6329_v61 = vpop.permute.xlu0 %6328 }
0x1953   : > { %v6100_v14 = vpop.xlane.xlu1 %6099  ;;  %12910 = vmatprep.subr.msk.bf16.mxu1 %vm16187_vm2, %v12908_v23  ;;  %v6127_v43 = vmul.f32 %v14477_v5, %v18572_v47 }
0x1954   : > { %14486 = vrcp.f32 %v6100_v14  ;;  %12913 = vmatpush3.bf16.xpose.msk.msra.mxu1 %vm16187_vm2, %v12908_v23 }
0x1955   : > { %v14479_v62 = vpop.eup %14478  ;;  %11912 = vmatprep.mubr.f32.mxu1 %v6127_v43 }
0x1956   : > { %v14481_v37 = vpop.eup %14480  ;;  %11913 = vmatmul.mubr.f32.gmra.mrb[124].mxu1 %v6128_v33  ;;  %v6333_v59 = vpop.permute.xlu0 %6332  ;;  %v6131_v47 = vmul.f32 %v14479_v62, %v18576_v41 }
0x1957   : > { %v6331_v55 = vpop.permute.xlu1 %6330  ;;  %11915 = vmatprep.mubr.f32.mxu1 %v6129_v52  ;;  %v6130_v29 = vmul.f32 %v14481_v37, %v18578_v57  ;;  %v14483_v10 = vpop.eup %14482 }
0x1958   : > { %v6132_v46 = vmul.f32 %v14483_v10, %v18570_v28 }
0x195a   : > { %11916 = vmatmul.mubr.f32.gmra.mrb[126].mxu1 %v6130_v29  ;;  %v6337_v26 = vpop.permute.xlu0 %6336  ;;  %v14485_v11 = vpop.eup %14484 }
0x195b   : > { %v6335_v48 = vpop.permute.xlu1 %6334  ;;  %11918 = vmatprep.mubr.f32.mxu1 %v6131_v47  ;;  %v6134_v27 = vmul.f32 %v14485_v11, %v18582_v51 }
0x195e   : > { %v14487_v12 = vpop.eup %14486  ;;  %11919 = vmatmul.mubr.f32.gmra.mrb[128].mxu1 %v6132_v46  ;;  %v6341_v45 = vpop.permute.xlu0 %6340 }
0x195f   : > { %v6339_v39 = vpop.permute.xlu1 %6338  ;;  %v6133_v17 = vmul.f32 %v14487_v12, %v18585_v19 }
0x1961   : > { %11921 = vmatprep.mubr.f32.mxu1 %v6133_v17 }
0x1962   : > { %11922 = vmatmul.mubr.f32.gmra.mrb[130].mxu1 %v6134_v27  ;;  %v6345_v57 = vpop.permute.xlu0 %6344 }
0x1963   : > { %v6343_v20 = vpop.permute.xlu1 %6342  ;;  %11956 = vmatprep.mubr.msk.f32.mxu1 %vm1433_vm1, %v6329_v61 }
0x1966   : > { %v6349_v41 = vpop.permute.xlu0 %6348  ;;  %11957 = vmatmul.mubr.msk.f32.vlgmr.msra.gmra.mrb[132].mxu1 %vm1433_vm1, %v6331_v55 }
0x1967   : > { %v6347_v25 = vpop.permute.xlu1 %6346  ;;  %11959 = vmatprep.mubr.msk.f32.mxu1 %vm1433_vm1, %v6333_v59 }
0x196a   : > { %v6353_v28 = vpop.permute.xlu0 %6352  ;;  %11960 = vmatmul.mubr.msk.f32.gmra.mrb[134].mxu1 %vm1433_vm1, %v6335_v48 }
0x196b   : > { %v6351_v32 = vpop.permute.xlu1 %6350  ;;  %11962 = vmatprep.mubr.msk.f32.mxu1 %vm1433_vm1, %v6337_v26 }
0x196e   : > { %v6357_v19 = vpop.permute.xlu0 %6356  ;;  %11963 = vmatmul.mubr.msk.f32.gmra.mrb[136].mxu1 %vm1433_vm1, %v6339_v39 }
0x196f   : > { %v6355_v51 = vpop.permute.xlu1 %6354  ;;  %11965 = vmatprep.mubr.msk.f32.mxu1 %vm1433_vm1, %v6341_v45 }
0x1972   : > { %v13856_v9 = vpop.permute.xlu0 %13855  ;;  %11966 = vmatmul.mubr.msk.f32.gmra.mrb[138].mxu1 %vm1433_vm1, %v6343_v20 }
0x1973   : > { %v13858_v3 = vunpack.i.h.bf16 %v13856_v9  ;;  %v13857_v54 = vunpack.i.l.bf16 %v13856_v9  ;;  %v6359_v7 = vpop.permute.xlu1 %6358  ;;  %11968 = vmatprep.mubr.msk.f32.mxu1 %vm1433_vm1, %v6345_v57 }
0x1975   : > { %v12914_v15 = vpack.c.bf16 %v13858_v3, %v13857_v54 }
0x1976   : > { %11969 = vmatmul.mubr.msk.f32.gmra.mrb[140].mxu1 %vm1433_vm1, %v6347_v25  ;;  %v13871_v49 = vpop.permute.xlu0 %13870 }
0x1977   : > { %v13861_v35 = vpop.permute.xlu1 %13860  ;;  %11971 = vmatprep.mubr.msk.f32.mxu1 %vm1433_vm1, %v6349_v41  ;;  %12915 = vmatprep.subr.bf16.mxu0 %v12914_v15  ;;  %v13873_v43 = vunpack.i.h.bf16 %v13871_v49  ;;  %v13872_v33 = vunpack.i.l.bf16 %v13871_v49 }
0x1978   : > { %v13863_v23 = vunpack.i.h.bf16 %v13861_v35  ;;  %v13862_v5 = vunpack.i.l.bf16 %v13861_v35  ;;  %12917 = vmatpush3.bf16.msra.mxu0 %v12914_v15 }
0x1979   : > { %v12926_v47 = vpack.c.bf16 %v13873_v43, %v13872_v33 }
0x197a   : > { %11972 = vmatmul.mubr.msk.f32.gmra.mrb[142].mxu1 %vm1433_vm1, %v6351_v32  ;;  %v12918_v61 = vpack.c.bf16 %v13863_v23, %v13862_v5  ;;  %v13876_v37 = vpop.permute.xlu0 %13875 }
0x197b   : > { %v13866_v14 = vpop.permute.xlu1 %13865  ;;  %11974 = vmatprep.mubr.msk.f32.mxu1 %vm1433_vm1, %v6353_v28  ;;  %v13878_v29 = vunpack.i.h.bf16 %v13876_v37  ;;  %v13877_v10 = vunpack.i.l.bf16 %v13876_v37 }
0x197c   : > { %v13868_v62 = vunpack.i.h.bf16 %v13866_v14  ;;  %v13867_v52 = vunpack.i.l.bf16 %v13866_v14  ;;  %12919 = vmatprep.subr.bf16.mxu0 %v12918_v61 }
0x197d   : > { %12921 = vmatpush3.bf16.msra.mxu0 %v12918_v61  ;;  %v12930_v11 = vpack.c.bf16 %v13878_v29, %v13877_v10 }
0x197e   : > { %11975 = vmatmul.mubr.msk.f32.gmra.mrb[144].mxu1 %vm1433_vm1, %v6355_v51  ;;  %v12922_v59 = vpack.c.bf16 %v13868_v62, %v13867_v52  ;;  %v13896_v41 = vpop.permute.xlu0 %13895 }
0x197f   : > { %v13881_v55 = vpop.permute.xlu1 %13880  ;;  %11977 = vmatprep.mubr.msk.f32.mxu1 %vm1433_vm1, %v6357_v19  ;;  %v13898_v25 = vunpack.i.h.bf16 %v13896_v41  ;;  %v13897_v28 = vunpack.i.l.bf16 %v13896_v41 }
0x1980   : > { %12923 = vmatprep.subr.bf16.mxu0 %v12922_v59  ;;  %v13883_v48 = vunpack.i.h.bf16 %v13881_v55  ;;  %v13882_v46 = vunpack.i.l.bf16 %v13881_v55 }
0x1981   : > { %12925 = vmatpush3.bf16.msra.mxu0 %v12922_v59  ;;  %v18713_v19 = vpack.c.bf16 %v13898_v25, %v13897_v28  ;;  %v20671_v28 = vld [vmem:[#allocation64_spill] sm:$0xff] }
0x1982   : > { %11978 = vmatmul.mubr.msk.f32.gmra.mrb[146].mxu1 %vm1433_vm1, %v6359_v7  ;;  %12927 = vmatprep.subr.bf16.mxu0 %v12926_v47  ;;  %v12934_v39 = vpack.c.bf16 %v13883_v48, %v13882_v46 }
0x1983   : > { %v13886_v26 = vpop.permute.xlu1 %13885 }
0x1984   : > { %v13888_v12 = vunpack.i.h.bf16 %v13886_v26  ;;  %v13887_v45 = vunpack.i.l.bf16 %v13886_v26 }
0x1985   : > { %12929 = vmatpush3.bf16.msra.mxu0 %v12926_v47  ;;  %v20668_v47 = vld [vmem:[#allocation63_spill] sm:$0xff] }
0x1986   : > { %12931 = vmatprep.subr.bf16.mxu0 %v12930_v11  ;;  %v12938_v20 = vpack.c.bf16 %v13888_v12, %v13887_v45  ;;  %v20669_v12 = vld [vmem:[#allocation62_spill] sm:$0xff] }
0x1987   : > { %v13891_v17 = vpop.permute.xlu1 %13890 }
0x1988   : > { %v13893_v27 = vunpack.i.h.bf16 %v13891_v17  ;;  %v13892_v57 = vunpack.i.l.bf16 %v13891_v17 }
0x1989   : > { %12933 = vmatpush3.bf16.msra.mxu0 %v12930_v11 }
0x198a   : > { %12935 = vmatprep.subr.bf16.mxu0 %v12934_v39  ;;  %v12942_v32 = vpack.c.bf16 %v13893_v27, %v13892_v57 }
0x198d   : > { %12937 = vmatpush3.bf16.msra.mxu0 %v12934_v39 }
0x198e   : > { %12939 = vmatprep.subr.bf16.mxu0 %v12938_v20 }
0x1991   : > { %12941 = vmatpush3.bf16.msra.mxu0 %v12938_v20 }
0x1992   : > { %12943 = vmatprep.subr.bf16.mxu0 %v12942_v32 }
0x1995   : > { %12945 = vmatpush3.bf16.msra.mxu0 %v12942_v32 }
0x1996   : > { %12948 = vmatprep.subr.msk.bf16.mxu0 %vm16187_vm2, %v18713_v19 }
0x19e4   : > { %v18718_v51 = vpop.f32.mrb[116].mxu1 }
0x19e5   : > { %20652 = vst [vmem:[#allocation75_spill] sm:$0xff] %v18718_v51  ;;  %v18720_v9 = vpop.f32.mrb[117].mxu1 }
0x19e6   : > { %20653 = vst [vmem:[#allocation78_spill] sm:$0xff] %v18720_v9 }
0x1a18   : > { %v18722_v3 = vpop.f32.mrb[118].mxu1 }
0x1a19   : > { %20654 = vst [vmem:[#allocation77_spill] sm:$0xff] %v18722_v3  ;;  %v18724_v54 = vpop.f32.mrb[119].mxu1 }
0x1a1a   : > { %20655 = vst [vmem:[#allocation80_spill] sm:$0xff] %v18724_v54 }
0x1a20   : > { %v18726_v7 = vpop.f32.mrb[120].mxu1 }
0x1a21   : > { %20656 = vst [vmem:[#allocation79_spill] sm:$0xff] %v18726_v7  ;;  %v18728_v15 = vpop.f32.mrb[121].mxu1 }
0x1a22   : > { %20657 = vst [vmem:[#allocation82_spill] sm:$0xff] %v18728_v15 }
0x1a24   : > { %v18730_v49 = vpop.f32.mrb[122].mxu1 }
0x1a25   : > { %20658 = vst [vmem:[#allocation81_spill] sm:$0xff] %v18730_v49  ;;  %v18732_v35 = vpop.f32.mrb[123].mxu1 }
0x1a26   : > { %20659 = vst [vmem:[#allocation84_spill] sm:$0xff] %v18732_v35 }
0x1a29   : > { %v18734_v23 = vpop.f32.mrb[124].mxu1 }
0x1a2a   : > { %20660 = vst [vmem:[#allocation83_spill] sm:$0xff] %v18734_v23  ;;  %v18736_v5 = vpop.f32.mrb[125].mxu1 }
0x1a2b   : > { %20661 = vst [vmem:[#allocation86_spill] sm:$0xff] %v18736_v5 }
0x1a2d   : > { %v18738_v61 = vpop.f32.mrb[126].mxu1 }
0x1a2e   : > { %20662 = vst [vmem:[#allocation85_spill] sm:$0xff] %v18738_v61  ;;  %v18740_v14 = vpop.f32.mrb[127].mxu1 }
0x1a2f   : > { %20663 = vst [vmem:[#allocation88_spill] sm:$0xff] %v18740_v14  ;;  %v20677_v14 = vld [vmem:[#allocation71_spill] sm:$0xff] }
0x1a31   : > { %v18742_v43 = vpop.f32.mrb[128].mxu1 }
0x1a32   : > { %20664 = vst [vmem:[#allocation87_spill] sm:$0xff] %v18742_v43  ;;  %v18744_v33 = vpop.f32.mrb[129].mxu1 }
0x1a33   : > { %20665 = vst [vmem:[#allocation90_spill] sm:$0xff] %v18744_v33 }
0x1a35   : > { %v18746_v62 = vpop.f32.mrb[130].mxu1 }
0x1a36   : > { %20666 = vst [vmem:[#allocation89_spill] sm:$0xff] %v18746_v62  ;;  %v18748_v52 = vpop.f32.mrb[131].mxu1  ;;  %v20675_v62 = vld [vmem:[#allocation68_spill] sm:$0xff] }
0x1a37   : > { %20667 = vst [vmem:[#allocation50_spill] sm:$0xff] %v18748_v52 }
0x1a39   : > { %v11958_v37 = vpop.f32.mrb[132].mxu1 }
0x1a3a   : > { %v6602_v59 = vmul.f32 0.35355338, %v11958_v37  ;;  %v6522_v55 = vpop.f32.mrb[133].mxu1 }
0x1a3b   : > { %v6601_v29 = vmul.f32 0.35355338, %v6522_v55 }
0x1a3c   : > { %v18751_v10 = vadd.f32 %v18379_v4, %v6602_v59  ;;  %v20670_v4 = vld [vmem:[#allocation65_spill] sm:$0xff] }
0x1a3d   : > { %v18754_v26 = vadd.f32 %v20668_v47, %v6601_v29  ;;  %v11961_v48 = vpop.f32.mrb[134].mxu1  ;;  %v20672_v29 = vld [vmem:[#allocation67_spill] sm:$0xff] }
0x1a3e   : > { %v6604_v46 = vmul.f32 0.35355338, %v11961_v48  ;;  %6635 = vmax.xlane.f32.xlu1 %v18751_v10  ;;  %v6532_v11 = vpop.f32.mrb[135].mxu1 }
0x1a3f   : > { %6633 = vmax.xlane.f32.xlu0 %v18754_v26  ;;  %v6603_v39 = vmul.f32 0.35355338, %v6532_v11 }
0x1a40   : > { %v18759_v45 = vadd.f32 %v20669_v12, %v6604_v46  ;;  %v20673_v12 = vld [vmem:[#allocation66_spill] sm:$0xff] }
0x1a41   : > { %v11964_v17 = vpop.f32.mrb[136].mxu1  ;;  %v18763_v57 = vadd.f32 %v20670_v4, %v6603_v39 }
0x1a42   : > { %v6542_v27 = vpop.f32.mrb[137].mxu1 }
0x1a43   : > { %6639 = vmax.xlane.f32.xlu0 %v18759_v45  ;;  %v6605_v20 = vmul.f32 0.35355338, %v6542_v27 }
0x1a45   : > { %v11967_v41 = vpop.f32.mrb[138].mxu1  ;;  %v18767_v32 = vadd.f32 %v20671_v28, %v6605_v20 }
0x1a46   : > { %v6552_v25 = vpop.f32.mrb[139].mxu1 }
0x1a47   : > { %6637 = vmax.xlane.f32.xlu0 %v18763_v57  ;;  %v6607_v37 = vmul.f32 0.35355338, %v6552_v25  ;;  %v20674_v25 = vld [vmem:[#allocation69_spill] sm:$0xff] }
0x1a49   : > { %v11970_v59 = vpop.f32.mrb[140].mxu1  ;;  %v18771_v47 = vadd.f32 %v20672_v29, %v6607_v37 }
0x1a4a   : > { %v6562_v55 = vpop.f32.mrb[141].mxu1  ;;  %v6610_v5 = vmul.f32 0.35355338, %v11970_v59  ;;  %v20682_v59 = vld [vmem:[#allocation76_spill] sm:$0xff] }
0x1a4b   : > { %6641 = vmax.xlane.f32.xlu0 %v18767_v32  ;;  %v6609_v48 = vmul.f32 0.35355338, %v6562_v55 }
0x1a4d   : > { %v11973_v46 = vpop.f32.mrb[142].mxu1  ;;  %v18777_v39 = vadd.f32 %v20673_v12, %v6609_v48  ;;  %v20676_v48 = vld [vmem:[#allocation70_spill] sm:$0xff]  ;;  %v6606_v12 = vmul.f32 0.35355338, %v11964_v17 }
0x1a4e   : > { %v6572_v11 = vpop.f32.mrb[143].mxu1 }
0x1a4f   : > { %13910 = vrot.lane.b32.xlu1 %v18241_v50, %s15395_s0  ;;  %6645 = vmax.xlane.f32.xlu0 %v18771_v47  ;;  %v6611_v27 = vmul.f32 0.35355338, %v6572_v11 }
0x1a51   : > { %v11976_v4 = vpop.f32.mrb[144].mxu1  ;;  %v18781_v28 = vadd.f32 %v20674_v25, %v6611_v27  ;;  %v6622_v27 = vadd.f32 %v20677_v14, %v6606_v12  ;;  %v6608_v25 = vmul.f32 0.35355338, %v11967_v41  ;;  %v20681_v14 = vld [vmem:[#allocation91_spill] sm:$0xff] }
0x1a52   : > { %v6582_v20 = vpop.f32.mrb[145].mxu1  ;;  %v6614_v49 = vmul.f32 0.35355338, %v11976_v4 }
0x1a53   : > { %6649 = vmax.xlane.f32.xlu0 %v18777_v39  ;;  %v6613_v37 = vmul.f32 0.35355338, %v6582_v20  ;;  %v20678_v20 = vld [vmem:[#allocation72_spill] sm:$0xff] }
0x1a54   : > { %v6624_v23 = vadd.f32 %v20678_v20, %v6608_v25  ;;  %v18802_v17 = vadd.f32 %v20681_v14, %v6614_v49 }
0x1a55   : > { %v11979_v55 = vpop.f32.mrb[146].mxu1  ;;  %v18785_v43 = vadd.f32 %v20675_v62, %v6613_v37  ;;  %v20679_v62 = vld [vmem:[#allocation73_spill] sm:$0xff] }
0x1a56   : > { %v6592_v29 = vpop.f32.mrb[147].mxu1  ;;  %v6626_v37 = vadd.f32 %v20679_v62, %v6610_v5  ;;  %v6616_v41 = vmul.f32 0.35355338, %v11979_v55  ;;  %v18809_v5 = vpop.permute.xlu1 %13900 }
0x1a57   : > { %6653 = vmax.xlane.f32.xlu0 %v18781_v28  ;;  %v6615_v61 = vmul.f32 0.35355338, %v6592_v29  ;;  %v6612_v29 = vmul.f32 0.35355338, %v11973_v46  ;;  %v18811_v46 = vpop.permute.xlu0 %13905 }
0x1a58   : > { %v18806_v12 = vadd.f32 %v20682_v59, %v6616_v41 }
0x1a59   : > { %v18789_v11 = vadd.f32 %v20676_v48, %v6615_v61  ;;  %v20680_v61 = vld [vmem:[#allocation74_spill] sm:$0xff] }
0x1a5a   : > { %v18798_v48 = vadd.f32 %v20680_v61, %v6612_v29 }
0x1a5b   : > { %6657 = vmax.xlane.f32.xlu0 %v18785_v43 }
0x1a5f   : > { %6661 = vmax.xlane.f32.xlu0 %v18789_v11 }
0x1a73   : > { %6643 = vmax.xlane.f32.xlu1 %v6622_v27 }
0x1a75   : > { %13915 = vrot.lane.b32.xlu0 %v18251_v58, %s15395_s0 }
0x1a77   : > { %6647 = vmax.xlane.f32.xlu1 %v6624_v23 }
0x1a7b   : > { %6651 = vmax.xlane.f32.xlu1 %v6626_v37 }
0x1a7f   : > { %6655 = vmax.xlane.f32.xlu1 %v18798_v48 }
0x1a83   : > { %6659 = vmax.xlane.f32.xlu1 %v18802_v17 }
0x1a87   : > { %6663 = vmax.xlane.f32.xlu1 %v18806_v12 }
0x1acb   : > { %v6636_v25 = vpop.xlane.xlu1 %6635 }
0x1acc   : > { %v6666_v4 = vsub.f32 %v18751_v10, %v6636_v25  ;;  %v6634_v20 = vpop.xlane.xlu0 %6633 }
0x1acd   : > { %v6665_v62 = vsub.f32 %v18754_v26, %v6634_v20 }
0x1ace   : > { %v6683_v49 = vmul.f32 1.442695, %v6666_v4 }
0x1acf   : > { %v6681_v29 = vmul.f32 1.442695, %v6665_v62  ;;  %v18825_v59 = vpop.permute.xlu1 %13910 }
0x1ad0   : > { %14488 = vpow2.f32 %v6683_v49  ;;  %v6640_v14 = vpop.xlane.xlu0 %6639 }
0x1ad1   : > { %14490 = vpow2.f32 %v6681_v29  ;;  %v6668_v4 = vsub.f32 %v18759_v45, %v6640_v14 }
0x1ad3   : > { %v6687_v35 = vmul.f32 1.442695, %v6668_v4 }
0x1ad4   : > { %v6638_v10 = vpop.xlane.xlu0 %6637 }
0x1ad5   : > { %v6667_v25 = vsub.f32 %v18763_v57, %v6638_v10 }
0x1ad7   : > { %v6685_v49 = vmul.f32 1.442695, %v6667_v25 }
0x1ad8   : > { %v6642_v26 = vpop.xlane.xlu0 %6641 }
0x1ad9   : > { %14492 = vpow2.f32 %v6685_v49  ;;  %v6669_v3 = vsub.f32 %v18767_v32, %v6642_v26 }
0x1ada   : > { %v18815_v55 = vpop.eup %14488  ;;  %14494 = vpow2.f32 %v6687_v35 }
0x1adb   : > { %v18817_v61 = vpop.eup %14490  ;;  %6715 = vadd.xlane.f32.xlu0 %v18815_v55  ;;  %v6689_v10 = vmul.f32 1.442695, %v6669_v3 }
0x1adc   : > { %6713 = vadd.xlane.f32.xlu1 %v18817_v61  ;;  %v6646_v41 = vpop.xlane.xlu0 %6645 }
0x1add   : > { %v6671_v33 = vsub.f32 %v18771_v47, %v6646_v41 }
0x1adf   : > { %v6693_v14 = vmul.f32 1.442695, %v6671_v33 }
0x1ae0   : > { %v6650_v20 = vpop.xlane.xlu0 %6649 }
0x1ae1   : > { %v6673_v32 = vsub.f32 %v18777_v39, %v6650_v20 }
0x1ae3   : > { %v6697_v33 = vmul.f32 1.442695, %v6673_v32 }
0x1ae4   : > { %v6654_v54 = vpop.xlane.xlu0 %6653 }
0x1ae5   : > { %v6675_v45 = vsub.f32 %v18781_v28, %v6654_v54 }
0x1ae7   : > { %v6701_v4 = vmul.f32 1.442695, %v6675_v45 }
0x1aed   : > { %13920 = vrot.lane.b32.xlu1 %v18261_v16, %s15395_s0 }
0x1af1   : > { %13925 = vrot.lane.b32.xlu0 %v18271_v13, %s15395_s0 }
0x1b00   : > { %v6644_v62 = vpop.xlane.xlu1 %6643 }
0x1b01   : > { %v6670_v29 = vsub.f32 %v6622_v27, %v6644_v62 }
0x1b03   : > { %v6691_v7 = vmul.f32 1.442695, %v6670_v29 }
0x1b04   : > { %v6648_v15 = vpop.xlane.xlu1 %6647 }
0x1b05   : > { %v6672_v52 = vsub.f32 %v6624_v23, %v6648_v15  ;;  %14496 = vpow2.f32 %v6691_v7  ;;  %v6658_v15 = vpop.xlane.xlu0 %6657  ;;  %v18833_v23 = vpop.eup %14492 }
0x1b06   : > { %v18835_v47 = vpop.eup %14494 }
0x1b07   : > { %v6695_v51 = vmul.f32 1.442695, %v6672_v52 }
0x1b08   : > { %v6652_v57 = vpop.xlane.xlu1 %6651 }
0x1b09   : > { %14498 = vpow2.f32 %v6695_v51  ;;  %v6674_v27 = vsub.f32 %v6626_v37, %v6652_v57  ;;  %v6677_v51 = vsub.f32 %v18785_v43, %v6658_v15  ;;  %v6662_v20 = vpop.xlane.xlu0 %6661 }
0x1b0a   : > { %14500 = vpow2.f32 %v6689_v10 }
0x1b0b   : > { %14502 = vpow2.f32 %v6693_v14  ;;  %v6699_v35 = vmul.f32 1.442695, %v6674_v27  ;;  %v6705_v26 = vmul.f32 1.442695, %v6677_v51  ;;  %v13903_v51 = vunpack.i.h.bf16 %v18809_v5 }
0x1b0c   : > { %v6656_v25 = vpop.xlane.xlu1 %6655  ;;  %14504 = vpow2.f32 %v6701_v4 }
0x1b0d   : > { %14506 = vpow2.f32 %v6699_v35  ;;  %v6676_v52 = vsub.f32 %v18798_v48, %v6656_v25  ;;  %v6679_v48 = vsub.f32 %v18789_v11, %v6662_v20  ;;  %v13916_v4 = vpop.permute.xlu0 %13915 }
0x1b0f   : > { %v18841_v54 = vpop.eup %14496  ;;  %v6703_v43 = vmul.f32 1.442695, %v6676_v52 }
0x1b10   : > { %v6660_v7 = vpop.xlane.xlu1 %6659  ;;  %6717 = vadd.xlane.f32.xlu0 %v18833_v23 }
0x1b11   : > { %v6678_v3 = vsub.f32 %v18802_v17, %v6660_v7  ;;  %6719 = vadd.xlane.f32.xlu1 %v18835_v47 }
0x1b13   : > { %v18844_v39 = vpop.eup %14498  ;;  %v6707_v28 = vmul.f32 1.442695, %v6678_v3  ;;  %v13902_v3 = vunpack.i.l.bf16 %v18809_v5  ;;  %v13907_v5 = vunpack.i.l.bf16 %v18811_v46 }
0x1b14   : > { %v6664_v37 = vpop.xlane.xlu1 %6663  ;;  %6723 = vadd.xlane.f32.xlu0 %v18841_v54  ;;  %v18849_v41 = vpop.eup %14500 }
0x1b15   : > { %14508 = vpow2.f32 %v6707_v28  ;;  %6727 = vadd.xlane.f32.xlu1 %v18844_v39  ;;  %v6680_v17 = vsub.f32 %v18806_v12, %v6664_v37  ;;  %v18851_v62 = vpop.eup %14502  ;;  %v6709_v12 = vmul.f32 1.442695, %v6679_v48  ;;  %v12952_v28 = vpack.c.bf16 %v13903_v51, %v13902_v3 }
0x1b16   : > { %14510 = vpow2.f32 %v6697_v33  ;;  %v18856_v29 = vpop.eup %14504  ;;  %v13908_v37 = vunpack.i.h.bf16 %v18811_v46  ;;  %v13917_v46 = vunpack.i.l.bf16 %v13916_v4 }
0x1b17   : > { %14512 = vpow2.f32 %v6705_v26  ;;  %v6711_v49 = vmul.f32 1.442695, %v6680_v17  ;;  %v18858_v57 = vpop.eup %14506  ;;  %v13912_v26 = vunpack.i.l.bf16 %v18825_v59 }
0x1b18   : > { %6721 = vadd.xlane.f32.xlu0 %v18849_v41  ;;  %14514 = vpow2.f32 %v6703_v43 }
0x1b19   : > { %6725 = vadd.xlane.f32.xlu1 %v18851_v62  ;;  %14516 = vpow2.f32 %v6711_v49 }
0x1b1a   : > { %14518 = vpow2.f32 %v6709_v12 }
0x1b1c   : > { %6733 = vadd.xlane.f32.xlu0 %v18856_v29 }
0x1b1d   : > { %6731 = vadd.xlane.f32.xlu1 %v18858_v57 }
0x1b1f   : > { %v18862_v10 = vpop.eup %14508 }
0x1b20   : > { %v18864_v45 = vpop.eup %14510  ;;  %6739 = vadd.xlane.f32.xlu0 %v18862_v10 }
0x1b21   : > { %6729 = vadd.xlane.f32.xlu1 %v18864_v45  ;;  %v18868_v11 = vpop.eup %14512 }
0x1b22   : > { %v18870_v14 = vpop.eup %14514 }
0x1b23   : > { %v18874_v27 = vpop.eup %14516 }
0x1b24   : > { %6737 = vadd.xlane.f32.xlu0 %v18868_v11  ;;  %v18877_v25 = vpop.eup %14518 }
0x1b25   : > { %6735 = vadd.xlane.f32.xlu1 %v18870_v14 }
0x1b29   : > { %6743 = vadd.xlane.f32.xlu1 %v18874_v27 }
0x1b2d   : > { %6741 = vadd.xlane.f32.xlu1 %v18877_v25 }
0x1b3a   : > { %13930 = vrot.lane.b32.xlu0 %v18283_v18, %s15395_s0  ;;  %s20779_s0 = sld [smem:[#allocation47_spill]] }
0x1b3e   : > { %6970 = vrot.lane.b32.xlu0 %v18205_v40, %s20683_s6  ;;  %6972 = vrot.lane.b32.xlu1 %v18203_v1, %s20683_s6 }
0x1b40   : > { %p20783_p10 = scmp.ne.s32.totalorder %s20779_s0, 0 }
0x1b42   : > { %6974 = vrot.lane.b32.xlu0 %v18217_v60, %s20683_s6  ;;  %6976 = vrot.lane.b32.xlu1 %v18215_v2, %s20683_s6 }
0x1b46   : > { %6978 = vrot.lane.b32.xlu0 %v18227_v30, %s20683_s6  ;;  %6980 = vrot.lane.b32.xlu1 %v18225_v22, %s20683_s6 }
0x1b4a   : > { %6982 = vrot.lane.b32.xlu0 %v18237_v0, %s20683_s6  ;;  %6984 = vrot.lane.b32.xlu1 %v18235_v31, %s20683_s6 }
0x1b4e   : > { %6986 = vrot.lane.b32.xlu0 %v18247_v6, %s20683_s6  ;;  %6988 = vrot.lane.b32.xlu1 %v18245_v42, %s20683_s6 }
0x1b52   : > { %6990 = vrot.lane.b32.xlu0 %v18257_v21, %s20683_s6  ;;  %6992 = vrot.lane.b32.xlu1 %v18255_v38, %s20683_s6 }
0x1b56   : > { %6994 = vrot.lane.b32.xlu0 %v18267_v56, %s20683_s6  ;;  %6996 = vrot.lane.b32.xlu1 %v18265_v34, %s20683_s6 }
0x1b5a   : > { %6998 = vrot.lane.b32.xlu0 %v18277_v44, %s20683_s6  ;;  %7000 = vrot.lane.b32.xlu1 %v18275_v36, %s20683_s6  ;;  %s20782_s6 = smov %s20781_s26 }
0x1b5e   : > { %13935 = vrot.lane.b32.xlu0 %v18211_v53, %s20684_s14  ;;  %13940 = vrot.lane.b32.xlu1 %v18221_v63, %s20684_s14 }
0x1b62   : > { %13950 = vrot.lane.b32.xlu0 %v18241_v50, %s20684_s14  ;;  %13945 = vrot.lane.b32.xlu1 %v18231_v24, %s20684_s14 }
0x1b66   : > { %13955 = vrot.lane.b32.xlu0 %v18251_v58, %s20684_s14  ;;  %13960 = vrot.lane.b32.xlu1 %v18261_v16, %s20684_s14 }
0x1b68   : > { %v6716_v32 = vpop.xlane.xlu0 %6715 }
0x1b69   : > { %14520 = vrcp.f32 %v6716_v32  ;;  %v6714_v15 = vpop.xlane.xlu1 %6713 }
0x1b6a   : > { %14522 = vrcp.f32 %v6714_v15  ;;  %13975 = vrot.lane.b32.xlu0 %v18211_v53, %s20685_s2  ;;  %13965 = vrot.lane.b32.xlu1 %v18271_v13, %s20684_s14 }
0x1b6c   : > { %v13926_v12 = vpop.permute.xlu0 %13925 }
0x1b6d   : > { %v13921_v20 = vpop.permute.xlu1 %13920  ;;  %v13928_v32 = vunpack.i.h.bf16 %v13926_v12 }
0x1b6e   : > { %13985 = vrot.lane.b32.xlu0 %v18231_v24, %s20685_s2  ;;  %13970 = vrot.lane.b32.xlu1 %v18283_v18, %s20684_s14  ;;  %v13923_v48 = vunpack.i.h.bf16 %v13921_v20  ;;  %v13922_v49 = vunpack.i.l.bf16 %v13921_v20  ;;  %s20778_s14 = sld [smem:[#allocation41_spill]] }
0x1b72   : > { %13980 = vrot.lane.b32.xlu1 %v18221_v63, %s20685_s2 }
0x1b73   : > { %v14521_v35 = vpop.eup %14520 }
0x1b74   : > { %v14523_v7 = vpop.eup %14522  ;;  %v6762_v52 = vmul.f32 %v14521_v35, %v18815_v55  ;;  %v13913_v55 = vunpack.i.h.bf16 %v18825_v59  ;;  %v12976_v59 = vpack.c.bf16 %v13923_v48, %v13922_v49  ;;  %s873_s25 = sand.u32 1, %s20778_s14  }
0x1b75   : > { %v6761_v33 = vmul.f32 %v14523_v7, %v18817_v61  ;;  %v12958_v61 = vpack.c.bf16 %v13908_v37, %v13907_v5  ;;  %s10032_s20 = sshll.u32 %s873_s25, 3  ;;  %s9758_s14 = scalar_lea.sflag [#allocation4], %s873_s25 }
0x1b76   : > { %13990 = vrot.lane.b32.xlu1 %v18241_v50, %s20685_s2  ;;  %v12964_v43 = vpack.c.bf16 %v13913_v55, %v13912_v26 }
0x1b77   : > { %12012 = vmatprep.mubr.f32.mxu0 %v6761_v33 }
0x1b78   : > { %12013 = vmatmul.mubr.f32.vlgmr.msra.gmra.mrb[116].mxu0 %v6762_v52 }
0x1b79   : > { %12951 = vmatpush3.bf16.xpose.msk.msra.mxu0 %vm16187_vm2, %v18713_v19  ;;  %v13918_v19 = vunpack.i.h.bf16 %v13916_v4  ;;  %v13927_v4 = vunpack.i.l.bf16 %v13926_v12 }
0x1b7a   : > { %12954 = vmatprep.subr.msk.bf16.mxu0 %vm16187_vm2, %v12952_v28 }
0x1b7b   : > { %v12970_v17 = vpack.c.bf16 %v13918_v19, %v13917_v46  ;;  %v12982_v7 = vpack.c.bf16 %v13928_v32, %v13927_v4 }
0x1b81   : > { %12957 = vmatpush3.bf16.xpose.msk.msra.mxu0 %vm16187_vm2, %v12952_v28 }
0x1b82   : > { %12960 = vmatprep.subr.msk.bf16.mxu0 %vm16187_vm2, %v12958_v61 }
0x1b89   : > { %12963 = vmatpush3.bf16.xpose.msk.msra.mxu0 %vm16187_vm2, %v12958_v61 }
0x1b8a   : > { %12966 = vmatprep.subr.msk.bf16.mxu0 %vm16187_vm2, %v12964_v43 }
0x1b91   : > { %12969 = vmatpush3.bf16.xpose.msk.msra.mxu0 %vm16187_vm2, %v12964_v43 }
0x1b92   : > { %12972 = vmatprep.subr.msk.bf16.mxu0 %vm16187_vm2, %v12970_v17 }
0x1b99   : > { %12975 = vmatpush3.bf16.xpose.msk.msra.mxu0 %vm16187_vm2, %v12970_v17 }
0x1b9a   : > { %12978 = vmatprep.subr.msk.bf16.mxu0 %vm16187_vm2, %v12976_v59 }
0x1b9d   : > { %v6718_v15 = vpop.xlane.xlu0 %6717 }
0x1b9e   : > { %14524 = vrcp.f32 %v6718_v15  ;;  %v6720_v35 = vpop.xlane.xlu1 %6719 }
0x1b9f   : > { %14526 = vrcp.f32 %v6720_v35 }
0x1ba1   : > { %12981 = vmatpush3.bf16.xpose.msk.msra.mxu0 %vm16187_vm2, %v12976_v59  ;;  %v6724_v51 = vpop.xlane.xlu0 %6723 }
0x1ba2   : > { %12984 = vmatprep.subr.msk.bf16.mxu0 %vm16187_vm2, %v12982_v7  ;;  %v6728_v3 = vpop.xlane.xlu1 %6727  ;;  %14528 = vrcp.f32 %v6724_v51 }
0x1ba5   : > { %v6722_v33 = vpop.xlane.xlu0 %6721 }
0x1ba6   : > { %14530 = vrcp.f32 %v6722_v33  ;;  %v6726_v52 = vpop.xlane.xlu1 %6725 }
0x1ba7   : > { %14532 = vrcp.f32 %v6726_v52 }
0x1ba8   : > { %v14525_v28 = vpop.eup %14524  ;;  %14534 = vrcp.f32 %v6728_v3 }
0x1ba9   : > { %v14527_v37 = vpop.eup %14526  ;;  %12987 = vmatpush3.bf16.xpose.msk.msra.mxu0 %vm16187_vm2, %v12982_v7  ;;  %v6734_v5 = vpop.xlane.xlu0 %6733  ;;  %v6763_v61 = vmul.f32 %v14525_v28, %v18833_v23 }
0x1baa   : > { %v6732_v55 = vpop.xlane.xlu1 %6731  ;;  %v6764_v26 = vmul.f32 %v14527_v37, %v18835_v47  ;;  %14536 = vrcp.f32 %v6734_v5 }
0x1bab   : > { %12015 = vmatprep.mubr.f32.mxu0 %v6763_v61  ;;  %14538 = vrcp.f32 %v6732_v55 }
0x1bac   : > { %12016 = vmatmul.mubr.f32.gmra.mrb[118].mxu0 %v6764_v26  ;;  %v14529_v46 = vpop.eup %14528 }
0x1bad   : > { %v6740_v43 = vpop.xlane.xlu0 %6739  ;;  %v6766_v23 = vmul.f32 %v14529_v46, %v18841_v54 }
0x1bae   : > { %v6730_v19 = vpop.xlane.xlu1 %6729 }
0x1baf   : > { %14540 = vrcp.f32 %v6730_v19 }
0x1bb0   : > { %v14531_v17 = vpop.eup %14530 }
0x1bb1   : > { %v14533_v20 = vpop.eup %14532  ;;  %v6738_v48 = vpop.xlane.xlu0 %6737  ;;  %v6765_v49 = vmul.f32 %v14531_v17, %v18849_v41 }
0x1bb2   : > { %14542 = vrcp.f32 %v6738_v48  ;;  %v6736_v59 = vpop.xlane.xlu1 %6735  ;;  %v6767_v12 = vmul.f32 %v14533_v20, %v18851_v62  ;;  %v14535_v47 = vpop.eup %14534 }
0x1bb3   : > { %14544 = vrcp.f32 %v6736_v59  ;;  %12018 = vmatprep.mubr.f32.mxu0 %v6765_v49  ;;  %v6768_v7 = vmul.f32 %v14535_v47, %v18844_v39 }
0x1bb4   : > { %12019 = vmatmul.mubr.f32.gmra.mrb[120].mxu0 %v6766_v23  ;;  %14546 = vrcp.f32 %v6740_v43  ;;  %v14537_v51 = vpop.eup %14536 }
0x1bb5   : > { %12021 = vmatprep.mubr.f32.mxu0 %v6767_v12  ;;  %v13931_v32 = vpop.permute.xlu0 %13930  ;;  %v14539_v41 = vpop.eup %14538  ;;  %v6771_v37 = vmul.f32 %v14537_v51, %v18856_v29 }
0x1bb6   : > { %v13933_v4 = vunpack.i.h.bf16 %v13931_v32  ;;  %v13932_v15 = vunpack.i.l.bf16 %v13931_v32  ;;  %v6744_v35 = vpop.xlane.xlu1 %6743  ;;  %v6770_v28 = vmul.f32 %v14539_v41, %v18858_v57 }
0x1bb7   : > { %14548 = vrcp.f32 %v6744_v35 }
0x1bb8   : > { %v12988_v3 = vpack.c.bf16 %v13933_v4, %v13932_v15  ;;  %12022 = vmatmul.mubr.f32.gmra.mrb[122].mxu0 %v6768_v7 }
0x1bb9   : > { %v14541_v33 = vpop.eup %14540  ;;  %v6971_v54 = vpop.permute.xlu0 %6970 }
0x1bba   : > { %v6742_v62 = vpop.xlane.xlu1 %6741  ;;  %12990 = vmatprep.subr.msk.bf16.mxu0 %vm16187_vm2, %v12988_v3  ;;  %v6769_v52 = vmul.f32 %v14541_v33, %v18864_v45 }
0x1bbb   : > { %14550 = vrcp.f32 %v6742_v62  ;;  %12993 = vmatpush3.bf16.xpose.msk.msra.mxu0 %vm16187_vm2, %v12988_v3 }
0x1bbc   : > { %v14543_v39 = vpop.eup %14542  ;;  %12024 = vmatprep.mubr.f32.mxu0 %v6769_v52 }
0x1bbd   : > { %v14545_v5 = vpop.eup %14544  ;;  %12025 = vmatmul.mubr.f32.gmra.mrb[124].mxu0 %v6770_v28  ;;  %v6975_v61 = vpop.permute.xlu0 %6974  ;;  %v6773_v45 = vmul.f32 %v14543_v39, %v18868_v11 }
0x1bbe   : > { %v6973_v55 = vpop.permute.xlu1 %6972  ;;  %12027 = vmatprep.mubr.f32.mxu0 %v6771_v37  ;;  %v6772_v26 = vmul.f32 %v14545_v5, %v18870_v14  ;;  %v14547_v43 = vpop.eup %14546 }
0x1bbf   : > { %v6774_v57 = vmul.f32 %v14547_v43, %v18862_v10 }
0x1bc1   : > { %12028 = vmatmul.mubr.f32.gmra.mrb[126].mxu0 %v6772_v26  ;;  %v6979_v19 = vpop.permute.xlu0 %6978  ;;  %v14549_v17 = vpop.eup %14548 }
0x1bc2   : > { %v6977_v46 = vpop.permute.xlu1 %6976  ;;  %12030 = vmatprep.mubr.f32.mxu0 %v6773_v45  ;;  %v6776_v59 = vmul.f32 %v14549_v17, %v18874_v27 }
0x1bc5   : > { %v14551_v20 = vpop.eup %14550  ;;  %12031 = vmatmul.mubr.f32.gmra.mrb[128].mxu0 %v6774_v57  ;;  %v6983_v29 = vpop.permute.xlu0 %6982 }
0x1bc6   : > { %v6981_v48 = vpop.permute.xlu1 %6980  ;;  %v6775_v49 = vmul.f32 %v14551_v20, %v18877_v25 }
0x1bc8   : > { %12033 = vmatprep.mubr.f32.mxu0 %v6775_v49 }
0x1bc9   : > { %12034 = vmatmul.mubr.f32.gmra.mrb[130].mxu0 %v6776_v59  ;;  %v6987_v14 = vpop.permute.xlu0 %6986 }
0x1bca   : > { %v6985_v23 = vpop.permute.xlu1 %6984  ;;  %12068 = vmatprep.mubr.msk.f32.mxu0 %vm1433_vm1, %v6971_v54 }
0x1bcd   : > { %v6991_v11 = vpop.permute.xlu0 %6990  ;;  %12069 = vmatmul.mubr.msk.f32.vlgmr.msra.gmra.mrb[132].mxu0 %vm1433_vm1, %v6973_v55 }
0x1bce   : > { %v6989_v12 = vpop.permute.xlu1 %6988  ;;  %12071 = vmatprep.mubr.msk.f32.mxu0 %vm1433_vm1, %v6975_v61 }
0x1bd1   : > { %v6995_v10 = vpop.permute.xlu0 %6994  ;;  %12072 = vmatmul.mubr.msk.f32.gmra.mrb[134].mxu0 %vm1433_vm1, %v6977_v46 }
0x1bd2   : > { %v6993_v47 = vpop.permute.xlu1 %6992  ;;  %12074 = vmatprep.mubr.msk.f32.mxu0 %vm1433_vm1, %v6979_v19 }
0x1bd5   : > { %v6999_v25 = vpop.permute.xlu0 %6998  ;;  %12075 = vmatmul.mubr.msk.f32.gmra.mrb[136].mxu0 %vm1433_vm1, %v6981_v48 }
0x1bd6   : > { %v6997_v27 = vpop.permute.xlu1 %6996  ;;  %12077 = vmatprep.mubr.msk.f32.mxu0 %vm1433_vm1, %v6983_v29 }
0x1bd9   : > { %v13936_v32 = vpop.permute.xlu0 %13935  ;;  %12078 = vmatmul.mubr.msk.f32.gmra.mrb[138].mxu0 %vm1433_vm1, %v6985_v23 }
0x1bda   : > { %v13938_v4 = vunpack.i.h.bf16 %v13936_v32  ;;  %v13937_v15 = vunpack.i.l.bf16 %v13936_v32  ;;  %v7001_v35 = vpop.permute.xlu1 %7000  ;;  %12080 = vmatprep.mubr.msk.f32.mxu0 %vm1433_vm1, %v6987_v14 }
0x1bdc   : > { %v12994_v7 = vpack.c.bf16 %v13938_v4, %v13937_v15 }
0x1bdd   : > { %12081 = vmatmul.mubr.msk.f32.gmra.mrb[140].mxu0 %vm1433_vm1, %v6989_v12  ;;  %v13951_v51 = vpop.permute.xlu0 %13950 }
0x1bde   : > { %v13941_v41 = vpop.permute.xlu1 %13940  ;;  %12083 = vmatprep.mubr.msk.f32.mxu0 %vm1433_vm1, %v6991_v11  ;;  %12995 = vmatprep.subr.bf16.mxu1 %v12994_v7  ;;  %v13953_v52 = vunpack.i.h.bf16 %v13951_v51  ;;  %v13952_v28 = vunpack.i.l.bf16 %v13951_v51 }
0x1bdf   : > { %v13943_v3 = vunpack.i.h.bf16 %v13941_v41  ;;  %v13942_v33 = vunpack.i.l.bf16 %v13941_v41  ;;  %12997 = vmatpush3.bf16.msra.mxu1 %v12994_v7 }
0x1be0   : > { %v13006_v45 = vpack.c.bf16 %v13953_v52, %v13952_v28 }
0x1be1   : > { %12084 = vmatmul.mubr.msk.f32.gmra.mrb[142].mxu0 %vm1433_vm1, %v6993_v47  ;;  %v12998_v54 = vpack.c.bf16 %v13943_v3, %v13942_v33  ;;  %v13956_v5 = vpop.permute.xlu0 %13955 }
0x1be2   : > { %v13946_v62 = vpop.permute.xlu1 %13945  ;;  %12086 = vmatprep.mubr.msk.f32.mxu0 %vm1433_vm1, %v6995_v10  ;;  %v13958_v26 = vunpack.i.h.bf16 %v13956_v5  ;;  %v13957_v43 = vunpack.i.l.bf16 %v13956_v5 }
0x1be3   : > { %v13948_v39 = vunpack.i.h.bf16 %v13946_v62  ;;  %v13947_v37 = vunpack.i.l.bf16 %v13946_v62  ;;  %12999 = vmatprep.subr.bf16.mxu1 %v12998_v54 }
0x1be4   : > { %13001 = vmatpush3.bf16.msra.mxu1 %v12998_v54  ;;  %v13010_v17 = vpack.c.bf16 %v13958_v26, %v13957_v43  ;;  %v19047_v43 = vld [vmem:[%s20489_s19 + $0x8] sm:$0xff] }
0x1be5   : > { %12087 = vmatmul.mubr.msk.f32.gmra.mrb[144].mxu0 %vm1433_vm1, %v6997_v27  ;;  %v13002_v61 = vpack.c.bf16 %v13948_v39, %v13947_v37  ;;  %v13976_v11 = vpop.permute.xlu0 %13975 }
0x1be6   : > { %v13961_v55 = vpop.permute.xlu1 %13960  ;;  %12089 = vmatprep.mubr.msk.f32.mxu0 %vm1433_vm1, %v6999_v25  ;;  %v13978_v12 = vunpack.i.h.bf16 %v13976_v11  ;;  %v13977_v10 = vunpack.i.l.bf16 %v13976_v11  ;;  %v19074_v11 = vld [vmem:[%s20489_s19 + $0x28] sm:$0xff] }
0x1be7   : > { %13003 = vmatprep.subr.bf16.mxu1 %v13002_v61  ;;  %v13963_v46 = vunpack.i.h.bf16 %v13961_v55  ;;  %v13962_v57 = vunpack.i.l.bf16 %v13961_v55 }
0x1be8   : > { %13005 = vmatpush3.bf16.msra.mxu1 %v13002_v61  ;;  %v19007_v25 = vpack.c.bf16 %v13978_v12, %v13977_v10  ;;  %v19082_v10 = vld [vmem:[%s20489_s19 + $0x10] sm:$0xff] }
0x1be9   : > { %12090 = vmatmul.mubr.msk.f32.gmra.mrb[146].mxu0 %vm1433_vm1, %v7001_v35  ;;  %13007 = vmatprep.subr.bf16.mxu1 %v13006_v45  ;;  %v13014_v48 = vpack.c.bf16 %v13963_v46, %v13962_v57 }
0x1bea   : > { %v13966_v19 = vpop.permute.xlu1 %13965 }
0x1beb   : > { %v13968_v20 = vunpack.i.h.bf16 %v13966_v19  ;;  %v13967_v29 = vunpack.i.l.bf16 %v13966_v19  ;;  %v19055_v19 = vld [vmem:[%s20489_s19] sm:$0xff] }
0x1bec   : > { %13009 = vmatpush3.bf16.msra.mxu1 %v13006_v45 }
0x1bed   : > { %13011 = vmatprep.subr.bf16.mxu1 %v13010_v17  ;;  %v13018_v23 = vpack.c.bf16 %v13968_v20, %v13967_v29  ;;  %v19065_v29 = vld [vmem:[%s20489_s19 + $0x18] sm:$0xff] }
0x1bee   : > { %v13971_v49 = vpop.permute.xlu1 %13970 }
0x1bef   : > { %v13973_v59 = vunpack.i.h.bf16 %v13971_v49  ;;  %v13972_v14 = vunpack.i.l.bf16 %v13971_v49 }
0x1bf0   : > { %13013 = vmatpush3.bf16.msra.mxu1 %v13010_v17 }
0x1bf1   : > { %13015 = vmatprep.subr.bf16.mxu1 %v13014_v48  ;;  %v13022_v47 = vpack.c.bf16 %v13973_v59, %v13972_v14 }
0x1bf4   : > { %13017 = vmatpush3.bf16.msra.mxu1 %v13014_v48 }
0x1bf5   : > { %13019 = vmatprep.subr.bf16.mxu1 %v13018_v23 }
0x1bf8   : > { %13021 = vmatpush3.bf16.msra.mxu1 %v13018_v23 }
0x1bf9   : > { %13023 = vmatprep.subr.bf16.mxu1 %v13022_v47 }
0x1bfc   : > { %13025 = vmatpush3.bf16.msra.mxu1 %v13022_v47 }
0x1bfd   : > { %13028 = vmatprep.subr.msk.bf16.mxu1 %vm16187_vm2, %v19007_v25 }
0x1c4b   : > { %v19012_v27 = vpop.f32.mrb[116].mxu0 }
0x1c4c   : > { %20686 = vst [vmem:[#allocation49_spill] sm:$0xff] %v19012_v27  ;;  %v19014_v32 = vpop.f32.mrb[117].mxu0 }
0x1c4d   : > { %20687 = vst [vmem:[#allocation52_spill] sm:$0xff] %v19014_v32 }
0x1c7f   : > { %v19016_v4 = vpop.f32.mrb[118].mxu0 }
0x1c80   : > { %20688 = vst [vmem:[#allocation51_spill] sm:$0xff] %v19016_v4  ;;  %v19018_v15 = vpop.f32.mrb[119].mxu0  ;;  %v19182_v4 = vld [vmem:[%s20489_s19 + $0x70] sm:$0xff] }
0x1c81   : > { %20689 = vst [vmem:[#allocation54_spill] sm:$0xff] %v19018_v15  ;;  %20712 = vst [vmem:[#allocation108_spill] sm:$0xff] %v19182_v4  ;;  %v19196_v15 = vpop.permute.xlu0 %13985 }
0x1c87   : > { %v19020_v35 = vpop.f32.mrb[120].mxu0 }
0x1c88   : > { %20690 = vst [vmem:[#allocation53_spill] sm:$0xff] %v19020_v35  ;;  %v19022_v7 = vpop.f32.mrb[121].mxu0 }
0x1c89   : > { %20691 = vst [vmem:[#allocation56_spill] sm:$0xff] %v19022_v7 }
0x1c8b   : > { %v19024_v51 = vpop.f32.mrb[122].mxu0 }
0x1c8c   : > { %20692 = vst [vmem:[#allocation55_spill] sm:$0xff] %v19024_v51  ;;  %v19026_v41 = vpop.f32.mrb[123].mxu0 }
0x1c8d   : > { %20693 = vst [vmem:[#allocation63_spill] sm:$0xff] %v19026_v41 }
0x1c90   : > { %v19028_v3 = vpop.f32.mrb[124].mxu0 }
0x1c91   : > { %20694 = vst [vmem:[#allocation62_spill] sm:$0xff] %v19028_v3  ;;  %v19030_v33 = vpop.f32.mrb[125].mxu0 }
0x1c92   : > { %20695 = vst [vmem:[#allocation65_spill] sm:$0xff] %v19030_v33 }
0x1c94   : > { %v19032_v54 = vpop.f32.mrb[126].mxu0 }
0x1c95   : > { %20696 = vst [vmem:[#allocation64_spill] sm:$0xff] %v19032_v54  ;;  %v19034_v62 = vpop.f32.mrb[127].mxu0 }
0x1c96   : > { %20697 = vst [vmem:[#allocation67_spill] sm:$0xff] %v19034_v62 }
0x1c98   : > { %v19036_v52 = vpop.f32.mrb[128].mxu0 }
0x1c99   : > { %20698 = vst [vmem:[#allocation66_spill] sm:$0xff] %v19036_v52  ;;  %v19038_v28 = vpop.f32.mrb[129].mxu0 }
0x1c9a   : > { %20699 = vst [vmem:[#allocation69_spill] sm:$0xff] %v19038_v28 }
0x1c9c   : > { %v19040_v39 = vpop.f32.mrb[130].mxu0 }
0x1c9d   : > { %20700 = vst [vmem:[#allocation68_spill] sm:$0xff] %v19040_v39  ;;  %v19042_v37 = vpop.f32.mrb[131].mxu0 }
0x1c9e   : > { %20701 = vst [vmem:[#allocation70_spill] sm:$0xff] %v19042_v37 }
0x1ca0   : > { %v12070_v5 = vpop.f32.mrb[132].mxu0 }
0x1ca1   : > { %v7244_v61 = vmul.f32 0.35355338, %v12070_v5  ;;  %v7164_v55 = vpop.f32.mrb[133].mxu0 }
0x1ca2   : > { %v7243_v26 = vmul.f32 0.35355338, %v7164_v55 }
0x1ca3   : > { %v19050_v45 = vadd.f32 %v19047_v43, %v7244_v61 }
0x1ca4   : > { %v19058_v46 = vadd.f32 %v19055_v19, %v7243_v26  ;;  %v12073_v57 = vpop.f32.mrb[134].mxu0 }
0x1ca5   : > { %v7246_v17 = vmul.f32 0.35355338, %v12073_v57  ;;  %7277 = vmax.xlane.f32.xlu1 %v19050_v45  ;;  %v7174_v20 = vpop.f32.mrb[135].mxu0  ;;  %v19092_v57 = vld [vmem:[%s20489_s19 + $0x38] sm:$0xff] }
0x1ca6   : > { %7275 = vmax.xlane.f32.xlu0 %v19058_v46  ;;  %v7245_v49 = vmul.f32 0.35355338, %v7174_v20  ;;  %20702 = vst [vmem:[#allocation71_spill] sm:$0xff] %v19092_v57  ;;  %v19100_v20 = vld [vmem:[%s20489_s19 + $0x20] sm:$0xff] }
0x1ca7   : > { %v19068_v48 = vadd.f32 %v19065_v29, %v7246_v17  ;;  %20703 = vst [vmem:[#allocation72_spill] sm:$0xff] %v19100_v20 }
0x1ca8   : > { %v12076_v59 = vpop.f32.mrb[136].mxu0  ;;  %v19085_v47 = vadd.f32 %v19082_v10, %v7245_v49 }
0x1ca9   : > { %v7248_v14 = vmul.f32 0.35355338, %v12076_v59  ;;  %v7184_v23 = vpop.f32.mrb[137].mxu0 }
0x1caa   : > { %7281 = vmax.xlane.f32.xlu0 %v19068_v48  ;;  %v7247_v5 = vmul.f32 0.35355338, %v7184_v23 }
0x1cab   : > { %v19077_v12 = vadd.f32 %v19074_v11, %v7248_v14 }
0x1cac   : > { %v12079_v61 = vpop.f32.mrb[138].mxu0  ;;  %v19103_v49 = vadd.f32 %v19100_v20, %v7247_v5  ;;  %v19118_v5 = vld [vmem:[%s20489_s19 + $0x30] sm:$0xff] }
0x1cad   : > { %v7250_v55 = vmul.f32 0.35355338, %v12079_v61  ;;  %7285 = vmax.xlane.f32.xlu1 %v19077_v12  ;;  %v7194_v26 = vpop.f32.mrb[139].mxu0  ;;  %20705 = vst [vmem:[#allocation74_spill] sm:$0xff] %v19118_v5 }
0x1cae   : > { %7279 = vmax.xlane.f32.xlu0 %v19085_v47  ;;  %v7249_v59 = vmul.f32 0.35355338, %v7194_v26 }
0x1caf   : > { %v19095_v17 = vadd.f32 %v19092_v57, %v7250_v55  ;;  %v19110_v55 = vld [vmem:[%s20489_s19 + $0x48] sm:$0xff] }
0x1cb0   : > { %v12082_v14 = vpop.f32.mrb[140].mxu0  ;;  %20704 = vst [vmem:[#allocation73_spill] sm:$0xff] %v19110_v55  ;;  %v19121_v26 = vadd.f32 %v19118_v5, %v7249_v59  ;;  %v19136_v59 = vld [vmem:[%s20489_s19 + $0x40] sm:$0xff] }
0x1cb1   : > { %v7252_v23 = vmul.f32 0.35355338, %v12082_v14  ;;  %7289 = vmax.xlane.f32.xlu1 %v19095_v17  ;;  %v7204_v61 = vpop.f32.mrb[141].mxu0  ;;  %20707 = vst [vmem:[#allocation76_spill] sm:$0xff] %v19136_v59 }
0x1cb2   : > { %7283 = vmax.xlane.f32.xlu0 %v19103_v49  ;;  %v7251_v14 = vmul.f32 0.35355338, %v7204_v61 }
0x1cb3   : > { %v19113_v9 = vadd.f32 %v19110_v55, %v7252_v23  ;;  %v19128_v23 = vld [vmem:[%s20489_s19 + $0x58] sm:$0xff] }
0x1cb4   : > { %v12085_v39 = vpop.f32.mrb[142].mxu0  ;;  %20706 = vst [vmem:[#allocation91_spill] sm:$0xff] %v19128_v23 }
0x1cb5   : > { %v7254_v52 = vmul.f32 0.35355338, %v12085_v39  ;;  %7293 = vmax.xlane.f32.xlu1 %v19113_v9  ;;  %v7214_v54 = vpop.f32.mrb[143].mxu0  ;;  %v19139_v39 = vadd.f32 %v19136_v59, %v7251_v14  ;;  %v19154_v14 = vld [vmem:[%s20489_s19 + $0x50] sm:$0xff] }
0x1cb6   : > { %7287 = vmax.xlane.f32.xlu0 %v19121_v26  ;;  %v7253_v61 = vmul.f32 0.35355338, %v7214_v54  ;;  %20709 = vst [vmem:[#allocation105_spill] sm:$0xff] %v19154_v14 }
0x1cb7   : > { %v19131_v37 = vadd.f32 %v19128_v23, %v7254_v52  ;;  %v19146_v52 = vld [vmem:[%s20489_s19 + $0x68] sm:$0xff] }
0x1cb8   : > { %v12088_v3 = vpop.f32.mrb[144].mxu0  ;;  %20708 = vst [vmem:[#allocation104_spill] sm:$0xff] %v19146_v52 }
0x1cb9   : > { %v7256_v28 = vmul.f32 0.35355338, %v12088_v3  ;;  %7297 = vmax.xlane.f32.xlu1 %v19131_v37  ;;  %v7224_v51 = vpop.f32.mrb[145].mxu0  ;;  %v19157_v3 = vadd.f32 %v19154_v14, %v7253_v61  ;;  %v19172_v61 = vld [vmem:[%s20489_s19 + $0x60] sm:$0xff] }
0x1cba   : > { %7291 = vmax.xlane.f32.xlu0 %v19139_v39  ;;  %v7255_v54 = vmul.f32 0.35355338, %v7224_v51  ;;  %20711 = vst [vmem:[#allocation107_spill] sm:$0xff] %v19172_v61 }
0x1cbb   : > { %v19149_v62 = vadd.f32 %v19146_v52, %v7256_v28  ;;  %v19164_v28 = vld [vmem:[%s20489_s19 + $0x78] sm:$0xff] }
0x1cbc   : > { %v12091_v35 = vpop.f32.mrb[146].mxu0  ;;  %20710 = vst [vmem:[#allocation106_spill] sm:$0xff] %v19164_v28 }
0x1cbd   : > { %v7258_v33 = vmul.f32 0.35355338, %v12091_v35  ;;  %7301 = vmax.xlane.f32.xlu1 %v19149_v62  ;;  %v7234_v41 = vpop.f32.mrb[147].mxu0  ;;  %v19175_v35 = vadd.f32 %v19172_v61, %v7255_v54 }
0x1cbe   : > { %7295 = vmax.xlane.f32.xlu0 %v19157_v3  ;;  %v7257_v51 = vmul.f32 0.35355338, %v7234_v41  ;;  %v19192_v41 = vpop.permute.xlu1 %13980 }
0x1cbf   : > { %v19167_v7 = vadd.f32 %v19164_v28, %v7258_v33 }
0x1cc0   : > { %v19185_v33 = vadd.f32 %v19182_v4, %v7257_v51 }
0x1cc1   : > { %7305 = vmax.xlane.f32.xlu1 %v19167_v7 }
0x1cc2   : > { %7299 = vmax.xlane.f32.xlu0 %v19175_v35  ;;  %v19194_v54 = vpop.permute.xlu1 %13990 }
0x1cc6   : > { %7303 = vmax.xlane.f32.xlu0 %v19185_v33 }
0x1cd2   : > { %14000 = vrot.lane.b32.xlu1 %v18261_v16, %s20685_s2 }
0x1cdc   : > { %13995 = vrot.lane.b32.xlu0 %v18251_v58, %s20685_s2 }
0x1d32   : > { %v7278_v27 = vpop.xlane.xlu1 %7277 }
0x1d33   : > { %v7308_v32 = vsub.f32 %v19050_v45, %v7278_v27  ;;  %v7276_v61 = vpop.xlane.xlu0 %7275 }
0x1d34   : > { %v7307_v51 = vsub.f32 %v19058_v46, %v7276_v61 }
0x1d35   : > { %v7325_v4 = vmul.f32 1.442695, %v7308_v32 }
0x1d36   : > { %v7323_v28 = vmul.f32 1.442695, %v7307_v51 }
0x1d37   : > { %14552 = vpow2.f32 %v7325_v4  ;;  %v7282_v14 = vpop.xlane.xlu0 %7281 }
0x1d38   : > { %14554 = vpow2.f32 %v7323_v28  ;;  %v7310_v16 = vsub.f32 %v19068_v48, %v7282_v14 }
0x1d3a   : > { %v7329_v52 = vmul.f32 1.442695, %v7310_v16  ;;  %v7286_v59 = vpop.xlane.xlu1 %7285 }
0x1d3b   : > { %v7280_v23 = vpop.xlane.xlu0 %7279 }
0x1d3c   : > { %14556 = vpow2.f32 %v7329_v52 }
0x1d3e   : > { %v7290_v5 = vpop.xlane.xlu1 %7289 }
0x1d3f   : > { %v7314_v55 = vsub.f32 %v19095_v17, %v7290_v5  ;;  %v7284_v20 = vpop.xlane.xlu0 %7283 }
0x1d41   : > { %v19202_v57 = vpop.eup %14552  ;;  %v7337_v27 = vmul.f32 1.442695, %v7314_v55 }
0x1d42   : > { %v19204_v45 = vpop.eup %14554  ;;  %v7294_v32 = vpop.xlane.xlu1 %7293  ;;  %7357 = vadd.xlane.f32.xlu0 %v19202_v57 }
0x1d43   : > { %14558 = vpow2.f32 %v7337_v27  ;;  %v7288_v4 = vpop.xlane.xlu0 %7287  ;;  %7355 = vadd.xlane.f32.xlu1 %v19204_v45  ;;  %v7316_v16 = vsub.f32 %v19113_v9, %v7294_v32  ;;  %v7309_v32 = vsub.f32 %v19085_v47, %v7280_v23 }
0x1d44   : > { %v7313_v46 = vsub.f32 %v19121_v26, %v7288_v4  ;;  %v7312_v4 = vsub.f32 %v19077_v12, %v7286_v59 }
0x1d45   : > { %v7341_v55 = vmul.f32 1.442695, %v7316_v16  ;;  %v7327_v16 = vmul.f32 1.442695, %v7309_v32 }
0x1d46   : > { %v19210_v48 = vpop.eup %14556  ;;  %v7335_v17 = vmul.f32 1.442695, %v7313_v46  ;;  %v7298_v14 = vpop.xlane.xlu1 %7297  ;;  %v7333_v46 = vmul.f32 1.442695, %v7312_v4 }
0x1d47   : > { %v7292_v5 = vpop.xlane.xlu0 %7291  ;;  %7361 = vadd.xlane.f32.xlu1 %v19210_v48  ;;  %v7318_v28 = vsub.f32 %v19131_v37, %v7298_v14 }
0x1d48   : > { %14560 = vpow2.f32 %v7335_v17  ;;  %v7315_v52 = vsub.f32 %v19139_v39, %v7292_v5  ;;  %v7311_v17 = vsub.f32 %v19103_v49, %v7284_v20 }
0x1d49   : > { %14562 = vpow2.f32 %v7341_v55  ;;  %v7345_v9 = vmul.f32 1.442695, %v7318_v28 }
0x1d4a   : > { %v7339_v61 = vmul.f32 1.442695, %v7315_v52  ;;  %v7331_v55 = vmul.f32 1.442695, %v7311_v17  ;;  %v7302_v14 = vpop.xlane.xlu1 %7301 }
0x1d4b   : > { %v7296_v5 = vpop.xlane.xlu0 %7295  ;;  %v7320_v28 = vsub.f32 %v19149_v62, %v7302_v14 }
0x1d4c   : > { %14564 = vpow2.f32 %v7339_v61  ;;  %v7317_v52 = vsub.f32 %v19157_v3, %v7296_v5 }
0x1d4d   : > { %v19215_v51 = vpop.eup %14558  ;;  %14566 = vpow2.f32 %v7345_v9  ;;  %v7349_v59 = vmul.f32 1.442695, %v7320_v28 }
0x1d4e   : > { %7369 = vadd.xlane.f32.xlu1 %v19215_v51  ;;  %14568 = vpow2.f32 %v7327_v16  ;;  %v7343_v47 = vmul.f32 1.442695, %v7317_v52  ;;  %v7306_v61 = vpop.xlane.xlu1 %7305 }
0x1d4f   : > { %14570 = vpow2.f32 %v7333_v46  ;;  %v7300_v23 = vpop.xlane.xlu0 %7299  ;;  %v7322_v62 = vsub.f32 %v19167_v7, %v7306_v61 }
0x1d50   : > { %14572 = vpow2.f32 %v7331_v55  ;;  %v7319_v20 = vsub.f32 %v19175_v35, %v7300_v23 }
0x1d51   : > { %14574 = vpow2.f32 %v7343_v47  ;;  %v7353_v35 = vmul.f32 1.442695, %v7322_v62 }
0x1d52   : > { %v19218_v26 = vpop.eup %14560  ;;  %14576 = vpow2.f32 %v7349_v59 }
0x1d53   : > { %7367 = vadd.xlane.f32.xlu1 %v19218_v26  ;;  %v19221_v27 = vpop.eup %14562  ;;  %v7304_v32 = vpop.xlane.xlu0 %7303 }
0x1d54   : > { %v7321_v4 = vsub.f32 %v19185_v33, %v7304_v32 }
0x1d56   : > { %v19226_v37 = vpop.eup %14564  ;;  %v7351_v46 = vmul.f32 1.442695, %v7321_v4 }
0x1d57   : > { %7373 = vadd.xlane.f32.xlu1 %v19221_v27  ;;  %v19229_v39 = vpop.eup %14566 }
0x1d58   : > { %14005 = vrot.lane.b32.xlu0 %v18271_v13, %s20685_s2  ;;  %v19239_v12 = vpop.eup %14568 }
0x1d59   : > { %v19243_v49 = vpop.eup %14570 }
0x1d5a   : > { %v19246_v3 = vpop.eup %14572 }
0x1d5b   : > { %7371 = vadd.xlane.f32.xlu1 %v19226_v37  ;;  %v19250_v9 = vpop.eup %14574 }
0x1d5c   : > { %v19254_v16 = vpop.eup %14576 }
0x1d5f   : > { %7377 = vadd.xlane.f32.xlu1 %v19229_v39 }
0x1d70   : > { %7614 = vrot.lane.b32.xlu1 %v18203_v1, %s20713_s27  ;;  %v7347_v1 = vmul.f32 1.442695, %v7319_v20 }
0x1d72   : > { %14578 = vpow2.f32 %v7347_v1 }
0x1d73   : > { %14580 = vpow2.f32 %v7353_v35 }
0x1d74   : > { %14582 = vpow2.f32 %v7351_v46 }
0x1d77   : > { %7359 = vadd.xlane.f32.xlu0 %v19239_v12 }
0x1d7b   : > { %7365 = vadd.xlane.f32.xlu0 %v19243_v49 }
0x1d7c   : > { %v19257_v17 = vpop.eup %14578 }
0x1d7d   : > { %v19260_v7 = vpop.eup %14580 }
0x1d7e   : > { %v19263_v5 = vpop.eup %14582 }
0x1d7f   : > { %7363 = vadd.xlane.f32.xlu0 %v19246_v3 }
0x1d83   : > { %7375 = vadd.xlane.f32.xlu0 %v19250_v9 }
0x1d87   : > { %7381 = vadd.xlane.f32.xlu0 %v19254_v16 }
0x1d8b   : > { %7379 = vadd.xlane.f32.xlu0 %v19257_v17 }
0x1d94   : > { %7385 = vadd.xlane.f32.xlu1 %v19260_v7 }
0x1d98   : > { %7383 = vadd.xlane.f32.xlu1 %v19263_v5 }
0x1da1   : > { %14010 = vrot.lane.b32.xlu0 %v18283_v18, %s20685_s2  ;;  %s20714_s2 = smov 40  }
0x1da5   : > { %7612 = vrot.lane.b32.xlu0 %v18205_v40, %s20713_s27  ;;  %v13996_v40 = vpop.permute.xlu0 %13995 }
0x1da9   : > { %7616 = vrot.lane.b32.xlu0 %v18217_v60, %s20713_s27  ;;  %7618 = vrot.lane.b32.xlu1 %v18215_v2, %s20713_s27  ;;  %v14001_v2 = vpop.permute.xlu1 %14000 }
0x1dad   : > { %7620 = vrot.lane.b32.xlu0 %v18227_v30, %s20713_s27  ;;  %7622 = vrot.lane.b32.xlu1 %v18225_v22, %s20713_s27 }
0x1db1   : > { %7624 = vrot.lane.b32.xlu0 %v18237_v0, %s20713_s27  ;;  %7626 = vrot.lane.b32.xlu1 %v18235_v31, %s20713_s27  ;;  %v13983_v31 = vunpack.i.h.bf16 %v19192_v41 }
0x1db5   : > { %7628 = vrot.lane.b32.xlu0 %v18247_v6, %s20713_s27  ;;  %7630 = vrot.lane.b32.xlu1 %v18245_v42, %s20713_s27  ;;  %v13988_v42 = vunpack.i.h.bf16 %v19196_v15  ;;  %v13987_v6 = vunpack.i.l.bf16 %v19196_v15  ;;  %v14003_v15 = vunpack.i.h.bf16 %v14001_v2 }
0x1db9   : > { %7632 = vrot.lane.b32.xlu0 %v18257_v21, %s20713_s27  ;;  %7634 = vrot.lane.b32.xlu1 %v18255_v38, %s20713_s27  ;;  %v13993_v38 = vunpack.i.h.bf16 %v19194_v54  ;;  %v13992_v21 = vunpack.i.l.bf16 %v19194_v54 }
0x1dbd   : > { %7636 = vrot.lane.b32.xlu0 %v18267_v56, %s20713_s27  ;;  %7638 = vrot.lane.b32.xlu1 %v18265_v34, %s20713_s27  ;;  %v13044_v34 = vpack.c.bf16 %v13993_v38, %v13992_v21  ;;  %v13998_v56 = vunpack.i.h.bf16 %v13996_v40 }
0x1dc1   : > { %7640 = vrot.lane.b32.xlu0 %v18277_v44, %s20713_s27  ;;  %7642 = vrot.lane.b32.xlu1 %v18275_v36, %s20713_s27  ;;  %v13997_v36 = vunpack.i.l.bf16 %v13996_v40  ;;  %s10459_s27 = sshll.u32 %s20457_s28, 7  ;;  %s15408_s28 = smov [#allocation29]  }
0x1dc2   : > { %s20235_s1 = scalar_lea.hbm %s20781_s26, %s10459_s27 }
0x1dc3   : > { %v13050_v44 = vpack.c.bf16 %v13998_v56, %v13997_v36 }
0x1dc5   : > { %14015 = vrot.lane.b32.xlu0 %v18211_v53, %s20714_s2  ;;  %14020 = vrot.lane.b32.xlu1 %v18221_v63, %s20714_s2  ;;  %v13982_v63 = vunpack.i.l.bf16 %v19192_v41 }
0x1dc9   : > { %14025 = vrot.lane.b32.xlu0 %v18231_v24, %s20714_s2  ;;  %14030 = vrot.lane.b32.xlu1 %v18241_v50, %s20714_s2  ;;  %v13032_v50 = vpack.c.bf16 %v13983_v31, %v13982_v63 }
0x1dcd   : > { %14035 = vrot.lane.b32.xlu0 %v18251_v58, %s20714_s2  ;;  %v13038_v58 = vpack.c.bf16 %v13988_v42, %v13987_v6 }
0x1dcf   : > { %v7358_v60 = vpop.xlane.xlu0 %7357 }
0x1dd0   : > { %14584 = vrcp.f32 %v7358_v60  ;;  %v7356_v22 = vpop.xlane.xlu1 %7355 }
0x1dd1   : > { %14586 = vrcp.f32 %v7356_v22 }
0x1dd3   : > { %v14006_v54 = vpop.permute.xlu0 %14005 }
0x1dd4   : > { %v14008_v55 = vunpack.i.h.bf16 %v14006_v54  ;;  %v14007_v52 = vunpack.i.l.bf16 %v14006_v54 }
0x1dd6   : > { %v13062_v28 = vpack.c.bf16 %v14008_v55, %v14007_v52 }
0x1dda   : > { %v14585_v30 = vpop.eup %14584 }
0x1ddb   : > { %v14587_v53 = vpop.eup %14586  ;;  %v7404_v0 = vmul.f32 %v14585_v30, %v19202_v57  ;;  %v14002_v57 = vunpack.i.l.bf16 %v14001_v2 }
0x1ddc   : > { %v7403_v24 = vmul.f32 %v14587_v53, %v19204_v45 }
0x1ddd   : > { %v13056_v41 = vpack.c.bf16 %v14003_v15, %v14002_v57 }
0x1dde   : > { %12124 = vmatprep.mubr.f32.mxu1 %v7403_v24 }
0x1ddf   : > { %12125 = vmatmul.mubr.f32.vlgmr.msra.gmra.mrb[148].mxu1 %v7404_v0 }
0x1de0   : > { %13031 = vmatpush3.bf16.xpose.msk.msra.mxu1 %vm16187_vm2, %v19007_v25  ;;  %v7362_v25 = vpop.xlane.xlu1 %7361 }
0x1de1   : > { %13034 = vmatprep.subr.msk.bf16.mxu1 %vm16187_vm2, %v13032_v50  ;;  %14588 = vrcp.f32 %v7362_v25 }
0x1de4   : > { %v7370_v33 = vpop.xlane.xlu1 %7369 }
0x1de8   : > { %13037 = vmatpush3.bf16.xpose.msk.msra.mxu1 %vm16187_vm2, %v13032_v50  ;;  %v7368_v45 = vpop.xlane.xlu1 %7367 }
0x1de9   : > { %13040 = vmatprep.subr.msk.bf16.mxu1 %vm16187_vm2, %v13038_v58 }
0x1deb   : > { %v14589_v20 = vpop.eup %14588 }
0x1dec   : > { %v7374_v47 = vpop.xlane.xlu1 %7373  ;;  %v7406_v35 = vmul.f32 %v14589_v20, %v19210_v48 }
0x1df0   : > { %13043 = vmatpush3.bf16.xpose.msk.msra.mxu1 %vm16187_vm2, %v13038_v58  ;;  %v7372_v1 = vpop.xlane.xlu1 %7371 }
0x1df1   : > { %13046 = vmatprep.subr.msk.bf16.mxu1 %vm16187_vm2, %v13044_v34 }
0x1df4   : > { %v7378_v40 = vpop.xlane.xlu1 %7377 }
0x1df8   : > { %13049 = vmatpush3.bf16.xpose.msk.msra.mxu1 %vm16187_vm2, %v13044_v34  ;;  %v7615_v24 = vpop.permute.xlu1 %7614 }
0x1df9   : > { %13052 = vmatprep.subr.msk.bf16.mxu1 %vm16187_vm2, %v13050_v44 }
0x1e00   : > { %13055 = vmatpush3.bf16.xpose.msk.msra.mxu1 %vm16187_vm2, %v13050_v44 }
0x1e01   : > { %13058 = vmatprep.subr.msk.bf16.mxu1 %vm16187_vm2, %v13056_v41 }
0x1e04   : > { %v7360_v14 = vpop.xlane.xlu0 %7359 }
0x1e05   : > { %14590 = vrcp.f32 %v7360_v14 }
0x1e06   : > { %14592 = vrcp.f32 %v7368_v45 }
0x1e08   : > { %13061 = vmatpush3.bf16.xpose.msk.msra.mxu1 %vm16187_vm2, %v13056_v41  ;;  %v7366_v23 = vpop.xlane.xlu0 %7365 }
0x1e09   : > { %13064 = vmatprep.subr.msk.bf16.mxu1 %vm16187_vm2, %v13062_v28  ;;  %14594 = vrcp.f32 %v7366_v23 }
0x1e0c   : > { %v7364_v59 = vpop.xlane.xlu0 %7363 }
0x1e0d   : > { %14596 = vrcp.f32 %v7364_v59 }
0x1e0e   : > { %14598 = vrcp.f32 %v7370_v33 }
0x1e0f   : > { %v14591_v61 = vpop.eup %14590  ;;  %14600 = vrcp.f32 %v7372_v1 }
0x1e10   : > { %13067 = vmatpush3.bf16.xpose.msk.msra.mxu1 %vm16187_vm2, %v13062_v28  ;;  %v7376_v62 = vpop.xlane.xlu0 %7375  ;;  %v7405_v32 = vmul.f32 %v14591_v61, %v19239_v12  ;;  %14602 = vrcp.f32 %v7374_v47  ;;  %v14593_v46 = vpop.eup %14592 }
0x1e11   : > { %14604 = vrcp.f32 %v7376_v62  ;;  %v7409_v48 = vmul.f32 %v14593_v46, %v19218_v26 }
0x1e12   : > { %12127 = vmatprep.mubr.f32.mxu1 %v7405_v32  ;;  %14606 = vrcp.f32 %v7378_v40 }
0x1e13   : > { %12128 = vmatmul.mubr.f32.gmra.mrb[150].mxu1 %v7406_v35  ;;  %v14595_v2 = vpop.eup %14594 }
0x1e14   : > { %v7382_v4 = vpop.xlane.xlu0 %7381  ;;  %v7408_v53 = vmul.f32 %v14595_v2, %v19243_v49 }
0x1e17   : > { %v14597_v60 = vpop.eup %14596 }
0x1e18   : > { %v7380_v22 = vpop.xlane.xlu0 %7379  ;;  %v7407_v30 = vmul.f32 %v14597_v60, %v19246_v3  ;;  %v14599_v12 = vpop.eup %14598 }
0x1e19   : > { %14608 = vrcp.f32 %v7380_v22  ;;  %v14601_v31 = vpop.eup %14600  ;;  %v7410_v42 = vmul.f32 %v14599_v12, %v19215_v51 }
0x1e1a   : > { %12130 = vmatprep.mubr.f32.mxu1 %v7407_v30  ;;  %14610 = vrcp.f32 %v7382_v4  ;;  %v14603_v6 = vpop.eup %14602  ;;  %v7411_v3 = vmul.f32 %v14601_v31, %v19226_v37 }
0x1e1b   : > { %12131 = vmatmul.mubr.f32.gmra.mrb[152].mxu1 %v7408_v53  ;;  %v14605_v58 = vpop.eup %14604  ;;  %v7412_v26 = vmul.f32 %v14603_v6, %v19221_v27 }
0x1e1c   : > { %12133 = vmatprep.mubr.f32.mxu1 %v7409_v48  ;;  %v14011_v63 = vpop.permute.xlu0 %14010  ;;  %v14607_v34 = vpop.eup %14606  ;;  %v7413_v51 = vmul.f32 %v14605_v58, %v19250_v9 }
0x1e1d   : > { %v14013_v0 = vunpack.i.h.bf16 %v14011_v63  ;;  %v14012_v50 = vunpack.i.l.bf16 %v14011_v63  ;;  %v7414_v44 = vmul.f32 %v14607_v34, %v19229_v39 }
0x1e1f   : > { %v13068_v38 = vpack.c.bf16 %v14013_v0, %v14012_v50  ;;  %12134 = vmatmul.mubr.f32.gmra.mrb[154].mxu1 %v7410_v42 }
0x1e20   : > { %12136 = vmatprep.mubr.f32.mxu1 %v7411_v3  ;;  %v7613_v49 = vpop.permute.xlu0 %7612 }
0x1e21   : > { %v7386_v21 = vpop.xlane.xlu1 %7385  ;;  %13070 = vmatprep.subr.msk.bf16.mxu1 %vm16187_vm2, %v13068_v38 }
0x1e22   : > { %13073 = vmatpush3.bf16.xpose.msk.msra.mxu1 %vm16187_vm2, %v13068_v38  ;;  %14612 = vrcp.f32 %v7386_v21 }
0x1e23   : > { %v14609_v56 = vpop.eup %14608  ;;  %12137 = vmatmul.mubr.f32.gmra.mrb[156].mxu1 %v7412_v26 }
0x1e24   : > { %12139 = vmatprep.mubr.f32.mxu1 %v7413_v51  ;;  %v7617_v37 = vpop.permute.xlu0 %7616  ;;  %v14611_v25 = vpop.eup %14610  ;;  %v7415_v15 = vmul.f32 %v14609_v56, %v19257_v17 }
0x1e25   : > { %v7384_v36 = vpop.xlane.xlu1 %7383  ;;  %v7416_v8 = vmul.f32 %v14611_v25, %v19254_v16 }
0x1e26   : > { %14614 = vrcp.f32 %v7384_v36 }
0x1e27   : > { %12140 = vmatmul.mubr.f32.gmra.mrb[158].mxu1 %v7414_v44 }
0x1e28   : > { %12142 = vmatprep.mubr.f32.mxu1 %v7415_v15  ;;  %v7621_v27 = vpop.permute.xlu0 %7620 }
0x1e29   : > { %v7619_v57 = vpop.permute.xlu1 %7618 }
0x1e2b   : > { %12143 = vmatmul.mubr.f32.gmra.mrb[160].mxu1 %v7416_v8 }
0x1e2c   : > { %v7625_v9 = vpop.permute.xlu0 %7624  ;;  %v14613_v41 = vpop.eup %14612 }
0x1e2d   : > { %v7623_v33 = vpop.permute.xlu1 %7622  ;;  %v7418_v39 = vmul.f32 %v14613_v41, %v19260_v7 }
0x1e30   : > { %v14615_v54 = vpop.eup %14614  ;;  %v7629_v45 = vpop.permute.xlu0 %7628 }
0x1e31   : > { %v7627_v55 = vpop.permute.xlu1 %7626  ;;  %v7417_v52 = vmul.f32 %v14615_v54, %v19263_v5 }
0x1e33   : > { %12145 = vmatprep.mubr.f32.mxu1 %v7417_v52 }
0x1e34   : > { %12146 = vmatmul.mubr.f32.gmra.mrb[162].mxu1 %v7418_v39  ;;  %v7633_v17 = vpop.permute.xlu0 %7632 }
0x1e35   : > { %v7631_v14 = vpop.permute.xlu1 %7630  ;;  %12180 = vmatprep.mubr.msk.f32.mxu1 %vm1433_vm1, %v7613_v49 }
0x1e38   : > { %v7637_v28 = vpop.permute.xlu0 %7636  ;;  %12181 = vmatmul.mubr.msk.f32.vlgmr.msra.gmra.mrb[164].mxu1 %vm1433_vm1, %v7615_v24 }
0x1e39   : > { %v7635_v16 = vpop.permute.xlu1 %7634  ;;  %12183 = vmatprep.mubr.msk.f32.mxu1 %vm1433_vm1, %v7617_v37 }
0x1e3c   : > { %v7641_v47 = vpop.permute.xlu0 %7640  ;;  %12184 = vmatmul.mubr.msk.f32.gmra.mrb[166].mxu1 %vm1433_vm1, %v7619_v57 }
0x1e3d   : > { %v7639_v23 = vpop.permute.xlu1 %7638  ;;  %12186 = vmatprep.mubr.msk.f32.mxu1 %vm1433_vm1, %v7621_v27 }
0x1e40   : > { %v14016_v5 = vpop.permute.xlu0 %14015  ;;  %12187 = vmatmul.mubr.msk.f32.gmra.mrb[168].mxu1 %vm1433_vm1, %v7623_v33 }
0x1e41   : > { %v14018_v7 = vunpack.i.h.bf16 %v14016_v5  ;;  %v14017_v59 = vunpack.i.l.bf16 %v14016_v5  ;;  %v7643_v20 = vpop.permute.xlu1 %7642  ;;  %12189 = vmatprep.mubr.msk.f32.mxu1 %vm1433_vm1, %v7625_v9 }
0x1e43   : > { %v13074_v1 = vpack.c.bf16 %v14018_v7, %v14017_v59 }
0x1e44   : > { %v14026_v61 = vpop.permute.xlu0 %14025  ;;  %12190 = vmatmul.mubr.msk.f32.gmra.mrb[170].mxu1 %vm1433_vm1, %v7627_v55 }
0x1e45   : > { %v14021_v62 = vpop.permute.xlu1 %14020  ;;  %12192 = vmatprep.mubr.msk.f32.mxu1 %vm1433_vm1, %v7629_v45  ;;  %13075 = vmatprep.subr.bf16.mxu0 %v13074_v1  ;;  %v14028_v32 = vunpack.i.h.bf16 %v14026_v61  ;;  %v14027_v35 = vunpack.i.l.bf16 %v14026_v61  ;;  %v20718_v61 = vld [vmem:[#allocation74_spill] sm:$0xff] }
0x1e46   : > { %v14023_v4 = vunpack.i.h.bf16 %v14021_v62  ;;  %v14022_v46 = vunpack.i.l.bf16 %v14021_v62  ;;  %13077 = vmatpush3.bf16.msra.mxu0 %v13074_v1 }
0x1e47   : > { %v13082_v30 = vpack.c.bf16 %v14028_v32, %v14027_v35 }
0x1e48   : > { %12193 = vmatmul.mubr.msk.f32.gmra.mrb[172].mxu1 %vm1433_vm1, %v7631_v14  ;;  %v13078_v40 = vpack.c.bf16 %v14023_v4, %v14022_v46  ;;  %v14036_v53 = vpop.permute.xlu0 %14035 }
0x1e49   : > { %v14031_v2 = vpop.permute.xlu1 %14030  ;;  %12195 = vmatprep.mubr.msk.f32.mxu1 %vm1433_vm1, %v7633_v17  ;;  %v14038_v12 = vunpack.i.h.bf16 %v14036_v53  ;;  %v14037_v48 = vunpack.i.l.bf16 %v14036_v53 }
0x1e4a   : > { %v14033_v60 = vunpack.i.h.bf16 %v14031_v2  ;;  %v14032_v22 = vunpack.i.l.bf16 %v14031_v2  ;;  %13079 = vmatprep.subr.bf16.mxu0 %v13078_v40 }
0x1e4b   : > { %13081 = vmatpush3.bf16.msra.mxu0 %v13078_v40  ;;  %v13090_v63 = vpack.c.bf16 %v14038_v12, %v14037_v48  ;;  %v20719_v40 = vld [vmem:[#allocation91_spill] sm:$0xff] }
0x1e4c   : > { %12196 = vmatmul.mubr.msk.f32.gmra.mrb[174].mxu1 %vm1433_vm1, %v7635_v16  ;;  %13083 = vmatprep.subr.bf16.mxu0 %v13082_v30  ;;  %v13086_v31 = vpack.c.bf16 %v14033_v60, %v14032_v22  ;;  %v20720_v60 = vld [vmem:[#allocation76_spill] sm:$0xff] }
0x1e4d   : > { %12198 = vmatprep.mubr.msk.f32.mxu1 %vm1433_vm1, %v7637_v28 }
0x1e4f   : > { %13085 = vmatpush3.bf16.msra.mxu0 %v13082_v30 }
0x1e50   : > { %12199 = vmatmul.mubr.msk.f32.gmra.mrb[176].mxu1 %vm1433_vm1, %v7639_v23  ;;  %13087 = vmatprep.subr.bf16.mxu0 %v13086_v31  ;;  %v20716_v23 = vld [vmem:[#allocation72_spill] sm:$0xff] }
0x1e51   : > { %12201 = vmatprep.mubr.msk.f32.mxu1 %vm1433_vm1, %v7641_v47 }
0x1e53   : > { %13089 = vmatpush3.bf16.msra.mxu0 %v13086_v31  ;;  %v20721_v31 = vld [vmem:[#allocation104_spill] sm:$0xff] }
0x1e54   : > { %12202 = vmatmul.mubr.msk.f32.gmra.mrb[178].mxu1 %vm1433_vm1, %v7643_v20  ;;  %13091 = vmatprep.subr.bf16.mxu0 %v13090_v63  ;;  %v20717_v20 = vld [vmem:[#allocation73_spill] sm:$0xff] }
0x1e57   : > { %13093 = vmatpush3.bf16.msra.mxu0 %v13090_v63 }
0x1eb2   : > { %v19377_v24 = vpop.f32.mrb[148].mxu1 }
0x1eb3   : > { %v19379_v0 = vpop.f32.mrb[149].mxu1 }
0x1ee6   : > { %v19381_v50 = vpop.f32.mrb[150].mxu1 }
0x1ee7   : > { %v19383_v42 = vpop.f32.mrb[151].mxu1 }
0x1eee   : > { %v19385_v6 = vpop.f32.mrb[152].mxu1 }
0x1eef   : > { %v19387_v3 = vpop.f32.mrb[153].mxu1 }
0x1ef2   : > { %v19389_v58 = vpop.f32.mrb[154].mxu1 }
0x1ef3   : > { %v19391_v38 = vpop.f32.mrb[155].mxu1 }
0x1ef6   : > { %v19393_v49 = vpop.f32.mrb[156].mxu1 }
0x1ef7   : > { %v19395_v21 = vpop.f32.mrb[157].mxu1 }
0x1efa   : > { %v19397_v26 = vpop.f32.mrb[158].mxu1 }
0x1efb   : > { %v19399_v34 = vpop.f32.mrb[159].mxu1 }
0x1efe   : > { %v19401_v51 = vpop.f32.mrb[160].mxu1 }
0x1eff   : > { %v19403_v56 = vpop.f32.mrb[161].mxu1 }
0x1f07   : > { %v19405_v37 = vpop.f32.mrb[162].mxu1 }
0x1f08   : > { %v19407_v36 = vpop.f32.mrb[163].mxu1 }
0x1f0b   : > { %v12182_v44 = vpop.f32.mrb[164].mxu1 }
0x1f0c   : > { %v7886_v25 = vmul.f32 0.35355338, %v12182_v44  ;;  %v7806_v15 = vpop.f32.mrb[165].mxu1  ;;  %v20722_v44 = vld [vmem:[#allocation105_spill] sm:$0xff] }
0x1f0d   : > { %v7885_v27 = vmul.f32 0.35355338, %v7806_v15 }
0x1f0e   : > { %v19410_v57 = vadd.f32 %v19047_v43, %v7886_v25 }
0x1f0f   : > { %v19413_v8 = vadd.f32 %v19055_v19, %v7885_v27  ;;  %v12185_v9 = vpop.f32.mrb[166].mxu1 }
0x1f10   : > { %v7888_v33 = vmul.f32 0.35355338, %v12185_v9  ;;  %7919 = vmax.xlane.f32.xlu1 %v19410_v57  ;;  %v7816_v41 = vpop.f32.mrb[167].mxu1 }
0x1f11   : > { %7917 = vmax.xlane.f32.xlu0 %v19413_v8  ;;  %v7887_v45 = vmul.f32 0.35355338, %v7816_v41  ;;  %v20723_v41 = vld [vmem:[#allocation106_spill] sm:$0xff] }
0x1f12   : > { %v19418_v54 = vadd.f32 %v19065_v29, %v7888_v33  ;;  %v20715_v29 = vld [vmem:[#allocation71_spill] sm:$0xff] }
0x1f13   : > { %v12188_v55 = vpop.f32.mrb[168].mxu1  ;;  %v19425_v19 = vadd.f32 %v19082_v10, %v7887_v45 }
0x1f14   : > { %v7890_v52 = vmul.f32 0.35355338, %v12188_v55  ;;  %v7826_v39 = vpop.f32.mrb[169].mxu1  ;;  %v20724_v55 = vld [vmem:[#allocation107_spill] sm:$0xff] }
0x1f15   : > { %7923 = vmax.xlane.f32.xlu0 %v19418_v54  ;;  %v7889_v17 = vmul.f32 0.35355338, %v7826_v39 }
0x1f16   : > { %v19422_v43 = vadd.f32 %v19074_v11, %v7890_v52 }
0x1f17   : > { %v12191_v14 = vpop.f32.mrb[170].mxu1  ;;  %v19433_v5 = vadd.f32 %v20716_v23, %v7889_v17  ;;  %v20725_v17 = vld [vmem:[#allocation108_spill] sm:$0xff] }
0x1f18   : > { %v7892_v28 = vmul.f32 0.35355338, %v12191_v14  ;;  %7927 = vmax.xlane.f32.xlu1 %v19422_v43  ;;  %v7836_v16 = vpop.f32.mrb[171].mxu1 }
0x1f19   : > { %7921 = vmax.xlane.f32.xlu0 %v19425_v19  ;;  %v7891_v7 = vmul.f32 0.35355338, %v7836_v16 }
0x1f1a   : > { %v19430_v47 = vadd.f32 %v20715_v29, %v7892_v28  ;;  %v20726_v28 = vld [vmem:[#allocation61_spill] sm:$0xff] }
0x1f1b   : > { %v12194_v11 = vpop.f32.mrb[172].mxu1  ;;  %v19441_v62 = vadd.f32 %v20718_v61, %v7891_v7 }
0x1f1c   : > { %v7894_v59 = vmul.f32 0.35355338, %v12194_v11  ;;  %7931 = vmax.xlane.f32.xlu1 %v19430_v47  ;;  %v7846_v10 = vpop.f32.mrb[173].mxu1 }
0x1f1d   : > { %7925 = vmax.xlane.f32.xlu0 %v19433_v5  ;;  %v7893_v32 = vmul.f32 0.35355338, %v7846_v10 }
0x1f1e   : > { %v19438_v1 = vadd.f32 %v20717_v20, %v7894_v59 }
0x1f1f   : > { %v12197_v35 = vpop.f32.mrb[174].mxu1  ;;  %v19449_v22 = vadd.f32 %v20720_v60, %v7893_v32 }
0x1f20   : > { %v7896_v4 = vmul.f32 0.35355338, %v12197_v35  ;;  %7935 = vmax.xlane.f32.xlu1 %v19438_v1  ;;  %v7856_v46 = vpop.f32.mrb[175].mxu1 }
0x1f21   : > { %7929 = vmax.xlane.f32.xlu0 %v19441_v62  ;;  %v7895_v30 = vmul.f32 0.35355338, %v7856_v46 }
0x1f22   : > { %v19446_v2 = vadd.f32 %v20719_v40, %v7896_v4 }
0x1f23   : > { %v12200_v53 = vpop.f32.mrb[176].mxu1  ;;  %v19457_v25 = vadd.f32 %v20722_v44, %v7895_v30 }
0x1f24   : > { %v7898_v12 = vmul.f32 0.35355338, %v12200_v53  ;;  %7939 = vmax.xlane.f32.xlu1 %v19446_v2  ;;  %v7866_v48 = vpop.f32.mrb[177].mxu1 }
0x1f25   : > { %7933 = vmax.xlane.f32.xlu0 %v19449_v22  ;;  %v7897_v15 = vmul.f32 0.35355338, %v7866_v48 }
0x1f26   : > { %v19454_v63 = vadd.f32 %v20721_v31, %v7898_v12 }
0x1f27   : > { %v12203_v27 = vpop.f32.mrb[178].mxu1  ;;  %v19465_v52 = vadd.f32 %v20724_v55, %v7897_v15 }
0x1f28   : > { %v7900_v9 = vmul.f32 0.35355338, %v12203_v27  ;;  %7943 = vmax.xlane.f32.xlu1 %v19454_v63  ;;  %v7876_v33 = vpop.f32.mrb[179].mxu1 }
0x1f29   : > { %7937 = vmax.xlane.f32.xlu0 %v19457_v25  ;;  %v7899_v39 = vmul.f32 0.35355338, %v7876_v33 }
0x1f2a   : > { %v19462_v45 = vadd.f32 %v20723_v41, %v7900_v9 }
0x1f2b   : > { %v19470_v14 = vadd.f32 %v20725_v17, %v7899_v39 }
0x1f2c   : > { %7947 = vmax.xlane.f32.xlu1 %v19462_v45 }
0x1f2d   : > { %7941 = vmax.xlane.f32.xlu0 %v19465_v52 }
0x1f31   : > { %7945 = vmax.xlane.f32.xlu0 %v19470_v14 }
0x1f3d   : > { %14040 = vrot.lane.b32.xlu1 %v20726_v28, %s20714_s2 }
0x1f47   : > { %14045 = vrot.lane.b32.xlu0 %v18271_v13, %s20714_s2 }
0x1f9d   : > { %v7920_v16 = vpop.xlane.xlu1 %7919 }
0x1f9e   : > { %v7950_v29 = vsub.f32 %v19410_v57, %v7920_v16  ;;  %v7918_v23 = vpop.xlane.xlu0 %7917 }
0x1f9f   : > { %v7949_v7 = vsub.f32 %v19413_v8, %v7918_v23 }
0x1fa0   : > { %v7967_v11 = vmul.f32 1.442695, %v7950_v29 }
0x1fa1   : > { %v7965_v59 = vmul.f32 1.442695, %v7949_v7 }
0x1fa2   : > { %14616 = vpow2.f32 %v7967_v11  ;;  %v7924_v10 = vpop.xlane.xlu0 %7923 }
0x1fa3   : > { %14618 = vpow2.f32 %v7965_v59  ;;  %v7952_v20 = vsub.f32 %v19418_v54, %v7924_v10 }
0x1fa5   : > { %v7971_v61 = vmul.f32 1.442695, %v7952_v20  ;;  %v7928_v32 = vpop.xlane.xlu1 %7927 }
0x1fa6   : > { %v7954_v35 = vsub.f32 %v19422_v43, %v7928_v32  ;;  %v7922_v4 = vpop.xlane.xlu0 %7921 }
0x1fa7   : > { %14620 = vpow2.f32 %v7971_v61  ;;  %v7951_v13 = vsub.f32 %v19425_v19, %v7922_v4 }
0x1fa8   : > { %v7975_v40 = vmul.f32 1.442695, %v7954_v35 }
0x1fa9   : > { %v7969_v46 = vmul.f32 1.442695, %v7951_v13  ;;  %v7932_v57 = vpop.xlane.xlu1 %7931 }
0x1faa   : > { %v7926_v60 = vpop.xlane.xlu0 %7925  ;;  %v7956_v8 = vsub.f32 %v19430_v47, %v7932_v57 }
0x1fab   : > { %14622 = vpow2.f32 %v7969_v46  ;;  %v7953_v30 = vsub.f32 %v19433_v5, %v7926_v60 }
0x1fac   : > { %v19484_v53 = vpop.eup %14616  ;;  %14624 = vpow2.f32 %v7975_v40  ;;  %v7979_v19 = vmul.f32 1.442695, %v7956_v8 }
0x1fad   : > { %v19486_v54 = vpop.eup %14618  ;;  %v7973_v12 = vmul.f32 1.442695, %v7953_v30  ;;  %v7936_v48 = vpop.xlane.xlu1 %7935  ;;  %7999 = vadd.xlane.f32.xlu0 %v19484_v53 }
0x1fae   : > { %v7930_v43 = vpop.xlane.xlu0 %7929  ;;  %7997 = vadd.xlane.f32.xlu1 %v19486_v54  ;;  %v7958_v27 = vsub.f32 %v19438_v1, %v7936_v48 }
0x1faf   : > { %14626 = vpow2.f32 %v7973_v12  ;;  %v7955_v31 = vsub.f32 %v19441_v62, %v7930_v43 }
0x1fb0   : > { %14628 = vpow2.f32 %v7979_v19  ;;  %v7983_v62 = vmul.f32 1.442695, %v7958_v27 }
0x1fb1   : > { %v19491_v44 = vpop.eup %14620  ;;  %v7940_v47 = vpop.xlane.xlu1 %7939  ;;  %v7977_v5 = vmul.f32 1.442695, %v7955_v31 }
0x1fb2   : > { %v7934_v15 = vpop.xlane.xlu0 %7933  ;;  %8003 = vadd.xlane.f32.xlu1 %v19491_v44  ;;  %v7960_v17 = vsub.f32 %v19446_v2, %v7940_v47 }
0x1fb3   : > { %v7957_v9 = vsub.f32 %v19449_v22, %v7934_v15  ;;  %14630 = vpow2.f32 %v7977_v5  ;;  %v20728_v5 = vld [vmem:[#allocation52_spill] sm:$0xff]  ;;  %v20729_v15 = vld [vmem:[#allocation49_spill] sm:$0xff] }
0x1fb4   : > { %v7987_v23 = vmul.f32 1.442695, %v7960_v17 }
0x1fb5   : > { %v19496_v33 = vpop.eup %14622  ;;  %v7981_v41 = vmul.f32 1.442695, %v7957_v9  ;;  %v7944_v55 = vpop.xlane.xlu1 %7943  ;;  %v20731_v9 = vld [vmem:[#allocation54_spill] sm:$0xff] }
0x1fb6   : > { %v7938_v39 = vpop.xlane.xlu0 %7937  ;;  %8001 = vadd.xlane.f32.xlu1 %v19496_v33  ;;  %v19500_v28 = vpop.eup %14624  ;;  %v7962_v31 = vsub.f32 %v19454_v63, %v7944_v55  ;;  %v20733_v63 = vld [vmem:[#allocation56_spill] sm:$0xff] }
0x1fb7   : > { %14632 = vpow2.f32 %v7981_v41  ;;  %v7959_v1 = vsub.f32 %v19457_v25, %v7938_v39  ;;  %v20736_v41 = vld [vmem:[#allocation53_spill] sm:$0xff] }
0x1fb8   : > { %14634 = vpow2.f32 %v7983_v62  ;;  %v7991_v47 = vmul.f32 1.442695, %v7962_v31 }
0x1fb9   : > { %v19502_v16 = vpop.eup %14626  ;;  %v7948_v29 = vpop.xlane.xlu1 %7947  ;;  %v7985_v59 = vmul.f32 1.442695, %v7959_v1  ;;  %14636 = vpow2.f32 %v7987_v23 }
0x1fba   : > { %v7942_v22 = vpop.xlane.xlu0 %7941  ;;  %8007 = vadd.xlane.f32.xlu1 %v19500_v28  ;;  %8005 = vadd.xlane.f32.xlu0 %v19502_v16  ;;  %v19507_v7 = vpop.eup %14628  ;;  %v7964_v8 = vsub.f32 %v19462_v45, %v7948_v29 }
0x1fbb   : > { %v7961_v61 = vsub.f32 %v19465_v52, %v7942_v22  ;;  %14638 = vpow2.f32 %v7985_v59 }
0x1fbd   : > { %v14041_v11 = vpop.permute.xlu1 %14040  ;;  %v19511_v25 = vpop.eup %14630  ;;  %v7989_v13 = vmul.f32 1.442695, %v7961_v61 }
0x1fbe   : > { %v14043_v2 = vunpack.i.h.bf16 %v14041_v11  ;;  %v14042_v10 = vunpack.i.l.bf16 %v14041_v11  ;;  %8011 = vadd.xlane.f32.xlu1 %v19507_v7  ;;  %v7946_v20 = vpop.xlane.xlu0 %7945 }
0x1fbf   : > { %v7963_v46 = vsub.f32 %v19470_v14, %v7946_v20  ;;  %14640 = vpow2.f32 %v7989_v13  ;;  %v7995_v14 = vmul.f32 1.442695, %v7964_v8 }
0x1fc0   : > { %v13094_v32 = vpack.c.bf16 %v14043_v2, %v14042_v10 }
0x1fc1   : > { %v19513_v35 = vpop.eup %14632  ;;  %v7993_v30 = vmul.f32 1.442695, %v7963_v46 }
0x1fc2   : > { %8009 = vadd.xlane.f32.xlu1 %v19511_v25  ;;  %13095 = vmatprep.subr.bf16.mxu0 %v13094_v32  ;;  %v14046_v4 = vpop.permute.xlu0 %14045  ;;  %v19518_v60 = vpop.eup %14634 }
0x1fc3   : > { %8013 = vadd.xlane.f32.xlu0 %v19513_v35  ;;  %v14048_v57 = vunpack.i.h.bf16 %v14046_v4  ;;  %v14047_v40 = vunpack.i.l.bf16 %v14046_v4  ;;  %13097 = vmatpush3.bf16.msra.mxu0 %v13094_v32  ;;  %v19522_v12 = vpop.eup %14636  ;;  %14642 = vpow2.f32 %v7993_v30 }
0x1fc4   : > { %14644 = vpow2.f32 %v7995_v14 }
0x1fc5   : > { %v13098_v52 = vpack.c.bf16 %v14048_v57, %v14047_v40  ;;  %v19525_v48 = vpop.eup %14638  ;;  %14646 = vpow2.f32 %v7991_v47 }
0x1fc6   : > { %8015 = vadd.xlane.f32.xlu1 %v19518_v60 }
0x1fc7   : > { %13099 = vmatprep.subr.bf16.mxu0 %v13098_v52 }
0x1fc8   : > { %13101 = vmatpush3.bf16.msra.mxu0 %v13098_v52 }
0x1fc9   : > { %v19528_v43 = vpop.eup %14640 }
0x1fca   : > { %8019 = vadd.xlane.f32.xlu1 %v19522_v12 }
0x1fcd   : > { %v19531_v45 = vpop.eup %14642 }
0x1fce   : > { %8017 = vadd.xlane.f32.xlu1 %v19525_v48  ;;  %v19534_v19 = vpop.eup %14644 }
0x1fcf   : > { %v19546_v27 = vpop.eup %14646 }
0x1fd2   : > { %8021 = vadd.xlane.f32.xlu1 %v19528_v43 }
0x1fd6   : > { %8025 = vadd.xlane.f32.xlu1 %v19531_v45 }
0x1fd9   : > { %14050 = vrot.lane.b32.xlu0 %v18283_v18, %s20714_s2  ;;  %v20732_v18 = vld [vmem:[#allocation51_spill] sm:$0xff]  ;;  %s875_s2 = scalar_lea.vmem [#allocation29], %s10032_s20  ;;  %s15275_s20 = sshll.u32 %s15408_s28, 4  ;;  %s15276_s20 = int_to_ptr.vmem [resolvable:$false] %s15275_s20 }
0x1fda   : > { %8027 = vadd.xlane.f32.xlu1 %v19534_v19  ;;  %s15277_s23 = scalar_lea.vmem %s15276_s20, 256 }
0x1feb   : > { %8270 = vrot.lane.b32.xlu1 %v20728_v5, %s20727_s3 }
0x1fef   : > { %8272 = vrot.lane.b32.xlu1 %v20729_v15, %s20727_s3 }
0x1ff3   : > { %8336 = vrot.lane.b32.xlu1 %v19377_v24, %s20730_s30  ;;  %v20734_v24 = vld [vmem:[#allocation63_spill] sm:$0xff] }
0x1ff7   : > { %8274 = vrot.lane.b32.xlu1 %v20731_v9, %s20727_s3 }
0x1ff8   : > { %8023 = vadd.xlane.f32.xlu0 %v19546_v27 }
0x1ffb   : > { %8276 = vrot.lane.b32.xlu1 %v20732_v18, %s20727_s3 }
0x1fff   : > { %8338 = vrot.lane.b32.xlu1 %v19383_v42, %s20730_s30  ;;  %v20735_v42 = vld [vmem:[#allocation65_spill] sm:$0xff] }
0x2003   : > { %8278 = vrot.lane.b32.xlu1 %v20733_v63, %s20727_s3 }
0x2007   : > { %8342 = vrot.lane.b32.xlu1 %v19387_v3, %s20730_s30  ;;  %v20738_v3 = vld [vmem:[#allocation55_spill] sm:$0xff] }
0x200b   : > { %8282 = vrot.lane.b32.xlu1 %v20734_v24, %s20727_s3 }
0x200e   : > { %8334 = vrot.lane.b32.xlu0 %v19379_v0, %s20730_s30  ;;  %v20737_v0 = vld [vmem:[#allocation67_spill] sm:$0xff] }
0x200f   : > { %8346 = vrot.lane.b32.xlu1 %v19391_v38, %s20730_s30  ;;  %v20740_v38 = vld [vmem:[#allocation62_spill] sm:$0xff] }
0x2012   : > { %8340 = vrot.lane.b32.xlu0 %v19381_v50, %s20730_s30  ;;  %v20739_v50 = vld [vmem:[#allocation69_spill] sm:$0xff] }
0x2013   : > { %8286 = vrot.lane.b32.xlu1 %v20735_v42, %s20727_s3 }
0x2016   : > { %8280 = vrot.lane.b32.xlu0 %v20736_v41, %s20727_s3 }
0x2017   : > { %8350 = vrot.lane.b32.xlu1 %v19395_v21, %s20730_s30  ;;  %v20742_v21 = vld [vmem:[#allocation64_spill] sm:$0xff] }
0x201a   : > { %8344 = vrot.lane.b32.xlu0 %v19385_v6, %s20730_s30  ;;  %v20741_v6 = vld [vmem:[#allocation70_spill] sm:$0xff] }
0x201b   : > { %8290 = vrot.lane.b32.xlu1 %v20737_v0, %s20727_s3 }
0x201e   : > { %8284 = vrot.lane.b32.xlu0 %v20738_v3, %s20727_s3 }
0x201f   : > { %8354 = vrot.lane.b32.xlu1 %v19399_v34, %s20730_s30 }
0x2022   : > { %8348 = vrot.lane.b32.xlu0 %v19389_v58, %s20730_s30  ;;  %v20743_v58 = vld [vmem:[#allocation66_spill] sm:$0xff] }
0x2023   : > { %8294 = vrot.lane.b32.xlu1 %v20739_v50, %s20727_s3 }
0x2026   : > { %8288 = vrot.lane.b32.xlu0 %v20740_v38, %s20727_s3 }
0x2027   : > { %8358 = vrot.lane.b32.xlu1 %v19403_v56, %s20730_s30 }
0x202a   : > { %8352 = vrot.lane.b32.xlu0 %v19393_v49, %s20730_s30  ;;  %v20744_v49 = vld [vmem:[#allocation68_spill] sm:$0xff] }
0x202b   : > { %8298 = vrot.lane.b32.xlu1 %v20741_v6, %s20727_s3  ;;  %v20747_v6 = vld [vmem:[#allocation80_spill] sm:$0xff] }
0x202e   : > { %8292 = vrot.lane.b32.xlu0 %v20742_v21, %s20727_s3 }
0x202f   : > { %8362 = vrot.lane.b32.xlu1 %v19407_v36, %s20730_s30 }
0x2032   : > { %8356 = vrot.lane.b32.xlu0 %v19397_v26, %s20730_s30 }
0x2036   : > { %8296 = vrot.lane.b32.xlu0 %v20743_v58, %s20727_s3 }
0x203a   : > { %8360 = vrot.lane.b32.xlu0 %v19401_v51, %s20730_s30  ;;  %v8000_v62 = vpop.xlane.xlu0 %7999 }
0x203b   : > { %v7998_v34 = vpop.xlane.xlu1 %7997 }
0x203c   : > { %14648 = vrcp.f32 %v7998_v34 }
0x203d   : > { %14650 = vrcp.f32 %v8000_v62 }
0x203e   : > { %8300 = vrot.lane.b32.xlu0 %v20744_v49, %s20727_s3  ;;  %s9771_s3 = sshll.u32 %s875_s2, 4  ;;  %s20237_s3 = int_to_ptr.vmem [resolvable:$true] %s9771_s3 }
0x203f   : > { %v8004_v56 = vpop.xlane.xlu1 %8003  ;;  %s15271_s21 = scalar_lea.vmem %s20237_s3, 128  ;;  %p15278_p4 = scmp.lt.s32.totalorder %s20237_s3, %s15276_s20 }
0x2040   : > { %p15272_p12 = scmp.ne.s32.totalorder %s20237_s3, %s15271_s21  ;;  %p15279_p7 = scmp.lt.s32.totalorder %s15277_s23, %s15271_s21 }
0x2042   : > { %8364 = vrot.lane.b32.xlu0 %v19405_v37, %s20730_s30  ;;  %p15273_p2 = pnand %p15272_p12, %p20783_p10  ;;  %p15280_p8 = por %p15279_p7, %p15278_p4 }
0x2043   : > { %v8002_v55 = vpop.xlane.xlu1 %8001 }
0x2044   : > { %14652 = vrcp.f32 %v8002_v55  ;;  %p15274_p3 = pneg %p15273_p2 }
0x2045   : > { %14654 = vrcp.f32 %v8004_v56 }
0x2046   : > { %v14649_v36 = vpop.eup %14648  ;;  %p15281_p11 = pnand %p15280_p8, %p15274_p3 }
0x2047   : > { %v8008_v39 = vpop.xlane.xlu1 %8007  ;;  %v8045_v26 = vmul.f32 %v14649_v36, %v19486_v54  ;;  %v8006_v29 = vpop.xlane.xlu0 %8005 }
0x2048   : > { %14656 = vrcp.f32 %v8006_v29  ;;  %v14651_v10 = vpop.eup %14650 }
0x2049   : > { %12236 = vmatprep.mubr.f32.mxu0 %v8045_v26  ;;  %14658 = vrcp.f32 %v8008_v39  ;;  %v8046_v20 = vmul.f32 %v14651_v10, %v19484_v53 }
0x204b   : > { %v8012_v17 = vpop.xlane.xlu1 %8011 }
0x204e   : > { %v14653_v54 = vpop.eup %14652 }
0x204f   : > { %v8010_v51 = vpop.xlane.xlu1 %8009  ;;  %v14655_v32 = vpop.eup %14654  ;;  %v8047_v4 = vmul.f32 %v14653_v54, %v19496_v33  ;;  %v8496_v54 = vld [vmem:[#allocation14 + $0x28] sm:$0xff] }
0x2050   : > { %v8014_v1 = vpop.xlane.xlu0 %8013  ;;  %14660 = vrcp.f32 %v8010_v51  ;;  %v8048_v57 = vmul.f32 %v14655_v32, %v19491_v44  ;;  %v8498_v32 = vld [vmem:[#allocation14 + $0x38] sm:$0xff] }
0x2051   : > { %14662 = vrcp.f32 %v8012_v17 }
0x2052   : > { %14664 = vrcp.f32 %v8014_v1  ;;  %v14657_v13 = vpop.eup %14656 }
0x2053   : > { %v8016_v22 = vpop.xlane.xlu1 %8015  ;;  %v14659_v40 = vpop.eup %14658  ;;  %v8049_v52 = vmul.f32 %v14657_v13, %v19502_v16 }
0x2054   : > { %v14051_v23 = vpop.permute.xlu0 %14050  ;;  %14666 = vrcp.f32 %v8016_v22  ;;  %v8050_v30 = vmul.f32 %v14659_v40, %v19500_v28  ;;  %v20745_v28 = vld [vmem:[#allocation78_spill] sm:$0xff] }
0x2055   : > { %v14053_v11 = vunpack.i.h.bf16 %v14051_v23  ;;  %v14052_v59 = vunpack.i.l.bf16 %v14051_v23 }
0x2057   : > { %v13102_v37 = vpack.c.bf16 %v14053_v11, %v14052_v59  ;;  %v8020_v2 = vpop.xlane.xlu1 %8019  ;;  %v20748_v11 = vld [vmem:[#allocation90_spill] sm:$0xff] }
0x2059   : > { %13103 = vmatprep.subr.bf16.mxu0 %v13102_v37 }
0x205a   : > { %13105 = vmatpush3.bf16.msra.mxu0 %v13102_v37  ;;  %v14661_v8 = vpop.eup %14660 }
0x205b   : > { %v8018_v61 = vpop.xlane.xlu1 %8017  ;;  %v14663_v33 = vpop.eup %14662  ;;  %v8051_v14 = vmul.f32 %v14661_v8, %v19511_v25 }
0x205c   : > { %14668 = vrcp.f32 %v8018_v61  ;;  %v14665_v31 = vpop.eup %14664  ;;  %v8052_v44 = vmul.f32 %v14663_v33, %v19507_v7  ;;  %v8497_v61 = vld [vmem:[#allocation14 + $0x30] sm:$0xff] }
0x205d   : > { %12237 = vmatmul.mubr.f32.vlgmr.msra.gmra.mrb[148].mxu0 %v8046_v20  ;;  %14670 = vrcp.f32 %v8020_v2  ;;  %v8053_v16 = vmul.f32 %v14665_v31, %v19513_v35  ;;  %v20746_v35 = vld [vmem:[#allocation75_spill] sm:$0xff]  ;;  %v20749_v2 = vld [vmem:[#allocation50_spill] sm:$0xff] }
0x205e   : > { %12239 = vmatprep.mubr.f32.mxu0 %v8047_v4  ;;  %v14667_v5 = vpop.eup %14666  ;;  %v13110_v4 = vpack.c.bf16 %v8498_v32, %v8497_v61 }
0x205f   : > { %v8022_v46 = vpop.xlane.xlu1 %8021  ;;  %v8054_v18 = vmul.f32 %v14667_v5, %v19518_v60 }
0x2060   : > { %14672 = vrcp.f32 %v8022_v46 }
0x2061   : > { %12240 = vmatmul.mubr.f32.gmra.mrb[150].mxu0 %v8048_v57 }
0x2062   : > { %12242 = vmatprep.mubr.f32.mxu0 %v8049_v52 }
0x2063   : > { %v8026_v53 = vpop.xlane.xlu1 %8025 }
0x2064   : > { %14674 = vrcp.f32 %v8026_v53 }
0x2065   : > { %12243 = vmatmul.mubr.f32.gmra.mrb[152].mxu0 %v8050_v30 }
0x2066   : > { %12245 = vmatprep.mubr.f32.mxu0 %v8051_v14  ;;  %v14669_v15 = vpop.eup %14668 }
0x2067   : > { %v8028_v47 = vpop.xlane.xlu1 %8027  ;;  %v14671_v63 = vpop.eup %14670  ;;  %v8055_v25 = vmul.f32 %v14669_v15, %v19525_v48 }
0x2068   : > { %v8056_v41 = vmul.f32 %v14671_v63, %v19522_v12 }
0x2069   : > { %12246 = vmatmul.mubr.f32.gmra.mrb[154].mxu0 %v8052_v44 }
0x206a   : > { %12248 = vmatprep.mubr.f32.mxu0 %v8053_v16  ;;  %v14673_v42 = vpop.eup %14672 }
0x206b   : > { %v8271_v9 = vpop.permute.xlu1 %8270  ;;  %v8057_v3 = vmul.f32 %v14673_v42, %v19528_v43 }
0x206c   : > { %v19619_v24 = vsel %vm1433_vm1, %v20745_v28, %v8271_v9 }
0x206d   : > { %12249 = vmatmul.mubr.f32.gmra.mrb[156].mxu0 %v8054_v18 }
0x206e   : > { %12251 = vmatprep.mubr.f32.mxu0 %v8055_v25  ;;  %v14675_v56 = vpop.eup %14674 }
0x206f   : > { %v8273_v7 = vpop.permute.xlu1 %8272  ;;  %v8059_v62 = vmul.f32 %v14675_v56, %v19531_v45 }
0x2070   : > { %v8447_v0 = vsel %vm1433_vm1, %v20746_v35, %v8273_v7 }
0x2071   : > { %12252 = vmatmul.mubr.f32.gmra.mrb[158].mxu0 %v8056_v41 }
0x2072   : > { %12254 = vmatprep.mubr.f32.mxu0 %v8057_v3 }
0x2073   : > { %v8337_v60 = vpop.permute.xlu1 %8336 }
0x2074   : > { %v19627_v50 = vsel %vm4146_vm3, %v8447_v0, %v8337_v60 }
0x2077   : > { %v8275_v38 = vpop.permute.xlu1 %8274 }
0x2078   : > { %v19631_v48 = vsel %vm1433_vm1, %v20747_v6, %v8275_v38 }
0x207b   : > { %v19633_v21 = vpop.permute.xlu1 %8276 }
0x207f   : > { %v19635_v58 = vpop.permute.xlu1 %8338 }
0x2083   : > { %v19637_v12 = vpop.permute.xlu1 %8278 }
0x2085   : > { %v8024_v34 = vpop.xlane.xlu0 %8023 }
0x2086   : > { %14676 = vrcp.f32 %v8024_v34 }
0x2087   : > { %v19639_v43 = vpop.permute.xlu1 %8342  ;;  %14678 = vrcp.f32 %v8028_v47 }
0x2089   : > { %v8335_v44 = vpop.permute.xlu0 %8334 }
0x208b   : > { %v19641_v49 = vpop.permute.xlu1 %8282 }
0x208d   : > { %v8341_v5 = vpop.permute.xlu0 %8340 }
0x208f   : > { %v19643_v55 = vpop.permute.xlu1 %8346 }
0x2090   : > { %v14677_v36 = vpop.eup %14676 }
0x2091   : > { %v8058_v39 = vmul.f32 %v14677_v36, %v19546_v27  ;;  %v14679_v26 = vpop.eup %14678  ;;  %v8281_v16 = vpop.permute.xlu0 %8280  ;;  %v8462_v36 = vsel %vm4146_vm3, %v19619_v24, %v8335_v44 }
0x2092   : > { %v8060_v29 = vmul.f32 %v14679_v26, %v19534_v19  ;;  %v8495_v19 = vld [vmem:[#allocation14 + $0x20] sm:$0xff] }
0x2093   : > { %12255 = vmatmul.mubr.f32.gmra.mrb[160].mxu0 %v8058_v39  ;;  %v19647_v17 = vpop.permute.xlu1 %8286  ;;  %v13106_v20 = vpack.c.bf16 %v8496_v54, %v8495_v19  ;;  %v20752_v19 = vld [vmem:[#allocation82_spill] sm:$0xff] }
0x2094   : > { %12257 = vmatprep.mubr.f32.mxu0 %v8059_v62  ;;  %v8450_v54 = vsel %vm1433_vm1, %v20752_v19, %v19637_v12  ;;  %v20754_v12 = vld [vmem:[#allocation84_spill] sm:$0xff]  ;;  %v20764_v19 = vld [vmem:[#allocation93_spill] sm:$0xff] }
0x2095   : > { %13107 = vmatprep.subr.bf16.mxu0 %v13106_v20  ;;  %v8345_v9 = vpop.permute.xlu0 %8344 }
0x2096   : > { %13109 = vmatpush3.bf16.msra.mxu0 %v13106_v20 }
0x2097   : > { %12258 = vmatmul.mubr.f32.gmra.mrb[162].mxu0 %v8060_v29  ;;  %v19650_v51 = vpop.permute.xlu1 %8350  ;;  %13111 = vmatprep.subr.bf16.mxu0 %v13110_v4 }
0x2099   : > { %v8285_v25 = vpop.permute.xlu0 %8284 }
0x209a   : > { %13113 = vmatpush3.bf16.msra.mxu0 %v13110_v4 }
0x209b   : > { %v19652_v1 = vpop.permute.xlu1 %8290 }
0x209d   : > { %v8349_v42 = vpop.permute.xlu0 %8348 }
0x209f   : > { %v19654_v22 = vpop.permute.xlu1 %8354 }
0x20a1   : > { %v8289_v7 = vpop.permute.xlu0 %8288 }
0x20a3   : > { %v8295_v23 = vpop.permute.xlu1 %8294 }
0x20a4   : > { %v8458_v27 = vsel %vm1433_vm1, %v20748_v11, %v8295_v23  ;;  %v20751_v23 = vld [vmem:[#allocation77_spill] sm:$0xff] }
0x20a5   : > { %v8353_v41 = vpop.permute.xlu0 %8352  ;;  %v8449_v11 = vsel %vm1433_vm1, %v20751_v23, %v19633_v21  ;;  %v8466_v21 = vsel %vm4146_vm3, %v8450_v54, %v19639_v43 }
0x20a7   : > { %v8359_v59 = vpop.permute.xlu1 %8358 }
0x20a8   : > { %v19659_v45 = vsel %vm4146_vm3, %v8458_v27, %v8359_v59  ;;  %v8464_v27 = vsel %vm4146_vm3, %v19631_v48, %v19635_v58  ;;  %v20753_v48 = vld [vmem:[#allocation79_spill] sm:$0xff] }
0x20a9   : > { %v8293_v35 = vpop.permute.xlu0 %8292  ;;  %v8451_v58 = vsel %vm1433_vm1, %v20753_v48, %v8281_v16 }
0x20aa   : > { %v8467_v32 = vsel %vm4146_vm3, %v8451_v58, %v8345_v9  ;;  %v20758_v9 = vld [vmem:[#allocation88_spill] sm:$0xff] }
0x20ab   : > { %v8299_v37 = vpop.permute.xlu1 %8298  ;;  %v20765_v58 = vld [vmem:[#allocation100_spill] sm:$0xff] }
0x20ac   : > { %v19663_v10 = vsel %vm1433_vm1, %v20749_v2, %v8299_v37  ;;  %v8465_v37 = vsel %vm4146_vm3, %v8449_v11, %v8341_v5 }
0x20ad   : > { %v8357_v0 = vpop.permute.xlu0 %8356 }
0x20af   : > { %v19687_v6 = vpop.permute.xlu1 %8362 }
0x20b1   : > { %v19681_v3 = vpop.permute.xlu0 %8296 }
0x20b5   : > { %v19683_v60 = vpop.permute.xlu0 %8360 }
0x20b9   : > { %v19685_v38 = vpop.permute.xlu0 %8300 }
0x20bd   : > { %v19689_v34 = vpop.permute.xlu0 %8364 }
0x2130   : > { %v12238_v13 = vpop.f32.mrb[148].mxu0 }
0x2131   : > { %8400 = vrot.lane.b32.xlu1 %v12238_v13, %s20750_s5  ;;  %v8175_v46 = vpop.f32.mrb[149].mxu0 }
0x2134   : > { %v12241_v57 = vpop.f32.mrb[150].mxu0 }
0x2135   : > { %8398 = vrot.lane.b32.xlu1 %v8175_v46, %s20750_s5  ;;  %8404 = vrot.lane.b32.xlu0 %v12241_v57, %s20750_s5  ;;  %v8185_v40 = vpop.f32.mrb[151].mxu0  ;;  %v8452_v46 = vsel %vm1433_vm1, %v20754_v12, %v19641_v49  ;;  %v20755_v57 = vld [vmem:[#allocation81_spill] sm:$0xff]  ;;  %v20756_v49 = vld [vmem:[#allocation86_spill] sm:$0xff] }
0x2136   : > { %v8468_v43 = vsel %vm4146_vm3, %v8452_v46, %v19643_v55  ;;  %v20766_v12 = vld [vmem:[#allocation94_spill] sm:$0xff] }
0x2138   : > { %v12244_v52 = vpop.f32.mrb[152].mxu0 }
0x2139   : > { %8402 = vrot.lane.b32.xlu1 %v8185_v40, %s20750_s5  ;;  %8408 = vrot.lane.b32.xlu0 %v12244_v52, %s20750_s5  ;;  %v8195_v8 = vpop.f32.mrb[153].mxu0  ;;  %v8453_v40 = vsel %vm1433_vm1, %v20755_v57, %v8285_v25 }
0x213c   : > { %v12247_v53 = vpop.f32.mrb[154].mxu0 }
0x213d   : > { %8406 = vrot.lane.b32.xlu1 %v8195_v8, %s20750_s5  ;;  %8412 = vrot.lane.b32.xlu0 %v12247_v53, %s20750_s5  ;;  %v8205_v30 = vpop.f32.mrb[155].mxu0  ;;  %v8469_v8 = vsel %vm4146_vm3, %v8453_v40, %v8349_v42  ;;  %v20767_v40 = vld [vmem:[#allocation95_spill] sm:$0xff] }
0x2140   : > { %v12250_v33 = vpop.f32.mrb[156].mxu0 }
0x2141   : > { %8410 = vrot.lane.b32.xlu1 %v8205_v30, %s20750_s5  ;;  %8416 = vrot.lane.b32.xlu0 %v12250_v33, %s20750_s5  ;;  %v8215_v14 = vpop.f32.mrb[157].mxu0 }
0x2144   : > { %v12253_v31 = vpop.f32.mrb[158].mxu0 }
0x2145   : > { %8414 = vrot.lane.b32.xlu1 %v8215_v14, %s20750_s5  ;;  %8420 = vrot.lane.b32.xlu0 %v12253_v31, %s20750_s5  ;;  %v8225_v47 = vpop.f32.mrb[159].mxu0  ;;  %v8454_v14 = vsel %vm1433_vm1, %v20756_v49, %v19647_v17  ;;  %v20757_v31 = vld [vmem:[#allocation83_spill] sm:$0xff]  ;;  %v8456_v17 = vsel %vm1433_vm1, %v20758_v9, %v19652_v1  ;;  %v20768_v49 = vld [vmem:[#allocation58_spill] sm:$0xff] }
0x2146   : > { %v8470_v55 = vsel %vm4146_vm3, %v8454_v14, %v19650_v51  ;;  %v8472_v51 = vsel %vm4146_vm3, %v8456_v17, %v19654_v22  ;;  %v20770_v17 = vld [vmem:[#allocation101_spill] sm:$0xff] }
0x2149   : > { %8418 = vrot.lane.b32.xlu1 %v8225_v47, %s20750_s5  ;;  %v8455_v47 = vsel %vm1433_vm1, %v20757_v31, %v8289_v7 }
0x214a   : > { %v8471_v5 = vsel %vm4146_vm3, %v8455_v47, %v8353_v41  ;;  %v20769_v47 = vld [vmem:[#allocation57_spill] sm:$0xff] }
0x2166   : > { %v12256_v15 = vpop.f32.mrb[160].mxu0 }
0x2167   : > { %8424 = vrot.lane.b32.xlu0 %v12256_v15, %s20750_s5  ;;  %v8235_v18 = vpop.f32.mrb[161].mxu0 }
0x2168   : > { %8422 = vrot.lane.b32.xlu1 %v8235_v18, %s20750_s5 }
0x216a   : > { %v12259_v63 = vpop.f32.mrb[162].mxu0 }
0x216b   : > { %8428 = vrot.lane.b32.xlu0 %v12259_v63, %s20750_s5  ;;  %v8245_v28 = vpop.f32.mrb[163].mxu0  ;;  %v20759_v63 = vld [vmem:[#allocation85_spill] sm:$0xff] }
0x216c   : > { %8426 = vrot.lane.b32.xlu1 %v8245_v28, %s20750_s5  ;;  %v8457_v28 = vsel %vm1433_vm1, %v20759_v63, %v8293_v35 }
0x216d   : > { %v8473_v42 = vsel %vm4146_vm3, %v8457_v28, %v8357_v0  ;;  %v20771_v28 = vld [vmem:[#allocation102_spill] sm:$0xff] }
0x21a3   : > { %v8401_v56 = vpop.permute.xlu1 %8400 }
0x21a4   : > { %v8479_v29 = vsel %vm4163_vm4, %v19627_v50, %v8401_v56  ;;  %v20760_v56 = vld [vmem:[#allocation87_spill] sm:$0xff] }
0x21a7   : > { %v8399_v39 = vpop.permute.xlu1 %8398  ;;  %v8405_v26 = vpop.permute.xlu0 %8404 }
0x21a8   : > { %v8478_v62 = vsel %vm4163_vm4, %v8462_v36, %v8399_v39  ;;  %v8481_v50 = vsel %vm4163_vm4, %v8465_v37, %v8405_v26  ;;  %v8459_v36 = vsel %vm1433_vm1, %v20760_v56, %v19681_v3  ;;  %v20761_v3 = vld [vmem:[#allocation89_spill] sm:$0xff]  ;;  %v20763_v37 = vld [vmem:[#allocation99_spill] sm:$0xff]  ;;  %v20772_v56 = vld [vmem:[#allocation96_spill] sm:$0xff] }
0x21a9   : > { %12268 = vmatprep.mubr.msk.f32.mxu0 %vm901_vm0, %v8478_v62  ;;  %v8475_v35 = vsel %vm4146_vm3, %v8459_v36, %v19683_v60  ;;  %v8476_v62 = vsel %vm4146_vm3, %v19663_v10, %v19687_v6  ;;  %v20762_v10 = vld [vmem:[#allocation92_spill] sm:$0xff] }
0x21aa   : > { %12269 = vmatmul.mubr.msk.f32.vlgmr.msra.gmra.mrb[164].mxu0 %vm901_vm0, %v8479_v29  ;;  %v8461_v29 = vsel %vm1433_vm1, %v20761_v3, %v19685_v38 }
0x21ab   : > { %v8403_v24 = vpop.permute.xlu1 %8402  ;;  %v8409_v59 = vpop.permute.xlu0 %8408  ;;  %v8477_v60 = vsel %vm4146_vm3, %v8461_v29, %v19689_v34 }
0x21ac   : > { %v8480_v2 = vsel %vm4163_vm4, %v8464_v27, %v8403_v24  ;;  %v8483_v13 = vsel %vm4163_vm4, %v8467_v32, %v8409_v59  ;;  %v19779_v24 = vld [vmem:[#allocation16 + $0x1] ss:$0 sm:$0xff] }
0x21ad   : > { %12271 = vmatprep.mubr.msk.f32.mxu0 %vm901_vm0, %v8480_v2 }
0x21ae   : > { %12272 = vmatmul.mubr.msk.f32.gmra.mrb[166].mxu0 %vm901_vm0, %v8481_v50 }
0x21af   : > { %v8407_v20 = vpop.permute.xlu1 %8406  ;;  %v8413_v61 = vpop.permute.xlu0 %8412 }
0x21b0   : > { %v8482_v4 = vsel %vm4163_vm4, %v8466_v21, %v8407_v20  ;;  %v8485_v33 = vsel %vm4163_vm4, %v8469_v8, %v8413_v61 }
0x21b1   : > { %12274 = vmatprep.mubr.msk.f32.mxu0 %vm901_vm0, %v8482_v4 }
0x21b2   : > { %12275 = vmatmul.mubr.msk.f32.gmra.mrb[168].mxu0 %vm901_vm0, %v8483_v13 }
0x21b3   : > { %v8411_v52 = vpop.permute.xlu1 %8410  ;;  %v8417_v30 = vpop.permute.xlu0 %8416 }
0x21b4   : > { %v8484_v53 = vsel %vm4163_vm4, %v8468_v43, %v8411_v52  ;;  %v8487_v15 = vsel %vm4163_vm4, %v8471_v5, %v8417_v30 }
0x21b5   : > { %12277 = vmatprep.mubr.msk.f32.mxu0 %vm901_vm0, %v8484_v53 }
0x21b6   : > { %12278 = vmatmul.mubr.msk.f32.gmra.mrb[170].mxu0 %vm901_vm0, %v8485_v33 }
0x21b7   : > { %v8415_v44 = vpop.permute.xlu1 %8414  ;;  %v8421_v18 = vpop.permute.xlu0 %8420 }
0x21b8   : > { %v8486_v16 = vsel %vm4163_vm4, %v8470_v55, %v8415_v44  ;;  %v8489_v41 = vsel %vm4163_vm4, %v8473_v42, %v8421_v18 }
0x21b9   : > { %12280 = vmatprep.mubr.msk.f32.mxu0 %vm901_vm0, %v8486_v16 }
0x21ba   : > { %12281 = vmatmul.mubr.msk.f32.gmra.mrb[172].mxu0 %vm901_vm0, %v8487_v15 }
0x21bb   : > { %v8419_v25 = vpop.permute.xlu1 %8418 }
0x21bc   : > { %v8488_v7 = vsel %vm4163_vm4, %v8472_v51, %v8419_v25 }
0x21bd   : > { %12283 = vmatprep.mubr.msk.f32.mxu0 %vm901_vm0, %v8488_v7 }
0x21be   : > { %12284 = vmatmul.mubr.msk.f32.gmra.mrb[174].mxu0 %vm901_vm0, %v8489_v41 }
0x21d9   : > { %v8425_v1 = vpop.permute.xlu0 %8424 }
0x21da   : > { %v8423_v22 = vpop.permute.xlu1 %8422  ;;  %v8491_v39 = vsel %vm4163_vm4, %v8475_v35, %v8425_v1 }
0x21db   : > { %v8490_v0 = vsel %vm4163_vm4, %v19659_v45, %v8423_v22 }
0x21dc   : > { %12286 = vmatprep.mubr.msk.f32.mxu0 %vm901_vm0, %v8490_v0  ;;  %v20773_v0 = vld [vmem:[#allocation103_spill] sm:$0xff] }
0x21dd   : > { %12287 = vmatmul.mubr.msk.f32.gmra.mrb[176].mxu0 %vm901_vm0, %v8491_v39  ;;  %v8429_v26 = vpop.permute.xlu0 %8428 }
0x21de   : > { %v8427_v23 = vpop.permute.xlu1 %8426  ;;  %v8493_v11 = vsel %vm4163_vm4, %v8477_v60, %v8429_v26 }
0x21df   : > { %v8492_v45 = vsel %vm4163_vm4, %v8476_v62, %v8427_v23 }
0x21e0   : > { %12289 = vmatprep.mubr.msk.f32.mxu0 %vm901_vm0, %v8492_v45  ;;  %v20774_v45 = vld [vmem:[#allocation97_spill] sm:$0xff] }
0x21e1   : > { %12290 = vmatmul.mubr.msk.f32.gmra.mrb[178].mxu0 %vm901_vm0, %v8493_v11 }
0x227d   : > { %v12270_v27 = vpop.f32.mrb[164].mxu0 }
0x227e   : > { %v8693_v6 = vadd.f32 %v12270_v27, %v20762_v10  ;;  %v8613_v59 = vpop.f32.mrb[165].mxu0  ;;  %v20775_v10 = vld [vmem:[#allocation98_spill] sm:$0xff] }
0x227f   : > { %v8692_v38 = vadd.f32 %v8613_v59, %v20763_v37 }
0x2280   : > { %v19784_v2 = vadd.f32 %v19779_v24, %v8693_v6 }
0x2281   : > { %v19787_v34 = vadd.f32 %v19779_v24, %v8692_v38  ;;  %v12273_v50 = vpop.f32.mrb[166].mxu0 }
0x2282   : > { %v8695_v54 = vadd.f32 %v12273_v50, %v20764_v19  ;;  %v8623_v21 = vpop.f32.mrb[167].mxu0  ;;  %v8734_v48 = vsel %vm901_vm0, %v19784_v2, 0.0  ;;  %v20776_v50 = vld [vmem:[#allocation59_spill] sm:$0xff] }
0x2283   : > { %v8694_v20 = vadd.f32 %v8623_v21, %v20765_v58  ;;  %8735 = vadd.xlane.f32.xlu0 %v8734_v48  ;;  %v8731_v61 = vsel %vm901_vm0, %v19787_v34, 0.0  ;;  %v20777_v48 = vld [vmem:[#allocation60_spill] sm:$0xff] }
0x2284   : > { %v19796_v32 = vadd.f32 %v19779_v24, %v8695_v54  ;;  %8732 = vadd.xlane.f32.xlu1 %v8731_v61 }
0x2285   : > { %v19799_v4 = vadd.f32 %v19779_v24, %v8694_v20  ;;  %v12276_v13 = vpop.f32.mrb[168].mxu0 }
0x2286   : > { %v8697_v46 = vadd.f32 %v12276_v13, %v20766_v12  ;;  %v8633_v43 = vpop.f32.mrb[169].mxu0  ;;  %v8740_v57 = vsel %vm901_vm0, %v19796_v32, 0.0 }
0x2287   : > { %v8696_v52 = vadd.f32 %v8633_v43, %v20767_v40  ;;  %v8737_v8 = vsel %vm901_vm0, %v19799_v4, 0.0 }
0x2288   : > { %v19808_v53 = vadd.f32 %v19779_v24, %v8697_v46  ;;  %8741 = vadd.xlane.f32.xlu1 %v8740_v57  ;;  %8738 = vadd.xlane.f32.xlu0 %v8737_v8 }
0x2289   : > { %v19811_v30 = vadd.f32 %v19779_v24, %v8696_v52  ;;  %v12279_v33 = vpop.f32.mrb[170].mxu0 }
0x228a   : > { %v8699_v14 = vadd.f32 %v12279_v33, %v20768_v49  ;;  %v8643_v55 = vpop.f32.mrb[171].mxu0  ;;  %v8746_v31 = vsel %vm901_vm0, %v19808_v53, 0.0 }
0x228b   : > { %v8698_v44 = vadd.f32 %v8643_v55, %v20769_v47  ;;  %v8743_v5 = vsel %vm901_vm0, %v19811_v30, 0.0 }
0x228c   : > { %v19820_v16 = vadd.f32 %v19779_v24, %v8699_v14  ;;  %8747 = vadd.xlane.f32.xlu1 %v8746_v31  ;;  %8744 = vadd.xlane.f32.xlu0 %v8743_v5 }
0x228d   : > { %v19823_v15 = vadd.f32 %v19779_v24, %v8698_v44  ;;  %v12282_v9 = vpop.f32.mrb[172].mxu0 }
0x228e   : > { %v8701_v18 = vadd.f32 %v12282_v9, %v20770_v17  ;;  %v8653_v51 = vpop.f32.mrb[173].mxu0  ;;  %v8752_v63 = vsel %vm901_vm0, %v19820_v16, 0.0 }
0x228f   : > { %v8700_v25 = vadd.f32 %v8653_v51, %v20771_v28  ;;  %v8749_v42 = vsel %vm901_vm0, %v19823_v15, 0.0 }
0x2290   : > { %v19832_v7 = vadd.f32 %v19779_v24, %v8701_v18  ;;  %8753 = vadd.xlane.f32.xlu1 %v8752_v63  ;;  %8750 = vadd.xlane.f32.xlu0 %v8749_v42 }
0x2291   : > { %v19835_v41 = vadd.f32 %v19779_v24, %v8700_v25  ;;  %v12285_v1 = vpop.f32.mrb[174].mxu0 }
0x2292   : > { %v8703_v36 = vadd.f32 %v12285_v1, %v20772_v56  ;;  %v8663_v22 = vpop.f32.mrb[175].mxu0  ;;  %v8758_v35 = vsel %vm901_vm0, %v19832_v7, 0.0 }
0x2293   : > { %v8702_v39 = vadd.f32 %v8663_v22, %v20773_v0  ;;  %v8755_v26 = vsel %vm901_vm0, %v19835_v41, 0.0 }
0x2294   : > { %v19844_v62 = vadd.f32 %v19779_v24, %v8703_v36  ;;  %8759 = vadd.xlane.f32.xlu1 %v8758_v35  ;;  %8756 = vadd.xlane.f32.xlu0 %v8755_v26 }
0x2295   : > { %v19847_v3 = vadd.f32 %v19779_v24, %v8702_v39 }
0x2296   : > { %v8764_v29 = vsel %vm901_vm0, %v19844_v62, 0.0 }
0x2297   : > { %v8761_v23 = vsel %vm901_vm0, %v19847_v3, 0.0 }
0x2298   : > { %8765 = vadd.xlane.f32.xlu1 %v8764_v29  ;;  %8762 = vadd.xlane.f32.xlu0 %v8761_v23 }
0x22b0   : > { %v12288_v60 = vpop.f32.mrb[176].mxu0 }
0x22b1   : > { %v8705_v11 = vadd.f32 %v12288_v60, %v20774_v45  ;;  %v8673_v27 = vpop.f32.mrb[177].mxu0 }
0x22b2   : > { %v8704_v6 = vadd.f32 %v8673_v27, %v20775_v10 }
0x22b3   : > { %v19856_v59 = vadd.f32 %v19779_v24, %v8705_v11 }
0x22b4   : > { %v19859_v37 = vadd.f32 %v19779_v24, %v8704_v6  ;;  %v12291_v38 = vpop.f32.mrb[178].mxu0 }
0x22b5   : > { %v8707_v19 = vadd.f32 %v12291_v38, %v20776_v50  ;;  %v8683_v54 = vpop.f32.mrb[179].mxu0  ;;  %v8770_v21 = vsel %vm901_vm0, %v19856_v59, 0.0 }
0x22b6   : > { %v8706_v58 = vadd.f32 %v8683_v54, %v20777_v48  ;;  %8771 = vadd.xlane.f32.xlu1 %v8770_v21  ;;  %v8767_v20 = vsel %vm901_vm0, %v19859_v37, 0.0 }
0x22b7   : > { %v19868_v61 = vadd.f32 %v19779_v24, %v8707_v19  ;;  %8768 = vadd.xlane.f32.xlu0 %v8767_v20 }
0x22b8   : > { %v19871_v13 = vadd.f32 %v19779_v24, %v8706_v58 }
0x22b9   : > { %v8776_v12 = vsel %vm901_vm0, %v19868_v61, 0.0 }
0x22ba   : > { %8777 = vadd.xlane.f32.xlu1 %v8776_v12  ;;  %v8773_v46 = vsel %vm901_vm0, %v19871_v13, 0.0 }
0x22bb   : > { %8774 = vadd.xlane.f32.xlu0 %v8773_v46 }
0x2310   : > { %v8736_v43 = vpop.xlane.xlu0 %8735 }
0x2311   : > { %v8780_v57 = vmul.f32 0.03125, %v8736_v43  ;;  %v8733_v40 = vpop.xlane.xlu1 %8732 }
0x2312   : > { %v8779_v52 = vmul.f32 0.03125, %v8733_v40 }
0x2313   : > { %v19878_v8 = vsub.f32 %v19784_v2, %v8780_v57 }
0x2314   : > { %v19881_v33 = vsub.f32 %v19787_v34, %v8779_v52 }
0x2315   : > { %v8742_v24 = vpop.xlane.xlu1 %8741  ;;  %v8739_v49 = vpop.xlane.xlu0 %8738  ;;  %v8812_v14 = vmul.f32 %v19878_v8, %v19878_v8 }
0x2316   : > { %v8782_v55 = vmul.f32 0.03125, %v8742_v24  ;;  %v8781_v31 = vmul.f32 0.03125, %v8739_v49  ;;  %v8811_v47 = vmul.f32 %v19881_v33, %v19881_v33 }
0x2317   : > { %v8830_v44 = vsel %vm901_vm0, %v8812_v14, 0.0 }
0x2318   : > { %v19889_v5 = vsub.f32 %v19796_v32, %v8782_v55  ;;  %v19892_v9 = vsub.f32 %v19799_v4, %v8781_v31  ;;  %8831 = vadd.xlane.f32.xlu1 %v8830_v44  ;;  %v8827_v17 = vsel %vm901_vm0, %v8811_v47, 0.0 }
0x2319   : > { %v8748_v18 = vpop.xlane.xlu1 %8747  ;;  %v8745_v51 = vpop.xlane.xlu0 %8744  ;;  %8828 = vadd.xlane.f32.xlu0 %v8827_v17 }
0x231a   : > { %v8784_v63 = vmul.f32 0.03125, %v8748_v18  ;;  %v8783_v28 = vmul.f32 0.03125, %v8745_v51  ;;  %v8814_v25 = vmul.f32 %v19889_v5, %v19889_v5  ;;  %v8813_v42 = vmul.f32 %v19892_v9, %v19892_v9  ;;  %v8980_v18 = vld [vmem:[#allocation20 + $0x20] sm:$0xff]  ;;  %v8981_v51 = vld [vmem:[#allocation20 + $0x28] sm:$0xff] }
0x231c   : > { %v19900_v1 = vsub.f32 %v19808_v53, %v8784_v63  ;;  %v19903_v56 = vsub.f32 %v19811_v30, %v8783_v28  ;;  %v8836_v36 = vsel %vm901_vm0, %v8814_v25, 0.0  ;;  %v8833_v22 = vsel %vm901_vm0, %v8813_v42, 0.0  ;;  %v8982_v28 = vld [vmem:[#allocation20 + $0x30] sm:$0xff]  ;;  %v8983_v25 = vld [vmem:[#allocation20 + $0x38] sm:$0xff] }
0x231d   : > { %v8754_v35 = vpop.xlane.xlu1 %8753  ;;  %v8751_v0 = vpop.xlane.xlu0 %8750  ;;  %8837 = vadd.xlane.f32.xlu1 %v8836_v36  ;;  %8834 = vadd.xlane.f32.xlu0 %v8833_v22  ;;  %v13114_v63 = vpack.c.bf16 %v8981_v51, %v8980_v18  ;;  %v13118_v42 = vpack.c.bf16 %v8983_v25, %v8982_v28 }
0x231e   : > { %v8786_v39 = vmul.f32 0.03125, %v8754_v35  ;;  %v8785_v26 = vmul.f32 0.03125, %v8751_v0  ;;  %v8816_v29 = vmul.f32 %v19900_v1, %v19900_v1  ;;  %v8815_v23 = vmul.f32 %v19903_v56, %v19903_v56 }
0x231f   : > { %13115 = vmatprep.subr.bf16.mxu1 %v13114_v63 }
0x2320   : > { %v19912_v60 = vsub.f32 %v19820_v16, %v8786_v39  ;;  %v19915_v45 = vsub.f32 %v19823_v15, %v8785_v26  ;;  %v8842_v11 = vsel %vm901_vm0, %v8816_v29, 0.0  ;;  %v8839_v27 = vsel %vm901_vm0, %v8815_v23, 0.0  ;;  %13117 = vmatpush3.bf16.msra.mxu1 %v13114_v63 }
0x2321   : > { %v8760_v10 = vpop.xlane.xlu1 %8759  ;;  %v8757_v6 = vpop.xlane.xlu0 %8756  ;;  %8843 = vadd.xlane.f32.xlu1 %v8842_v11  ;;  %8840 = vadd.xlane.f32.xlu0 %v8839_v27 }
0x2322   : > { %v8788_v38 = vmul.f32 0.03125, %v8760_v10  ;;  %v8787_v50 = vmul.f32 0.03125, %v8757_v6  ;;  %v8818_v19 = vmul.f32 %v19912_v60, %v19912_v60  ;;  %v8817_v54 = vmul.f32 %v19915_v45, %v19915_v45  ;;  %13119 = vmatprep.subr.bf16.mxu1 %v13118_v42 }
0x2324   : > { %v19924_v21 = vsub.f32 %v19832_v7, %v8788_v38  ;;  %v19927_v48 = vsub.f32 %v19835_v41, %v8787_v50  ;;  %v8848_v58 = vsel %vm901_vm0, %v8818_v19, 0.0  ;;  %v8845_v20 = vsel %vm901_vm0, %v8817_v54, 0.0  ;;  %13121 = vmatpush3.bf16.msra.mxu1 %v13118_v42 }
0x2325   : > { %v8766_v12 = vpop.xlane.xlu1 %8765  ;;  %v8763_v46 = vpop.xlane.xlu0 %8762  ;;  %8849 = vadd.xlane.f32.xlu1 %v8848_v58  ;;  %8846 = vadd.xlane.f32.xlu0 %v8845_v20 }
0x2326   : > { %v8790_v43 = vmul.f32 0.03125, %v8766_v12  ;;  %v8789_v57 = vmul.f32 0.03125, %v8763_v46  ;;  %v8820_v40 = vmul.f32 %v19924_v21, %v19924_v21  ;;  %v8819_v52 = vmul.f32 %v19927_v48, %v19927_v48 }
0x2328   : > { %v19936_v24 = vsub.f32 %v19844_v62, %v8790_v43  ;;  %v19939_v49 = vsub.f32 %v19847_v3, %v8789_v57  ;;  %v8854_v14 = vsel %vm901_vm0, %v8820_v40, 0.0  ;;  %v8851_v55 = vsel %vm901_vm0, %v8819_v52, 0.0 }
0x2329   : > { %8855 = vadd.xlane.f32.xlu1 %v8854_v14  ;;  %8852 = vadd.xlane.f32.xlu0 %v8851_v55 }
0x232a   : > { %v8822_v31 = vmul.f32 %v19936_v24, %v19936_v24  ;;  %v8821_v47 = vmul.f32 %v19939_v49, %v19939_v49 }
0x232c   : > { %v8860_v44 = vsel %vm901_vm0, %v8822_v31, 0.0  ;;  %v8857_v17 = vsel %vm901_vm0, %v8821_v47, 0.0 }
0x232d   : > { %8861 = vadd.xlane.f32.xlu1 %v8860_v44  ;;  %8858 = vadd.xlane.f32.xlu0 %v8857_v17 }
0x2343   : > { %v8772_v36 = vpop.xlane.xlu1 %8771 }
0x2344   : > { %v8792_v22 = vmul.f32 0.03125, %v8772_v36  ;;  %v8769_v35 = vpop.xlane.xlu0 %8768 }
0x2345   : > { %v8791_v0 = vmul.f32 0.03125, %v8769_v35 }
0x2346   : > { %v19950_v39 = vsub.f32 %v19856_v59, %v8792_v22 }
0x2347   : > { %v19953_v26 = vsub.f32 %v19859_v37, %v8791_v0  ;;  %v8778_v29 = vpop.xlane.xlu1 %8777 }
0x2348   : > { %v8794_v23 = vmul.f32 0.03125, %v8778_v29  ;;  %v8775_v11 = vpop.xlane.xlu0 %8774  ;;  %v8824_v27 = vmul.f32 %v19950_v39, %v19950_v39 }
0x2349   : > { %v8793_v10 = vmul.f32 0.03125, %v8775_v11  ;;  %v8823_v6 = vmul.f32 %v19953_v26, %v19953_v26 }
0x234a   : > { %v19960_v38 = vsub.f32 %v19868_v61, %v8794_v23  ;;  %v8866_v50 = vsel %vm901_vm0, %v8824_v27, 0.0  ;;  %v19973_v27 = vld [vmem:[#allocation17 + $0x1] ss:$0 sm:$0xff] }
0x234b   : > { %v19964_v19 = vsub.f32 %v19871_v13, %v8793_v10  ;;  %8867 = vadd.xlane.f32.xlu1 %v8866_v50  ;;  %v8863_v54 = vsel %vm901_vm0, %v8823_v6, 0.0 }
0x234c   : > { %8864 = vadd.xlane.f32.xlu0 %v8863_v54  ;;  %v8826_v58 = vmul.f32 %v19960_v38, %v19960_v38 }
0x234d   : > { %v8825_v20 = vmul.f32 %v19964_v19, %v19964_v19 }
0x234e   : > { %v8872_v12 = vsel %vm901_vm0, %v8826_v58, 0.0 }
0x234f   : > { %8873 = vadd.xlane.f32.xlu1 %v8872_v12  ;;  %v8869_v46 = vsel %vm901_vm0, %v8825_v20, 0.0 }
0x2350   : > { %8870 = vadd.xlane.f32.xlu0 %v8869_v46  ;;  %v19977_v46 = vld [vmem:[#allocation19 + $0x1] ss:$0 sm:$0xff] }
0x23a5   : > { %v8832_v43 = vpop.xlane.xlu1 %8831 }
0x23a6   : > { %v8876_v57 = vmul.f32 0.03125, %v8832_v43  ;;  %v8829_v40 = vpop.xlane.xlu0 %8828 }
0x23a7   : > { %v8875_v52 = vmul.f32 0.03125, %v8829_v40 }
0x23a8   : > { %v8892_v14 = vadd.f32 1e-05, %v8876_v57 }
0x23a9   : > { %v8891_v55 = vadd.f32 1e-05, %v8875_v52 }
0x23aa   : > { %14680 = vrsqrt.f32 %v8892_v14  ;;  %v8838_v31 = vpop.xlane.xlu1 %8837  ;;  %v8835_v47 = vpop.xlane.xlu0 %8834 }
0x23ab   : > { %14682 = vrsqrt.f32 %v8891_v55  ;;  %v8878_v44 = vmul.f32 0.03125, %v8838_v31  ;;  %v8877_v17 = vmul.f32 0.03125, %v8835_v47 }
0x23ad   : > { %v8894_v18 = vadd.f32 1e-05, %v8878_v44  ;;  %v8893_v51 = vadd.f32 1e-05, %v8877_v17 }
0x23ae   : > { %v8844_v63 = vpop.xlane.xlu1 %8843  ;;  %v8841_v28 = vpop.xlane.xlu0 %8840 }
0x23af   : > { %14684 = vrsqrt.f32 %v8894_v18  ;;  %v8880_v25 = vmul.f32 0.03125, %v8844_v63  ;;  %v8879_v42 = vmul.f32 0.03125, %v8841_v28 }
0x23b0   : > { %14686 = vrsqrt.f32 %v8893_v51 }
0x23b1   : > { %v8896_v36 = vadd.f32 1e-05, %v8880_v25  ;;  %v8895_v22 = vadd.f32 1e-05, %v8879_v42 }
0x23b2   : > { %v8850_v35 = vpop.xlane.xlu1 %8849  ;;  %v8847_v0 = vpop.xlane.xlu0 %8846 }
0x23b3   : > { %14688 = vrsqrt.f32 %v8896_v36  ;;  %v8882_v29 = vmul.f32 0.03125, %v8850_v35  ;;  %v8881_v23 = vmul.f32 0.03125, %v8847_v0 }
0x23b4   : > { %v14681_v11 = vpop.eup %14680  ;;  %14690 = vrsqrt.f32 %v8895_v22 }
0x23b5   : > { %v14683_v10 = vpop.eup %14682  ;;  %v8924_v6 = vmul.f32 %v14681_v11, %v19878_v8  ;;  %v8898_v50 = vadd.f32 1e-05, %v8882_v29  ;;  %v8897_v54 = vadd.f32 1e-05, %v8881_v23 }
0x23b6   : > { %v8856_v58 = vpop.xlane.xlu1 %8855  ;;  %v8853_v20 = vpop.xlane.xlu0 %8852  ;;  %v8923_v12 = vmul.f32 %v14683_v10, %v19881_v33 }
0x23b7   : > { %v8944_v43 = vmul.f32 %v19973_v27, %v8924_v6  ;;  %14692 = vrsqrt.f32 %v8898_v50  ;;  %v8884_v57 = vmul.f32 0.03125, %v8856_v58  ;;  %v8883_v40 = vmul.f32 0.03125, %v8853_v20 }
0x23b8   : > { %14694 = vrsqrt.f32 %v8897_v54  ;;  %v8943_v52 = vmul.f32 %v19973_v27, %v8923_v12 }
0x23b9   : > { %v14685_v14 = vpop.eup %14684  ;;  %v8900_v55 = vadd.f32 1e-05, %v8884_v57  ;;  %v8899_v31 = vadd.f32 1e-05, %v8883_v40  ;;  %v8964_v47 = vadd.f32 %v19977_v46, %v8944_v43 }
0x23ba   : > { %v14687_v8 = vpop.eup %14686  ;;  %v8862_v44 = vpop.xlane.xlu1 %8861  ;;  %v8963_v33 = vadd.f32 %v19977_v46, %v8943_v52  ;;  %v8926_v18 = vmul.f32 %v14685_v14, %v19889_v5 }
0x23bb   : > { %v8859_v17 = vpop.xlane.xlu0 %8858  ;;  %14696 = vrsqrt.f32 %v8900_v55  ;;  %v8886_v51 = vmul.f32 0.03125, %v8862_v44  ;;  %v8925_v28 = vmul.f32 %v14687_v8, %v19892_v9 }
0x23bc   : > { %v8885_v63 = vmul.f32 0.03125, %v8859_v17  ;;  %14698 = vrsqrt.f32 %v8899_v31  ;;  %12300 = vmatprep.mubr.msk.f32.mxu1 %vm901_vm0, %v8963_v33  ;;  %v8946_v25 = vmul.f32 %v19973_v27, %v8926_v18 }
0x23bd   : > { %v14689_v42 = vpop.eup %14688  ;;  %v8902_v36 = vadd.f32 1e-05, %v8886_v51  ;;  %12301 = vmatmul.mubr.msk.f32.vlgmr.msra.gmra.mrb[180].mxu1 %vm901_vm0, %v8964_v47  ;;  %v8945_v35 = vmul.f32 %v19973_v27, %v8925_v28 }
0x23be   : > { %v8901_v22 = vadd.f32 1e-05, %v8885_v63  ;;  %v14691_v0 = vpop.eup %14690  ;;  %v8966_v5 = vadd.f32 %v19977_v46, %v8946_v25  ;;  %v8928_v29 = vmul.f32 %v14689_v42, %v19900_v1 }
0x23bf   : > { %14700 = vrsqrt.f32 %v8902_v36  ;;  %v8965_v9 = vadd.f32 %v19977_v46, %v8945_v35  ;;  %v8927_v23 = vmul.f32 %v14691_v0, %v19903_v56 }
0x23c0   : > { %14702 = vrsqrt.f32 %v8901_v22  ;;  %v8948_v11 = vmul.f32 %v19973_v27, %v8928_v29 }
0x23c1   : > { %v14693_v10 = vpop.eup %14692  ;;  %12303 = vmatprep.mubr.msk.f32.mxu1 %vm901_vm0, %v8965_v9  ;;  %v8947_v6 = vmul.f32 %v19973_v27, %v8927_v23 }
0x23c2   : > { %v14695_v50 = vpop.eup %14694  ;;  %12304 = vmatmul.mubr.msk.f32.gmra.mrb[182].mxu1 %vm901_vm0, %v8966_v5  ;;  %v8968_v54 = vadd.f32 %v19977_v46, %v8948_v11  ;;  %v8930_v1 = vmul.f32 %v14693_v10, %v19912_v60 }
0x23c3   : > { %v8967_v58 = vadd.f32 %v19977_v46, %v8947_v6  ;;  %v8929_v20 = vmul.f32 %v14695_v50, %v19915_v45 }
0x23c4   : > { %v8950_v56 = vmul.f32 %v19973_v27, %v8930_v1 }
0x23c5   : > { %v14697_v12 = vpop.eup %14696  ;;  %12306 = vmatprep.mubr.msk.f32.mxu1 %vm901_vm0, %v8967_v58  ;;  %v8949_v43 = vmul.f32 %v19973_v27, %v8929_v20 }
0x23c6   : > { %v14699_v57 = vpop.eup %14698  ;;  %12307 = vmatmul.mubr.msk.f32.gmra.mrb[184].mxu1 %vm901_vm0, %v8968_v54  ;;  %v8970_v40 = vadd.f32 %v19977_v46, %v8950_v56  ;;  %v8932_v52 = vmul.f32 %v14697_v12, %v19924_v21 }
0x23c7   : > { %v8969_v60 = vadd.f32 %v19977_v46, %v8949_v43  ;;  %v8931_v14 = vmul.f32 %v14699_v57, %v19927_v48 }
0x23c8   : > { %v8952_v45 = vmul.f32 %v19973_v27, %v8932_v52 }
0x23c9   : > { %v14701_v55 = vpop.eup %14700  ;;  %12309 = vmatprep.mubr.msk.f32.mxu1 %vm901_vm0, %v8969_v60  ;;  %v8951_v31 = vmul.f32 %v19973_v27, %v8931_v14  ;;  %v10431_v60 = vld [vmem:[%s20619_s4 + $0x60] sm:$0xff]  ;;  %v10432_v14 = vld [vmem:[%s20619_s4 + $0x68] sm:$0xff] }
0x23ca   : > { %v14703_v8 = vpop.eup %14702  ;;  %12310 = vmatmul.mubr.msk.f32.gmra.mrb[186].mxu1 %vm901_vm0, %v8970_v40  ;;  %v8972_v47 = vadd.f32 %v19977_v46, %v8952_v45  ;;  %v8934_v44 = vmul.f32 %v14701_v55, %v19936_v24  ;;  %v13130_v45 = vpack.c.bf16 %v10432_v14, %v10431_v60  ;;  %v10433_v55 = vld [vmem:[%s20619_s4 + $0x70] sm:$0xff] }
0x23cb   : > { %v8971_v21 = vadd.f32 %v19977_v46, %v8951_v31  ;;  %v8933_v17 = vmul.f32 %v14703_v8, %v19939_v49  ;;  %v10434_v31 = vld [vmem:[%s20619_s4 + $0x78] sm:$0xff] }
0x23cc   : > { %v8954_v48 = vmul.f32 %v19973_v27, %v8934_v44  ;;  %v13134_v8 = vpack.c.bf16 %v10434_v31, %v10433_v55 }
0x23cd   : > { %12312 = vmatprep.mubr.msk.f32.mxu1 %vm901_vm0, %v8971_v21  ;;  %v8953_v33 = vmul.f32 %v19973_v27, %v8933_v17 }
0x23ce   : > { %12313 = vmatmul.mubr.msk.f32.gmra.mrb[188].mxu1 %vm901_vm0, %v8972_v47  ;;  %v8974_v18 = vadd.f32 %v19977_v46, %v8954_v48  ;;  %v20065_v47 = vld [vmem:[#allocation22 + $0x1] ss:$0 sm:$0xff] }
0x23cf   : > { %v8973_v51 = vadd.f32 %v19977_v46, %v8953_v33 }
0x23d1   : > { %12315 = vmatprep.mubr.msk.f32.mxu1 %vm901_vm0, %v8973_v51 }
0x23d2   : > { %12316 = vmatmul.mubr.msk.f32.gmra.mrb[190].mxu1 %vm901_vm0, %v8974_v18 }
0x23d8   : > { %v8868_v24 = vpop.xlane.xlu1 %8867 }
0x23d9   : > { %v8888_v63 = vmul.f32 0.03125, %v8868_v24  ;;  %v8865_v28 = vpop.xlane.xlu0 %8864 }
0x23da   : > { %v8887_v49 = vmul.f32 0.03125, %v8865_v28 }
0x23db   : > { %v8904_v25 = vadd.f32 1e-05, %v8888_v63 }
0x23dc   : > { %v8903_v42 = vadd.f32 1e-05, %v8887_v49  ;;  %v8874_v36 = vpop.xlane.xlu1 %8873 }
0x23dd   : > { %14704 = vrsqrt.f32 %v8904_v25  ;;  %v8890_v22 = vmul.f32 0.03125, %v8874_v36  ;;  %v8871_v35 = vpop.xlane.xlu0 %8870 }
0x23de   : > { %14706 = vrsqrt.f32 %v8903_v42  ;;  %v8889_v0 = vmul.f32 0.03125, %v8871_v35 }
0x23df   : > { %v8906_v5 = vadd.f32 1e-05, %v8890_v22 }
0x23e0   : > { %v8905_v29 = vadd.f32 1e-05, %v8889_v0 }
0x23e1   : > { %14708 = vrsqrt.f32 %v8906_v5 }
0x23e2   : > { %14710 = vrsqrt.f32 %v8905_v29 }
0x23e7   : > { %v14705_v9 = vpop.eup %14704 }
0x23e8   : > { %v14707_v23 = vpop.eup %14706  ;;  %v8936_v11 = vmul.f32 %v14705_v9, %v19950_v39 }
0x23e9   : > { %v8935_v10 = vmul.f32 %v14707_v23, %v19953_v26 }
0x23ea   : > { %v8956_v6 = vmul.f32 %v19973_v27, %v8936_v11 }
0x23eb   : > { %v14709_v50 = vpop.eup %14708  ;;  %v8955_v54 = vmul.f32 %v19973_v27, %v8935_v10 }
0x23ec   : > { %v14711_v1 = vpop.eup %14710  ;;  %v8938_v58 = vmul.f32 %v14709_v50, %v19960_v38  ;;  %v8976_v12 = vadd.f32 %v19977_v46, %v8956_v6  ;;  %v10427_v38 = vld [vmem:[%s20619_s4 + $0x40] sm:$0xff] }
0x23ed   : > { %v8975_v20 = vadd.f32 %v19977_v46, %v8955_v54  ;;  %v8937_v56 = vmul.f32 %v14711_v1, %v19964_v19  ;;  %v10428_v19 = vld [vmem:[%s20619_s4 + $0x48] sm:$0xff] }
0x23ee   : > { %v8958_v43 = vmul.f32 %v19973_v27, %v8938_v58  ;;  %v13122_v40 = vpack.c.bf16 %v10428_v19, %v10427_v38 }
0x23ef   : > { %12318 = vmatprep.mubr.msk.f32.mxu1 %vm901_vm0, %v8975_v20  ;;  %v8957_v39 = vmul.f32 %v19973_v27, %v8937_v56  ;;  %v10429_v27 = vld [vmem:[%s20619_s4 + $0x50] sm:$0xff] }
0x23f0   : > { %12319 = vmatmul.mubr.msk.f32.gmra.mrb[192].mxu1 %vm901_vm0, %v8976_v12  ;;  %v8978_v57 = vadd.f32 %v19977_v46, %v8958_v43  ;;  %13123 = vmatprep.subr.bf16.mxu0 %v13122_v40 }
0x23f1   : > { %v8977_v26 = vadd.f32 %v19977_v46, %v8957_v39  ;;  %13125 = vmatpush3.bf16.msra.mxu0 %v13122_v40  ;;  %v10430_v46 = vld [vmem:[%s20619_s4 + $0x58] sm:$0xff] }
0x23f2   : > { %v13126_v52 = vpack.c.bf16 %v10430_v46, %v10429_v27 }
0x23f3   : > { %12321 = vmatprep.mubr.msk.f32.mxu1 %vm901_vm0, %v8977_v26 }
0x23f4   : > { %12322 = vmatmul.mubr.msk.f32.gmra.mrb[194].mxu1 %vm901_vm0, %v8978_v57  ;;  %13127 = vmatprep.subr.bf16.mxu0 %v13126_v52 }
0x23f5   : > { %13129 = vmatpush3.bf16.msra.mxu0 %v13126_v52 }
0x23f6   : > { %13131 = vmatprep.subr.bf16.mxu0 %v13130_v45 }
0x23f9   : > { %13133 = vmatpush3.bf16.msra.mxu0 %v13130_v45 }
0x23fa   : > { %13135 = vmatprep.subr.bf16.mxu0 %v13134_v8 }
0x23fd   : > { %13137 = vmatpush3.bf16.msra.mxu0 %v13134_v8 }
0x2490   : > { %v12302_v44 = vpop.f32.mrb[180].mxu1 }
0x2491   : > { %v20068_v21 = vadd.f32 %v12302_v44, %v20065_v47  ;;  %v9103_v17 = vpop.f32.mrb[181].mxu1 }
0x2492   : > { %v9104_v48 = vadd.f32 %v20065_v47, %v9103_v17 }
0x2493   : > { %v9199_v33 = vmul.f32 0.044715, %v20068_v21 }
0x2494   : > { %v9198_v18 = vmul.f32 0.044715, %v9104_v48 }
0x2495   : > { %v9215_v51 = vmul.f32 %v9199_v33, %v20068_v21  ;;  %v12305_v24 = vpop.f32.mrb[182].mxu1 }
0x2496   : > { %v9214_v63 = vmul.f32 %v9198_v18, %v9104_v48  ;;  %v20074_v28 = vadd.f32 %v12305_v24, %v20065_v47  ;;  %v9113_v49 = vpop.f32.mrb[183].mxu1 }
0x2497   : > { %v9231_v25 = vmul.f32 %v9215_v51, %v20068_v21  ;;  %v20078_v42 = vadd.f32 %v20065_v47, %v9113_v49 }
0x2498   : > { %v9230_v36 = vmul.f32 %v9214_v63, %v9104_v48  ;;  %v9201_v22 = vmul.f32 0.044715, %v20074_v28 }
0x2499   : > { %v9247_v35 = vadd.f32 %v9231_v25, %v20068_v21  ;;  %v9200_v0 = vmul.f32 0.044715, %v20078_v42  ;;  %v12308_v5 = vpop.f32.mrb[184].mxu1 }
0x249a   : > { %v9246_v29 = vadd.f32 %v9230_v36, %v9104_v48  ;;  %v9217_v9 = vmul.f32 %v9201_v22, %v20074_v28  ;;  %v20085_v23 = vadd.f32 %v12308_v5, %v20065_v47  ;;  %v9123_v11 = vpop.f32.mrb[185].mxu1 }
0x249b   : > { %v9263_v10 = vmul.f32 0.7978846, %v9247_v35  ;;  %v9216_v6 = vmul.f32 %v9200_v0, %v20078_v42  ;;  %v20089_v50 = vadd.f32 %v20065_v47, %v9123_v11  ;;  %v9182_v35 = vmul.f32 0.5, %v9104_v48 }
0x249c   : > { %v9233_v54 = vmul.f32 %v9217_v9, %v20074_v28  ;;  %v9203_v1 = vmul.f32 0.044715, %v20085_v23  ;;  %v9262_v58 = vmul.f32 0.7978846, %v9246_v29 }
0x249d   : > { %14712 = vtanh.f32 %v9263_v10  ;;  %v9232_v20 = vmul.f32 %v9216_v6, %v20078_v42  ;;  %v9202_v56 = vmul.f32 0.044715, %v20089_v50  ;;  %v12311_v12 = vpop.f32.mrb[186].mxu1 }
0x249e   : > { %v9249_v43 = vadd.f32 %v9233_v54, %v20074_v28  ;;  %v9219_v39 = vmul.f32 %v9203_v1, %v20085_v23  ;;  %v20098_v26 = vadd.f32 %v12311_v12, %v20065_v47  ;;  %v9133_v57 = vpop.f32.mrb[187].mxu1  ;;  %14714 = vtanh.f32 %v9262_v58 }
0x249f   : > { %v9248_v38 = vadd.f32 %v9232_v20, %v20078_v42  ;;  %v9218_v19 = vmul.f32 %v9202_v56, %v20089_v50  ;;  %v20103_v40 = vadd.f32 %v20065_v47, %v9133_v57 }
0x24a0   : > { %v9235_v27 = vmul.f32 %v9219_v39, %v20085_v23  ;;  %v9205_v46 = vmul.f32 0.044715, %v20098_v26  ;;  %v9265_v52 = vmul.f32 0.7978846, %v9249_v43 }
0x24a1   : > { %v9234_v60 = vmul.f32 %v9218_v19, %v20089_v50  ;;  %v9204_v14 = vmul.f32 0.044715, %v20103_v40  ;;  %v12314_v45 = vpop.f32.mrb[188].mxu1  ;;  %v9264_v55 = vmul.f32 0.7978846, %v9248_v38  ;;  %v9183_v19 = vmul.f32 0.5, %v20068_v21 }
0x24a2   : > { %v9251_v31 = vadd.f32 %v9235_v27, %v20085_v23  ;;  %v9221_v8 = vmul.f32 %v9205_v46, %v20098_v26  ;;  %v20112_v44 = vadd.f32 %v12314_v45, %v20065_v47  ;;  %v9143_v17 = vpop.f32.mrb[189].mxu1  ;;  %14716 = vtanh.f32 %v9265_v52 }
0x24a3   : > { %v9250_v33 = vadd.f32 %v9234_v60, %v20089_v50  ;;  %v9220_v18 = vmul.f32 %v9204_v14, %v20103_v40  ;;  %v20117_v51 = vadd.f32 %v20065_v47, %v9143_v17  ;;  %14718 = vtanh.f32 %v9264_v55 }
0x24a4   : > { %v9237_v24 = vmul.f32 %v9221_v8, %v20098_v26  ;;  %v9207_v63 = vmul.f32 0.044715, %v20112_v44  ;;  %v9267_v49 = vmul.f32 0.7978846, %v9251_v31 }
0x24a5   : > { %v9236_v25 = vmul.f32 %v9220_v18, %v20103_v40  ;;  %v9206_v36 = vmul.f32 0.044715, %v20117_v51  ;;  %v12317_v22 = vpop.f32.mrb[190].mxu1  ;;  %v9266_v0 = vmul.f32 0.7978846, %v9250_v33 }
0x24a6   : > { %v9253_v5 = vadd.f32 %v9237_v24, %v20098_v26  ;;  %v9223_v29 = vmul.f32 %v9207_v63, %v20112_v44  ;;  %v20126_v9 = vadd.f32 %v12317_v22, %v20065_v47  ;;  %v9153_v11 = vpop.f32.mrb[191].mxu1  ;;  %14720 = vtanh.f32 %v9267_v49 }
0x24a7   : > { %v14713_v10 = vpop.eup %14712  ;;  %v9252_v6 = vadd.f32 %v9236_v25, %v20103_v40  ;;  %v9222_v54 = vmul.f32 %v9206_v36, %v20117_v51  ;;  %v20131_v1 = vadd.f32 %v20065_v47, %v9153_v11  ;;  %14722 = vtanh.f32 %v9266_v0 }
0x24a8   : > { %v14715_v48 = vpop.eup %14714  ;;  %v9295_v58 = vadd.f32 1.0, %v14713_v10  ;;  %v9239_v20 = vmul.f32 %v9223_v29, %v20112_v44  ;;  %v9209_v56 = vmul.f32 0.044715, %v20126_v9  ;;  %v9269_v12 = vmul.f32 0.7978846, %v9253_v5 }
0x24a9   : > { %v9238_v43 = vmul.f32 %v9222_v54, %v20117_v51  ;;  %v9208_v39 = vmul.f32 0.044715, %v20131_v1  ;;  %v9294_v57 = vadd.f32 1.0, %v14715_v48  ;;  %v9268_v38 = vmul.f32 0.7978846, %v9252_v6 }
0x24aa   : > { %v9255_v27 = vadd.f32 %v9239_v20, %v20112_v44  ;;  %v9225_v46 = vmul.f32 %v9209_v56, %v20126_v9  ;;  %14724 = vtanh.f32 %v9269_v12  ;;  %v9311_v55 = vmul.f32 %v9295_v58, %v9183_v19 }
0x24ab   : > { %v9254_v52 = vadd.f32 %v9238_v43, %v20117_v51  ;;  %v9224_v60 = vmul.f32 %v9208_v39, %v20131_v1  ;;  %v9310_v14 = vmul.f32 %v9294_v57, %v9182_v35  ;;  %14726 = vtanh.f32 %v9268_v38 }
0x24ac   : > { %v14717_v45 = vpop.eup %14716  ;;  %v9241_v31 = vmul.f32 %v9225_v46, %v20126_v9  ;;  %v9271_v8 = vmul.f32 0.7978846, %v9255_v27  ;;  %v9184_v63 = vmul.f32 0.5, %v20078_v42  ;;  %v9185_v36 = vmul.f32 0.5, %v20074_v28 }
0x24ad   : > { %v14719_v17 = vpop.eup %14718  ;;  %v9240_v33 = vmul.f32 %v9224_v60, %v20131_v1  ;;  %12340 = vmatprep.mubr.msk.f32.mxu0 %vm5018_vm5, %v9310_v14  ;;  %v9297_v21 = vadd.f32 1.0, %v14717_v45  ;;  %v9270_v18 = vmul.f32 0.7978846, %v9254_v52  ;;  %v9186_v6 = vmul.f32 0.5, %v20089_v50 }
0x24ae   : > { %v9257_v24 = vadd.f32 %v9241_v31, %v20126_v9  ;;  %12341 = vmatmul.mubr.msk.f32.vlgmr.msra.gmra.mrb[180].mxu0 %vm5018_vm5, %v9311_v55  ;;  %v9296_v49 = vadd.f32 1.0, %v14719_v17  ;;  %14728 = vtanh.f32 %v9271_v8  ;;  %v9187_v42 = vmul.f32 0.5, %v20085_v23 }
0x24af   : > { %v9256_v25 = vadd.f32 %v9240_v33, %v20131_v1  ;;  %14730 = vtanh.f32 %v9270_v18  ;;  %v9313_v29 = vmul.f32 %v9297_v21, %v9185_v36  ;;  %v9188_v12 = vmul.f32 0.5, %v20103_v40 }
0x24b0   : > { %v14721_v22 = vpop.eup %14720  ;;  %v9312_v35 = vmul.f32 %v9296_v49, %v9184_v63  ;;  %v9273_v0 = vmul.f32 0.7978846, %v9257_v24  ;;  %v9189_v50 = vmul.f32 0.5, %v20098_v26  ;;  %v9190_v27 = vmul.f32 0.5, %v20117_v51 }
0x24b1   : > { %v14723_v5 = vpop.eup %14722  ;;  %v9299_v11 = vadd.f32 1.0, %v14721_v22  ;;  %v9272_v10 = vmul.f32 0.7978846, %v9256_v25  ;;  %v9191_v52 = vmul.f32 0.5, %v20112_v44  ;;  %v9192_v26 = vmul.f32 0.5, %v20131_v1 }
0x24b2   : > { %12343 = vmatprep.mubr.msk.f32.mxu0 %vm5018_vm5, %v9312_v35  ;;  %v9298_v54 = vadd.f32 1.0, %v14723_v5  ;;  %14732 = vtanh.f32 %v9273_v0  ;;  %v9193_v8 = vmul.f32 0.5, %v20126_v9 }
0x24b3   : > { %12344 = vmatmul.mubr.msk.f32.gmra.mrb[182].mxu0 %vm5018_vm5, %v9313_v29  ;;  %14734 = vtanh.f32 %v9272_v10  ;;  %v9315_v20 = vmul.f32 %v9299_v11, %v9187_v42 }
0x24b4   : > { %v14725_v28 = vpop.eup %14724  ;;  %v9314_v48 = vmul.f32 %v9298_v54, %v9186_v6 }
0x24b5   : > { %v14727_v58 = vpop.eup %14726  ;;  %v9301_v56 = vadd.f32 1.0, %v14725_v28 }
0x24b6   : > { %12346 = vmatprep.mubr.msk.f32.mxu0 %vm5018_vm5, %v9314_v48  ;;  %v9300_v43 = vadd.f32 1.0, %v14727_v58 }
0x24b7   : > { %12347 = vmatmul.mubr.msk.f32.gmra.mrb[184].mxu0 %vm5018_vm5, %v9315_v20  ;;  %v9317_v19 = vmul.f32 %v9301_v56, %v9189_v50 }
0x24b8   : > { %v14729_v39 = vpop.eup %14728  ;;  %v9316_v57 = vmul.f32 %v9300_v43, %v9188_v12 }
0x24b9   : > { %v14731_v38 = vpop.eup %14730  ;;  %v9303_v23 = vadd.f32 1.0, %v14729_v39 }
0x24ba   : > { %12349 = vmatprep.mubr.msk.f32.mxu0 %vm5018_vm5, %v9316_v57  ;;  %v9302_v46 = vadd.f32 1.0, %v14731_v38 }
0x24bb   : > { %12350 = vmatmul.mubr.msk.f32.gmra.mrb[186].mxu0 %vm5018_vm5, %v9317_v19  ;;  %v9319_v45 = vmul.f32 %v9303_v23, %v9191_v52 }
0x24bc   : > { %v14733_v40 = vpop.eup %14732  ;;  %v9318_v60 = vmul.f32 %v9302_v46, %v9190_v27 }
0x24bd   : > { %v14735_v14 = vpop.eup %14734  ;;  %v9305_v55 = vadd.f32 1.0, %v14733_v40 }
0x24be   : > { %12352 = vmatprep.mubr.msk.f32.mxu0 %vm5018_vm5, %v9318_v60  ;;  %v9304_v31 = vadd.f32 1.0, %v14735_v14 }
0x24bf   : > { %12353 = vmatmul.mubr.msk.f32.gmra.mrb[188].mxu0 %vm5018_vm5, %v9319_v45  ;;  %v9321_v17 = vmul.f32 %v9305_v55, %v9193_v8  ;;  %v15406_v8 = vmov 0.0  }
0x24c0   : > { %v9320_v51 = vmul.f32 %v9304_v31, %v9192_v26  ;;  %v15404_v31 = vmov 0.0|0.0   ;;  %12396 = vmatprep.mubr.msk.f32.mxu1 %vm15405_vm6, %v15406_v8 }
0x24c1   : > { %13138 = vmatprep.subr.bf16.mxu1 %v15404_v31 }
0x24c2   : > { %12355 = vmatprep.mubr.msk.f32.mxu0 %vm5018_vm5, %v9320_v51 }
0x24c3   : > { %12356 = vmatmul.mubr.msk.f32.gmra.mrb[190].mxu0 %vm5018_vm5, %v9321_v17  ;;  %v12320_v44 = vpop.f32.mrb[192].mxu1  ;;  %v20179_v17 = vld [vmem:[#allocation23 + $0x1] ss:$0 sm:$0xff] }
0x24c4   : > { %v9169_v33 = vadd.f32 %v12320_v44, %v20065_v47  ;;  %v9163_v21 = vpop.f32.mrb[193].mxu1 }
0x24c5   : > { %v9164_v18 = vadd.f32 %v20065_v47, %v9163_v21 }
0x24c6   : > { %v9211_v24 = vmul.f32 0.044715, %v9169_v33  ;;  %v9195_v19 = vmul.f32 0.5, %v9169_v33 }
0x24c7   : > { %v9210_v63 = vmul.f32 0.044715, %v9164_v18  ;;  %v12323_v1 = vpop.f32.mrb[194].mxu1  ;;  %v9194_v57 = vmul.f32 0.5, %v9164_v18 }
0x24c8   : > { %v9227_v49 = vmul.f32 %v9211_v24, %v9169_v33  ;;  %v9179_v25 = vadd.f32 %v12323_v1, %v20065_v47  ;;  %v9173_v36 = vpop.f32.mrb[195].mxu1 }
0x24c9   : > { %v9226_v9 = vmul.f32 %v9210_v63, %v9164_v18  ;;  %v9174_v22 = vadd.f32 %v20065_v47, %v9173_v36 }
0x24ca   : > { %v9243_v35 = vmul.f32 %v9227_v49, %v9169_v33  ;;  %v9213_v0 = vmul.f32 0.044715, %v9179_v25  ;;  %v9197_v45 = vmul.f32 0.5, %v9179_v25 }
0x24cb   : > { %v9242_v5 = vmul.f32 %v9226_v9, %v9164_v18  ;;  %v9212_v29 = vmul.f32 0.044715, %v9174_v22  ;;  %v9196_v60 = vmul.f32 0.5, %v9174_v22 }
0x24cc   : > { %v9259_v11 = vadd.f32 %v9243_v35, %v9169_v33  ;;  %v9229_v10 = vmul.f32 %v9213_v0, %v9179_v25 }
0x24cd   : > { %v9258_v6 = vadd.f32 %v9242_v5, %v9164_v18  ;;  %v9228_v54 = vmul.f32 %v9212_v29, %v9174_v22 }
0x24ce   : > { %v9245_v42 = vmul.f32 %v9229_v10, %v9179_v25  ;;  %v9275_v28 = vmul.f32 0.7978846, %v9259_v11 }
0x24cf   : > { %v9244_v48 = vmul.f32 %v9228_v54, %v9174_v22  ;;  %v9274_v58 = vmul.f32 0.7978846, %v9258_v6 }
0x24d0   : > { %v9261_v20 = vadd.f32 %v9245_v42, %v9179_v25  ;;  %14736 = vtanh.f32 %v9275_v28 }
0x24d1   : > { %v9260_v56 = vadd.f32 %v9244_v48, %v9174_v22  ;;  %14738 = vtanh.f32 %v9274_v58 }
0x24d2   : > { %v9277_v12 = vmul.f32 0.7978846, %v9261_v20 }
0x24d3   : > { %v9276_v43 = vmul.f32 0.7978846, %v9260_v56 }
0x24d4   : > { %14740 = vtanh.f32 %v9277_v12 }
0x24d5   : > { %14742 = vtanh.f32 %v9276_v43 }
0x24da   : > { %v14737_v47 = vpop.eup %14736 }
0x24db   : > { %v14739_v50 = vpop.eup %14738  ;;  %v9307_v39 = vadd.f32 1.0, %v14737_v47 }
0x24dc   : > { %v9306_v38 = vadd.f32 1.0, %v14739_v50 }
0x24dd   : > { %v9323_v52 = vmul.f32 %v9307_v39, %v9195_v19 }
0x24de   : > { %v14741_v23 = vpop.eup %14740  ;;  %v9322_v27 = vmul.f32 %v9306_v38, %v9194_v57  ;;  %v9565_v38 = vlaneseq }
0x24df   : > { %v14743_v46 = vpop.eup %14742  ;;  %v9309_v40 = vadd.f32 1.0, %v14741_v23 }
0x24e0   : > { %12358 = vmatprep.mubr.msk.f32.mxu0 %vm5018_vm5, %v9322_v27  ;;  %v9308_v14 = vadd.f32 1.0, %v14743_v46 }
0x24e1   : > { %12359 = vmatmul.mubr.msk.f32.gmra.mrb[192].mxu0 %vm5018_vm5, %v9323_v52  ;;  %v9325_v26 = vmul.f32 %v9309_v40, %v9197_v45  ;;  %v9566_v52 = vshrl.u32 %v9565_v38, 7 }
0x24e2   : > { %v9324_v55 = vmul.f32 %v9308_v14, %v9196_v60 }
0x24e4   : > { %12361 = vmatprep.mubr.msk.f32.mxu0 %vm5018_vm5, %v9324_v55 }
0x24e5   : > { %12362 = vmatmul.mubr.msk.f32.gmra.mrb[194].mxu0 %vm5018_vm5, %v9325_v26 }
0x2581   : > { %v12342_v51 = vpop.f32.mrb[180].mxu0 }
0x2582   : > { %v9529_v44 = vadd.f32 %v12342_v51, %v19784_v2  ;;  %v9449_v33 = vpop.f32.mrb[181].mxu0  ;;  %v9569_v51 = vmul.u32 16, %v9566_v52 }
0x2583   : > { %v9528_v21 = vadd.f32 %v9449_v33, %v19787_v34 }
0x2584   : > { %v9550_v18 = vadd.f32 %v20179_v17, %v9529_v44  ;;  %v15407_v44 = vmov 1.0  }
0x2585   : > { %v9549_v24 = vadd.f32 %v20179_v17, %v9528_v21 }
0x2586   : > { %v12345_v63 = vpop.f32.mrb[182].mxu0 }
0x2587   : > { %v13139_v1 = vpack.c.bf16 %v9550_v18, %v9549_v24  ;;  %v9531_v49 = vadd.f32 %v12345_v63, %v19796_v32  ;;  %v9459_v25 = vpop.f32.mrb[183].mxu0 }
0x2588   : > { %v9530_v36 = vadd.f32 %v9459_v25, %v19799_v4 }
0x2589   : > { %v9552_v9 = vadd.f32 %v20179_v17, %v9531_v49  ;;  %13140 = vmatpush3.bf16.msra.mxu1 %v13139_v1  ;;  %v9672_v1 = vld [vmem:[#allocation28] sm:$0xff]  ;;  %v9673_v49 = vld [vmem:[#allocation28 + $0x8] sm:$0xff] }
0x258a   : > { %v9551_v22 = vadd.f32 %v20179_v17, %v9530_v36  ;;  %v12348_v2 = vpop.f32.mrb[184].mxu0  ;;  %13141 = vmatprep.subr.bf16.mxu1 %v15404_v31  ;;  %v13163_v25 = vpack.c.bf16 %v9673_v49, %v9672_v1  ;;  %v9674_v36 = vld [vmem:[#allocation28 + $0x10] sm:$0xff] }
0x258b   : > { %v9533_v34 = vadd.f32 %v12348_v2, %v19808_v53  ;;  %v9469_v35 = vpop.f32.mrb[185].mxu0 }
0x258c   : > { %v13142_v0 = vpack.c.bf16 %v9552_v9, %v9551_v22  ;;  %v9532_v5 = vadd.f32 %v9469_v35, %v19811_v30  ;;  %v9675_v9 = vld [vmem:[#allocation28 + $0x18] sm:$0xff] }
0x258d   : > { %v9554_v29 = vadd.f32 %v20179_v17, %v9533_v34 }
0x258e   : > { %v9553_v32 = vadd.f32 %v20179_v17, %v9532_v5  ;;  %v12351_v11 = vpop.f32.mrb[186].mxu0  ;;  %13143 = vmatpush3.bf16.msra.mxu1 %v13142_v0  ;;  %v10454_v0 = vld [vmem:[#allocation25] ss:$0 sm:$0xff] }
0x258f   : > { %v9535_v4 = vadd.f32 %v12351_v11, %v19820_v16  ;;  %v9479_v10 = vpop.f32.mrb[187].mxu0  ;;  %13144 = vmatprep.subr.bf16.mxu1 %v15404_v31 }
0x2590   : > { %v13145_v6 = vpack.c.bf16 %v9554_v29, %v9553_v32  ;;  %v9534_v54 = vadd.f32 %v9479_v10, %v19823_v15  ;;  %v10455_v29 = vld [vmem:[#allocation26] ss:$0 sm:$0xff] }
0x2591   : > { %v9556_v53 = vadd.f32 %v20179_v17, %v9535_v4 }
0x2592   : > { %v9555_v42 = vadd.f32 %v20179_v17, %v9534_v54  ;;  %v12354_v28 = vpop.f32.mrb[188].mxu0  ;;  %13146 = vmatpush3.bf16.msra.mxu1 %v13145_v6 }
0x2593   : > { %v9537_v30 = vadd.f32 %v12354_v28, %v19832_v7  ;;  %v9489_v48 = vpop.f32.mrb[189].mxu0  ;;  %13147 = vmatprep.subr.bf16.mxu1 %v15404_v31 }
0x2594   : > { %v13148_v58 = vpack.c.bf16 %v9556_v53, %v9555_v42  ;;  %v9536_v16 = vadd.f32 %v9489_v48, %v19835_v41 }
0x2595   : > { %v9558_v20 = vadd.f32 %v20179_v17, %v9537_v30 }
0x2596   : > { %v9557_v56 = vadd.f32 %v20179_v17, %v9536_v16  ;;  %v12357_v12 = vpop.f32.mrb[190].mxu0  ;;  %13149 = vmatpush3.bf16.msra.mxu1 %v13148_v58 }
0x2597   : > { %v9539_v15 = vadd.f32 %v12357_v12, %v19844_v62  ;;  %v9499_v43 = vpop.f32.mrb[191].mxu0  ;;  %13150 = vmatprep.subr.bf16.mxu1 %v15404_v31 }
0x2598   : > { %v13151_v47 = vpack.c.bf16 %v9558_v20, %v9557_v56  ;;  %v9538_v7 = vadd.f32 %v9499_v43, %v19847_v3 }
0x2599   : > { %v9560_v50 = vadd.f32 %v20179_v17, %v9539_v15 }
0x259a   : > { %v9559_v39 = vadd.f32 %v20179_v17, %v9538_v7  ;;  %13152 = vmatpush3.bf16.msra.mxu1 %v13151_v47 }
0x259b   : > { %13153 = vmatprep.subr.bf16.mxu1 %v15404_v31 }
0x259c   : > { %v13154_v41 = vpack.c.bf16 %v9560_v50, %v9559_v39 }
0x259e   : > { %13155 = vmatpush3.bf16.msra.mxu1 %v13154_v41 }
0x259f   : > { %13156 = vmatprep.subr.bf16.mxu1 %v15404_v31 }
0x25b4   : > { %v12360_v57 = vpop.f32.mrb[192].mxu0 }
0x25b5   : > { %v9541_v62 = vadd.f32 %v12360_v57, %v19856_v59  ;;  %v9509_v19 = vpop.f32.mrb[193].mxu0  ;;  %v9568_v59 = vand.u32 127, %v9565_v38 }
0x25b6   : > { %v9540_v23 = vadd.f32 %v9509_v19, %v19859_v37 }
0x25b7   : > { %v9562_v3 = vadd.f32 %v20179_v17, %v9541_v62  ;;  %vm9570_vm7 = vcmp.eq.s32.totalorder %v9568_v59, %v9569_v51 }
0x25b8   : > { %v9561_v27 = vadd.f32 %v20179_v17, %v9540_v23  ;;  %v12363_v46 = vpop.f32.mrb[194].mxu0 }
0x25b9   : > { %v9543_v40 = vadd.f32 %v12363_v46, %v19868_v61  ;;  %v9519_v60 = vpop.f32.mrb[195].mxu0 }
0x25ba   : > { %v13157_v14 = vpack.c.bf16 %v9562_v3, %v9561_v27  ;;  %v9542_v45 = vadd.f32 %v9519_v60, %v19871_v13 }
0x25bb   : > { %v9564_v55 = vadd.f32 %v20179_v17, %v9543_v40 }
0x25bc   : > { %v9563_v26 = vadd.f32 %v20179_v17, %v9542_v45  ;;  %13158 = vmatpush3.bf16.msra.mxu1 %v13157_v14 }
0x25bd   : > { %13159 = vmatprep.subr.bf16.mxu1 %v15404_v31 }
0x25be   : > { %v13160_v37 = vpack.c.bf16 %v9564_v55, %v9563_v26 }
0x25c0   : > { %13161 = vmatpush3.bf16.msra.mxu1 %v13160_v37 }
0x25c1   : > { %13162 = vmatprep.subr.bf16.mxu1 %v15404_v31 }
0x25c3   : > { %12397 = vmatmul.mubr.msk.f32.vlgmr.msra.gmra.mrb[196].mxu1 %vm9570_vm7, %v15407_v44 }
0x25c4   : > { %12407 = vmatprep.mubr.msk.f32.mxu1 %vm15405_vm6, %v15406_v8  ;;  %13164 = vmatpush3.bf16.msra.mxu1 %v13163_v25  ;;  %v13166_v8 = vpack.c.bf16 %v9675_v9, %v9674_v36 }
0x25c5   : > { %13165 = vmatprep.subr.bf16.mxu1 %v15404_v31  ;;  %v10456_v31 = vld [vmem:[%s20780_s24] ss:$0 sm:$0xff] }
0x25c8   : > { %13167 = vmatpush3.bf16.msra.mxu1 %v13166_v8 }
0x2696   : > { %v9639_v61 = vpop.f32.mrb[196].mxu1 }
0x2697   : > { %v12398_v13 = vpop.f32.mrb[197].mxu1  ;;  %v9645_v33 = vsel %vm901_vm0, %v9639_v61, 0.0 }
0x2698   : > { %9646 = vadd.xlane.f32.xlu0 %v9645_v33 }
0x2725   : > { %v9647_v17 = vpop.xlane.xlu0 %9646 }
0x2726   : > { %v9648_v21 = vmul.f32 0.03125, %v9647_v17 }
0x2728   : > { %v9649_v18 = vsub.f32 %v9639_v61, %v9648_v21 }
0x272a   : > { %v9650_v24 = vmul.f32 %v9649_v18, %v9649_v18 }
0x272c   : > { %v9651_v63 = vsel %vm901_vm0, %v9650_v24, 0.0 }
0x272d   : > { %9652 = vadd.xlane.f32.xlu1 %v9651_v63 }
0x27ba   : > { %v9653_v22 = vpop.xlane.xlu1 %9652 }
0x27bb   : > { %v9654_v2 = vmul.f32 0.03125, %v9653_v22 }
0x27bd   : > { %v9655_v34 = vadd.f32 1e-05, %v9654_v2 }
0x27bf   : > { %14744 = vrsqrt.f32 %v9655_v34 }
0x27c9   : > { %v14745_v35 = vpop.eup %14744 }
0x27ca   : > { %v9657_v5 = vmul.f32 %v14745_v35, %v9649_v18 }
0x27cc   : > { %v9664_v32 = vmul.f32 %v10454_v0, %v9657_v5 }
0x27ce   : > { %v9671_v11 = vadd.f32 %v10455_v29, %v9664_v32 }
0x27d0   : > { %12408 = vmatmul.mubr.msk.f32.vlgmr.msra.gmra.mrb[198].mxu1 %vm901_vm0, %v9671_v11 }
0x28a3   : > { %v9752_v4 = vpop.f32.mrb[198].mxu1 }
0x28a4   : > { %v9753_v10 = vadd.f32 %v10456_v31, %v9752_v4  ;;  %v12409_v6 = vpop.f32.mrb[199].mxu1 }
0x28a6   : > { %9756 = vst [vmem:[%s875_s2] sm:$0xff] %v9753_v10 }
0x28a7   : > { %15284 = shalt.err (!%p15281_p11)
}
0x28a8   : > { %s15285_s25 = scalar_lea.hbm %s20235_s1, 128  ;;  %s15289_s2 = scalar_lea.hbm %s20782_s6, 256 }
0x28a9   : > { %p15286_p13 = scmp.ne.s32.totalorder %s20235_s1, %s15285_s25  ;;  %p15290_p6 = scmp.lt.u32.totalorder %s20235_s1, %s20782_s6 }
0x28aa   : > { %p15291_p5 = scmp.lt.u32.totalorder %s15289_s2, %s15285_s25  ;;  %p15293_p12 = scmp.lt.u32.totalorder %s15285_s25, %s20235_s1 }
0x28ab   : > { %p15287_p0 = pnand %p15286_p13, %p20783_p10 }
0x28ac   : > { %p15292_p9 = por %p15291_p5, %p15290_p6 }
0x28ad   : > { %p15288_p1 = pneg %p15287_p0 }
0x28ae   : > { %p15294_p2 = por %p15293_p12, %p15292_p9 }
0x28b0   : > { %p15295_p3 = pnand %p15294_p2, %p15288_p1 }
0x28b2   : > { %15298 = shalt.err (!%p15295_p3)
}
0x28b3   : > { %13252 = dma.vmem_to_hbm [thread:$0]  (%p20783_p10), %s20237_s3, 128, %s20235_s1, %s9758_s14  }
0x28b4 PF: > { %s20784_s26 = sld [smem:[#allocation43_spill]]  ;;  %s20785_s21 = sld [smem:[#allocation40_spill]] }
0x28b5   : > { %s20786_s28 = sld [smem:[#allocation48_spill]] }
0x28ba   : > { %p13344_p4 = scmp.ge.s32.totalorder %s20784_s26, 2  ;;  %s9783_s20 = sand.u32 1, %s20785_s21  }
0x28bb   : > { %p20787_p7 = scmp.ne.s32.totalorder %s20786_s28, 0  ;;  %s9784_s23 = scalar_lea.sflag [#allocation4], %s9783_s20 }
0x28bd   : > { %p13307_p8 = pnand %p13344_p4, %p20787_p7 }
0x28bf   : > { %15352 = dma.done.wait (!%p13307_p8), %s9784_s23, 128  }
0x28c0   : > { %15354 = vsyncadd (!%p13307_p8), %s9784_s23, 4294967168  ;;  %s20788_s27 = sld [smem:[#allocation45_spill]]  ;;  %s20789_s2 = sld [smem:[#allocation41_spill]] }
0x28c1   : > { %s20790_s25 = sld [smem:[#allocation42_spill]]  ;;  %s20791_s26 = sld [smem:[#allocation46_spill]] }
0x28c6   : > { %p40_p11 = scmp.ge.s32.totalorder %s20788_s27, 4  }
0x28c8   :  { %42 = sbr.rel (!%p40_p11) target bundleno = 24 (0x18), region = 212 }
0x28cf   :  { %9789 = vsyncpa [#allocation3], 1 }
0x28d0   :  { %9791 = vsyncpa [#allocation3 + $0x1], 1 }
0x28d1   :  { %9792 = vsyncpa [#allocation6], 1 }
0x28d2   :  { %9793 = vsyncpa [#allocation9], 1 }
0x28d3   :  { %9794 = vsyncpa [#allocation12], 1 }
0x28d4   :  { %9795 = vsyncpa [#allocation15], 1 }
0x28d5   :  { %9796 = vsyncpa [#allocation18], 1 }
0x28d6   :  { %9797 = vsyncpa [#allocation21], 1 }
0x28d7   :  { %9798 = vsyncpa [#allocation24], 1 }
0x28d8   :  { %9799 = vsyncpa [#allocation27], 1 }
0x28d9   :  { %9800 = vsyncpa [#allocation4], 1 }
0x28da   :  { %9802 = vsyncpa [#allocation4 + $0x1], 1 }

</bundles_post_ra>
